<compile_context>
chip_gen: v7x
topology: tpu7x:2x2x1
jax: 0.10.0
libtpu: 0.0.40
codegen_flags: <defaults>
</compile_context>

<pallas_src>
import functools

import jax
import jax.numpy as jnp
from jax import lax
from jax.experimental import pallas as pl
from jax.experimental.pallas import tpu as pltpu

GRID = 32
NUM_XY = GRID * GRID          # 1024 (ix*32 + iy)
NUM_CELLS = GRID ** 3         # 32768


def _symmetry_loss_kernel(params_ref, scale_ref, pts_ref, closest_ref, out_ref,
                          oh_ref, s_ref, *, n_points, tile_n):
    # params_ref  : (B, 24)          f32 SMEM  -- output.reshape(B, 6*4)
    # scale_ref   : (B, 6)           f32 SMEM  -- [1/(n.n)]*3 ++ [1/||quat||]*3
    # pts_ref     : (1, 3, TN)       f32 VMEM  (lane-dense points)
    # closest_ref : (1, 96, 1024)    f32 VMEM  (row = coord*32+iz, col = ix*32+iy)
    # out_ref     : (1, 8, 128)      f32 VMEM  (per-tile partial sum, broadcast)
    # oh_ref      : (1024, 6*TN)     f32 VMEM scratch (batched xy one-hot)
    # s_ref       : (24, TN)         f32 VMEM scratch (sx/sy/sz stash per transform)
    b = pl.program_id(0)
    t = pl.program_id(1)

    pts = pts_ref[...][0]                     # (3, TN)
    px = pts[0:1, :]                          # (1, TN)
    py = pts[1:2, :]
    pz = pts[2:3, :]

    # Hoisted loop-invariant iotas / validity mask (padded lanes masked at the end).
    xy_iota = lax.broadcasted_iota(jnp.int32, (NUM_XY, tile_n), 0)   # (1024, TN)
    z_iota = lax.broadcasted_iota(jnp.int32, (GRID, tile_n), 0)      # (32, TN)
    lane_pos = t * tile_n + lax.broadcasted_iota(jnp.int32, (1, tile_n), 1)
    valid = lane_pos < n_points                                      # (1, TN)

    def clamp(v):  # mirrors the python if/elif + int() truncation
        return jnp.where(v < 0.0, 0.0, jnp.where(v >= 32.0, 31.0, v))

    # ---------- Pass 1: six symmetry transforms + batched xy one-hot ----------
    for i in range(6):
        c0 = params_ref[b, 4 * i + 0]
        c1 = params_ref[b, 4 * i + 1]
        c2 = params_ref[b, 4 * i + 2]
        c3 = params_ref[b, 4 * i + 3]
        inv = scale_ref[b, i]                 # 1/(n.n)  or  1/||quat||

        if i < 3:
            # Reflective plane: q_sym = q - 2 * ((n.q + d)/(n.n)) * n
            dis = (px * c0 + py * c1 + pz * c2 + c3) * inv
            sx = px - 2.0 * dis * c0
            sy = py - 2.0 * dis * c1
            sz = pz - 2.0 * dis * c2
        else:
            # Rotation quaternion R=(w,a): q_sym = vec(R*(0,q)*R_inv), R_inv=(w,-a)/||R||
            w, ax, ay, az = c0, c1, c2, c3
            s = -(ax * px + ay * py + az * pz)        # scalar part of R*(0,q)
            vx = w * px + ay * pz - az * py           # vector part of R*(0,q)
            vy = w * py + az * px - ax * pz
            vz = w * pz + ax * py - ay * px
            sx = (-s * ax + w * vx + ay * vz - az * vy) * inv
            sy = (-s * ay + w * vy + az * vx - ax * vz) * inv
            sz = (-s * az + w * vz + ax * vy - ay * vx) * inv

        # Stash transform results in VMEM so they don't stay live (in vregs)
        # across the big matmul below.
        s_ref[4 * i + 0:4 * i + 1, :] = sx
        s_ref[4 * i + 1:4 * i + 2, :] = sy
        s_ref[4 * i + 2:4 * i + 3, :] = sz

        ix = clamp(sx).astype(jnp.int32)
        iy = clamp(sy).astype(jnp.int32)
        rowxy = ix * GRID + iy                               # (1, TN) in [0,1024)

        # NOTE(perf review): an outer-product one-hot (ohx ⊗ ohy) was evaluated;
        # under Mosaic the (32,TN)->(32,32,TN) sublane-splat broadcast costs about
        # the same per output vreg as this single compare+select and adds a
        # relayout-heavy reshape, so the direct compare is kept.
        oh_ref[:, i * tile_n:(i + 1) * tile_n] = (
            (xy_iota == rowxy).astype(jnp.float32))          # (1024, TN)

    # ---------- One batched MXU gather for all six transforms ----------------
    cgrid = closest_ref[...][0]                              # (96, 1024)
    cand_all = jnp.dot(cgrid, oh_ref[...],
                       preferred_element_type=jnp.float32)   # (96, 6*TN)

    # ---------- Pass 2: z selection + distances ------------------------------
    dist_acc = jnp.zeros((1, tile_n), jnp.float32)
    for i in range(6):
        sx = s_ref[4 * i + 0:4 * i + 1, :]
        sy = s_ref[4 * i + 1:4 * i + 2, :]
        sz = s_ref[4 * i + 2:4 * i + 3, :]
        iz = clamp(sz).astype(jnp.int32)
        onehot_z = (z_iota == iz).astype(jnp.float32)        # (32, TN)

        ci = cand_all[:, i * tile_n:(i + 1) * tile_n]        # (96, TN), lane-aligned
        cpx = jnp.sum(ci[0:GRID, :] * onehot_z, axis=0, keepdims=True)
        cpy = jnp.sum(ci[GRID:2 * GRID, :] * onehot_z, axis=0, keepdims=True)
        cpz = jnp.sum(ci[2 * GRID:3 * GRID, :] * onehot_z, axis=0, keepdims=True)

        dx = sx - cpx
        dy = sy - cpy
        dz = sz - cpz
        dist_acc = dist_acc + jnp.sqrt(dx * dx + dy * dy + dz * dz)

    # Validity mask applied once (hoisted out of the transform loop).
    tile_sum = jnp.sum(jnp.where(valid, dist_acc, 0.0))      # scalar
    out_ref[...] = jnp.zeros(out_ref.shape, jnp.float32) + tile_sum


def _choose_tile_n(n_points, batch):
    """Largest point tile in {128,256,512} that doesn't over-pad tiny N and
    leaves >= 2 grid units when B == 1 (keeps both v7x TensorCores busy)."""
    tile = 512
    while tile > 128 and tile >= 2 * n_points:
        tile //= 2
    if batch == 1:
        while tile > 128 and pl.cdiv(n_points, tile) < 2:
            tile //= 2
    return tile


@jax.jit
def symmetry_distance_loss(output, points, closest):
    """output: (B,6,4) f32, points: (B,N,3) f32, closest: (B,32768,3) f32 -> (1,) f32."""
    B, N, _ = points.shape

    # --- tiny SMEM-side parameter prep (6 scalars per batch) ---
    nv = output[:, 0:3, 0:3]
    inv_nn = 1.0 / jnp.sum(nv * nv, axis=-1)                          # (B, 3)
    quat = output[:, 3:6, :]
    inv_norm = 1.0 / jnp.sqrt(jnp.sum(quat * quat, axis=-1))          # (B, 3)
    scales = jnp.concatenate([inv_nn, inv_norm], axis=1).astype(jnp.float32)  # (B, 6)
    params = output.reshape(B, 24).astype(jnp.float32)

    # --- lane-dense points, padded to a multiple of the point tile ---
    tile_n = _choose_tile_n(N, B)
    n_tiles = pl.cdiv(N, tile_n)
    n_pad = n_tiles * tile_n
    pts = jnp.transpose(points, (0, 2, 1)).astype(jnp.float32)        # (B, 3, N)
    if n_pad != N:
        pts = jnp.pad(pts, ((0, 0), (0, 0), (0, n_pad - N)))

    # --- closest grid, coordinate-major: row = coord*32 + iz, col = ix*32 + iy ---
    # Kept coordinate-major so the in-kernel z-select stays a cheap 32-high
    # sublane reduce; the strided natural layout would triple that VPU work.
    # TODO(synk): if the lookup grid is reused across steps, store it in this
    # layout once (or fuse the transpose into its producer) to avoid the
    # per-call ~768 KiB/batch HBM round-trip (mostly a v5e bandwidth concern).
    cgrid = jnp.transpose(closest.reshape(B, NUM_XY, GRID, 3),
                          (0, 3, 2, 1)).reshape(B, 3 * GRID, NUM_XY)  # (B, 96, 1024)
    cgrid = cgrid.astype(jnp.float32)

    kernel = functools.partial(_symmetry_loss_kernel, n_points=N, tile_n=tile_n)

    per_tile = pl.pallas_call(
        kernel,
        out_shape=jax.ShapeDtypeStruct((B, n_tiles * 8, 128), jnp.float32),
        grid_spec=pltpu.PrefetchScalarGridSpec(
            num_scalar_prefetch=0,
            grid=(B, n_tiles),
            in_specs=[
                pl.BlockSpec(memory_space=pltpu.MemorySpace.SMEM),      # params (B,24)
                pl.BlockSpec(memory_space=pltpu.MemorySpace.SMEM),      # scales (B,6)
                pl.BlockSpec((1, 3, tile_n), lambda b, t: (b, 0, t)),   # points
                pl.BlockSpec((1, 3 * GRID, NUM_XY), lambda b, t: (b, 0, 0)),  # grid
            ],
            out_specs=pl.BlockSpec((1, 8, 128), lambda b, t: (b, t, 0)),
            scratch_shapes=[
                pltpu.VMEM((NUM_XY, 6 * tile_n), jnp.float32),   # batched xy one-hot
                pltpu.VMEM((24, tile_n), jnp.float32),           # sx/sy/sz stash
            ],
        ),
        compiler_params=pltpu.CompilerParams(
            dimension_semantics=("parallel", "parallel"),
            # TN=512 one-hot scratch (12 MiB) + intermediates exceed v5e's
            # 16 MiB default scoped limit and approach v7x's 32 MiB default;
            # 48 MiB stays well under every generation's physical VMEM.
            vmem_limit_bytes=48 * 1024 * 1024,
        ),
    )(params, scales, pts, cgrid)

    tile_sums = per_tile[:, ::8, 0]                 # (B, n_tiles) partial sums
    per_batch_sum = jnp.sum(tile_sums, axis=1)      # (B,) sum of 6N distances
    return (jnp.sum(per_batch_sum) / (N * B)).reshape(1)


def reference_loss(output, points, closest):
    """Pure-JAX transcription of the PyTorch forward (for verification)."""
    B, N, _ = points.shape
    loss = jnp.zeros((1,), jnp.float32)
    for b in range(B):
        Q = points[b]
        grid = closest[b]
        sym_list = []
        for i in range(3):
            nv = output[b, i, 0:3]
            d = output[b, i, 3]
            dis = (Q @ nv + d) / jnp.dot(nv, nv)
            sym_list.append(Q - 2.0 * dis[:, None] * nv[None, :])
        for i in range(3, 6):
            R = output[b, i]
            w, v = R[0], R[1:4]
            inv_nrm = 1.0 / jnp.sqrt(jnp.sum(R * R))
            s = -(Q @ v)
            vec = w * Q + jnp.cross(jnp.broadcast_to(v, Q.shape), Q)
            sym_list.append((-s[:, None] * v[None, :] + w * vec
                             + jnp.cross(jnp.broadcast_to(v, vec.shape), vec)) * inv_nrm)
        sym = jnp.concatenate(sym_list, axis=0)                     # (6N, 3)

        def clamp(x):
            return jnp.where(x < 0.0, 0.0, jnp.where(x >= 32.0, 31.0, x))

        idx = (clamp(sym[:, 0]).astype(jnp.int32) * (GRID * GRID)
               + clamp(sym[:, 1]).astype(jnp.int32) * GRID
               + clamp(sym[:, 2]).astype(jnp.int32))
        cp = grid[idx]
        dist = jnp.sqrt(jnp.sum((sym - cp) ** 2, axis=1))
        loss = loss + jnp.sum(dist) / N
    return loss / B


if __name__ == "__main__":
    key = jax.random.PRNGKey(0)
    B, N = 2, 8
    k1, k2, k3 = jax.random.split(key, 3)
    # "output" of the upstream network: 3 plane params + 3 quaternions per sample
    output = jax.random.normal(k1, (B, 6, 4), dtype=jnp.float32)
    # target['points']: points roughly inside the 32^3 grid
    points = jax.random.uniform(k2, (B, N, 3), dtype=jnp.float32, minval=0.0, maxval=32.0)
    # target['closest']: closest-point lookup table for every grid cell
    closest = jax.random.uniform(k3, (B, NUM_CELLS, 3), dtype=jnp.float32,
                                 minval=0.0, maxval=32.0)

    loss = jax.block_until_ready(symmetry_distance_loss(output, points, closest))
    ref = reference_loss(output, points, closest)

    assert loss.shape == (1,)
    assert jnp.allclose(loss, ref, rtol=1e-3, atol=1e-3), (loss, ref)
    print("KERNEL_OK")
</pallas_src>

<mosaic_0001>
module attributes {stable_mosaic.version = 11 : i64} {
  func.func @_symmetry_loss_kernel(%arg0: i32, %arg1: i32, %arg2: memref<2x24xf32, #tpu.memory_space<smem>>, %arg3: memref<2x6xf32, #tpu.memory_space<smem>>, %arg4: memref<1x3x128xf32, #tpu.memory_space<vmem>>, %arg5: memref<1x96x1024xf32, #tpu.memory_space<vmem>>, %arg6: memref<1x8x128xf32, #tpu.memory_space<vmem>>, %arg7: memref<1024x768xf32, #tpu.memory_space<vmem>>, %arg8: memref<24x128xf32, #tpu.memory_space<vmem>>) attributes {dimension_semantics = [#tpu.dimension_semantics<parallel>, #tpu.dimension_semantics<parallel>], iteration_bounds = array<i64: 2, 1>, scalar_prefetch = 0 : i64, scratch_operands = 2 : i64, tpu.core_type = #tpu.core_type<tc>, window_params = [{transform_indices = @transform_0, window_bounds = array<i64: 2, 24>}, {transform_indices = @transform_1, window_bounds = array<i64: 2, 6>}, {transform_indices = @transform_2, window_bounds = array<i64: 1, 3, 128>}, {transform_indices = @transform_3, window_bounds = array<i64: 1, 96, 1024>}, {transform_indices = @transform_4, window_bounds = array<i64: 1, 8, 128>}]} {
    %c0 = arith.constant 0 : index
    %c0_0 = arith.constant 0 : index
    %c0_1 = arith.constant 0 : index
    %0 = vector.load %arg4[%c0, %c0_0, %c0_1] : memref<1x3x128xf32, #tpu.memory_space<vmem>>, vector<1x3x128xf32>
    %1 = vector.shape_cast %0 : vector<1x3x128xf32> to vector<3x128xf32>
    %2 = vector.extract_strided_slice %1 {offsets = [0, 0], sizes = [1, 128], strides = [1, 1]} : vector<3x128xf32> to vector<1x128xf32>
    %3 = vector.extract_strided_slice %1 {offsets = [1, 0], sizes = [1, 128], strides = [1, 1]} : vector<3x128xf32> to vector<1x128xf32>
    %4 = vector.extract_strided_slice %1 {offsets = [2, 0], sizes = [1, 128], strides = [1, 1]} : vector<3x128xf32> to vector<1x128xf32>
    %5 = tpu.iota {dimensions = array<i32: 0>} : vector<1024x128xi32>
    %6 = tpu.iota {dimensions = array<i32: 0>} : vector<32x128xi32>
    %c128_i32 = arith.constant 128 : i32
    %7 = arith.muli %arg1, %c128_i32 : i32
    %8 = tpu.iota {dimensions = array<i32: 1>} : vector<1x128xi32>
    %9 = vector.broadcast %7 : i32 to vector<1x128xi32>
    %10 = arith.addi %9, %8 : vector<1x128xi32>
    %c8_i32 = arith.constant 8 : i32
    %11 = vector.broadcast %c8_i32 : i32 to vector<1x128xi32>
    %12 = arith.cmpi slt, %10, %11 : vector<1x128xi32>
    %13 = arith.index_cast %arg0 : i32 to index
    %c0_2 = arith.constant 0 : index
    %14 = memref.load %arg2[%13, %c0_2] : memref<2x24xf32, #tpu.memory_space<smem>>
    %15 = arith.index_cast %arg0 : i32 to index
    %c1 = arith.constant 1 : index
    %16 = memref.load %arg2[%15, %c1] : memref<2x24xf32, #tpu.memory_space<smem>>
    %17 = arith.index_cast %arg0 : i32 to index
    %c2 = arith.constant 2 : index
    %18 = memref.load %arg2[%17, %c2] : memref<2x24xf32, #tpu.memory_space<smem>>
    %19 = arith.index_cast %arg0 : i32 to index
    %c3 = arith.constant 3 : index
    %20 = memref.load %arg2[%19, %c3] : memref<2x24xf32, #tpu.memory_space<smem>>
    %21 = arith.index_cast %arg0 : i32 to index
    %c0_3 = arith.constant 0 : index
    %22 = memref.load %arg3[%21, %c0_3] : memref<2x6xf32, #tpu.memory_space<smem>>
    %23 = vector.broadcast %14 : f32 to vector<1x128xf32>
    %24 = arith.mulf %2, %23 : vector<1x128xf32>
    %25 = vector.broadcast %16 : f32 to vector<1x128xf32>
    %26 = arith.mulf %3, %25 : vector<1x128xf32>
    %27 = arith.addf %24, %26 : vector<1x128xf32>
    %28 = vector.broadcast %18 : f32 to vector<1x128xf32>
    %29 = arith.mulf %4, %28 : vector<1x128xf32>
    %30 = arith.addf %27, %29 : vector<1x128xf32>
    %31 = vector.broadcast %20 : f32 to vector<1x128xf32>
    %32 = arith.addf %30, %31 : vector<1x128xf32>
    %33 = vector.broadcast %22 : f32 to vector<1x128xf32>
    %34 = arith.mulf %32, %33 : vector<1x128xf32>
    %cst = arith.constant 2.000000e+00 : f32
    %35 = vector.broadcast %cst : f32 to vector<1x128xf32>
    %36 = arith.mulf %35, %34 : vector<1x128xf32>
    %37 = vector.broadcast %14 : f32 to vector<1x128xf32>
    %38 = arith.mulf %36, %37 : vector<1x128xf32>
    %39 = arith.subf %2, %38 : vector<1x128xf32>
    %cst_4 = arith.constant 2.000000e+00 : f32
    %40 = vector.broadcast %cst_4 : f32 to vector<1x128xf32>
    %41 = arith.mulf %40, %34 : vector<1x128xf32>
    %42 = vector.broadcast %16 : f32 to vector<1x128xf32>
    %43 = arith.mulf %41, %42 : vector<1x128xf32>
    %44 = arith.subf %3, %43 : vector<1x128xf32>
    %cst_5 = arith.constant 2.000000e+00 : f32
    %45 = vector.broadcast %cst_5 : f32 to vector<1x128xf32>
    %46 = arith.mulf %45, %34 : vector<1x128xf32>
    %47 = vector.broadcast %18 : f32 to vector<1x128xf32>
    %48 = arith.mulf %46, %47 : vector<1x128xf32>
    %49 = arith.subf %4, %48 : vector<1x128xf32>
    %c0_6 = arith.constant 0 : index
    %c0_7 = arith.constant 0 : index
    %50 = vector.load %arg8[%c0_6, %c0_7] : memref<24x128xf32, #tpu.memory_space<vmem>>, vector<1x128xf32>
    tpu.vector_store %arg8[%c0_6, %c0_7], %39 {strides = array<i32>} : memref<24x128xf32, #tpu.memory_space<vmem>>, vector<1x128xf32>,
    %c1_8 = arith.constant 1 : index
    %c0_9 = arith.constant 0 : index
    %51 = vector.load %arg8[%c1_8, %c0_9] : memref<24x128xf32, #tpu.memory_space<vmem>>, vector<1x128xf32>
    tpu.vector_store %arg8[%c1_8, %c0_9], %44 {strides = array<i32>} : memref<24x128xf32, #tpu.memory_space<vmem>>, vector<1x128xf32>,
    %c2_10 = arith.constant 2 : index
    %c0_11 = arith.constant 0 : index
    %52 = vector.load %arg8[%c2_10, %c0_11] : memref<24x128xf32, #tpu.memory_space<vmem>>, vector<1x128xf32>
    tpu.vector_store %arg8[%c2_10, %c0_11], %49 {strides = array<i32>} : memref<24x128xf32, #tpu.memory_space<vmem>>, vector<1x128xf32>,
    %cst_12 = arith.constant 0.000000e+00 : f32
    %53 = vector.broadcast %cst_12 : f32 to vector<1x128xf32>
    %54 = arith.cmpf olt, %39, %53 : vector<1x128xf32>
    %cst_13 = arith.constant 3.200000e+01 : f32
    %55 = vector.broadcast %cst_13 : f32 to vector<1x128xf32>
    %56 = arith.cmpf oge, %39, %55 : vector<1x128xf32>
    %cst_14 = arith.constant 3.100000e+01 : f32
    %57 = vector.broadcast %cst_14 : f32 to vector<1x128xf32>
    %58 = arith.select %56, %57, %39 : vector<1x128xi1>, vector<1x128xf32>
    %cst_15 = arith.constant 0.000000e+00 : f32
    %59 = vector.broadcast %cst_15 : f32 to vector<1x128xf32>
    %60 = arith.select %54, %59, %58 : vector<1x128xi1>, vector<1x128xf32>
    %61 = arith.fptosi %60 : vector<1x128xf32> to vector<1x128xi32>
    %cst_16 = arith.constant 0.000000e+00 : f32
    %62 = vector.broadcast %cst_16 : f32 to vector<1x128xf32>
    %63 = arith.cmpf olt, %44, %62 : vector<1x128xf32>
    %cst_17 = arith.constant 3.200000e+01 : f32
    %64 = vector.broadcast %cst_17 : f32 to vector<1x128xf32>
    %65 = arith.cmpf oge, %44, %64 : vector<1x128xf32>
    %cst_18 = arith.constant 3.100000e+01 : f32
    %66 = vector.broadcast %cst_18 : f32 to vector<1x128xf32>
    %67 = arith.select %65, %66, %44 : vector<1x128xi1>, vector<1x128xf32>
    %cst_19 = arith.constant 0.000000e+00 : f32
    %68 = vector.broadcast %cst_19 : f32 to vector<1x128xf32>
    %69 = arith.select %63, %68, %67 : vector<1x128xi1>, vector<1x128xf32>
    %70 = arith.fptosi %69 : vector<1x128xf32> to vector<1x128xi32>
    %c32_i32 = arith.constant 32 : i32
    %71 = vector.broadcast %c32_i32 : i32 to vector<1x128xi32>
    %72 = arith.muli %61, %71 : vector<1x128xi32>
    %73 = arith.addi %72, %70 : vector<1x128xi32>
    %74 = vector.broadcast %73 : vector<1x128xi32> to vector<1024x128xi32>
    %75 = arith.cmpi eq, %5, %74 : vector<1024x128xi32>
    %76 = arith.extui %75 : vector<1024x128xi1> to vector<1024x128xi32>
    %77 = arith.sitofp %76 : vector<1024x128xi32> to vector<1024x128xf32>
    %c0_20 = arith.constant 0 : index
    %c0_21 = arith.constant 0 : index
    %78 = vector.load %arg7[%c0_20, %c0_21] : memref<1024x768xf32, #tpu.memory_space<vmem>>, vector<1024x128xf32>
    tpu.vector_store %arg7[%c0_20, %c0_21], %77 {strides = array<i32>} : memref<1024x768xf32, #tpu.memory_space<vmem>>, vector<1024x128xf32>,
    %79 = arith.index_cast %arg0 : i32 to index
    %c4 = arith.constant 4 : index
    %80 = memref.load %arg2[%79, %c4] : memref<2x24xf32, #tpu.memory_space<smem>>
    %81 = arith.index_cast %arg0 : i32 to index
    %c5 = arith.constant 5 : index
    %82 = memref.load %arg2[%81, %c5] : memref<2x24xf32, #tpu.memory_space<smem>>
    %83 = arith.index_cast %arg0 : i32 to index
    %c6 = arith.constant 6 : index
    %84 = memref.load %arg2[%83, %c6] : memref<2x24xf32, #tpu.memory_space<smem>>
    %85 = arith.index_cast %arg0 : i32 to index
    %c7 = arith.constant 7 : index
    %86 = memref.load %arg2[%85, %c7] : memref<2x24xf32, #tpu.memory_space<smem>>
    %87 = arith.index_cast %arg0 : i32 to index
    %c1_22 = arith.constant 1 : index
    %88 = memref.load %arg3[%87, %c1_22] : memref<2x6xf32, #tpu.memory_space<smem>>
    %89 = vector.broadcast %80 : f32 to vector<1x128xf32>
    %90 = arith.mulf %2, %89 : vector<1x128xf32>
    %91 = vector.broadcast %82 : f32 to vector<1x128xf32>
    %92 = arith.mulf %3, %91 : vector<1x128xf32>
    %93 = arith.addf %90, %92 : vector<1x128xf32>
    %94 = vector.broadcast %84 : f32 to vector<1x128xf32>
    %95 = arith.mulf %4, %94 : vector<1x128xf32>
    %96 = arith.addf %93, %95 : vector<1x128xf32>
    %97 = vector.broadcast %86 : f32 to vector<1x128xf32>
    %98 = arith.addf %96, %97 : vector<1x128xf32>
    %99 = vector.broadcast %88 : f32 to vector<1x128xf32>
    %100 = arith.mulf %98, %99 : vector<1x128xf32>
    %cst_23 = arith.constant 2.000000e+00 : f32
    %101 = vector.broadcast %cst_23 : f32 to vector<1x128xf32>
    %102 = arith.mulf %101, %100 : vector<1x128xf32>
    %103 = vector.broadcast %80 : f32 to vector<1x128xf32>
    %104 = arith.mulf %102, %103 : vector<1x128xf32>
    %105 = arith.subf %2, %104 : vector<1x128xf32>
    %cst_24 = arith.constant 2.000000e+00 : f32
    %106 = vector.broadcast %cst_24 : f32 to vector<1x128xf32>
    %107 = arith.mulf %106, %100 : vector<1x128xf32>
    %108 = vector.broadcast %82 : f32 to vector<1x128xf32>
    %109 = arith.mulf %107, %108 : vector<1x128xf32>
    %110 = arith.subf %3, %109 : vector<1x128xf32>
    %cst_25 = arith.constant 2.000000e+00 : f32
    %111 = vector.broadcast %cst_25 : f32 to vector<1x128xf32>
    %112 = arith.mulf %111, %100 : vector<1x128xf32>
    %113 = vector.broadcast %84 : f32 to vector<1x128xf32>
    %114 = arith.mulf %112, %113 : vector<1x128xf32>
    %115 = arith.subf %4, %114 : vector<1x128xf32>
    %c4_26 = arith.constant 4 : index
    %c0_27 = arith.constant 0 : index
    %116 = vector.load %arg8[%c4_26, %c0_27] : memref<24x128xf32, #tpu.memory_space<vmem>>, vector<1x128xf32>
    tpu.vector_store %arg8[%c4_26, %c0_27], %105 {strides = array<i32>} : memref<24x128xf32, #tpu.memory_space<vmem>>, vector<1x128xf32>,
    %c5_28 = arith.constant 5 : index
    %c0_29 = arith.constant 0 : index
    %117 = vector.load %arg8[%c5_28, %c0_29] : memref<24x128xf32, #tpu.memory_space<vmem>>, vector<1x128xf32>
    tpu.vector_store %arg8[%c5_28, %c0_29], %110 {strides = array<i32>} : memref<24x128xf32, #tpu.memory_space<vmem>>, vector<1x128xf32>,
    %c6_30 = arith.constant 6 : index
    %c0_31 = arith.constant 0 : index
    %118 = vector.load %arg8[%c6_30, %c0_31] : memref<24x128xf32, #tpu.memory_space<vmem>>, vector<1x128xf32>
    tpu.vector_store %arg8[%c6_30, %c0_31], %115 {strides = array<i32>} : memref<24x128xf32, #tpu.memory_space<vmem>>, vector<1x128xf32>,
    %cst_32 = arith.constant 0.000000e+00 : f32
    %119 = vector.broadcast %cst_32 : f32 to vector<1x128xf32>
    %120 = arith.cmpf olt, %105, %119 : vector<1x128xf32>
    %cst_33 = arith.constant 3.200000e+01 : f32
    %121 = vector.broadcast %cst_33 : f32 to vector<1x128xf32>
    %122 = arith.cmpf oge, %105, %121 : vector<1x128xf32>
    %cst_34 = arith.constant 3.100000e+01 : f32
    %123 = vector.broadcast %cst_34 : f32 to vector<1x128xf32>
    %124 = arith.select %122, %123, %105 : vector<1x128xi1>, vector<1x128xf32>
    %cst_35 = arith.constant 0.000000e+00 : f32
    %125 = vector.broadcast %cst_35 : f32 to vector<1x128xf32>
    %126 = arith.select %120, %125, %124 : vector<1x128xi1>, vector<1x128xf32>
    %127 = arith.fptosi %126 : vector<1x128xf32> to vector<1x128xi32>
    %cst_36 = arith.constant 0.000000e+00 : f32
    %128 = vector.broadcast %cst_36 : f32 to vector<1x128xf32>
    %129 = arith.cmpf olt, %110, %128 : vector<1x128xf32>
    %cst_37 = arith.constant 3.200000e+01 : f32
    %130 = vector.broadcast %cst_37 : f32 to vector<1x128xf32>
    %131 = arith.cmpf oge, %110, %130 : vector<1x128xf32>
    %cst_38 = arith.constant 3.100000e+01 : f32
    %132 = vector.broadcast %cst_38 : f32 to vector<1x128xf32>
    %133 = arith.select %131, %132, %110 : vector<1x128xi1>, vector<1x128xf32>
    %cst_39 = arith.constant 0.000000e+00 : f32
    %134 = vector.broadcast %cst_39 : f32 to vector<1x128xf32>
    %135 = arith.select %129, %134, %133 : vector<1x128xi1>, vector<1x128xf32>
    %136 = arith.fptosi %135 : vector<1x128xf32> to vector<1x128xi32>
    %c32_i32_40 = arith.constant 32 : i32
    %137 = vector.broadcast %c32_i32_40 : i32 to vector<1x128xi32>
    %138 = arith.muli %127, %137 : vector<1x128xi32>
    %139 = arith.addi %138, %136 : vector<1x128xi32>
    %140 = vector.broadcast %139 : vector<1x128xi32> to vector<1024x128xi32>
    %141 = arith.cmpi eq, %5, %140 : vector<1024x128xi32>
    %142 = arith.extui %141 : vector<1024x128xi1> to vector<1024x128xi32>
    %143 = arith.sitofp %142 : vector<1024x128xi32> to vector<1024x128xf32>
    %c0_41 = arith.constant 0 : index
    %c128 = arith.constant 128 : index
    %144 = vector.load %arg7[%c0_41, %c128] : memref<1024x768xf32, #tpu.memory_space<vmem>>, vector<1024x128xf32>
    tpu.vector_store %arg7[%c0_41, %c128], %143 {strides = array<i32>} : memref<1024x768xf32, #tpu.memory_space<vmem>>, vector<1024x128xf32>,
    %145 = arith.index_cast %arg0 : i32 to index
    %c8 = arith.constant 8 : index
    %146 = memref.load %arg2[%145, %c8] : memref<2x24xf32, #tpu.memory_space<smem>>
    %147 = arith.index_cast %arg0 : i32 to index
    %c9 = arith.constant 9 : index
    %148 = memref.load %arg2[%147, %c9] : memref<2x24xf32, #tpu.memory_space<smem>>
    %149 = arith.index_cast %arg0 : i32 to index
    %c10 = arith.constant 10 : index
    %150 = memref.load %arg2[%149, %c10] : memref<2x24xf32, #tpu.memory_space<smem>>
    %151 = arith.index_cast %arg0 : i32 to index
    %c11 = arith.constant 11 : index
    %152 = memref.load %arg2[%151, %c11] : memref<2x24xf32, #tpu.memory_space<smem>>
    %153 = arith.index_cast %arg0 : i32 to index
    %c2_42 = arith.constant 2 : index
    %154 = memref.load %arg3[%153, %c2_42] : memref<2x6xf32, #tpu.memory_space<smem>>
    %155 = vector.broadcast %146 : f32 to vector<1x128xf32>
    %156 = arith.mulf %2, %155 : vector<1x128xf32>
    %157 = vector.broadcast %148 : f32 to vector<1x128xf32>
    %158 = arith.mulf %3, %157 : vector<1x128xf32>
    %159 = arith.addf %156, %158 : vector<1x128xf32>
    %160 = vector.broadcast %150 : f32 to vector<1x128xf32>
    %161 = arith.mulf %4, %160 : vector<1x128xf32>
    %162 = arith.addf %159, %161 : vector<1x128xf32>
    %163 = vector.broadcast %152 : f32 to vector<1x128xf32>
    %164 = arith.addf %162, %163 : vector<1x128xf32>
    %165 = vector.broadcast %154 : f32 to vector<1x128xf32>
    %166 = arith.mulf %164, %165 : vector<1x128xf32>
    %cst_43 = arith.constant 2.000000e+00 : f32
    %167 = vector.broadcast %cst_43 : f32 to vector<1x128xf32>
    %168 = arith.mulf %167, %166 : vector<1x128xf32>
    %169 = vector.broadcast %146 : f32 to vector<1x128xf32>
    %170 = arith.mulf %168, %169 : vector<1x128xf32>
    %171 = arith.subf %2, %170 : vector<1x128xf32>
    %cst_44 = arith.constant 2.000000e+00 : f32
    %172 = vector.broadcast %cst_44 : f32 to vector<1x128xf32>
    %173 = arith.mulf %172, %166 : vector<1x128xf32>
    %174 = vector.broadcast %148 : f32 to vector<1x128xf32>
    %175 = arith.mulf %173, %174 : vector<1x128xf32>
    %176 = arith.subf %3, %175 : vector<1x128xf32>
    %cst_45 = arith.constant 2.000000e+00 : f32
    %177 = vector.broadcast %cst_45 : f32 to vector<1x128xf32>
    %178 = arith.mulf %177, %166 : vector<1x128xf32>
    %179 = vector.broadcast %150 : f32 to vector<1x128xf32>
    %180 = arith.mulf %178, %179 : vector<1x128xf32>
    %181 = arith.subf %4, %180 : vector<1x128xf32>
    %c8_46 = arith.constant 8 : index
    %c0_47 = arith.constant 0 : index
    %182 = vector.load %arg8[%c8_46, %c0_47] : memref<24x128xf32, #tpu.memory_space<vmem>>, vector<1x128xf32>
    tpu.vector_store %arg8[%c8_46, %c0_47], %171 {strides = array<i32>} : memref<24x128xf32, #tpu.memory_space<vmem>>, vector<1x128xf32>,
    %c9_48 = arith.constant 9 : index
    %c0_49 = arith.constant 0 : index
    %183 = vector.load %arg8[%c9_48, %c0_49] : memref<24x128xf32, #tpu.memory_space<vmem>>, vector<1x128xf32>
    tpu.vector_store %arg8[%c9_48, %c0_49], %176 {strides = array<i32>} : memref<24x128xf32, #tpu.memory_space<vmem>>, vector<1x128xf32>,
    %c10_50 = arith.constant 10 : index
    %c0_51 = arith.constant 0 : index
    %184 = vector.load %arg8[%c10_50, %c0_51] : memref<24x128xf32, #tpu.memory_space<vmem>>, vector<1x128xf32>
    tpu.vector_store %arg8[%c10_50, %c0_51], %181 {strides = array<i32>} : memref<24x128xf32, #tpu.memory_space<vmem>>, vector<1x128xf32>,
    %cst_52 = arith.constant 0.000000e+00 : f32
    %185 = vector.broadcast %cst_52 : f32 to vector<1x128xf32>
    %186 = arith.cmpf olt, %171, %185 : vector<1x128xf32>
    %cst_53 = arith.constant 3.200000e+01 : f32
    %187 = vector.broadcast %cst_53 : f32 to vector<1x128xf32>
    %188 = arith.cmpf oge, %171, %187 : vector<1x128xf32>
    %cst_54 = arith.constant 3.100000e+01 : f32
    %189 = vector.broadcast %cst_54 : f32 to vector<1x128xf32>
    %190 = arith.select %188, %189, %171 : vector<1x128xi1>, vector<1x128xf32>
    %cst_55 = arith.constant 0.000000e+00 : f32
    %191 = vector.broadcast %cst_55 : f32 to vector<1x128xf32>
    %192 = arith.select %186, %191, %190 : vector<1x128xi1>, vector<1x128xf32>
    %193 = arith.fptosi %192 : vector<1x128xf32> to vector<1x128xi32>
    %cst_56 = arith.constant 0.000000e+00 : f32
    %194 = vector.broadcast %cst_56 : f32 to vector<1x128xf32>
    %195 = arith.cmpf olt, %176, %194 : vector<1x128xf32>
    %cst_57 = arith.constant 3.200000e+01 : f32
    %196 = vector.broadcast %cst_57 : f32 to vector<1x128xf32>
    %197 = arith.cmpf oge, %176, %196 : vector<1x128xf32>
    %cst_58 = arith.constant 3.100000e+01 : f32
    %198 = vector.broadcast %cst_58 : f32 to vector<1x128xf32>
    %199 = arith.select %197, %198, %176 : vector<1x128xi1>, vector<1x128xf32>
    %cst_59 = arith.constant 0.000000e+00 : f32
    %200 = vector.broadcast %cst_59 : f32 to vector<1x128xf32>
    %201 = arith.select %195, %200, %199 : vector<1x128xi1>, vector<1x128xf32>
    %202 = arith.fptosi %201 : vector<1x128xf32> to vector<1x128xi32>
    %c32_i32_60 = arith.constant 32 : i32
    %203 = vector.broadcast %c32_i32_60 : i32 to vector<1x128xi32>
    %204 = arith.muli %193, %203 : vector<1x128xi32>
    %205 = arith.addi %204, %202 : vector<1x128xi32>
    %206 = vector.broadcast %205 : vector<1x128xi32> to vector<1024x128xi32>
    %207 = arith.cmpi eq, %5, %206 : vector<1024x128xi32>
    %208 = arith.extui %207 : vector<1024x128xi1> to vector<1024x128xi32>
    %209 = arith.sitofp %208 : vector<1024x128xi32> to vector<1024x128xf32>
    %c0_61 = arith.constant 0 : index
    %c256 = arith.constant 256 : index
    %210 = vector.load %arg7[%c0_61, %c256] : memref<1024x768xf32, #tpu.memory_space<vmem>>, vector<1024x128xf32>
    tpu.vector_store %arg7[%c0_61, %c256], %209 {strides = array<i32>} : memref<1024x768xf32, #tpu.memory_space<vmem>>, vector<1024x128xf32>,
    %211 = arith.index_cast %arg0 : i32 to index
    %c12 = arith.constant 12 : index
    %212 = memref.load %arg2[%211, %c12] : memref<2x24xf32, #tpu.memory_space<smem>>
    %213 = arith.index_cast %arg0 : i32 to index
    %c13 = arith.constant 13 : index
    %214 = memref.load %arg2[%213, %c13] : memref<2x24xf32, #tpu.memory_space<smem>>
    %215 = arith.index_cast %arg0 : i32 to index
    %c14 = arith.constant 14 : index
    %216 = memref.load %arg2[%215, %c14] : memref<2x24xf32, #tpu.memory_space<smem>>
    %217 = arith.index_cast %arg0 : i32 to index
    %c15 = arith.constant 15 : index
    %218 = memref.load %arg2[%217, %c15] : memref<2x24xf32, #tpu.memory_space<smem>>
    %219 = arith.index_cast %arg0 : i32 to index
    %c3_62 = arith.constant 3 : index
    %220 = memref.load %arg3[%219, %c3_62] : memref<2x6xf32, #tpu.memory_space<smem>>
    %221 = vector.broadcast %214 : f32 to vector<1x128xf32>
    %222 = arith.mulf %221, %2 : vector<1x128xf32>
    %223 = vector.broadcast %216 : f32 to vector<1x128xf32>
    %224 = arith.mulf %223, %3 : vector<1x128xf32>
    %225 = arith.addf %222, %224 : vector<1x128xf32>
    %226 = vector.broadcast %218 : f32 to vector<1x128xf32>
    %227 = arith.mulf %226, %4 : vector<1x128xf32>
    %228 = arith.addf %225, %227 : vector<1x128xf32>
    %cst_63 = arith.constant 0.000000e+00 : f32
    %229 = vector.broadcast %cst_63 : f32 to vector<1x128xf32>
    %230 = arith.subf %229, %228 : vector<1x128xf32>
    %231 = vector.broadcast %212 : f32 to vector<1x128xf32>
    %232 = arith.mulf %231, %2 : vector<1x128xf32>
    %233 = vector.broadcast %216 : f32 to vector<1x128xf32>
    %234 = arith.mulf %233, %4 : vector<1x128xf32>
    %235 = arith.addf %232, %234 : vector<1x128xf32>
    %236 = vector.broadcast %218 : f32 to vector<1x128xf32>
    %237 = arith.mulf %236, %3 : vector<1x128xf32>
    %238 = arith.subf %235, %237 : vector<1x128xf32>
    %239 = vector.broadcast %212 : f32 to vector<1x128xf32>
    %240 = arith.mulf %239, %3 : vector<1x128xf32>
    %241 = vector.broadcast %218 : f32 to vector<1x128xf32>
    %242 = arith.mulf %241, %2 : vector<1x128xf32>
    %243 = arith.addf %240, %242 : vector<1x128xf32>
    %244 = vector.broadcast %214 : f32 to vector<1x128xf32>
    %245 = arith.mulf %244, %4 : vector<1x128xf32>
    %246 = arith.subf %243, %245 : vector<1x128xf32>
    %247 = vector.broadcast %212 : f32 to vector<1x128xf32>
    %248 = arith.mulf %247, %4 : vector<1x128xf32>
    %249 = vector.broadcast %214 : f32 to vector<1x128xf32>
    %250 = arith.mulf %249, %3 : vector<1x128xf32>
    %251 = arith.addf %248, %250 : vector<1x128xf32>
    %252 = vector.broadcast %216 : f32 to vector<1x128xf32>
    %253 = arith.mulf %252, %2 : vector<1x128xf32>
    %254 = arith.subf %251, %253 : vector<1x128xf32>
    %cst_64 = arith.constant 0.000000e+00 : f32
    %255 = vector.broadcast %cst_64 : f32 to vector<1x128xf32>
    %256 = arith.subf %255, %230 : vector<1x128xf32>
    %257 = vector.broadcast %214 : f32 to vector<1x128xf32>
    %258 = arith.mulf %256, %257 : vector<1x128xf32>
    %259 = vector.broadcast %212 : f32 to vector<1x128xf32>
    %260 = arith.mulf %259, %238 : vector<1x128xf32>
    %261 = arith.addf %258, %260 : vector<1x128xf32>
    %262 = vector.broadcast %216 : f32 to vector<1x128xf32>
    %263 = arith.mulf %262, %254 : vector<1x128xf32>
    %264 = arith.addf %261, %263 : vector<1x128xf32>
    %265 = vector.broadcast %218 : f32 to vector<1x128xf32>
    %266 = arith.mulf %265, %246 : vector<1x128xf32>
    %267 = arith.subf %264, %266 : vector<1x128xf32>
    %268 = vector.broadcast %220 : f32 to vector<1x128xf32>
    %269 = arith.mulf %267, %268 : vector<1x128xf32>
    %cst_65 = arith.constant 0.000000e+00 : f32
    %270 = vector.broadcast %cst_65 : f32 to vector<1x128xf32>
    %271 = arith.subf %270, %230 : vector<1x128xf32>
    %272 = vector.broadcast %216 : f32 to vector<1x128xf32>
    %273 = arith.mulf %271, %272 : vector<1x128xf32>
    %274 = vector.broadcast %212 : f32 to vector<1x128xf32>
    %275 = arith.mulf %274, %246 : vector<1x128xf32>
    %276 = arith.addf %273, %275 : vector<1x128xf32>
    %277 = vector.broadcast %218 : f32 to vector<1x128xf32>
    %278 = arith.mulf %277, %238 : vector<1x128xf32>
    %279 = arith.addf %276, %278 : vector<1x128xf32>
    %280 = vector.broadcast %214 : f32 to vector<1x128xf32>
    %281 = arith.mulf %280, %254 : vector<1x128xf32>
    %282 = arith.subf %279, %281 : vector<1x128xf32>
    %283 = vector.broadcast %220 : f32 to vector<1x128xf32>
    %284 = arith.mulf %282, %283 : vector<1x128xf32>
    %cst_66 = arith.constant 0.000000e+00 : f32
    %285 = vector.broadcast %cst_66 : f32 to vector<1x128xf32>
    %286 = arith.subf %285, %230 : vector<1x128xf32>
    %287 = vector.broadcast %218 : f32 to vector<1x128xf32>
    %288 = arith.mulf %286, %287 : vector<1x128xf32>
    %289 = vector.broadcast %212 : f32 to vector<1x128xf32>
    %290 = arith.mulf %289, %254 : vector<1x128xf32>
    %291 = arith.addf %288, %290 : vector<1x128xf32>
    %292 = vector.broadcast %214 : f32 to vector<1x128xf32>
    %293 = arith.mulf %292, %246 : vector<1x128xf32>
    %294 = arith.addf %291, %293 : vector<1x128xf32>
    %295 = vector.broadcast %216 : f32 to vector<1x128xf32>
    %296 = arith.mulf %295, %238 : vector<1x128xf32>
    %297 = arith.subf %294, %296 : vector<1x128xf32>
    %298 = vector.broadcast %220 : f32 to vector<1x128xf32>
    %299 = arith.mulf %297, %298 : vector<1x128xf32>
    %c12_67 = arith.constant 12 : index
    %c0_68 = arith.constant 0 : index
    %300 = vector.load %arg8[%c12_67, %c0_68] : memref<24x128xf32, #tpu.memory_space<vmem>>, vector<1x128xf32>
    tpu.vector_store %arg8[%c12_67, %c0_68], %269 {strides = array<i32>} : memref<24x128xf32, #tpu.memory_space<vmem>>, vector<1x128xf32>,
    %c13_69 = arith.constant 13 : index
    %c0_70 = arith.constant 0 : index
    %301 = vector.load %arg8[%c13_69, %c0_70] : memref<24x128xf32, #tpu.memory_space<vmem>>, vector<1x128xf32>
    tpu.vector_store %arg8[%c13_69, %c0_70], %284 {strides = array<i32>} : memref<24x128xf32, #tpu.memory_space<vmem>>, vector<1x128xf32>,
    %c14_71 = arith.constant 14 : index
    %c0_72 = arith.constant 0 : index
    %302 = vector.load %arg8[%c14_71, %c0_72] : memref<24x128xf32, #tpu.memory_space<vmem>>, vector<1x128xf32>
    tpu.vector_store %arg8[%c14_71, %c0_72], %299 {strides = array<i32>} : memref<24x128xf32, #tpu.memory_space<vmem>>, vector<1x128xf32>,
    %cst_73 = arith.constant 0.000000e+00 : f32
    %303 = vector.broadcast %cst_73 : f32 to vector<1x128xf32>
    %304 = arith.cmpf olt, %269, %303 : vector<1x128xf32>
    %cst_74 = arith.constant 3.200000e+01 : f32
    %305 = vector.broadcast %cst_74 : f32 to vector<1x128xf32>
    %306 = arith.cmpf oge, %269, %305 : vector<1x128xf32>
    %cst_75 = arith.constant 3.100000e+01 : f32
    %307 = vector.broadcast %cst_75 : f32 to vector<1x128xf32>
    %308 = arith.select %306, %307, %269 : vector<1x128xi1>, vector<1x128xf32>
    %cst_76 = arith.constant 0.000000e+00 : f32
    %309 = vector.broadcast %cst_76 : f32 to vector<1x128xf32>
    %310 = arith.select %304, %309, %308 : vector<1x128xi1>, vector<1x128xf32>
    %311 = arith.fptosi %310 : vector<1x128xf32> to vector<1x128xi32>
    %cst_77 = arith.constant 0.000000e+00 : f32
    %312 = vector.broadcast %cst_77 : f32 to vector<1x128xf32>
    %313 = arith.cmpf olt, %284, %312 : vector<1x128xf32>
    %cst_78 = arith.constant 3.200000e+01 : f32
    %314 = vector.broadcast %cst_78 : f32 to vector<1x128xf32>
    %315 = arith.cmpf oge, %284, %314 : vector<1x128xf32>
    %cst_79 = arith.constant 3.100000e+01 : f32
    %316 = vector.broadcast %cst_79 : f32 to vector<1x128xf32>
    %317 = arith.select %315, %316, %284 : vector<1x128xi1>, vector<1x128xf32>
    %cst_80 = arith.constant 0.000000e+00 : f32
    %318 = vector.broadcast %cst_80 : f32 to vector<1x128xf32>
    %319 = arith.select %313, %318, %317 : vector<1x128xi1>, vector<1x128xf32>
    %320 = arith.fptosi %319 : vector<1x128xf32> to vector<1x128xi32>
    %c32_i32_81 = arith.constant 32 : i32
    %321 = vector.broadcast %c32_i32_81 : i32 to vector<1x128xi32>
    %322 = arith.muli %311, %321 : vector<1x128xi32>
    %323 = arith.addi %322, %320 : vector<1x128xi32>
    %324 = vector.broadcast %323 : vector<1x128xi32> to vector<1024x128xi32>
    %325 = arith.cmpi eq, %5, %324 : vector<1024x128xi32>
    %326 = arith.extui %325 : vector<1024x128xi1> to vector<1024x128xi32>
    %327 = arith.sitofp %326 : vector<1024x128xi32> to vector<1024x128xf32>
    %c0_82 = arith.constant 0 : index
    %c384 = arith.constant 384 : index
    %328 = vector.load %arg7[%c0_82, %c384] : memref<1024x768xf32, #tpu.memory_space<vmem>>, vector<1024x128xf32>
    tpu.vector_store %arg7[%c0_82, %c384], %327 {strides = array<i32>} : memref<1024x768xf32, #tpu.memory_space<vmem>>, vector<1024x128xf32>,
    %329 = arith.index_cast %arg0 : i32 to index
    %c16 = arith.constant 16 : index
    %330 = memref.load %arg2[%329, %c16] : memref<2x24xf32, #tpu.memory_space<smem>>
    %331 = arith.index_cast %arg0 : i32 to index
    %c17 = arith.constant 17 : index
    %332 = memref.load %arg2[%331, %c17] : memref<2x24xf32, #tpu.memory_space<smem>>
    %333 = arith.index_cast %arg0 : i32 to index
    %c18 = arith.constant 18 : index
    %334 = memref.load %arg2[%333, %c18] : memref<2x24xf32, #tpu.memory_space<smem>>
    %335 = arith.index_cast %arg0 : i32 to index
    %c19 = arith.constant 19 : index
    %336 = memref.load %arg2[%335, %c19] : memref<2x24xf32, #tpu.memory_space<smem>>
    %337 = arith.index_cast %arg0 : i32 to index
    %c4_83 = arith.constant 4 : index
    %338 = memref.load %arg3[%337, %c4_83] : memref<2x6xf32, #tpu.memory_space<smem>>
    %339 = vector.broadcast %332 : f32 to vector<1x128xf32>
    %340 = arith.mulf %339, %2 : vector<1x128xf32>
    %341 = vector.broadcast %334 : f32 to vector<1x128xf32>
    %342 = arith.mulf %341, %3 : vector<1x128xf32>
    %343 = arith.addf %340, %342 : vector<1x128xf32>
    %344 = vector.broadcast %336 : f32 to vector<1x128xf32>
    %345 = arith.mulf %344, %4 : vector<1x128xf32>
    %346 = arith.addf %343, %345 : vector<1x128xf32>
    %cst_84 = arith.constant 0.000000e+00 : f32
    %347 = vector.broadcast %cst_84 : f32 to vector<1x128xf32>
    %348 = arith.subf %347, %346 : vector<1x128xf32>
    %349 = vector.broadcast %330 : f32 to vector<1x128xf32>
    %350 = arith.mulf %349, %2 : vector<1x128xf32>
    %351 = vector.broadcast %334 : f32 to vector<1x128xf32>
    %352 = arith.mulf %351, %4 : vector<1x128xf32>
    %353 = arith.addf %350, %352 : vector<1x128xf32>
    %354 = vector.broadcast %336 : f32 to vector<1x128xf32>
    %355 = arith.mulf %354, %3 : vector<1x128xf32>
    %356 = arith.subf %353, %355 : vector<1x128xf32>
    %357 = vector.broadcast %330 : f32 to vector<1x128xf32>
    %358 = arith.mulf %357, %3 : vector<1x128xf32>
    %359 = vector.broadcast %336 : f32 to vector<1x128xf32>
    %360 = arith.mulf %359, %2 : vector<1x128xf32>
    %361 = arith.addf %358, %360 : vector<1x128xf32>
    %362 = vector.broadcast %332 : f32 to vector<1x128xf32>
    %363 = arith.mulf %362, %4 : vector<1x128xf32>
    %364 = arith.subf %361, %363 : vector<1x128xf32>
    %365 = vector.broadcast %330 : f32 to vector<1x128xf32>
    %366 = arith.mulf %365, %4 : vector<1x128xf32>
    %367 = vector.broadcast %332 : f32 to vector<1x128xf32>
    %368 = arith.mulf %367, %3 : vector<1x128xf32>
    %369 = arith.addf %366, %368 : vector<1x128xf32>
    %370 = vector.broadcast %334 : f32 to vector<1x128xf32>
    %371 = arith.mulf %370, %2 : vector<1x128xf32>
    %372 = arith.subf %369, %371 : vector<1x128xf32>
    %cst_85 = arith.constant 0.000000e+00 : f32
    %373 = vector.broadcast %cst_85 : f32 to vector<1x128xf32>
    %374 = arith.subf %373, %348 : vector<1x128xf32>
    %375 = vector.broadcast %332 : f32 to vector<1x128xf32>
    %376 = arith.mulf %374, %375 : vector<1x128xf32>
    %377 = vector.broadcast %330 : f32 to vector<1x128xf32>
    %378 = arith.mulf %377, %356 : vector<1x128xf32>
    %379 = arith.addf %376, %378 : vector<1x128xf32>
    %380 = vector.broadcast %334 : f32 to vector<1x128xf32>
    %381 = arith.mulf %380, %372 : vector<1x128xf32>
    %382 = arith.addf %379, %381 : vector<1x128xf32>
    %383 = vector.broadcast %336 : f32 to vector<1x128xf32>
    %384 = arith.mulf %383, %364 : vector<1x128xf32>
    %385 = arith.subf %382, %384 : vector<1x128xf32>
    %386 = vector.broadcast %338 : f32 to vector<1x128xf32>
    %387 = arith.mulf %385, %386 : vector<1x128xf32>
    %cst_86 = arith.constant 0.000000e+00 : f32
    %388 = vector.broadcast %cst_86 : f32 to vector<1x128xf32>
    %389 = arith.subf %388, %348 : vector<1x128xf32>
    %390 = vector.broadcast %334 : f32 to vector<1x128xf32>
    %391 = arith.mulf %389, %390 : vector<1x128xf32>
    %392 = vector.broadcast %330 : f32 to vector<1x128xf32>
    %393 = arith.mulf %392, %364 : vector<1x128xf32>
    %394 = arith.addf %391, %393 : vector<1x128xf32>
    %395 = vector.broadcast %336 : f32 to vector<1x128xf32>
    %396 = arith.mulf %395, %356 : vector<1x128xf32>
    %397 = arith.addf %394, %396 : vector<1x128xf32>
    %398 = vector.broadcast %332 : f32 to vector<1x128xf32>
    %399 = arith.mulf %398, %372 : vector<1x128xf32>
    %400 = arith.subf %397, %399 : vector<1x128xf32>
    %401 = vector.broadcast %338 : f32 to vector<1x128xf32>
    %402 = arith.mulf %400, %401 : vector<1x128xf32>
    %cst_87 = arith.constant 0.000000e+00 : f32
    %403 = vector.broadcast %cst_87 : f32 to vector<1x128xf32>
    %404 = arith.subf %403, %348 : vector<1x128xf32>
    %405 = vector.broadcast %336 : f32 to vector<1x128xf32>
    %406 = arith.mulf %404, %405 : vector<1x128xf32>
    %407 = vector.broadcast %330 : f32 to vector<1x128xf32>
    %408 = arith.mulf %407, %372 : vector<1x128xf32>
    %409 = arith.addf %406, %408 : vector<1x128xf32>
    %410 = vector.broadcast %332 : f32 to vector<1x128xf32>
    %411 = arith.mulf %410, %364 : vector<1x128xf32>
    %412 = arith.addf %409, %411 : vector<1x128xf32>
    %413 = vector.broadcast %334 : f32 to vector<1x128xf32>
    %414 = arith.mulf %413, %356 : vector<1x128xf32>
    %415 = arith.subf %412, %414 : vector<1x128xf32>
    %416 = vector.broadcast %338 : f32 to vector<1x128xf32>
    %417 = arith.mulf %415, %416 : vector<1x128xf32>
    %c16_88 = arith.constant 16 : index
    %c0_89 = arith.constant 0 : index
    %418 = vector.load %arg8[%c16_88, %c0_89] : memref<24x128xf32, #tpu.memory_space<vmem>>, vector<1x128xf32>
    tpu.vector_store %arg8[%c16_88, %c0_89], %387 {strides = array<i32>} : memref<24x128xf32, #tpu.memory_space<vmem>>, vector<1x128xf32>,
    %c17_90 = arith.constant 17 : index
    %c0_91 = arith.constant 0 : index
    %419 = vector.load %arg8[%c17_90, %c0_91] : memref<24x128xf32, #tpu.memory_space<vmem>>, vector<1x128xf32>
    tpu.vector_store %arg8[%c17_90, %c0_91], %402 {strides = array<i32>} : memref<24x128xf32, #tpu.memory_space<vmem>>, vector<1x128xf32>,
    %c18_92 = arith.constant 18 : index
    %c0_93 = arith.constant 0 : index
    %420 = vector.load %arg8[%c18_92, %c0_93] : memref<24x128xf32, #tpu.memory_space<vmem>>, vector<1x128xf32>
    tpu.vector_store %arg8[%c18_92, %c0_93], %417 {strides = array<i32>} : memref<24x128xf32, #tpu.memory_space<vmem>>, vector<1x128xf32>,
    %cst_94 = arith.constant 0.000000e+00 : f32
    %421 = vector.broadcast %cst_94 : f32 to vector<1x128xf32>
    %422 = arith.cmpf olt, %387, %421 : vector<1x128xf32>
    %cst_95 = arith.constant 3.200000e+01 : f32
    %423 = vector.broadcast %cst_95 : f32 to vector<1x128xf32>
    %424 = arith.cmpf oge, %387, %423 : vector<1x128xf32>
    %cst_96 = arith.constant 3.100000e+01 : f32
    %425 = vector.broadcast %cst_96 : f32 to vector<1x128xf32>
    %426 = arith.select %424, %425, %387 : vector<1x128xi1>, vector<1x128xf32>
    %cst_97 = arith.constant 0.000000e+00 : f32
    %427 = vector.broadcast %cst_97 : f32 to vector<1x128xf32>
    %428 = arith.select %422, %427, %426 : vector<1x128xi1>, vector<1x128xf32>
    %429 = arith.fptosi %428 : vector<1x128xf32> to vector<1x128xi32>
    %cst_98 = arith.constant 0.000000e+00 : f32
    %430 = vector.broadcast %cst_98 : f32 to vector<1x128xf32>
    %431 = arith.cmpf olt, %402, %430 : vector<1x128xf32>
    %cst_99 = arith.constant 3.200000e+01 : f32
    %432 = vector.broadcast %cst_99 : f32 to vector<1x128xf32>
    %433 = arith.cmpf oge, %402, %432 : vector<1x128xf32>
    %cst_100 = arith.constant 3.100000e+01 : f32
    %434 = vector.broadcast %cst_100 : f32 to vector<1x128xf32>
    %435 = arith.select %433, %434, %402 : vector<1x128xi1>, vector<1x128xf32>
    %cst_101 = arith.constant 0.000000e+00 : f32
    %436 = vector.broadcast %cst_101 : f32 to vector<1x128xf32>
    %437 = arith.select %431, %436, %435 : vector<1x128xi1>, vector<1x128xf32>
    %438 = arith.fptosi %437 : vector<1x128xf32> to vector<1x128xi32>
    %c32_i32_102 = arith.constant 32 : i32
    %439 = vector.broadcast %c32_i32_102 : i32 to vector<1x128xi32>
    %440 = arith.muli %429, %439 : vector<1x128xi32>
    %441 = arith.addi %440, %438 : vector<1x128xi32>
    %442 = vector.broadcast %441 : vector<1x128xi32> to vector<1024x128xi32>
    %443 = arith.cmpi eq, %5, %442 : vector<1024x128xi32>
    %444 = arith.extui %443 : vector<1024x128xi1> to vector<1024x128xi32>
    %445 = arith.sitofp %444 : vector<1024x128xi32> to vector<1024x128xf32>
    %c0_103 = arith.constant 0 : index
    %c512 = arith.constant 512 : index
    %446 = vector.load %arg7[%c0_103, %c512] : memref<1024x768xf32, #tpu.memory_space<vmem>>, vector<1024x128xf32>
    tpu.vector_store %arg7[%c0_103, %c512], %445 {strides = array<i32>} : memref<1024x768xf32, #tpu.memory_space<vmem>>, vector<1024x128xf32>,
    %447 = arith.index_cast %arg0 : i32 to index
    %c20 = arith.constant 20 : index
    %448 = memref.load %arg2[%447, %c20] : memref<2x24xf32, #tpu.memory_space<smem>>
    %449 = arith.index_cast %arg0 : i32 to index
    %c21 = arith.constant 21 : index
    %450 = memref.load %arg2[%449, %c21] : memref<2x24xf32, #tpu.memory_space<smem>>
    %451 = arith.index_cast %arg0 : i32 to index
    %c22 = arith.constant 22 : index
    %452 = memref.load %arg2[%451, %c22] : memref<2x24xf32, #tpu.memory_space<smem>>
    %453 = arith.index_cast %arg0 : i32 to index
    %c23 = arith.constant 23 : index
    %454 = memref.load %arg2[%453, %c23] : memref<2x24xf32, #tpu.memory_space<smem>>
    %455 = arith.index_cast %arg0 : i32 to index
    %c5_104 = arith.constant 5 : index
    %456 = memref.load %arg3[%455, %c5_104] : memref<2x6xf32, #tpu.memory_space<smem>>
    %457 = vector.broadcast %450 : f32 to vector<1x128xf32>
    %458 = arith.mulf %457, %2 : vector<1x128xf32>
    %459 = vector.broadcast %452 : f32 to vector<1x128xf32>
    %460 = arith.mulf %459, %3 : vector<1x128xf32>
    %461 = arith.addf %458, %460 : vector<1x128xf32>
    %462 = vector.broadcast %454 : f32 to vector<1x128xf32>
    %463 = arith.mulf %462, %4 : vector<1x128xf32>
    %464 = arith.addf %461, %463 : vector<1x128xf32>
    %cst_105 = arith.constant 0.000000e+00 : f32
    %465 = vector.broadcast %cst_105 : f32 to vector<1x128xf32>
    %466 = arith.subf %465, %464 : vector<1x128xf32>
    %467 = vector.broadcast %448 : f32 to vector<1x128xf32>
    %468 = arith.mulf %467, %2 : vector<1x128xf32>
    %469 = vector.broadcast %452 : f32 to vector<1x128xf32>
    %470 = arith.mulf %469, %4 : vector<1x128xf32>
    %471 = arith.addf %468, %470 : vector<1x128xf32>
    %472 = vector.broadcast %454 : f32 to vector<1x128xf32>
    %473 = arith.mulf %472, %3 : vector<1x128xf32>
    %474 = arith.subf %471, %473 : vector<1x128xf32>
    %475 = vector.broadcast %448 : f32 to vector<1x128xf32>
    %476 = arith.mulf %475, %3 : vector<1x128xf32>
    %477 = vector.broadcast %454 : f32 to vector<1x128xf32>
    %478 = arith.mulf %477, %2 : vector<1x128xf32>
    %479 = arith.addf %476, %478 : vector<1x128xf32>
    %480 = vector.broadcast %450 : f32 to vector<1x128xf32>
    %481 = arith.mulf %480, %4 : vector<1x128xf32>
    %482 = arith.subf %479, %481 : vector<1x128xf32>
    %483 = vector.broadcast %448 : f32 to vector<1x128xf32>
    %484 = arith.mulf %483, %4 : vector<1x128xf32>
    %485 = vector.broadcast %450 : f32 to vector<1x128xf32>
    %486 = arith.mulf %485, %3 : vector<1x128xf32>
    %487 = arith.addf %484, %486 : vector<1x128xf32>
    %488 = vector.broadcast %452 : f32 to vector<1x128xf32>
    %489 = arith.mulf %488, %2 : vector<1x128xf32>
    %490 = arith.subf %487, %489 : vector<1x128xf32>
    %cst_106 = arith.constant 0.000000e+00 : f32
    %491 = vector.broadcast %cst_106 : f32 to vector<1x128xf32>
    %492 = arith.subf %491, %466 : vector<1x128xf32>
    %493 = vector.broadcast %450 : f32 to vector<1x128xf32>
    %494 = arith.mulf %492, %493 : vector<1x128xf32>
    %495 = vector.broadcast %448 : f32 to vector<1x128xf32>
    %496 = arith.mulf %495, %474 : vector<1x128xf32>
    %497 = arith.addf %494, %496 : vector<1x128xf32>
    %498 = vector.broadcast %452 : f32 to vector<1x128xf32>
    %499 = arith.mulf %498, %490 : vector<1x128xf32>
    %500 = arith.addf %497, %499 : vector<1x128xf32>
    %501 = vector.broadcast %454 : f32 to vector<1x128xf32>
    %502 = arith.mulf %501, %482 : vector<1x128xf32>
    %503 = arith.subf %500, %502 : vector<1x128xf32>
    %504 = vector.broadcast %456 : f32 to vector<1x128xf32>
    %505 = arith.mulf %503, %504 : vector<1x128xf32>
    %cst_107 = arith.constant 0.000000e+00 : f32
    %506 = vector.broadcast %cst_107 : f32 to vector<1x128xf32>
    %507 = arith.subf %506, %466 : vector<1x128xf32>
    %508 = vector.broadcast %452 : f32 to vector<1x128xf32>
    %509 = arith.mulf %507, %508 : vector<1x128xf32>
    %510 = vector.broadcast %448 : f32 to vector<1x128xf32>
    %511 = arith.mulf %510, %482 : vector<1x128xf32>
    %512 = arith.addf %509, %511 : vector<1x128xf32>
    %513 = vector.broadcast %454 : f32 to vector<1x128xf32>
    %514 = arith.mulf %513, %474 : vector<1x128xf32>
    %515 = arith.addf %512, %514 : vector<1x128xf32>
    %516 = vector.broadcast %450 : f32 to vector<1x128xf32>
    %517 = arith.mulf %516, %490 : vector<1x128xf32>
    %518 = arith.subf %515, %517 : vector<1x128xf32>
    %519 = vector.broadcast %456 : f32 to vector<1x128xf32>
    %520 = arith.mulf %518, %519 : vector<1x128xf32>
    %cst_108 = arith.constant 0.000000e+00 : f32
    %521 = vector.broadcast %cst_108 : f32 to vector<1x128xf32>
    %522 = arith.subf %521, %466 : vector<1x128xf32>
    %523 = vector.broadcast %454 : f32 to vector<1x128xf32>
    %524 = arith.mulf %522, %523 : vector<1x128xf32>
    %525 = vector.broadcast %448 : f32 to vector<1x128xf32>
    %526 = arith.mulf %525, %490 : vector<1x128xf32>
    %527 = arith.addf %524, %526 : vector<1x128xf32>
    %528 = vector.broadcast %450 : f32 to vector<1x128xf32>
    %529 = arith.mulf %528, %482 : vector<1x128xf32>
    %530 = arith.addf %527, %529 : vector<1x128xf32>
    %531 = vector.broadcast %452 : f32 to vector<1x128xf32>
    %532 = arith.mulf %531, %474 : vector<1x128xf32>
    %533 = arith.subf %530, %532 : vector<1x128xf32>
    %534 = vector.broadcast %456 : f32 to vector<1x128xf32>
    %535 = arith.mulf %533, %534 : vector<1x128xf32>
    %c20_109 = arith.constant 20 : index
    %c0_110 = arith.constant 0 : index
    %536 = vector.load %arg8[%c20_109, %c0_110] : memref<24x128xf32, #tpu.memory_space<vmem>>, vector<1x128xf32>
    tpu.vector_store %arg8[%c20_109, %c0_110], %505 {strides = array<i32>} : memref<24x128xf32, #tpu.memory_space<vmem>>, vector<1x128xf32>,
    %c21_111 = arith.constant 21 : index
    %c0_112 = arith.constant 0 : index
    %537 = vector.load %arg8[%c21_111, %c0_112] : memref<24x128xf32, #tpu.memory_space<vmem>>, vector<1x128xf32>
    tpu.vector_store %arg8[%c21_111, %c0_112], %520 {strides = array<i32>} : memref<24x128xf32, #tpu.memory_space<vmem>>, vector<1x128xf32>,
    %c22_113 = arith.constant 22 : index
    %c0_114 = arith.constant 0 : index
    %538 = vector.load %arg8[%c22_113, %c0_114] : memref<24x128xf32, #tpu.memory_space<vmem>>, vector<1x128xf32>
    tpu.vector_store %arg8[%c22_113, %c0_114], %535 {strides = array<i32>} : memref<24x128xf32, #tpu.memory_space<vmem>>, vector<1x128xf32>,
    %cst_115 = arith.constant 0.000000e+00 : f32
    %539 = vector.broadcast %cst_115 : f32 to vector<1x128xf32>
    %540 = arith.cmpf olt, %505, %539 : vector<1x128xf32>
    %cst_116 = arith.constant 3.200000e+01 : f32
    %541 = vector.broadcast %cst_116 : f32 to vector<1x128xf32>
    %542 = arith.cmpf oge, %505, %541 : vector<1x128xf32>
    %cst_117 = arith.constant 3.100000e+01 : f32
    %543 = vector.broadcast %cst_117 : f32 to vector<1x128xf32>
    %544 = arith.select %542, %543, %505 : vector<1x128xi1>, vector<1x128xf32>
    %cst_118 = arith.constant 0.000000e+00 : f32
    %545 = vector.broadcast %cst_118 : f32 to vector<1x128xf32>
    %546 = arith.select %540, %545, %544 : vector<1x128xi1>, vector<1x128xf32>
    %547 = arith.fptosi %546 : vector<1x128xf32> to vector<1x128xi32>
    %cst_119 = arith.constant 0.000000e+00 : f32
    %548 = vector.broadcast %cst_119 : f32 to vector<1x128xf32>
    %549 = arith.cmpf olt, %520, %548 : vector<1x128xf32>
    %cst_120 = arith.constant 3.200000e+01 : f32
    %550 = vector.broadcast %cst_120 : f32 to vector<1x128xf32>
    %551 = arith.cmpf oge, %520, %550 : vector<1x128xf32>
    %cst_121 = arith.constant 3.100000e+01 : f32
    %552 = vector.broadcast %cst_121 : f32 to vector<1x128xf32>
    %553 = arith.select %551, %552, %520 : vector<1x128xi1>, vector<1x128xf32>
    %cst_122 = arith.constant 0.000000e+00 : f32
    %554 = vector.broadcast %cst_122 : f32 to vector<1x128xf32>
    %555 = arith.select %549, %554, %553 : vector<1x128xi1>, vector<1x128xf32>
    %556 = arith.fptosi %555 : vector<1x128xf32> to vector<1x128xi32>
    %c32_i32_123 = arith.constant 32 : i32
    %557 = vector.broadcast %c32_i32_123 : i32 to vector<1x128xi32>
    %558 = arith.muli %547, %557 : vector<1x128xi32>
    %559 = arith.addi %558, %556 : vector<1x128xi32>
    %560 = vector.broadcast %559 : vector<1x128xi32> to vector<1024x128xi32>
    %561 = arith.cmpi eq, %5, %560 : vector<1024x128xi32>
    %562 = arith.extui %561 : vector<1024x128xi1> to vector<1024x128xi32>
    %563 = arith.sitofp %562 : vector<1024x128xi32> to vector<1024x128xf32>
    %c0_124 = arith.constant 0 : index
    %c640 = arith.constant 640 : index
    %564 = vector.load %arg7[%c0_124, %c640] : memref<1024x768xf32, #tpu.memory_space<vmem>>, vector<1024x128xf32>
    tpu.vector_store %arg7[%c0_124, %c640], %563 {strides = array<i32>} : memref<1024x768xf32, #tpu.memory_space<vmem>>, vector<1024x128xf32>,
    %c0_125 = arith.constant 0 : index
    %c0_126 = arith.constant 0 : index
    %c0_127 = arith.constant 0 : index
    %565 = vector.load %arg5[%c0_125, %c0_126, %c0_127] : memref<1x96x1024xf32, #tpu.memory_space<vmem>>, vector<1x96x1024xf32>
    %566 = vector.shape_cast %565 : vector<1x96x1024xf32> to vector<96x1024xf32>
    %c0_128 = arith.constant 0 : index
    %c0_129 = arith.constant 0 : index
    %567 = vector.load %arg7[%c0_128, %c0_129] : memref<1024x768xf32, #tpu.memory_space<vmem>>, vector<1024x768xf32>
    %cst_130 = arith.constant dense<0.000000e+00> : vector<96x768xf32>
    %568 = tpu.matmul %566, %567, %cst_130 {dimension_numbers = #tpu.dot_dimension_numbers<[1], [0], [0], [1], [0, 0, 1, 1], [], []>} : vector<96x1024xf32>, vector<1024x768xf32>, vector<96x768xf32> -> vector<96x768xf32>
    %cst_131 = arith.constant 0.000000e+00 : f32
    %569 = vector.broadcast %cst_131 : f32 to vector<1x128xf32>
    %c0_132 = arith.constant 0 : index
    %c0_133 = arith.constant 0 : index
    %570 = vector.load %arg8[%c0_132, %c0_133] : memref<24x128xf32, #tpu.memory_space<vmem>>, vector<1x128xf32>
    %c1_134 = arith.constant 1 : index
    %c0_135 = arith.constant 0 : index
    %571 = vector.load %arg8[%c1_134, %c0_135] : memref<24x128xf32, #tpu.memory_space<vmem>>, vector<1x128xf32>
    %c2_136 = arith.constant 2 : index
    %c0_137 = arith.constant 0 : index
    %572 = vector.load %arg8[%c2_136, %c0_137] : memref<24x128xf32, #tpu.memory_space<vmem>>, vector<1x128xf32>
    %cst_138 = arith.constant 0.000000e+00 : f32
    %573 = vector.broadcast %cst_138 : f32 to vector<1x128xf32>
    %574 = arith.cmpf olt, %572, %573 : vector<1x128xf32>
    %cst_139 = arith.constant 3.200000e+01 : f32
    %575 = vector.broadcast %cst_139 : f32 to vector<1x128xf32>
    %576 = arith.cmpf oge, %572, %575 : vector<1x128xf32>
    %cst_140 = arith.constant 3.100000e+01 : f32
    %577 = vector.broadcast %cst_140 : f32 to vector<1x128xf32>
    %578 = arith.select %576, %577, %572 : vector<1x128xi1>, vector<1x128xf32>
    %cst_141 = arith.constant 0.000000e+00 : f32
    %579 = vector.broadcast %cst_141 : f32 to vector<1x128xf32>
    %580 = arith.select %574, %579, %578 : vector<1x128xi1>, vector<1x128xf32>
    %581 = arith.fptosi %580 : vector<1x128xf32> to vector<1x128xi32>
    %582 = vector.broadcast %581 : vector<1x128xi32> to vector<32x128xi32>
    %583 = arith.cmpi eq, %6, %582 : vector<32x128xi32>
    %584 = arith.extui %583 : vector<32x128xi1> to vector<32x128xi32>
    %585 = arith.sitofp %584 : vector<32x128xi32> to vector<32x128xf32>
    %586 = vector.extract_strided_slice %568 {offsets = [0, 0], sizes = [96, 128], strides = [1, 1]} : vector<96x768xf32> to vector<96x128xf32>
    %587 = vector.extract_strided_slice %586 {offsets = [0, 0], sizes = [32, 128], strides = [1, 1]} : vector<96x128xf32> to vector<32x128xf32>
    %588 = arith.mulf %587, %585 : vector<32x128xf32>
    %cst_142 = arith.constant dense<0.000000e+00> : vector<128xf32>
    %589 = vector.multi_reduction <add>, %588, %cst_142 [0] : vector<32x128xf32> to vector<128xf32>
    %590 = vector.shape_cast %589 : vector<128xf32> to vector<1x128xf32>
    %591 = vector.extract_strided_slice %586 {offsets = [32, 0], sizes = [32, 128], strides = [1, 1]} : vector<96x128xf32> to vector<32x128xf32>
    %592 = arith.mulf %591, %585 : vector<32x128xf32>
    %cst_143 = arith.constant dense<0.000000e+00> : vector<128xf32>
    %593 = vector.multi_reduction <add>, %592, %cst_143 [0] : vector<32x128xf32> to vector<128xf32>
    %594 = vector.shape_cast %593 : vector<128xf32> to vector<1x128xf32>
    %595 = vector.extract_strided_slice %586 {offsets = [64, 0], sizes = [32, 128], strides = [1, 1]} : vector<96x128xf32> to vector<32x128xf32>
    %596 = arith.mulf %595, %585 : vector<32x128xf32>
    %cst_144 = arith.constant dense<0.000000e+00> : vector<128xf32>
    %597 = vector.multi_reduction <add>, %596, %cst_144 [0] : vector<32x128xf32> to vector<128xf32>
    %598 = vector.shape_cast %597 : vector<128xf32> to vector<1x128xf32>
    %599 = arith.subf %570, %590 : vector<1x128xf32>
    %600 = arith.subf %571, %594 : vector<1x128xf32>
    %601 = arith.subf %572, %598 : vector<1x128xf32>
    %602 = arith.mulf %599, %599 : vector<1x128xf32>
    %603 = arith.mulf %600, %600 : vector<1x128xf32>
    %604 = arith.addf %602, %603 : vector<1x128xf32>
    %605 = arith.mulf %601, %601 : vector<1x128xf32>
    %606 = arith.addf %604, %605 : vector<1x128xf32>
    %607 = math.sqrt %606 : vector<1x128xf32>
    %608 = arith.addf %569, %607 : vector<1x128xf32>
    %c4_145 = arith.constant 4 : index
    %c0_146 = arith.constant 0 : index
    %609 = vector.load %arg8[%c4_145, %c0_146] : memref<24x128xf32, #tpu.memory_space<vmem>>, vector<1x128xf32>
    %c5_147 = arith.constant 5 : index
    %c0_148 = arith.constant 0 : index
    %610 = vector.load %arg8[%c5_147, %c0_148] : memref<24x128xf32, #tpu.memory_space<vmem>>, vector<1x128xf32>
    %c6_149 = arith.constant 6 : index
    %c0_150 = arith.constant 0 : index
    %611 = vector.load %arg8[%c6_149, %c0_150] : memref<24x128xf32, #tpu.memory_space<vmem>>, vector<1x128xf32>
    %cst_151 = arith.constant 0.000000e+00 : f32
    %612 = vector.broadcast %cst_151 : f32 to vector<1x128xf32>
    %613 = arith.cmpf olt, %611, %612 : vector<1x128xf32>
    %cst_152 = arith.constant 3.200000e+01 : f32
    %614 = vector.broadcast %cst_152 : f32 to vector<1x128xf32>
    %615 = arith.cmpf oge, %611, %614 : vector<1x128xf32>
    %cst_153 = arith.constant 3.100000e+01 : f32
    %616 = vector.broadcast %cst_153 : f32 to vector<1x128xf32>
    %617 = arith.select %615, %616, %611 : vector<1x128xi1>, vector<1x128xf32>
    %cst_154 = arith.constant 0.000000e+00 : f32
    %618 = vector.broadcast %cst_154 : f32 to vector<1x128xf32>
    %619 = arith.select %613, %618, %617 : vector<1x128xi1>, vector<1x128xf32>
    %620 = arith.fptosi %619 : vector<1x128xf32> to vector<1x128xi32>
    %621 = vector.broadcast %620 : vector<1x128xi32> to vector<32x128xi32>
    %622 = arith.cmpi eq, %6, %621 : vector<32x128xi32>
    %623 = arith.extui %622 : vector<32x128xi1> to vector<32x128xi32>
    %624 = arith.sitofp %623 : vector<32x128xi32> to vector<32x128xf32>
    %625 = vector.extract_strided_slice %568 {offsets = [0, 128], sizes = [96, 128], strides = [1, 1]} : vector<96x768xf32> to vector<96x128xf32>
    %626 = vector.extract_strided_slice %625 {offsets = [0, 0], sizes = [32, 128], strides = [1, 1]} : vector<96x128xf32> to vector<32x128xf32>
    %627 = arith.mulf %626, %624 : vector<32x128xf32>
    %cst_155 = arith.constant dense<0.000000e+00> : vector<128xf32>
    %628 = vector.multi_reduction <add>, %627, %cst_155 [0] : vector<32x128xf32> to vector<128xf32>
    %629 = vector.shape_cast %628 : vector<128xf32> to vector<1x128xf32>
    %630 = vector.extract_strided_slice %625 {offsets = [32, 0], sizes = [32, 128], strides = [1, 1]} : vector<96x128xf32> to vector<32x128xf32>
    %631 = arith.mulf %630, %624 : vector<32x128xf32>
    %cst_156 = arith.constant dense<0.000000e+00> : vector<128xf32>
    %632 = vector.multi_reduction <add>, %631, %cst_156 [0] : vector<32x128xf32> to vector<128xf32>
    %633 = vector.shape_cast %632 : vector<128xf32> to vector<1x128xf32>
    %634 = vector.extract_strided_slice %625 {offsets = [64, 0], sizes = [32, 128], strides = [1, 1]} : vector<96x128xf32> to vector<32x128xf32>
    %635 = arith.mulf %634, %624 : vector<32x128xf32>
    %cst_157 = arith.constant dense<0.000000e+00> : vector<128xf32>
    %636 = vector.multi_reduction <add>, %635, %cst_157 [0] : vector<32x128xf32> to vector<128xf32>
    %637 = vector.shape_cast %636 : vector<128xf32> to vector<1x128xf32>
    %638 = arith.subf %609, %629 : vector<1x128xf32>
    %639 = arith.subf %610, %633 : vector<1x128xf32>
    %640 = arith.subf %611, %637 : vector<1x128xf32>
    %641 = arith.mulf %638, %638 : vector<1x128xf32>
    %642 = arith.mulf %639, %639 : vector<1x128xf32>
    %643 = arith.addf %641, %642 : vector<1x128xf32>
    %644 = arith.mulf %640, %640 : vector<1x128xf32>
    %645 = arith.addf %643, %644 : vector<1x128xf32>
    %646 = math.sqrt %645 : vector<1x128xf32>
    %647 = arith.addf %608, %646 : vector<1x128xf32>
    %c8_158 = arith.constant 8 : index
    %c0_159 = arith.constant 0 : index
    %648 = vector.load %arg8[%c8_158, %c0_159] : memref<24x128xf32, #tpu.memory_space<vmem>>, vector<1x128xf32>
    %c9_160 = arith.constant 9 : index
    %c0_161 = arith.constant 0 : index
    %649 = vector.load %arg8[%c9_160, %c0_161] : memref<24x128xf32, #tpu.memory_space<vmem>>, vector<1x128xf32>
    %c10_162 = arith.constant 10 : index
    %c0_163 = arith.constant 0 : index
    %650 = vector.load %arg8[%c10_162, %c0_163] : memref<24x128xf32, #tpu.memory_space<vmem>>, vector<1x128xf32>
    %cst_164 = arith.constant 0.000000e+00 : f32
    %651 = vector.broadcast %cst_164 : f32 to vector<1x128xf32>
    %652 = arith.cmpf olt, %650, %651 : vector<1x128xf32>
    %cst_165 = arith.constant 3.200000e+01 : f32
    %653 = vector.broadcast %cst_165 : f32 to vector<1x128xf32>
    %654 = arith.cmpf oge, %650, %653 : vector<1x128xf32>
    %cst_166 = arith.constant 3.100000e+01 : f32
    %655 = vector.broadcast %cst_166 : f32 to vector<1x128xf32>
    %656 = arith.select %654, %655, %650 : vector<1x128xi1>, vector<1x128xf32>
    %cst_167 = arith.constant 0.000000e+00 : f32
    %657 = vector.broadcast %cst_167 : f32 to vector<1x128xf32>
    %658 = arith.select %652, %657, %656 : vector<1x128xi1>, vector<1x128xf32>
    %659 = arith.fptosi %658 : vector<1x128xf32> to vector<1x128xi32>
    %660 = vector.broadcast %659 : vector<1x128xi32> to vector<32x128xi32>
    %661 = arith.cmpi eq, %6, %660 : vector<32x128xi32>
    %662 = arith.extui %661 : vector<32x128xi1> to vector<32x128xi32>
    %663 = arith.sitofp %662 : vector<32x128xi32> to vector<32x128xf32>
    %664 = vector.extract_strided_slice %568 {offsets = [0, 256], sizes = [96, 128], strides = [1, 1]} : vector<96x768xf32> to vector<96x128xf32>
    %665 = vector.extract_strided_slice %664 {offsets = [0, 0], sizes = [32, 128], strides = [1, 1]} : vector<96x128xf32> to vector<32x128xf32>
    %666 = arith.mulf %665, %663 : vector<32x128xf32>
    %cst_168 = arith.constant dense<0.000000e+00> : vector<128xf32>
    %667 = vector.multi_reduction <add>, %666, %cst_168 [0] : vector<32x128xf32> to vector<128xf32>
    %668 = vector.shape_cast %667 : vector<128xf32> to vector<1x128xf32>
    %669 = vector.extract_strided_slice %664 {offsets = [32, 0], sizes = [32, 128], strides = [1, 1]} : vector<96x128xf32> to vector<32x128xf32>
    %670 = arith.mulf %669, %663 : vector<32x128xf32>
    %cst_169 = arith.constant dense<0.000000e+00> : vector<128xf32>
    %671 = vector.multi_reduction <add>, %670, %cst_169 [0] : vector<32x128xf32> to vector<128xf32>
    %672 = vector.shape_cast %671 : vector<128xf32> to vector<1x128xf32>
    %673 = vector.extract_strided_slice %664 {offsets = [64, 0], sizes = [32, 128], strides = [1, 1]} : vector<96x128xf32> to vector<32x128xf32>
    %674 = arith.mulf %673, %663 : vector<32x128xf32>
    %cst_170 = arith.constant dense<0.000000e+00> : vector<128xf32>
    %675 = vector.multi_reduction <add>, %674, %cst_170 [0] : vector<32x128xf32> to vector<128xf32>
    %676 = vector.shape_cast %675 : vector<128xf32> to vector<1x128xf32>
    %677 = arith.subf %648, %668 : vector<1x128xf32>
    %678 = arith.subf %649, %672 : vector<1x128xf32>
    %679 = arith.subf %650, %676 : vector<1x128xf32>
    %680 = arith.mulf %677, %677 : vector<1x128xf32>
    %681 = arith.mulf %678, %678 : vector<1x128xf32>
    %682 = arith.addf %680, %681 : vector<1x128xf32>
    %683 = arith.mulf %679, %679 : vector<1x128xf32>
    %684 = arith.addf %682, %683 : vector<1x128xf32>
    %685 = math.sqrt %684 : vector<1x128xf32>
    %686 = arith.addf %647, %685 : vector<1x128xf32>
    %c12_171 = arith.constant 12 : index
    %c0_172 = arith.constant 0 : index
    %687 = vector.load %arg8[%c12_171, %c0_172] : memref<24x128xf32, #tpu.memory_space<vmem>>, vector<1x128xf32>
    %c13_173 = arith.constant 13 : index
    %c0_174 = arith.constant 0 : index
    %688 = vector.load %arg8[%c13_173, %c0_174] : memref<24x128xf32, #tpu.memory_space<vmem>>, vector<1x128xf32>
    %c14_175 = arith.constant 14 : index
    %c0_176 = arith.constant 0 : index
    %689 = vector.load %arg8[%c14_175, %c0_176] : memref<24x128xf32, #tpu.memory_space<vmem>>, vector<1x128xf32>
    %cst_177 = arith.constant 0.000000e+00 : f32
    %690 = vector.broadcast %cst_177 : f32 to vector<1x128xf32>
    %691 = arith.cmpf olt, %689, %690 : vector<1x128xf32>
    %cst_178 = arith.constant 3.200000e+01 : f32
    %692 = vector.broadcast %cst_178 : f32 to vector<1x128xf32>
    %693 = arith.cmpf oge, %689, %692 : vector<1x128xf32>
    %cst_179 = arith.constant 3.100000e+01 : f32
    %694 = vector.broadcast %cst_179 : f32 to vector<1x128xf32>
    %695 = arith.select %693, %694, %689 : vector<1x128xi1>, vector<1x128xf32>
    %cst_180 = arith.constant 0.000000e+00 : f32
    %696 = vector.broadcast %cst_180 : f32 to vector<1x128xf32>
    %697 = arith.select %691, %696, %695 : vector<1x128xi1>, vector<1x128xf32>
    %698 = arith.fptosi %697 : vector<1x128xf32> to vector<1x128xi32>
    %699 = vector.broadcast %698 : vector<1x128xi32> to vector<32x128xi32>
    %700 = arith.cmpi eq, %6, %699 : vector<32x128xi32>
    %701 = arith.extui %700 : vector<32x128xi1> to vector<32x128xi32>
    %702 = arith.sitofp %701 : vector<32x128xi32> to vector<32x128xf32>
    %703 = vector.extract_strided_slice %568 {offsets = [0, 384], sizes = [96, 128], strides = [1, 1]} : vector<96x768xf32> to vector<96x128xf32>
    %704 = vector.extract_strided_slice %703 {offsets = [0, 0], sizes = [32, 128], strides = [1, 1]} : vector<96x128xf32> to vector<32x128xf32>
    %705 = arith.mulf %704, %702 : vector<32x128xf32>
    %cst_181 = arith.constant dense<0.000000e+00> : vector<128xf32>
    %706 = vector.multi_reduction <add>, %705, %cst_181 [0] : vector<32x128xf32> to vector<128xf32>
    %707 = vector.shape_cast %706 : vector<128xf32> to vector<1x128xf32>
    %708 = vector.extract_strided_slice %703 {offsets = [32, 0], sizes = [32, 128], strides = [1, 1]} : vector<96x128xf32> to vector<32x128xf32>
    %709 = arith.mulf %708, %702 : vector<32x128xf32>
    %cst_182 = arith.constant dense<0.000000e+00> : vector<128xf32>
    %710 = vector.multi_reduction <add>, %709, %cst_182 [0] : vector<32x128xf32> to vector<128xf32>
    %711 = vector.shape_cast %710 : vector<128xf32> to vector<1x128xf32>
    %712 = vector.extract_strided_slice %703 {offsets = [64, 0], sizes = [32, 128], strides = [1, 1]} : vector<96x128xf32> to vector<32x128xf32>
    %713 = arith.mulf %712, %702 : vector<32x128xf32>
    %cst_183 = arith.constant dense<0.000000e+00> : vector<128xf32>
    %714 = vector.multi_reduction <add>, %713, %cst_183 [0] : vector<32x128xf32> to vector<128xf32>
    %715 = vector.shape_cast %714 : vector<128xf32> to vector<1x128xf32>
    %716 = arith.subf %687, %707 : vector<1x128xf32>
    %717 = arith.subf %688, %711 : vector<1x128xf32>
    %718 = arith.subf %689, %715 : vector<1x128xf32>
    %719 = arith.mulf %716, %716 : vector<1x128xf32>
    %720 = arith.mulf %717, %717 : vector<1x128xf32>
    %721 = arith.addf %719, %720 : vector<1x128xf32>
    %722 = arith.mulf %718, %718 : vector<1x128xf32>
    %723 = arith.addf %721, %722 : vector<1x128xf32>
    %724 = math.sqrt %723 : vector<1x128xf32>
    %725 = arith.addf %686, %724 : vector<1x128xf32>
    %c16_184 = arith.constant 16 : index
    %c0_185 = arith.constant 0 : index
    %726 = vector.load %arg8[%c16_184, %c0_185] : memref<24x128xf32, #tpu.memory_space<vmem>>, vector<1x128xf32>
    %c17_186 = arith.constant 17 : index
    %c0_187 = arith.constant 0 : index
    %727 = vector.load %arg8[%c17_186, %c0_187] : memref<24x128xf32, #tpu.memory_space<vmem>>, vector<1x128xf32>
    %c18_188 = arith.constant 18 : index
    %c0_189 = arith.constant 0 : index
    %728 = vector.load %arg8[%c18_188, %c0_189] : memref<24x128xf32, #tpu.memory_space<vmem>>, vector<1x128xf32>
    %cst_190 = arith.constant 0.000000e+00 : f32
    %729 = vector.broadcast %cst_190 : f32 to vector<1x128xf32>
    %730 = arith.cmpf olt, %728, %729 : vector<1x128xf32>
    %cst_191 = arith.constant 3.200000e+01 : f32
    %731 = vector.broadcast %cst_191 : f32 to vector<1x128xf32>
    %732 = arith.cmpf oge, %728, %731 : vector<1x128xf32>
    %cst_192 = arith.constant 3.100000e+01 : f32
    %733 = vector.broadcast %cst_192 : f32 to vector<1x128xf32>
    %734 = arith.select %732, %733, %728 : vector<1x128xi1>, vector<1x128xf32>
    %cst_193 = arith.constant 0.000000e+00 : f32
    %735 = vector.broadcast %cst_193 : f32 to vector<1x128xf32>
    %736 = arith.select %730, %735, %734 : vector<1x128xi1>, vector<1x128xf32>
    %737 = arith.fptosi %736 : vector<1x128xf32> to vector<1x128xi32>
    %738 = vector.broadcast %737 : vector<1x128xi32> to vector<32x128xi32>
    %739 = arith.cmpi eq, %6, %738 : vector<32x128xi32>
    %740 = arith.extui %739 : vector<32x128xi1> to vector<32x128xi32>
    %741 = arith.sitofp %740 : vector<32x128xi32> to vector<32x128xf32>
    %742 = vector.extract_strided_slice %568 {offsets = [0, 512], sizes = [96, 128], strides = [1, 1]} : vector<96x768xf32> to vector<96x128xf32>
    %743 = vector.extract_strided_slice %742 {offsets = [0, 0], sizes = [32, 128], strides = [1, 1]} : vector<96x128xf32> to vector<32x128xf32>
    %744 = arith.mulf %743, %741 : vector<32x128xf32>
    %cst_194 = arith.constant dense<0.000000e+00> : vector<128xf32>
    %745 = vector.multi_reduction <add>, %744, %cst_194 [0] : vector<32x128xf32> to vector<128xf32>
    %746 = vector.shape_cast %745 : vector<128xf32> to vector<1x128xf32>
    %747 = vector.extract_strided_slice %742 {offsets = [32, 0], sizes = [32, 128], strides = [1, 1]} : vector<96x128xf32> to vector<32x128xf32>
    %748 = arith.mulf %747, %741 : vector<32x128xf32>
    %cst_195 = arith.constant dense<0.000000e+00> : vector<128xf32>
    %749 = vector.multi_reduction <add>, %748, %cst_195 [0] : vector<32x128xf32> to vector<128xf32>
    %750 = vector.shape_cast %749 : vector<128xf32> to vector<1x128xf32>
    %751 = vector.extract_strided_slice %742 {offsets = [64, 0], sizes = [32, 128], strides = [1, 1]} : vector<96x128xf32> to vector<32x128xf32>
    %752 = arith.mulf %751, %741 : vector<32x128xf32>
    %cst_196 = arith.constant dense<0.000000e+00> : vector<128xf32>
    %753 = vector.multi_reduction <add>, %752, %cst_196 [0] : vector<32x128xf32> to vector<128xf32>
    %754 = vector.shape_cast %753 : vector<128xf32> to vector<1x128xf32>
    %755 = arith.subf %726, %746 : vector<1x128xf32>
    %756 = arith.subf %727, %750 : vector<1x128xf32>
    %757 = arith.subf %728, %754 : vector<1x128xf32>
    %758 = arith.mulf %755, %755 : vector<1x128xf32>
    %759 = arith.mulf %756, %756 : vector<1x128xf32>
    %760 = arith.addf %758, %759 : vector<1x128xf32>
    %761 = arith.mulf %757, %757 : vector<1x128xf32>
    %762 = arith.addf %760, %761 : vector<1x128xf32>
    %763 = math.sqrt %762 : vector<1x128xf32>
    %764 = arith.addf %725, %763 : vector<1x128xf32>
    %c20_197 = arith.constant 20 : index
    %c0_198 = arith.constant 0 : index
    %765 = vector.load %arg8[%c20_197, %c0_198] : memref<24x128xf32, #tpu.memory_space<vmem>>, vector<1x128xf32>
    %c21_199 = arith.constant 21 : index
    %c0_200 = arith.constant 0 : index
    %766 = vector.load %arg8[%c21_199, %c0_200] : memref<24x128xf32, #tpu.memory_space<vmem>>, vector<1x128xf32>
    %c22_201 = arith.constant 22 : index
    %c0_202 = arith.constant 0 : index
    %767 = vector.load %arg8[%c22_201, %c0_202] : memref<24x128xf32, #tpu.memory_space<vmem>>, vector<1x128xf32>
    %cst_203 = arith.constant 0.000000e+00 : f32
    %768 = vector.broadcast %cst_203 : f32 to vector<1x128xf32>
    %769 = arith.cmpf olt, %767, %768 : vector<1x128xf32>
    %cst_204 = arith.constant 3.200000e+01 : f32
    %770 = vector.broadcast %cst_204 : f32 to vector<1x128xf32>
    %771 = arith.cmpf oge, %767, %770 : vector<1x128xf32>
    %cst_205 = arith.constant 3.100000e+01 : f32
    %772 = vector.broadcast %cst_205 : f32 to vector<1x128xf32>
    %773 = arith.select %771, %772, %767 : vector<1x128xi1>, vector<1x128xf32>
    %cst_206 = arith.constant 0.000000e+00 : f32
    %774 = vector.broadcast %cst_206 : f32 to vector<1x128xf32>
    %775 = arith.select %769, %774, %773 : vector<1x128xi1>, vector<1x128xf32>
    %776 = arith.fptosi %775 : vector<1x128xf32> to vector<1x128xi32>
    %777 = vector.broadcast %776 : vector<1x128xi32> to vector<32x128xi32>
    %778 = arith.cmpi eq, %6, %777 : vector<32x128xi32>
    %779 = arith.extui %778 : vector<32x128xi1> to vector<32x128xi32>
    %780 = arith.sitofp %779 : vector<32x128xi32> to vector<32x128xf32>
    %781 = vector.extract_strided_slice %568 {offsets = [0, 640], sizes = [96, 128], strides = [1, 1]} : vector<96x768xf32> to vector<96x128xf32>
    %782 = vector.extract_strided_slice %781 {offsets = [0, 0], sizes = [32, 128], strides = [1, 1]} : vector<96x128xf32> to vector<32x128xf32>
    %783 = arith.mulf %782, %780 : vector<32x128xf32>
    %cst_207 = arith.constant dense<0.000000e+00> : vector<128xf32>
    %784 = vector.multi_reduction <add>, %783, %cst_207 [0] : vector<32x128xf32> to vector<128xf32>
    %785 = vector.shape_cast %784 : vector<128xf32> to vector<1x128xf32>
    %786 = vector.extract_strided_slice %781 {offsets = [32, 0], sizes = [32, 128], strides = [1, 1]} : vector<96x128xf32> to vector<32x128xf32>
    %787 = arith.mulf %786, %780 : vector<32x128xf32>
    %cst_208 = arith.constant dense<0.000000e+00> : vector<128xf32>
    %788 = vector.multi_reduction <add>, %787, %cst_208 [0] : vector<32x128xf32> to vector<128xf32>
    %789 = vector.shape_cast %788 : vector<128xf32> to vector<1x128xf32>
    %790 = vector.extract_strided_slice %781 {offsets = [64, 0], sizes = [32, 128], strides = [1, 1]} : vector<96x128xf32> to vector<32x128xf32>
    %791 = arith.mulf %790, %780 : vector<32x128xf32>
    %cst_209 = arith.constant dense<0.000000e+00> : vector<128xf32>
    %792 = vector.multi_reduction <add>, %791, %cst_209 [0] : vector<32x128xf32> to vector<128xf32>
    %793 = vector.shape_cast %792 : vector<128xf32> to vector<1x128xf32>
    %794 = arith.subf %765, %785 : vector<1x128xf32>
    %795 = arith.subf %766, %789 : vector<1x128xf32>
    %796 = arith.subf %767, %793 : vector<1x128xf32>
    %797 = arith.mulf %794, %794 : vector<1x128xf32>
    %798 = arith.mulf %795, %795 : vector<1x128xf32>
    %799 = arith.addf %797, %798 : vector<1x128xf32>
    %800 = arith.mulf %796, %796 : vector<1x128xf32>
    %801 = arith.addf %799, %800 : vector<1x128xf32>
    %802 = math.sqrt %801 : vector<1x128xf32>
    %803 = arith.addf %764, %802 : vector<1x128xf32>
    %cst_210 = arith.constant 0.000000e+00 : f32
    %804 = vector.broadcast %cst_210 : f32 to vector<1x128xf32>
    %805 = arith.select %12, %803, %804 : vector<1x128xi1>, vector<1x128xf32>
    %806 = vector.shape_cast %805 : vector<1x128xf32> to vector<1x1x128xf32>
    %cst_211 = arith.constant dense<0.000000e+00> : vector<1xf32>
    %807 = vector.multi_reduction <add>, %806, %cst_211 [1, 2] : vector<1x1x128xf32> to vector<1xf32>
    %808 = vector.shape_cast %807 : vector<1xf32> to vector<1x1x1xf32>
    %809 = vector.extract %808[0, 0, 0] : f32 from vector<1x1x1xf32>
    %cst_212 = arith.constant 0.000000e+00 : f32
    %810 = vector.broadcast %cst_212 : f32 to vector<1x8x128xf32>
    %811 = vector.broadcast %809 : f32 to vector<1x8x128xf32>
    %812 = arith.addf %810, %811 : vector<1x8x128xf32>
    %c0_213 = arith.constant 0 : index
    %c0_214 = arith.constant 0 : index
    %c0_215 = arith.constant 0 : index
    %813 = vector.load %arg6[%c0_213, %c0_214, %c0_215] : memref<1x8x128xf32, #tpu.memory_space<vmem>>, vector<1x8x128xf32>
    tpu.vector_store %arg6[%c0_213, %c0_214, %c0_215], %812 {strides = array<i32>} : memref<1x8x128xf32, #tpu.memory_space<vmem>>, vector<1x8x128xf32>,
    return
  }
  func.func @transform_0(%arg0: i32, %arg1: i32) -> (i32, i32) {
    %c0_i32 = arith.constant 0 : i32
    %c0_i32_0 = arith.constant 0 : i32
    %c0_i32_1 = arith.constant 0 : i32
    return %c0_i32, %c0_i32_0 : i32, i32
  }
  func.func @transform_1(%arg0: i32, %arg1: i32) -> (i32, i32) {
    %c0_i32 = arith.constant 0 : i32
    %c0_i32_0 = arith.constant 0 : i32
    %c0_i32_1 = arith.constant 0 : i32
    return %c0_i32, %c0_i32_0 : i32, i32
  }
  func.func @transform_2(%arg0: i32, %arg1: i32) -> (i32, i32, i32) {
    %c0_i32 = arith.constant 0 : i32
    %c0_i32_0 = arith.constant 0 : i32
    return %arg0, %c0_i32, %arg1 : i32, i32, i32
  }
  func.func @transform_3(%arg0: i32, %arg1: i32) -> (i32, i32, i32) {
    %c0_i32 = arith.constant 0 : i32
    %c0_i32_0 = arith.constant 0 : i32
    %c0_i32_1 = arith.constant 0 : i32
    return %arg0, %c0_i32, %c0_i32_0 : i32, i32, i32
  }
  func.func @transform_4(%arg0: i32, %arg1: i32) -> (i32, i32, i32) {
    %c0_i32 = arith.constant 0 : i32
    %c0_i32_0 = arith.constant 0 : i32
    return %arg0, %arg1, %c0_i32 : i32, i32, i32
  }
}

</mosaic_0001>

<bundles_post_ra>
// kernel: symmetry_distance_loss.1
= control target key start
LH: loop header
LB: loop body
LE: loop exit
PB: predicated region body
PF: predicated region fallthrough
CT: control target
= control target key end

     0   :  { %9 = vsyncpa [#allocation5], 0  ;;  %s16949_s0 = inlined_call_operand.vmem [shape: f32[2,24], index: 0, kind: input, shape index: {}]   ;;  %s16950_s1 = inlined_call_operand.vmem [shape: f32[2,6], index: 1, kind: input, shape index: {}]   ;;  %s16951_s2 = inlined_call_operand.vmem [shape: f32[2,3,128], index: 2, kind: input, shape index: {}]   ;;  %s16952_s3 = inlined_call_operand.vmem [shape: f32[2,96,1024], index: 3, kind: input, shape index: {}]   ;;  %s16953_s4 = inlined_call_operand.vmem [shape: f32[2,8,128], index: 4, kind: output, shape index: {}]  }
   0x1   :  { %10 = vsyncpa [#allocation7], 0  ;;  %s9937_s15 = smov 0   ;;  %s9939_s16 = smov 0  }
   0x2   :  { %s9941_s17 = smov 0  }
   0x3 LB: > { %s7089_s18 = sadd.s32 4294967295, %s9906_s17   ;;  %s28_s19 = sadd.s32 1, %s9902_s16  ;;  %s9906_s17 = sphi %s9941_s17, %s16_s17   ;;  %s9902_s16 = sphi %s9939_s16, %s18238_s16   ;;  %s9898_s15 = sphi %s9937_s15, %s18237_s15  }
   0x4   : > { %p30_p0 = scmp.ge.s32.totalorder %s28_s19, 2  ;;  %p7091_p1 = scmp.ge.s32.totalorder %s9906_s17, 1 }
   0x5   : > { %p157_p2 = scmp.lt.s32.totalorder %s9906_s17, 3  ;;  %p9962_p4 = scmp.eq.s32.totalorder %s7089_s18, 0 }
   0x6   : > { %s18240_s19 = smov (%p30_p0, %s28_s19), 0  ;;  %s170_s24 = sshll.u32 %s16949_s0, 4  ;;  %s171_s24 = int_to_ptr.vmem [resolvable:$true] %s170_s24 }
   0x7   : > { %p9958_p3 = pnand %p7091_p1, %p157_p2  ;;  %s181_s27 = sshll.u32 %s16950_s1, 4  ;;  %s182_s27 = int_to_ptr.vmem [resolvable:$true] %s181_s27 }
   0x8   : > { %s17193_s21 = scalar_select %p9962_p4, 1, 0 }
   0x9   : > { %s17192_s20 = scalar_select %p9958_p3, 1, 0 }
   0xa   : > { %p9695_p5 = pneg %p9958_p3  ;;  %s9846_s29 = scalar_lea.vmem %s171_s24, 32 }
   0xb   : > { %p9847_p7 = scmp.ne.s32.totalorder %s171_s24, %s9846_s29  ;;  %p9854_p11 = scmp.lt.s32.totalorder %s171_s24, %s171_s24 }
   0xc   : > { %p9976_p6 = pnand %p9962_p4, %p9695_p5  ;;  %p9855_p12 = scmp.lt.s32.totalorder %s9846_s29, %s9846_s29 }
   0xe   : > { %p9848_p8 = pneg %p9976_p6  ;;  %p9856_p13 = por %p9855_p12, %p9854_p11 }
  0x10   : > { %p9849_p9 = pnand %p9848_p8, %p9847_p7 }
  0x12   : > { %p9850_p10 = pneg %p9849_p9 }
  0x14   : > { %p9857_p0 = pnand %p9856_p13, %p9850_p10 }
  0x16   : > { %9860 = shalt.err (!%p9857_p0)
}
  0x17   : > { %s9908_s30 = smov [#allocation4]   ;;  %s9861_s5 = scalar_lea.vmem %s182_s27, 32 }
  0x18   : > { %9698 = dma.vmem_to_smem (!%p9976_p6), %s171_s24, 32, %s9908_s30, [#allocation5]  }
  0x19   : > { %p9862_p1 = scmp.ne.s32.totalorder %s182_s27, %s9861_s5  ;;  %p9869_p4 = scmp.lt.s32.totalorder %s182_s27, %s182_s27 }
  0x1a   : > { %p9870_p3 = scmp.lt.s32.totalorder %s9861_s5, %s9861_s5 }
  0x1b   : > { %p9864_p2 = pnand %p9862_p1, %p9848_p8 }
  0x1c   : > { %p9871_p7 = por %p9870_p3, %p9869_p4 }
  0x1d   : > { %p9865_p5 = pneg %p9864_p2 }
  0x1f   : > { %p9872_p9 = pnand %p9871_p7, %p9865_p5 }
  0x21   : > { %9875 = shalt.err (!%p9872_p9)
}
  0x22   : > { %s9909_s6 = smov [#allocation6]   ;;  %p17195_p10 = scmp.ne.s32.totalorder %s17192_s20, 0 }
  0x23   : > { %9701 = dma.vmem_to_smem (!%p9976_p6), %s182_s27, 32, %s9909_s6, [#allocation7]  }
  0x24   : > { %212 = sbr.rel (%p17195_p10) target bundleno = 1027 (0x403), region = 36 }
  0x2b   : > { %p17196_p11 = scmp.ne.s32.totalorder %s17193_s21, 0 }
  0x2d   : > { %9889 = dma.done.wait (%p17196_p11), [#allocation5], 32  }
  0x2e   : > { %9891 = vsyncadd (%p17196_p11), [#allocation5], 4294967264 }
  0x2f   : > { %9893 = dma.done.wait (%p17196_p11), [#allocation7], 32  }
  0x30   : > { %9895 = vsyncadd (%p17196_p11), [#allocation7], 4294967264 }
  0x31   : > { %222 = sfence }
  0x32   : > { %p252_p3 = scmp.lt.s32.totalorder %s9898_s15, 1  ;;  %s9998_s7 = sshll.u32 %s9898_s15, 7  ;;  %v16957_v37 = vlaneseq }
  0x33   : > { %s409_s8 = sadd.s32 1, %s9998_s7  ;;  %s979_s9 = sadd.s32 4, %s9998_s7 }
  0x34   : > { %s18242_s15 = smov (!%p252_p3, %s9898_s15), 1  ;;  %s10007_s10 = sld [smem:[#allocation4 + %s979_s9]]  ;;  %v10083_v47 = vshrl.u32 %v16957_v37, 7 }
  0x35   : > { %s981_s11 = sadd.s32 5, %s9998_s7  ;;  %s7098_s12 = sshll.u32 %s18242_s15, 2 }
  0x36   : > { %s10013_s13 = sld [smem:[#allocation4 + %s981_s11]]  ;;  %s10018_s20 = scalar_lea.vmem %s16951_s2, %s7098_s12  ;;  %v10087_v56 = vsub.s32 0, %v10083_v47  ;;  %v10090_v60 = vadd.s32 8, %v10083_v47  ;;  %v10093_v61 = vadd.s32 512, %v10083_v47  ;;  %v10643_v37 = vadd.s32 704, %v10083_v47 }
  0x37   : > { %s983_s21 = sadd.s32 6, %s9998_s7  ;;  %s985_s23 = sadd.s32 7, %s9998_s7  ;;  %v10027_v0 = vld [vmem:[%s10018_s20] sm:$0x7] }
  0x38   : > { %s10021_s22 = sld [smem:[#allocation4 + %s983_s21]]  ;;  %s411_s28 = sadd.s32 2, %s9998_s7  ;;  %17199 = vst [vmem:[#allocation12_spill] sm:$0xff] %v10087_v56  ;;  %17200 = vst [vmem:[#allocation13_spill] sm:$0xff] %v10090_v60 }
  0x39   : > { %s10024_s24 = sld [smem:[#allocation4 + %s985_s23]]  ;;  %s413_s30 = sadd.s32 3, %s9998_s7  ;;  %17201 = vst [vmem:[#allocation14_spill] sm:$0xff] %v10093_v61  ;;  %17297 = vst [vmem:[#allocation62_spill] sm:$0xff] %v10643_v37 }
  0x3a   : > { %s10029_s25 = sld [smem:[#allocation6 + %s409_s8]]  ;;  %v988_v1 = vstv %s10007_s10  ;;  %s9648_s5 = smul.u32 768, %s18242_s15 }
  0x3b   : > { %s10032_s26 = sld [smem:[#allocation4 + %s9998_s7]]  ;;  %v989_v3 = vmul.f32 %v988_v1, %v10027_v0  ;;  %s2125_s14 = sadd.s32 13, %s9998_s7 }
  0x3c   : > { %s10035_s27 = sld [smem:[#allocation4 + %s409_s8]]  ;;  %v990_v2 = vstv %s10013_s13  ;;  %s10057_s12 = scalar_lea.vmem %s16952_s3, %s9648_s5 }
  0x3d   : > { %s10041_s29 = sld [smem:[#allocation4 + %s411_s28]]  ;;  %v991_v4 = vmul.f32 %v990_v2, %v10027_v0  ;;  %v3984_v12 = vld [vmem:[%s10057_s12 + $0x8] sm:$0xff]  ;;  %s2127_s18 = sadd.s32 14, %s9998_s7 }
  0x3e   : > { %v16958_v5 = vstv %s10021_s22  ;;  %s414_s6 = sld [smem:[#allocation4 + %s413_s30]]  ;;  %v3988_v13 = vld [vmem:[%s10057_s12 + $0x28] sm:$0xff]  ;;  %4911 = vmatprep.mubr.f32.mxu1 %v3984_v12  ;;  %v10117_v12 = vadd.s32 40, %v10083_v47  ;;  %s2129_s21 = sadd.s32 15, %s9998_s7 }
  0x3f   : > { %v993_v6 = vrot.slane %v991_v4, 1  ;;  %v997_v7 = vmul.f32 %v16958_v5, %v10027_v0  ;;  %s415_s13 = sld [smem:[#allocation6 + %s9998_s7]]  ;;  %v1002_v14 = vstv %s10024_s24  ;;  %5185 = vmatprep.mubr.f32.mxu0 %v3988_v13  ;;  %v10761_v5 = vadd.s32 240, %v10083_v47  ;;  %s2123_s23 = sadd.s32 12, %s9998_s7 }
  0x40   : > { %v1004_v20 = vstv %s10029_s25  ;;  %17208 = vst [vmem:[#allocation21_spill] sm:$0xff] %v10117_v12  ;;  %s11263_s24 = sld [smem:[#allocation4 + %s2125_s14]]  ;;  %s3367_s8 = sadd.s32 22, %s9998_s7 }
  0x41   : > { %v416_v8 = vstv %s10032_s26  ;;  %v995_v9 = vadd.f32 %v993_v6, %v989_v3  ;;  %v999_v10 = vrot.slane %v997_v7, 2  ;;  %v10099_v3 = vadd.s32 16, %v10083_v47  ;;  %17318 = vst [vmem:[#allocation72_spill] sm:$0xff] %v10761_v5  ;;  %s11286_s25 = sld [smem:[#allocation4 + %s2127_s18]]  ;;  %s3365_s26 = sadd.s32 21, %s9998_s7 }
  0x42   : > { %v418_v11 = vstv %s10035_s27  ;;  %v417_v15 = vmul.f32 %v416_v8, %v10027_v0  ;;  %v10105_v7 = vadd.s32 24, %v10083_v47  ;;  %s11314_s27 = sld [smem:[#allocation4 + %s2129_s21]]  ;;  %s3369_s10 = sadd.s32 23, %s9998_s7 }
  0x43   : > { %v419_v16 = vmul.f32 %v418_v11, %v10027_v0  ;;  %v16959_v17 = vstv %s10041_s29  ;;  %v1001_v18 = vadd.f32 %v999_v10, %v995_v9  ;;  %17203 = vst [vmem:[#allocation16_spill] sm:$0xff] %v10099_v3  ;;  %v10111_v10 = vadd.s32 536, %v10083_v47  ;;  %s11337_s5 = sld [smem:[#allocation4 + %s2123_s23]] }
  0x44   : > { %v425_v19 = vmul.f32 %v16959_v17, %v10027_v0  ;;  %v430_v26 = vstv %s414_s6  ;;  %17204 = vst [vmem:[#allocation17_spill] sm:$0xff] %v10105_v7  ;;  %v10764_v17 = vadd.s32 248, %v10083_v47  ;;  %s11358_s6 = sld [smem:[#allocation4 + %s3365_s26]] }
  0x45   : > { %v421_v21 = vrot.slane %v419_v16, 1  ;;  %v1003_v22 = vadd.f32 %v1002_v14, %v1001_v18  ;;  %v432_v29 = vstv %s415_s13  ;;  %17206 = vst [vmem:[#allocation19_spill] sm:$0xff] %v10111_v10  ;;  %v16962_v14 = vmov 1.0|1.0   ;;  %s3363_s13 = sadd.s32 20, %s9998_s7  ;;  %s11455_s14 = sld [smem:[#allocation4 + %s3367_s8]] }
  0x46   : > { %v427_v23 = vrot.slane %v425_v19, 2  ;;  %v10149_v19 = vadd.s32 544, %v10083_v47  ;;  %v10623_v18 = vadd.s32 200, %v10083_v47  ;;  %17319 = vst [vmem:[#allocation73_spill] sm:$0xff] %v10764_v17  ;;  %s11484_s18 = sld [smem:[#allocation4 + %s3369_s10]]  ;;  %s2747_s8 = sadd.s32 18, %s9998_s7 }
  0x47   : > { %v423_v24 = vadd.f32 %v421_v21, %v417_v15  ;;  %v1005_v25 = vmul.f32 %v1004_v20, %v1003_v22  ;;  %v10152_v20 = vadd.s32 552, %v10083_v47  ;;  %v10159_v22 = vadd.s32 48, %v10083_v47  ;;  %s11519_s21 = sld [smem:[#allocation4 + %s3363_s13]]  ;;  %s1557_s10 = sadd.s32 11, %s9998_s7 }
  0x48   : > { %17211 = vst [vmem:[#allocation22_spill] sm:$0xff] %v10149_v19  ;;  %v10508_v21 = vadd.s32 656, %v10083_v47  ;;  %17294 = vst [vmem:[#allocation61_spill] sm:$0xff] %v10623_v18  ;;  %s11805_s23 = sld [smem:[#allocation6 + %s413_s30]]  ;;  %s1551_s30 = sadd.s32 8, %s9998_s7 }
  0x49   : > { %v429_v27 = vadd.f32 %v427_v23, %v423_v24  ;;  %v10071_v28 = vmul.f32 2.0, %v1005_v25  ;;  %17212 = vst [vmem:[#allocation23_spill] sm:$0xff] %v10152_v20  ;;  %17215 = vst [vmem:[#allocation24_spill] sm:$0xff] %v10159_v22  ;;  %v10162_v23 = vadd.s32 56, %v10083_v47  ;;  %v10190_v25 = vadd.s32 560, %v10083_v47  ;;  %s11891_s26 = sld [smem:[#allocation6 + %s981_s11]] }
  0x4a   : > { %17273 = vst [vmem:[#allocation50_spill] sm:$0xff] %v10508_v21  ;;  %v10511_v24 = vadd.s32 664, %v10083_v47  ;;  %s11915_s11 = sld [smem:[#allocation4 + %s1551_s30]] }
  0x4b   : > { %17197 = vst [vmem:[#allocation10_spill] sm:$0xff] %v10071_v28  ;;  %v431_v30 = vadd.f32 %v430_v26, %v429_v27  ;;  %v1007_v31 = vmul.f32 %v10071_v28, %v988_v1  ;;  %v1009_v32 = vmul.f32 %v10071_v28, %v990_v2  ;;  %17216 = vst [vmem:[#allocation25_spill] sm:$0xff] %v10162_v23  ;;  %v10193_v26 = vadd.s32 568, %v10083_v47 }
  0x4c   : > { %17219 = vst [vmem:[#allocation26_spill] sm:$0xff] %v10190_v25  ;;  %17274 = vst [vmem:[#allocation51_spill] sm:$0xff] %v10511_v24  ;;  %v10738_v27 = vadd.s32 744, %v10083_v47  ;;  %v11014_v28 = vadd.s32 840, %v10083_v47 }
  0x4d   : > { %v433_v33 = vmul.f32 %v432_v29, %v431_v30  ;;  %v1008_v34 = vsub.f32 %v10027_v0, %v1007_v31  ;;  %v1011_v35 = vrot.slane %v1009_v32, 7  ;;  %17220 = vst [vmem:[#allocation27_spill] sm:$0xff] %v10193_v26  ;;  %v10219_v29 = vadd.s32 64, %v10083_v47 }
  0x4e   : > { %v10222_v30 = vadd.s32 72, %v10083_v47  ;;  %v10234_v32 = vadd.s32 576, %v10083_v47  ;;  %v10528_v31 = vadd.s32 160, %v10083_v47  ;;  %17315 = vst [vmem:[#allocation71_spill] sm:$0xff] %v10738_v27  ;;  %17362 = vst [vmem:[#allocation94_spill] sm:$0xff] %v11014_v28 }
  0x4f   : > { %v10076_v36 = vmul.f32 2.0, %v433_v33  ;;  %v1013_v38 = vsub.f32 %v10027_v0, %v1011_v35  ;;  %vm1022_vm0 = vcmp.lt.f32.partialorder %v1008_v34, 0.0  ;;  %vm1023_vm1 = vcmp.ge.f32.partialorder %v1008_v34, 32.0  ;;  %1019 = vst [vmem:[#allocation3 + $0x4] sm:$0x1] %v1008_v34  ;;  %17223 = vst [vmem:[#allocation28_spill] sm:$0xff] %v10219_v29 }
  0x50   : > { %v1024_v39 = vsel %vm1023_vm1, 31.0, %v1008_v34  ;;  %17224 = vst [vmem:[#allocation29_spill] sm:$0xff] %v10222_v30  ;;  %17227 = vst [vmem:[#allocation30_spill] sm:$0xff] %v10234_v32  ;;  %v10237_v33 = vadd.s32 584, %v10083_v47  ;;  %v10272_v35 = vadd.s32 80, %v10083_v47  ;;  %v10531_v34 = vadd.s32 168, %v10083_v47 }
  0x51   : > { %17198 = vst [vmem:[#allocation11_spill] sm:$0xff] %v10076_v36  ;;  %v435_v40 = vmul.f32 %v10076_v36, %v416_v8  ;;  %v437_v41 = vmul.f32 %v10076_v36, %v418_v11  ;;  %v1025_v42 = vsel %vm1022_vm0, 0.0, %v1024_v39  ;;  %vm1027_vm2 = vcmp.lt.f32.partialorder %v1013_v38, 0.0  ;;  %1020 = vst [vmem:[#allocation3 + $0x4] sm:$0x2] %v1013_v38 }
  0x52   : > { %vm1028_vm3 = vcmp.ge.f32.partialorder %v1013_v38, 32.0  ;;  %v9653_v43 = vtrunc.f32 %v1025_v42  ;;  %v10108_v8 = vadd.s32 528, %v10083_v47  ;;  %v10114_v11 = vadd.s32 32, %v10083_v47  ;;  %17228 = vst [vmem:[#allocation31_spill] sm:$0xff] %v10237_v33  ;;  %17231 = vst [vmem:[#allocation32_spill] sm:$0xff] %v10272_v35 }
  0x53   : > { %v1029_v44 = vsel %vm1028_vm3, 31.0, %v1013_v38  ;;  %v436_v45 = vsub.f32 %v10027_v0, %v435_v40  ;;  %v439_v46 = vrot.slane %v437_v41, 7  ;;  %v10275_v38 = vadd.s32 88, %v10083_v47  ;;  %17277 = vst [vmem:[#allocation52_spill] sm:$0xff] %v10528_v31  ;;  %17278 = vst [vmem:[#allocation53_spill] sm:$0xff] %v10531_v34 }
  0x54   : > { %v1030_v48 = vsel %vm1027_vm2, 0.0, %v1029_v44  ;;  %v9654_v49 = vcvt.f32.s32 %v9653_v43  ;;  %17205 = vst [vmem:[#allocation18_spill] sm:$0xff] %v10108_v8  ;;  %17207 = vst [vmem:[#allocation20_spill] sm:$0xff] %v10114_v11  ;;  %v10287_v40 = vadd.s32 592, %v10083_v47  ;;  %v10290_v41 = vadd.s32 600, %v10083_v47 }
  0x55   : > { %v9655_v50 = vtrunc.f32 %v1030_v48  ;;  %v441_v51 = vsub.f32 %v10027_v0, %v439_v46  ;;  %vm450_vm4 = vcmp.lt.f32.partialorder %v436_v45, 0.0  ;;  %447 = vst [vmem:[#allocation3] sm:$0x1] %v436_v45  ;;  %vm451_vm5 = vcmp.ge.f32.partialorder %v436_v45, 32.0  ;;  %17232 = vst [vmem:[#allocation33_spill] sm:$0xff] %v10275_v38 }
  0x56   : > { %v1032_v53 = vmul.u32 32, %v9654_v49  ;;  %v452_v54 = vsel %vm451_vm5, 31.0, %v436_v45  ;;  %v10096_v0 = vadd.s32 520, %v10083_v47  ;;  %17235 = vst [vmem:[#allocation34_spill] sm:$0xff] %v10287_v40  ;;  %17236 = vst [vmem:[#allocation35_spill] sm:$0xff] %v10290_v41  ;;  %v10329_v44 = vadd.s32 96, %v10083_v47 }
  0x57   : > { %v9656_v52 = vcvt.f32.s32 %v9655_v50  ;;  %vm455_vm6 = vcmp.lt.f32.partialorder %v441_v51, 0.0  ;;  %448 = vst [vmem:[#allocation3] sm:$0x2] %v441_v51  ;;  %v453_v55 = vsel %vm450_vm4, 0.0, %v452_v54  ;;  %vm456_vm7 = vcmp.ge.f32.partialorder %v441_v51, 32.0 }
  0x58   : > { %v9649_v58 = vtrunc.f32 %v453_v55  ;;  %v457_v59 = vsel %vm456_vm7, 31.0, %v441_v51  ;;  %17202 = vst [vmem:[#allocation15_spill] sm:$0xff] %v10096_v0  ;;  %17241 = vst [vmem:[#allocation36_spill] sm:$0xff] %v10329_v44  ;;  %v10332_v45 = vadd.s32 104, %v10083_v47  ;;  %v10346_v48 = vadd.s32 608, %v10083_v47 }
  0x59   : > { %v1033_v57 = vrot.slane %v9656_v52, 1  ;;  %v458_v62 = vsel %vm455_vm6, 0.0, %v457_v59  ;;  %v10349_v49 = vadd.s32 616, %v10083_v47  ;;  %v10388_v52 = vadd.s32 112, %v10083_v47 }
  0x5a   : > { %v9650_v1 = vcvt.f32.s32 %v9649_v58  ;;  %v9651_v2 = vtrunc.f32 %v458_v62  ;;  %17242 = vst [vmem:[#allocation37_spill] sm:$0xff] %v10332_v45  ;;  %17245 = vst [vmem:[#allocation38_spill] sm:$0xff] %v10346_v48  ;;  %v10405_v55 = vadd.s32 624, %v10083_v47  ;;  %v10447_v62 = vadd.s32 128, %v10083_v47 }
  0x5b   : > { %v1034_v63 = vadd.s32 %v1033_v57, %v1032_v53  ;;  %17246 = vst [vmem:[#allocation39_spill] sm:$0xff] %v10349_v49  ;;  %17251 = vst [vmem:[#allocation40_spill] sm:$0xff] %v10388_v52  ;;  %v10391_v53 = vadd.s32 120, %v10083_v47  ;;  %v10408_v57 = vadd.s32 632, %v10083_v47  ;;  %v10551_v42 = vadd.s32 672, %v10083_v47 }
  0x5c   : > { %v9652_v6 = vcvt.f32.s32 %v9651_v2  ;;  %v460_v9 = vmul.u32 32, %v9650_v1  ;;  %17255 = vst [vmem:[#allocation42_spill] sm:$0xff] %v10405_v55  ;;  %17261 = vst [vmem:[#allocation44_spill] sm:$0xff] %v10447_v62  ;;  %v10464_v2 = vadd.s32 640, %v10083_v47  ;;  %v10554_v43 = vadd.s32 680, %v10083_v47 }
  0x5d   : > { %v10102_v4 = vrot.slane %v1034_v63, %v10087_v56  ;;  %17252 = vst [vmem:[#allocation41_spill] sm:$0xff] %v10391_v53  ;;  %17256 = vst [vmem:[#allocation43_spill] sm:$0xff] %v10408_v57  ;;  %v10450_v63 = vadd.s32 136, %v10083_v47  ;;  %v10577_v50 = vadd.s32 176, %v10083_v47  ;;  %v10580_v51 = vadd.s32 184, %v10083_v47 }
  0x5e   : > { %v461_v13 = vrot.slane %v9652_v6, 1  ;;  %17265 = vst [vmem:[#allocation46_spill] sm:$0xff] %v10464_v2  ;;  %v10467_v6 = vadd.s32 648, %v10083_v47  ;;  %17281 = vst [vmem:[#allocation54_spill] sm:$0xff] %v10551_v42  ;;  %v10600_v58 = vadd.s32 688, %v10083_v47  ;;  %v10603_v59 = vadd.s32 696, %v10083_v47 }
  0x5f   : > { %vm1039_vm8 = vcmp.eq.s32.totalorder %v10083_v47, %v10102_v4  ;;  %vm1040_vm9 = vcmp.eq.s32.totalorder %v10090_v60, %v10102_v4  ;;  %vm1103_vm10 = vcmp.eq.s32.totalorder %v10093_v61, %v10102_v4  ;;  %vm1104_vm11 = vcmp.eq.s32.totalorder %v10096_v0, %v10102_v4  ;;  %17262 = vst [vmem:[#allocation45_spill] sm:$0xff] %v10450_v63 }
  0x60   : > { %vm8664_vm12 = vmpackc.low %vm1040_vm9, %vm1039_vm8  ;;  %vm1041_vm14 = vcmp.eq.s32.totalorder %v10099_v3, %v10102_v4  ;;  %vm1042_vm15 = vcmp.eq.s32.totalorder %v10105_v7, %v10102_v4  ;;  %v462_v15 = vadd.s32 %v461_v13, %v460_v9  ;;  %vm1105_vm0 = vcmp.eq.s32.totalorder %v10108_v8, %v10102_v4  ;;  %17266 = vst [vmem:[#allocation47_spill] sm:$0xff] %v10467_v6 }
  0x61   : > { %8665 = vmatprep.subr.msk.bf16.mxu1 %vm8664_vm12, %v16962_v14  ;;  %vm8792_vm13 = vmpackc.low %vm1104_vm11, %vm1103_vm10  ;;  %vm1106_vm1 = vcmp.eq.s32.totalorder %v10111_v10, %v10102_v4  ;;  %vm1043_vm2 = vcmp.eq.s32.totalorder %v10114_v11, %v10102_v4  ;;  %vm1044_vm3 = vcmp.eq.s32.totalorder %v10117_v12, %v10102_v4  ;;  %v10485_v13 = vadd.s32 144, %v10083_v47  ;;  %17282 = vst [vmem:[#allocation55_spill] sm:$0xff] %v10554_v43 }
  0x62   : > { %8793 = vmatprep.subr.msk.bf16.mxu0 %vm8792_vm13, %v16962_v14  ;;  %v10142_v16 = vrot.slane %v462_v15, %v10087_v56  ;;  %vm10144_vm4 = vmpackc.low %vm1042_vm15, %vm1041_vm14  ;;  %v10488_v15 = vadd.s32 152, %v10083_v47  ;;  %17285 = vst [vmem:[#allocation56_spill] sm:$0xff] %v10577_v50  ;;  %v10620_v9 = vadd.s32 192, %v10083_v47  ;;  %v10646_v39 = vadd.s32 712, %v10083_v47 }
  0x63   : > { %vm10154_vm5 = vmpackc.low %vm1106_vm1, %vm1105_vm0  ;;  %vm1107_vm1 = vcmp.eq.s32.totalorder %v10149_v19, %v10102_v4  ;;  %17269 = vst [vmem:[#allocation48_spill] sm:$0xff] %v10485_v13  ;;  %v10669_v46 = vadd.s32 208, %v10083_v47  ;;  %v10672_v54 = vadd.s32 216, %v10083_v47  ;;  %v10695_v1 = vadd.s32 728, %v10083_v47 }
  0x64   : > { %vm467_vm6 = vcmp.eq.s32.totalorder %v10083_v47, %v10142_v16  ;;  %vm468_vm7 = vcmp.eq.s32.totalorder %v10090_v60, %v10142_v16  ;;  %vm531_vm8 = vcmp.eq.s32.totalorder %v10093_v61, %v10142_v16  ;;  %vm532_vm9 = vcmp.eq.s32.totalorder %v10096_v0, %v10142_v16  ;;  %vm10172_vm10 = vmpackc.low %vm1044_vm3, %vm1043_vm2  ;;  %17270 = vst [vmem:[#allocation49_spill] sm:$0xff] %v10488_v15  ;;  %v11575_v60 = vld [vmem:[%s10018_s20] sm:$0x7] }
  0x65   : > { %vm8666_vm11 = vmpackc.low %vm468_vm7, %vm467_vm6  ;;  %vm469_vm12 = vcmp.eq.s32.totalorder %v10099_v3, %v10142_v16  ;;  %vm470_vm13 = vcmp.eq.s32.totalorder %v10105_v7, %v10142_v16  ;;  %vm533_vm14 = vcmp.eq.s32.totalorder %v10108_v8, %v10142_v16  ;;  %vm534_vm15 = vcmp.eq.s32.totalorder %v10111_v10, %v10142_v16  ;;  %17286 = vst [vmem:[#allocation57_spill] sm:$0xff] %v10580_v51 }
  0x66   : > { %8667 = vmatpush1.bf16.msk.msra.mxu1 %vm8666_vm11, %v16962_v14  ;;  %vm8794_vm0 = vmpackc.low %vm532_vm9, %vm531_vm8  ;;  %vm1108_vm2 = vcmp.eq.s32.totalorder %v10152_v20, %v10102_v4  ;;  %vm1045_vm6 = vcmp.eq.s32.totalorder %v10159_v22, %v10102_v4  ;;  %vm1046_vm7 = vcmp.eq.s32.totalorder %v10162_v23, %v10102_v4  ;;  %vm471_vm9 = vcmp.eq.s32.totalorder %v10114_v11, %v10142_v16  ;;  %v4003_v11 = vld [vmem:[%s10057_s12 + $0xa0] sm:$0xff] }
  0x67   : > { %8795 = vmatpush1.bf16.msk.msra.mxu0 %vm8794_vm0, %v16962_v14  ;;  %8669 = vmatprep.subr.msk.bf16.mxu1 %vm10144_vm4, %v16962_v14  ;;  %vm8670_vm3 = vmpackc.low %vm470_vm13, %vm469_vm12  ;;  %vm472_vm11 = vcmp.eq.s32.totalorder %v10117_v12, %v10142_v16  ;;  %vm535_vm4 = vcmp.eq.s32.totalorder %v10149_v19, %v10142_v16  ;;  %vm536_vm12 = vcmp.eq.s32.totalorder %v10152_v20, %v10142_v16  ;;  %v10896_v10 = vadd.s32 288, %v10083_v47 }
  0x68   : > { %8797 = vmatprep.subr.msk.bf16.mxu0 %vm10154_vm5, %v16962_v14  ;;  %vm8798_vm8 = vmpackc.low %vm534_vm15, %vm533_vm14  ;;  %vm1109_vm13 = vcmp.eq.s32.totalorder %v10190_v25, %v10102_v4  ;;  %vm1110_vm14 = vcmp.eq.s32.totalorder %v10193_v26, %v10102_v4  ;;  %17289 = vst [vmem:[#allocation58_spill] sm:$0xff] %v10600_v58  ;;  %v10899_v8 = vadd.s32 296, %v10083_v47  ;;  %v10919_v36 = vadd.s32 800, %v10083_v47 }
  0x69   : > { %vm10210_vm0 = vmpackc.low %vm1108_vm2, %vm1107_vm1  ;;  %vm473_vm1 = vcmp.eq.s32.totalorder %v10159_v22, %v10142_v16  ;;  %vm474_vm2 = vcmp.eq.s32.totalorder %v10162_v23, %v10142_v16  ;;  %17290 = vst [vmem:[#allocation59_spill] sm:$0xff] %v10603_v59  ;;  %v10945_v20 = vadd.s32 304, %v10083_v47  ;;  %v10971_v19 = vadd.s32 824, %v10083_v47  ;;  %v4004_v23 = vld [vmem:[%s10057_s12 + $0xa8] sm:$0xff] }
  0x6a   : > { %8671 = vmatpush1.bf16.msk.msra.mxu1 %vm8670_vm3, %v16962_v14  ;;  %vm10225_vm5 = vmpackc.low %vm1046_vm7, %vm1045_vm6  ;;  %vm537_vm3 = vcmp.eq.s32.totalorder %v10190_v25, %v10142_v16  ;;  %vm538_vm6 = vcmp.eq.s32.totalorder %v10193_v26, %v10142_v16  ;;  %17293 = vst [vmem:[#allocation60_spill] sm:$0xff] %v10620_v9  ;;  %v10827_v25 = vadd.s32 768, %v10083_v47  ;;  %v10922_v26 = vadd.s32 808, %v10083_v47 }
  0x6b   : > { %8799 = vmatpush1.bf16.msk.msra.mxu0 %vm8798_vm8, %v16962_v14  ;;  %8673 = vmatprep.subr.msk.bf16.mxu1 %vm10172_vm10, %v16962_v14  ;;  %vm8674_vm15 = vmpackc.low %vm472_vm11, %vm471_vm9  ;;  %vm1047_vm8 = vcmp.eq.s32.totalorder %v10219_v29, %v10102_v4  ;;  %vm1048_vm9 = vcmp.eq.s32.totalorder %v10222_v30, %v10102_v4  ;;  %17298 = vst [vmem:[#allocation63_spill] sm:$0xff] %v10646_v39  ;;  %v11037_v0 = vadd.s32 336, %v10083_v47  ;;  %v11063_v61 = vadd.s32 856, %v10083_v47 }
  0x6c   : > { %8801 = vmatprep.subr.msk.bf16.mxu0 %vm10210_vm0, %v16962_v14  ;;  %vm8802_vm10 = vmpackc.low %vm536_vm12, %vm535_vm4  ;;  %vm1111_vm0 = vcmp.eq.s32.totalorder %v10234_v32, %v10102_v4  ;;  %vm1112_vm4 = vcmp.eq.s32.totalorder %v10237_v33, %v10102_v4  ;;  %17301 = vst [vmem:[#allocation64_spill] sm:$0xff] %v10669_v46  ;;  %v11506_v22 = vadd.s32 960, %v10083_v47  ;;  %v11515_v12 = vstv %s11286_s25  ;;  %s1555_s25 = sadd.s32 10, %s9998_s7 }
  0x6d   : > { %vm10263_vm7 = vmpackc.low %vm1110_vm14, %vm1109_vm13  ;;  %vm475_vm13 = vcmp.eq.s32.totalorder %v10219_v29, %v10142_v16  ;;  %vm476_vm14 = vcmp.eq.s32.totalorder %v10222_v30, %v10142_v16  ;;  %17302 = vst [vmem:[#allocation65_spill] sm:$0xff] %v10672_v54  ;;  %v11479_v30 = vadd.s32 448, %v10083_v47  ;;  %v11482_v29 = vadd.s32 456, %v10083_v47 }
  0x6e   : > { %8675 = vmatpush1.bf16.msk.msra.mxu1 %vm8674_vm15, %v16962_v14  ;;  %vm10278_vm11 = vmpackc.low %vm474_vm2, %vm473_vm1  ;;  %vm539_vm15 = vcmp.eq.s32.totalorder %v10234_v32, %v10142_v16  ;;  %vm540_vm1 = vcmp.eq.s32.totalorder %v10237_v33, %v10142_v16  ;;  %17306 = vst [vmem:[#allocation67_spill] sm:$0xff] %v10695_v1  ;;  %v10804_v33 = vadd.s32 256, %v10083_v47  ;;  %v10807_v32 = vadd.s32 264, %v10083_v47 }
  0x6f   : > { %8803 = vmatpush1.bf16.msk.msra.mxu0 %vm8802_vm10, %v16962_v14  ;;  %8677 = vmatprep.subr.msk.bf16.mxu1 %vm10225_vm5, %v16962_v14  ;;  %vm10299_vm12 = vmpackc.low %vm538_vm6, %vm537_vm3  ;;  %vm1049_vm10 = vcmp.eq.s32.totalorder %v10272_v35, %v10102_v4  ;;  %vm1050_vm3 = vcmp.eq.s32.totalorder %v10275_v38, %v10102_v4  ;;  %17330 = vst [vmem:[#allocation78_spill] sm:$0xff] %v10827_v25  ;;  %v11552_v7 = vstv %s11314_s27 }
  0x70   : > { %8805 = vmatprep.subr.msk.bf16.mxu0 %vm10263_vm7, %v16962_v14  ;;  %vm8680_vm5 = vmpackc.low %vm1048_vm9, %vm1047_vm8  ;;  %vm1113_vm7 = vcmp.eq.s32.totalorder %v10287_v40, %v10102_v4  ;;  %vm1114_vm8 = vcmp.eq.s32.totalorder %v10290_v41, %v10102_v4  ;;  %17326 = vst [vmem:[#allocation76_spill] sm:$0xff] %v10804_v33 }
  0x71   : > { %vm10320_vm2 = vmpackc.low %vm1112_vm4, %vm1111_vm0  ;;  %vm478_vm0 = vcmp.eq.s32.totalorder %v10275_v38, %v10142_v16  ;;  %17327 = vst [vmem:[#allocation77_spill] sm:$0xff] %v10807_v32  ;;  %v3992_v38 = vld [vmem:[%s10057_s12 + $0x48] sm:$0xff] }
  0x72   : > { %8679 = vmatpush1.bf16.msk.msra.mxu1 %vm10278_vm11, %v16962_v14  ;;  %vm10337_vm6 = vmpackc.low %vm476_vm14, %vm475_vm13  ;;  %vm477_vm11 = vcmp.eq.s32.totalorder %v10272_v35, %v10142_v16  ;;  %vm542_vm13 = vcmp.eq.s32.totalorder %v10290_v41, %v10142_v16  ;;  %v10853_v41 = vadd.s32 272, %v10083_v47  ;;  %17342 = vst [vmem:[#allocation84_spill] sm:$0xff] %v10896_v10  ;;  %v11476_v35 = vadd.s32 952, %v10083_v47 }
  0x73   : > { %8807 = vmatpush1.bf16.msk.msra.mxu0 %vm10299_vm12, %v16962_v14  ;;  %8681 = vmatprep.subr.msk.bf16.mxu1 %vm8680_vm5, %v16962_v14  ;;  %vm10358_vm9 = vmpackc.low %vm540_vm1, %vm539_vm15  ;;  %vm541_vm12 = vcmp.eq.s32.totalorder %v10287_v40, %v10142_v16  ;;  %vm1051_vm5 = vcmp.eq.s32.totalorder %v10329_v44, %v10102_v4  ;;  %vm1052_vm15 = vcmp.eq.s32.totalorder %v10332_v45, %v10102_v4  ;;  %v10879_v40 = vadd.s32 792, %v10083_v47 }
  0x74   : > { %8809 = vmatprep.subr.msk.bf16.mxu0 %vm10320_vm2, %v16962_v14  ;;  %vm8684_vm4 = vmpackc.low %vm1050_vm3, %vm1049_vm10  ;;  %vm1115_vm2 = vcmp.eq.s32.totalorder %v10346_v48, %v10102_v4  ;;  %vm1116_vm10 = vcmp.eq.s32.totalorder %v10349_v49, %v10102_v4  ;;  %17334 = vst [vmem:[#allocation80_spill] sm:$0xff] %v10853_v41 }
  0x75   : > { %vm10379_vm14 = vmpackc.low %vm1114_vm8, %vm1113_vm7  ;;  %vm480_vm7 = vcmp.eq.s32.totalorder %v10332_v45, %v10142_v16  ;;  %17339 = vst [vmem:[#allocation83_spill] sm:$0xff] %v10879_v40  ;;  %v11453_v45 = vadd.s32 440, %v10083_v47 }
  0x76   : > { %8683 = vmatpush1.bf16.msk.msra.mxu1 %vm10337_vm6, %v16962_v14  ;;  %vm10396_vm1 = vmpackc.low %vm478_vm0, %vm477_vm11  ;;  %vm479_vm6 = vcmp.eq.s32.totalorder %v10329_v44, %v10142_v16  ;;  %vm544_vm11 = vcmp.eq.s32.totalorder %v10349_v49, %v10142_v16  ;;  %v10830_v49 = vadd.s32 776, %v10083_v47  ;;  %17343 = vst [vmem:[#allocation85_spill] sm:$0xff] %v10899_v8  ;;  %v11572_v44 = vadd.s32 984, %v10083_v47 }
  0x77   : > { %8811 = vmatpush1.bf16.msk.msra.mxu0 %vm10358_vm9, %v16962_v14  ;;  %8685 = vmatprep.subr.msk.bf16.mxu1 %vm8684_vm4, %v16962_v14  ;;  %vm10417_vm3 = vmpackc.low %vm542_vm13, %vm541_vm12  ;;  %vm543_vm9 = vcmp.eq.s32.totalorder %v10346_v48, %v10142_v16  ;;  %vm1053_vm4 = vcmp.eq.s32.totalorder %v10388_v52, %v10102_v4  ;;  %vm1054_vm12 = vcmp.eq.s32.totalorder %v10391_v53, %v10102_v4  ;;  %v10735_v48 = vadd.s32 736, %v10083_v47 }
  0x78   : > { %8813 = vmatprep.subr.msk.bf16.mxu0 %vm10379_vm14, %v16962_v14  ;;  %vm8688_vm8 = vmpackc.low %vm1052_vm15, %vm1051_vm5  ;;  %vm1117_vm14 = vcmp.eq.s32.totalorder %v10405_v55, %v10102_v4  ;;  %vm1118_vm5 = vcmp.eq.s32.totalorder %v10408_v57, %v10102_v4  ;;  %17331 = vst [vmem:[#allocation79_spill] sm:$0xff] %v10830_v49 }
  0x79   : > { %vm10438_vm0 = vmpackc.low %vm1116_vm10, %vm1115_vm2  ;;  %vm482_vm2 = vcmp.eq.s32.totalorder %v10391_v53, %v10142_v16  ;;  %17314 = vst [vmem:[#allocation70_spill] sm:$0xff] %v10735_v48  ;;  %v11444_v53 = vadd.s32 928, %v10083_v47 }
  0x7a   : > { %8687 = vmatpush1.bf16.msk.msra.mxu1 %vm10396_vm1, %v16962_v14  ;;  %vm10455_vm13 = vmpackc.low %vm480_vm7, %vm479_vm6  ;;  %vm481_vm1 = vcmp.eq.s32.totalorder %v10388_v52, %v10142_v16  ;;  %vm546_vm6 = vcmp.eq.s32.totalorder %v10408_v57, %v10142_v16  ;;  %v10715_v57 = vadd.s32 232, %v10083_v47  ;;  %17346 = vst [vmem:[#allocation86_spill] sm:$0xff] %v10919_v36  ;;  %v11450_v52 = vadd.s32 432, %v10083_v47 }
  0x7b   : > { %8815 = vmatpush1.bf16.msk.msra.mxu0 %vm10417_vm3, %v16962_v14  ;;  %8689 = vmatprep.subr.msk.bf16.mxu1 %vm8688_vm8, %v16962_v14  ;;  %vm10476_vm15 = vmpackc.low %vm544_vm11, %vm543_vm9  ;;  %vm545_vm3 = vcmp.eq.s32.totalorder %v10405_v55, %v10142_v16  ;;  %vm1055_vm8 = vcmp.eq.s32.totalorder %v10447_v62, %v10102_v4  ;;  %vm1056_vm9 = vcmp.eq.s32.totalorder %v10450_v63, %v10102_v4  ;;  %v17311_v55 = vmov 1.0|1.0  }
  0x7c   : > { %8817 = vmatprep.subr.msk.bf16.mxu0 %vm10438_vm0, %v16962_v14  ;;  %vm10499_vm10 = vmpackc.low %vm1054_vm12, %vm1053_vm4  ;;  %vm1119_vm0 = vcmp.eq.s32.totalorder %v10464_v2, %v10102_v4  ;;  %vm1120_vm4 = vcmp.eq.s32.totalorder %v10467_v6, %v10102_v4  ;;  %17310 = vst [vmem:[#allocation69_spill] sm:$0xff] %v10715_v57 }
  0x7d   : > { %vm10519_vm7 = vmpackc.low %vm1118_vm5, %vm1117_vm14  ;;  %vm484_vm14 = vcmp.eq.s32.totalorder %v10450_v63, %v10142_v16  ;;  %17347 = vst [vmem:[#allocation87_spill] sm:$0xff] %v10922_v26  ;;  %v11312_v63 = vadd.s32 384, %v10083_v47 }
  0x7e   : > { %8691 = vmatpush1.bf16.msk.msra.mxu1 %vm10455_vm13, %v16962_v14  ;;  %vm10542_vm11 = vmpackc.low %vm482_vm2, %vm481_vm1  ;;  %vm483_vm13 = vcmp.eq.s32.totalorder %v10447_v62, %v10142_v16  ;;  %vm548_vm1 = vcmp.eq.s32.totalorder %v10467_v6, %v10142_v16  ;;  %v10692_v6 = vadd.s32 720, %v10083_v47  ;;  %17350 = vst [vmem:[#allocation88_spill] sm:$0xff] %v10945_v20  ;;  %v11103_v62 = vadd.s32 864, %v10083_v47 }
  0x7f   : > { %8819 = vmatpush1.bf16.msk.msra.mxu0 %vm10476_vm15, %v16962_v14  ;;  %8693 = vmatprep.subr.msk.bf16.mxu1 %vm10499_vm10, %v16962_v14  ;;  %vm10568_vm12 = vmpackc.low %vm546_vm6, %vm545_vm3  ;;  %vm547_vm15 = vcmp.eq.s32.totalorder %v10464_v2, %v10142_v16  ;;  %vm1057_vm10 = vcmp.eq.s32.totalorder %v10485_v13, %v10102_v4  ;;  %vm1058_vm3 = vcmp.eq.s32.totalorder %v10488_v15, %v10102_v4  ;;  %v10712_v2 = vadd.s32 224, %v10083_v47 }
  0x80   : > { %8821 = vmatprep.subr.msk.bf16.mxu0 %vm10519_vm7, %v16962_v14  ;;  %vm10591_vm5 = vmpackc.low %vm1056_vm9, %vm1055_vm8  ;;  %vm1121_vm7 = vcmp.eq.s32.totalorder %v10508_v21, %v10102_v4  ;;  %vm1122_vm8 = vcmp.eq.s32.totalorder %v10511_v24, %v10102_v4  ;;  %17305 = vst [vmem:[#allocation66_spill] sm:$0xff] %v10692_v6 }
  0x81   : > { %vm10611_vm2 = vmpackc.low %vm1120_vm4, %vm1119_vm0  ;;  %vm486_vm0 = vcmp.eq.s32.totalorder %v10488_v15, %v10142_v16  ;;  %17309 = vst [vmem:[#allocation68_spill] sm:$0xff] %v10712_v2  ;;  %v11080_v15 = vadd.s32 352, %v10083_v47 }
  0x82   : > { %8695 = vmatpush1.bf16.msk.msra.mxu1 %vm10542_vm11, %v16962_v14  ;;  %vm10634_vm6 = vmpackc.low %vm484_vm14, %vm483_vm13  ;;  %vm485_vm11 = vcmp.eq.s32.totalorder %v10485_v13, %v10142_v16  ;;  %vm550_vm13 = vcmp.eq.s32.totalorder %v10511_v24, %v10142_v16  ;;  %v10856_v24 = vadd.s32 280, %v10083_v47  ;;  %17355 = vst [vmem:[#allocation91_spill] sm:$0xff] %v10971_v19  ;;  %v11083_v13 = vadd.s32 360, %v10083_v47 }
  0x83   : > { %8823 = vmatpush1.bf16.msk.msra.mxu0 %vm10568_vm12, %v16962_v14  ;;  %8697 = vmatprep.subr.msk.bf16.mxu1 %vm10591_vm5, %v16962_v14  ;;  %vm10660_vm9 = vmpackc.low %vm548_vm1, %vm547_vm15  ;;  %vm549_vm12 = vcmp.eq.s32.totalorder %v10508_v21, %v10142_v16  ;;  %vm1059_vm5 = vcmp.eq.s32.totalorder %v10528_v31, %v10102_v4  ;;  %vm1060_vm15 = vcmp.eq.s32.totalorder %v10531_v34, %v10102_v4  ;;  %v10784_v21 = vadd.s32 752, %v10083_v47 }
  0x84   : > { %8825 = vmatprep.subr.msk.bf16.mxu0 %vm10611_vm2, %v16962_v14  ;;  %vm10683_vm4 = vmpackc.low %vm1058_vm3, %vm1057_vm10  ;;  %vm1123_vm2 = vcmp.eq.s32.totalorder %v10551_v42, %v10102_v4  ;;  %vm1124_vm10 = vcmp.eq.s32.totalorder %v10554_v43, %v10102_v4  ;;  %v10787_v14 = vadd.s32 760, %v10083_v47  ;;  %17335 = vst [vmem:[#allocation81_spill] sm:$0xff] %v10856_v24 }
  0x85   : > { %vm10703_vm14 = vmpackc.low %vm1122_vm8, %vm1121_vm7  ;;  %vm488_vm7 = vcmp.eq.s32.totalorder %v10531_v34, %v10142_v16  ;;  %17322 = vst [vmem:[#allocation74_spill] sm:$0xff] %v10784_v21  ;;  %v11106_v34 = vadd.s32 872, %v10083_v47 }
  0x86   : > { %8699 = vmatpush1.bf16.msk.msra.mxu1 %vm10634_vm6, %v17311_v55  ;;  %vm10726_vm1 = vmpackc.low %vm486_vm0, %vm485_vm11  ;;  %vm487_vm6 = vcmp.eq.s32.totalorder %v10528_v31, %v10142_v16  ;;  %vm552_vm11 = vcmp.eq.s32.totalorder %v10554_v43, %v10142_v16  ;;  %17323 = vst [vmem:[#allocation75_spill] sm:$0xff] %v10787_v14  ;;  %v10948_v43 = vadd.s32 312, %v10083_v47  ;;  %v11011_v31 = vadd.s32 832, %v10083_v47 }
  0x87   : > { %8827 = vmatpush1.bf16.msk.msra.mxu0 %vm10660_vm9, %v17311_v55  ;;  %8701 = vmatprep.subr.msk.bf16.mxu1 %vm10683_vm4, %v17311_v55  ;;  %vm10752_vm3 = vmpackc.low %vm550_vm13, %vm549_vm12  ;;  %vm551_vm9 = vcmp.eq.s32.totalorder %v10551_v42, %v10142_v16  ;;  %vm1061_vm4 = vcmp.eq.s32.totalorder %v10577_v50, %v10102_v4  ;;  %vm1062_vm12 = vcmp.eq.s32.totalorder %v10580_v51, %v10102_v4  ;;  %v10876_v42 = vadd.s32 784, %v10083_v47 }
  0x88   : > { %8829 = vmatprep.subr.msk.bf16.mxu0 %vm10703_vm14, %v17311_v55  ;;  %vm10775_vm8 = vmpackc.low %vm1060_vm15, %vm1059_vm5  ;;  %vm1125_vm14 = vcmp.eq.s32.totalorder %v10600_v58, %v10102_v4  ;;  %vm1126_vm5 = vcmp.eq.s32.totalorder %v10603_v59, %v10102_v4  ;;  %17351 = vst [vmem:[#allocation89_spill] sm:$0xff] %v10948_v43 }
  0x89   : > { %vm10795_vm0 = vmpackc.low %vm1124_vm10, %vm1123_vm2  ;;  %vm490_vm2 = vcmp.eq.s32.totalorder %v10580_v51, %v10142_v16  ;;  %17338 = vst [vmem:[#allocation82_spill] sm:$0xff] %v10876_v42  ;;  %v10988_v51 = vadd.s32 320, %v10083_v47 }
  0x8a   : > { %8703 = vmatpush1.bf16.msk.msra.mxu1 %vm10726_vm1, %v17311_v55  ;;  %vm10818_vm13 = vmpackc.low %vm488_vm7, %vm487_vm6  ;;  %vm489_vm1 = vcmp.eq.s32.totalorder %v10577_v50, %v10142_v16  ;;  %vm554_vm6 = vcmp.eq.s32.totalorder %v10603_v59, %v10142_v16  ;;  %v10991_v50 = vadd.s32 328, %v10083_v47  ;;  %17361 = vst [vmem:[#allocation93_spill] sm:$0xff] %v11011_v31  ;;  %v11040_v59 = vadd.s32 344, %v10083_v47 }
  0x8b   : > { %8831 = vmatpush1.bf16.msk.msra.mxu0 %vm10752_vm3, %v17311_v55  ;;  %8705 = vmatprep.subr.msk.bf16.mxu1 %vm10775_vm8, %v17311_v55  ;;  %vm10844_vm15 = vmpackc.low %vm552_vm11, %vm551_vm9  ;;  %vm553_vm3 = vcmp.eq.s32.totalorder %v10600_v58, %v10142_v16  ;;  %vm1063_vm8 = vcmp.eq.s32.totalorder %v10620_v9, %v10102_v4  ;;  %vm1064_vm9 = vcmp.eq.s32.totalorder %v10623_v18, %v10102_v4  ;;  %v10968_v58 = vadd.s32 816, %v10083_v47 }
  0x8c   : > { %8833 = vmatprep.subr.msk.bf16.mxu0 %vm10795_vm0, %v17311_v55  ;;  %vm10867_vm10 = vmpackc.low %vm1062_vm12, %vm1061_vm4  ;;  %vm1127_vm0 = vcmp.eq.s32.totalorder %v10643_v37, %v10102_v4  ;;  %vm1128_vm4 = vcmp.eq.s32.totalorder %v10646_v39, %v10102_v4  ;;  %17358 = vst [vmem:[#allocation92_spill] sm:$0xff] %v10991_v50 }
  0x8d   : > { %vm10887_vm7 = vmpackc.low %vm1126_vm5, %vm1125_vm14  ;;  %vm492_vm14 = vcmp.eq.s32.totalorder %v10623_v18, %v10142_v16  ;;  %17354 = vst [vmem:[#allocation90_spill] sm:$0xff] %v10968_v58  ;;  %v11129_v18 = vadd.s32 368, %v10083_v47 }
  0x8e   : > { %8707 = vmatpush1.bf16.msk.msra.mxu1 %vm10818_vm13, %v17311_v55  ;;  %vm10910_vm11 = vmpackc.low %vm490_vm2, %vm489_vm1  ;;  %vm491_vm13 = vcmp.eq.s32.totalorder %v10620_v9, %v10142_v16  ;;  %vm556_vm1 = vcmp.eq.s32.totalorder %v10646_v39, %v10142_v16  ;;  %17368 = vst [vmem:[#allocation96_spill] sm:$0xff] %v11063_v61  ;;  %v11132_v39 = vadd.s32 376, %v10083_v47  ;;  %v11154_v9 = vadd.s32 880, %v10083_v47 }
  0x8f   : > { %8835 = vmatpush1.bf16.msk.msra.mxu0 %vm10844_vm15, %v17311_v55  ;;  %8709 = vmatprep.subr.msk.bf16.mxu1 %vm10867_vm10, %v17311_v55  ;;  %vm10936_vm12 = vmpackc.low %vm554_vm6, %vm553_vm3  ;;  %vm555_vm15 = vcmp.eq.s32.totalorder %v10643_v37, %v10142_v16  ;;  %vm1065_vm10 = vcmp.eq.s32.totalorder %v10669_v46, %v10102_v4  ;;  %vm1066_vm3 = vcmp.eq.s32.totalorder %v10672_v54, %v10102_v4  ;;  %v11060_v37 = vadd.s32 848, %v10083_v47 }
  0x90   : > { %8837 = vmatprep.subr.msk.bf16.mxu0 %vm10887_vm7, %v17311_v55  ;;  %vm10959_vm5 = vmpackc.low %vm1064_vm9, %vm1063_vm8  ;;  %vm1129_vm7 = vcmp.eq.s32.totalorder %v10692_v6, %v10102_v4  ;;  %vm1130_vm8 = vcmp.eq.s32.totalorder %v10695_v1, %v10102_v4  ;;  %17373 = vst [vmem:[#allocation97_spill] sm:$0xff] %v11103_v62 }
  0x91   : > { %vm10979_vm2 = vmpackc.low %vm1128_vm4, %vm1127_vm0  ;;  %vm494_vm0 = vcmp.eq.s32.totalorder %v10672_v54, %v10142_v16  ;;  %17367 = vst [vmem:[#allocation95_spill] sm:$0xff] %v11060_v37  ;;  %v11219_v54 = vadd.s32 888, %v10083_v47 }
  0x92   : > { %8711 = vmatpush1.bf16.msk.msra.mxu1 %vm10910_vm11, %v17311_v55  ;;  %vm11002_vm6 = vmpackc.low %vm492_vm14, %vm491_vm13  ;;  %vm493_vm11 = vcmp.eq.s32.totalorder %v10669_v46, %v10142_v16  ;;  %vm558_vm13 = vcmp.eq.s32.totalorder %v10695_v1, %v10142_v16  ;;  %17374 = vst [vmem:[#allocation98_spill] sm:$0xff] %v11106_v34  ;;  %v11414_v46 = vadd.s32 912, %v10083_v47  ;;  %v11417_v1 = vadd.s32 920, %v10083_v47 }
  0x93   : > { %8839 = vmatpush1.bf16.msk.msra.mxu0 %vm10936_vm12, %v17311_v55  ;;  %8713 = vmatprep.subr.msk.bf16.mxu1 %vm10959_vm5, %v17311_v55  ;;  %vm11028_vm9 = vmpackc.low %vm556_vm1, %vm555_vm15  ;;  %vm557_vm12 = vcmp.eq.s32.totalorder %v10692_v6, %v10142_v16  ;;  %vm1067_vm5 = vcmp.eq.s32.totalorder %v10712_v2, %v10102_v4  ;;  %vm1068_vm15 = vcmp.eq.s32.totalorder %v10715_v57, %v10102_v4  ;;  %v11447_v6 = vadd.s32 936, %v10083_v47 }
  0x94   : > { %8841 = vmatprep.subr.msk.bf16.mxu0 %vm10979_vm2, %v17311_v55  ;;  %vm11051_vm4 = vmpackc.low %vm1066_vm3, %vm1065_vm10  ;;  %vm1131_vm2 = vcmp.eq.s32.totalorder %v10735_v48, %v10102_v4  ;;  %vm1132_vm10 = vcmp.eq.s32.totalorder %v10738_v27, %v10102_v4  ;;  %17379 = vst [vmem:[#allocation99_spill] sm:$0xff] %v11154_v9 }
  0x95   : > { %vm11071_vm14 = vmpackc.low %vm1130_vm8, %vm1129_vm7  ;;  %vm496_vm7 = vcmp.eq.s32.totalorder %v10715_v57, %v10142_v16  ;;  %17386 = vst [vmem:[#allocation100_spill] sm:$0xff] %v11219_v54  ;;  %v3995_v57 = vld [vmem:[%s10057_s12 + $0x60] sm:$0xff] }
  0x96   : > { %8715 = vmatpush1.bf16.msk.msra.mxu1 %vm11002_vm6, %v17311_v55  ;;  %vm11094_vm1 = vmpackc.low %vm494_vm0, %vm493_vm11  ;;  %vm495_vm6 = vcmp.eq.s32.totalorder %v10712_v2, %v10142_v16  ;;  %vm560_vm11 = vcmp.eq.s32.totalorder %v10738_v27, %v10142_v16  ;;  %vm1069_vm0 = vcmp.eq.s32.totalorder %v10761_v5, %v10102_v4  ;;  %v11380_v27 = vadd.s32 896, %v10083_v47  ;;  %17411 = vst [vmem:[#allocation103_spill] sm:$0xff] %v11414_v46 }
  0x97   : > { %8843 = vmatpush1.bf16.msk.msra.mxu0 %vm11028_vm9, %v17311_v55  ;;  %8717 = vmatprep.subr.msk.bf16.mxu1 %vm11051_vm4, %v17311_v55  ;;  %vm11120_vm3 = vmpackc.low %vm558_vm13, %vm557_vm12  ;;  %vm559_vm9 = vcmp.eq.s32.totalorder %v10735_v48, %v10142_v16  ;;  %vm1070_vm12 = vcmp.eq.s32.totalorder %v10764_v17, %v10102_v4  ;;  %vm1133_vm13 = vcmp.eq.s32.totalorder %v10784_v21, %v10102_v4  ;;  %v3996_v48 = vld [vmem:[%s10057_s12 + $0x68] sm:$0xff]  ;;  %v11543_v2 = vadd.s32 464, %v10083_v47 }
  0x98   : > { %8845 = vmatprep.subr.msk.bf16.mxu0 %vm11071_vm14, %v17311_v55  ;;  %vm11143_vm8 = vmpackc.low %vm1068_vm15, %vm1067_vm5  ;;  %vm1134_vm14 = vcmp.eq.s32.totalorder %v10787_v14, %v10102_v4  ;;  %vm562_vm5 = vcmp.eq.s32.totalorder %v10787_v14, %v10142_v16  ;;  %v11356_v14 = vadd.s32 392, %v10083_v47  ;;  %17405 = vst [vmem:[#allocation101_spill] sm:$0xff] %v11380_v27 }
  0x99   : > { %vm11162_vm4 = vmpackc.low %vm1132_vm10, %vm1131_vm2  ;;  %vm498_vm2 = vcmp.eq.s32.totalorder %v10764_v17, %v10142_v16  ;;  %vm561_vm10 = vcmp.eq.s32.totalorder %v10784_v21, %v10142_v16  ;;  %v3983_v21 = vld [vmem:[%s10057_s12] sm:$0xff]  ;;  %v11383_v17 = vadd.s32 904, %v10083_v47  ;;  %17412 = vst [vmem:[#allocation104_spill] sm:$0xff] %v11417_v1 }
  0x9a   : > { %8719 = vmatpush1.bf16.msk.msra.mxu1 %vm11094_vm1, %v17311_v55  ;;  %vm11183_vm15 = vmpackc.low %vm496_vm7, %vm495_vm6  ;;  %vm1071_vm1 = vcmp.eq.s32.totalorder %v10804_v33, %v10102_v4  ;;  %vm1072_vm7 = vcmp.eq.s32.totalorder %v10807_v32, %v10102_v4  ;;  %17417 = vst [vmem:[#allocation106_spill] sm:$0xff] %v11444_v53 }
  0x9b   : > { %8847 = vmatpush1.bf16.msk.msra.mxu0 %vm11120_vm3, %v17311_v55  ;;  %8721 = vmatprep.subr.msk.bf16.mxu1 %vm11143_vm8, %v17311_v55  ;;  %vm11208_vm6 = vmpackc.low %vm560_vm11, %vm559_vm9  ;;  %vm499_vm11 = vcmp.eq.s32.totalorder %v10804_v33, %v10142_v16  ;;  %vm501_vm8 = vcmp.eq.s32.totalorder %v10853_v41, %v10142_v16  ;;  %vm565_vm3 = vcmp.eq.s32.totalorder %v10876_v42, %v10142_v16  ;;  %v11386_v33 = vadd.s32 400, %v10083_v47 }
  0x9c   : > { %8849 = vmatprep.subr.msk.bf16.mxu0 %vm11162_vm4, %v17311_v55  ;;  %vm11231_vm9 = vmpackc.low %vm1070_vm12, %vm1069_vm0  ;;  %vm1073_vm12 = vcmp.eq.s32.totalorder %v10853_v41, %v10102_v4  ;;  %vm502_vm4 = vcmp.eq.s32.totalorder %v10856_v24, %v10142_v16  ;;  %17406 = vst [vmem:[#allocation102_spill] sm:$0xff] %v11383_v17  ;;  %v11509_v41 = vadd.s32 968, %v10083_v47 }
  0x9d   : > { %vm11250_vm0 = vmpackc.low %vm1134_vm14, %vm1133_vm13  ;;  %vm17391_vm13 = vcmp.eq.s32.totalorder %v10761_v5, %v10142_v16  ;;  %v3987_v5 = vld [vmem:[%s10057_s12 + $0x20] sm:$0xff]  ;;  %17418 = vst [vmem:[#allocation107_spill] sm:$0xff] %v11447_v6 }
  0x9e   : > { %8723 = vmatpush1.bf16.msk.msra.mxu1 %vm11183_vm15, %v17311_v55  ;;  %vm11274_vm14 = vmpackc.low %vm498_vm2, %vm17391_vm13  ;;  %vm1075_vm13 = vcmp.eq.s32.totalorder %v10896_v10, %v10102_v4  ;;  %vm505_vm15 = vcmp.eq.s32.totalorder %v10945_v20, %v10142_v16  ;;  %17419 = vst [vmem:[#allocation108_spill] sm:$0xff] %v11450_v52 }
  0x9f   : > { %8851 = vmatpush1.bf16.msk.msra.mxu0 %vm11208_vm6, %v17311_v55  ;;  %8725 = vmatprep.subr.msk.bf16.mxu1 %vm11231_vm9, %v17311_v55  ;;  %vm11301_vm2 = vmpackc.low %vm562_vm5, %vm561_vm10  ;;  %vm1140_vm10 = vcmp.eq.s32.totalorder %v10922_v26, %v10102_v4  ;;  %vm568_vm9 = vcmp.eq.s32.totalorder %v10922_v26, %v10142_v16  ;;  %17420 = vst [vmem:[#allocation109_spill] sm:$0xff] %v11453_v45  ;;  %v11672_v45 = vstv %s11455_s14  ;;  %s12062_s14 = sld [smem:[#allocation4 + %s2747_s8]] }
  0xa0   : > { %8853 = vmatprep.subr.msk.bf16.mxu0 %vm11250_vm0, %v17311_v55  ;;  %vm11325_vm5 = vmpackc.low %vm1072_vm7, %vm1071_vm1  ;;  %vm17398_vm1 = vcmp.eq.s32.totalorder %v10827_v25, %v10102_v4  ;;  %vm17399_vm7 = vcmp.eq.s32.totalorder %v10830_v49, %v10102_v4  ;;  %vm1141_vm0 = vcmp.eq.s32.totalorder %v10968_v58, %v10102_v4  ;;  %17426 = vst [vmem:[#allocation111_spill] sm:$0xff] %v11476_v35 }
  0xa1   : > { %vm11345_vm6 = vmpackc.low %vm17399_vm7, %vm17398_vm1  ;;  %vm17402_vm1 = vcmp.eq.s32.totalorder %v10807_v32, %v10142_v16  ;;  %v11389_v32 = vadd.s32 408, %v10083_v47  ;;  %17427 = vst [vmem:[#allocation112_spill] sm:$0xff] %v11479_v30 }
  0xa2   : > { %8727 = vmatpush1.bf16.msk.msra.mxu1 %vm11274_vm14, %v17311_v55  ;;  %vm11371_vm7 = vmpackc.low %vm17402_vm1, %vm499_vm11  ;;  %vm17407_vm11 = vcmp.eq.s32.totalorder %v10827_v25, %v10142_v16  ;;  %vm17408_vm14 = vcmp.eq.s32.totalorder %v10830_v49, %v10142_v16  ;;  %v11420_v25 = vadd.s32 416, %v10083_v47  ;;  %v11423_v49 = vadd.s32 424, %v10083_v47  ;;  %17428 = vst [vmem:[#allocation113_spill] sm:$0xff] %v11482_v29 }
  0xa3   : > { %8855 = vmatpush1.bf16.msk.msra.mxu0 %vm11301_vm2, %v17311_v55  ;;  %8729 = vmatprep.subr.msk.bf16.mxu1 %vm11325_vm5, %v17311_v55  ;;  %vm11405_vm1 = vmpackc.low %vm17408_vm14, %vm17407_vm11  ;;  %vm17414_vm5 = vcmp.eq.s32.totalorder %v10856_v24, %v10102_v4  ;;  %vm1079_vm2 = vcmp.eq.s32.totalorder %v10988_v51, %v10102_v4  ;;  %vm1144_vm14 = vcmp.eq.s32.totalorder %v11014_v28, %v10102_v4  ;;  %v11512_v24 = vstv %s11263_s24  ;;  %s1553_s24 = sadd.s32 9, %s9998_s7 }
  0xa4   : > { %17413 = vst [vmem:[#allocation105_spill] sm:$0xff] %v11423_v49  ;;  %8857 = vmatprep.subr.msk.bf16.mxu0 %vm11345_vm6, %v17311_v55  ;;  %vm11435_vm11 = vmpackc.low %vm17414_vm5, %vm1073_vm12  ;;  %vm17421_vm12 = vcmp.eq.s32.totalorder %v10876_v42, %v10102_v4  ;;  %vm17422_vm6 = vcmp.eq.s32.totalorder %v10879_v40, %v10102_v4  ;;  %v11546_v42 = vadd.s32 472, %v10083_v47  ;;  %v11579_v56 = vmul.f32 %v11575_v60, %v11512_v24  ;;  %s11940_s27 = sld [smem:[#allocation4 + %s1553_s24]] }
  0xa5   : > { %4912 = vmatmul.mubr.f32.vlgmr.msra.gmra.mrb[0].mxu1 %v3983_v21  ;;  %vm11463_vm5 = vmpackc.low %vm17422_vm6, %vm17421_vm12  ;;  %v11473_v21 = vadd.s32 944, %v10083_v47  ;;  %vm1143_vm6 = vcmp.eq.s32.totalorder %v11011_v31, %v10102_v4  ;;  %17431 = vst [vmem:[#allocation114_spill] sm:$0xff] %v11506_v22  ;;  %v11609_v29 = vstv %s11358_s6  ;;  %s2745_s6 = sadd.s32 17, %s9998_s7 }
  0xa6   : > { %8731 = vmatpush1.bf16.msk.msra.mxu1 %vm11371_vm7, %v17311_v55  ;;  %5186 = vmatmul.mubr.f32.vlgmr.msra.gmra.mrb[0].mxu0 %v3987_v5  ;;  %vm11495_vm12 = vmpackc.low %vm502_vm4, %vm501_vm8  ;;  %v3991_v5 = vld [vmem:[%s10057_s12 + $0x40] sm:$0xff]  ;;  %17432 = vst [vmem:[#allocation115_spill] sm:$0xff] %v11509_v41  ;;  %vm17435_vm8 = vcmp.eq.s32.totalorder %v10879_v40, %v10142_v16  ;;  %vm507_vm7 = vcmp.eq.s32.totalorder %v10988_v51, %v10142_v16  ;;  %v11549_v40 = vadd.s32 976, %v10083_v47  ;;  %s12058_s13 = sld [smem:[#allocation4 + %s2745_s6]] }
  0xa7   : > { %17425 = vst [vmem:[#allocation110_spill] sm:$0xff] %v11473_v21  ;;  %17433 = vst [vmem:[#allocation116_spill] sm:$0xff] %v11512_v24  ;;  %8859 = vmatpush1.bf16.msk.msra.mxu0 %vm11405_vm1, %v17311_v55  ;;  %8733 = vmatprep.subr.msk.bf16.mxu1 %vm11435_vm11, %v17311_v55  ;;  %v2141_v41 = vmul.f32 %v11575_v60, %v11552_v7 }
  0xa8   : > { %17434 = vst [vmem:[#allocation117_spill] sm:$0xff] %v11515_v12  ;;  %vm11533_vm4 = vmpackc.low %vm17435_vm8, %vm565_vm3  ;;  %8861 = vmatprep.subr.msk.bf16.mxu0 %vm11463_vm5, %v17311_v55  ;;  %vm17442_vm3 = vcmp.eq.s32.totalorder %v10899_v8, %v10102_v4  ;;  %4917 = vmatprep.mubr.f32.mxu1 %v3992_v38  ;;  %vm1146_vm8 = vcmp.eq.s32.totalorder %v11063_v61, %v10102_v4 }
  0xa9   : > { %17438 = vst [vmem:[#allocation118_spill] sm:$0xff] %v11543_v2  ;;  %17439 = vst [vmem:[#allocation119_spill] sm:$0xff] %v11546_v42  ;;  %v11584_v42 = vstv %s11337_s5  ;;  %5191 = vmatprep.mubr.f32.mxu0 %v3996_v48  ;;  %4918 = vmatmul.mubr.f32.gmra.mrb[2].mxu1 %v3991_v5  ;;  %v11602_v2 = vadd.s32 480, %v10083_v47  ;;  %v3999_v5 = vld [vmem:[%s10057_s12 + $0x80] sm:$0xff]  ;;  %v2143_v3 = vrot.slane %v2141_v41, 2  ;;  %v2152_v35 = vrot.slane %v2141_v41, 1 }
  0xaa   : > { %17440 = vst [vmem:[#allocation120_spill] sm:$0xff] %v11549_v40  ;;  %17441 = vst [vmem:[#allocation121_spill] sm:$0xff] %v11552_v7  ;;  %v2135_v40 = vmul.f32 %v11575_v60, %v11515_v12  ;;  %v2148_v22 = vmul.f32 %v11575_v60, %v11584_v42  ;;  %8735 = vmatpush1.bf16.msk.msra.mxu1 %vm11495_vm12, %v17311_v55  ;;  %5192 = vmatmul.mubr.f32.gmra.mrb[2].mxu0 %v3995_v57  ;;  %v2155_v21 = vrot.slane %v2141_v41, 7  ;;  %v4007_v48 = vld [vmem:[%s10057_s12 + $0xc0] sm:$0xff]  ;;  %s11944_s5 = sld [smem:[#allocation4 + %s1555_s25]] }
  0xab   : > { %vm11563_vm11 = vmpackc.low %vm17442_vm3, %vm1075_vm13  ;;  %17445 = vst [vmem:[#allocation122_spill] sm:$0xff] %v11572_v44  ;;  %vm17447_vm13 = vcmp.eq.s32.totalorder %v10919_v36, %v10102_v4  ;;  %v4000_v44 = vld [vmem:[%s10057_s12 + $0x88] sm:$0xff]  ;;  %vm1145_vm3 = vcmp.eq.s32.totalorder %v11060_v37, %v10102_v4  ;;  %8863 = vmatpush1.bf16.msk.msra.mxu0 %vm11533_vm4, %v17311_v55  ;;  %vm17456_vm12 = vcmp.eq.s32.totalorder %v10919_v36, %v10142_v16  ;;  %s12253_s25 = sld [smem:[#allocation6 + %s411_s28]] }
  0xac   : > { %17446 = vst [vmem:[#allocation123_spill] sm:$0xff] %v11584_v42  ;;  %vm11592_vm5 = vmpackc.low %vm1140_vm10, %vm17447_vm13  ;;  %vm17452_vm10 = vcmp.eq.s32.totalorder %v10896_v10, %v10142_v16  ;;  %vm17453_vm13 = vcmp.eq.s32.totalorder %v10899_v8, %v10142_v16  ;;  %v2149_v30 = vrot.slane %v2135_v40, 2  ;;  %v2159_v10 = vrot.slane %v11579_v56, 1  ;;  %8737 = vmatprep.subr.msk.bf16.mxu1 %vm11563_vm11, %v17311_v55  ;;  %4923 = vmatprep.mubr.f32.mxu1 %v4000_v44  ;;  %s12635_s28 = sld [smem:[#allocation6 + %s979_s9]] }
  0xad   : > { %17450 = vst [vmem:[#allocation124_spill] sm:$0xff] %v11602_v2  ;;  %17451 = vst [vmem:[#allocation125_spill] sm:$0xff] %v11609_v29  ;;  %v2137_v2 = vrot.slane %v2135_v40, 1  ;;  %v2162_v8 = vrot.slane %v11579_v56, 7  ;;  %v2165_v36 = vrot.slane %v2135_v40, 6  ;;  %8865 = vmatprep.subr.msk.bf16.mxu0 %vm11592_vm5, %v17311_v55  ;;  %vm17460_vm11 = vcmp.eq.s32.totalorder %v10948_v43, %v10102_v4  ;;  %5197 = vmatprep.mubr.f32.mxu0 %v4004_v23 }
  0xae   : > { %vm11620_vm1 = vmpackc.low %vm17453_vm13, %vm17452_vm10  ;;  %vm573_vm4 = vcmp.eq.s32.totalorder %v11060_v37, %v10142_v16  ;;  %v2151_v40 = vadd.f32 %v2149_v30, %v2148_v22  ;;  %17463 = vst [vmem:[#allocation126_spill] sm:$0xff] %v11672_v45  ;;  %vm17464_vm5 = vcmp.eq.s32.totalorder %v10971_v19, %v10102_v4  ;;  %4924 = vmatmul.mubr.f32.gmra.mrb[4].mxu1 %v3999_v5  ;;  %v11698_v44 = vstv %s11484_s18  ;;  %s12100_s18 = sld [smem:[#allocation4 + %s1557_s10]] }
  0xaf   : > { %vm11644_vm10 = vmpackc.low %vm568_vm9, %vm17456_vm12  ;;  %vm17459_vm9 = vcmp.eq.s32.totalorder %v10945_v20, %v10102_v4  ;;  %v2139_v41 = vadd.f32 %v2137_v2, %v11579_v56  ;;  %v2164_v38 = vadd.f32 %v2162_v8, %v2148_v22  ;;  %v4008_v56 = vld [vmem:[%s10057_s12 + $0xc8] sm:$0xff]  ;;  %v2157_v8 = vadd.f32 %v2155_v21, %v2148_v22  ;;  %17467 = vst [vmem:[#allocation127_spill] sm:$0xff] %v11698_v44  ;;  %v4019_v22 = vld [vmem:[%s10057_s12 + $0x120] sm:$0xff] }
  0xb0   : > { %vm11662_vm12 = vmpackc.low %vm17460_vm11, %vm17459_vm9  ;;  %v11691_v30 = vmul.f32 %v11575_v60, %v11609_v29  ;;  %v11695_v2 = vmul.f32 %v11575_v60, %v11672_v45  ;;  %8739 = vmatpush1.bf16.msk.msra.mxu1 %vm11620_vm1, %v17311_v55  ;;  %5198 = vmatmul.mubr.f32.gmra.mrb[4].mxu0 %v4003_v11  ;;  %vm1147_vm13 = vcmp.eq.s32.totalorder %v11103_v62, %v10102_v4  ;;  %v4012_v21 = vld [vmem:[%s10057_s12 + $0xe8] sm:$0xff] }
  0xb1   : > { %vm11680_vm9 = vmpackc.low %vm17464_vm5, %vm1141_vm0  ;;  %vm17468_vm0 = vcmp.eq.s32.totalorder %v10948_v43, %v10142_v16  ;;  %v2145_v23 = vadd.f32 %v2143_v3, %v2139_v41  ;;  %v11719_v5 = vsub.f32 %v2151_v40, %v2152_v35  ;;  %v11721_v20 = vsub.f32 %v2164_v38, %v2165_v36  ;;  %8867 = vmatpush1.bf16.msk.msra.mxu0 %vm11644_vm10, %v17311_v55  ;;  %v4011_v36 = vld [vmem:[%s10057_s12 + $0xe0] sm:$0xff] }
  0xb2   : > { %vm11709_vm5 = vmpackc.low %vm17468_vm0, %vm505_vm15  ;;  %v11724_v43 = vstv %s11519_s21  ;;  %8741 = vmatprep.subr.msk.bf16.mxu1 %vm11662_vm12, %v17311_v55  ;;  %vm17474_vm15 = vcmp.eq.s32.totalorder %v10968_v58, %v10142_v16  ;;  %vm17475_vm1 = vcmp.eq.s32.totalorder %v10971_v19, %v10142_v16  ;;  %vm511_vm11 = vcmp.eq.s32.totalorder %v11080_v15, %v10142_v16  ;;  %8869 = vmatprep.subr.msk.bf16.mxu0 %vm11680_vm9, %v17311_v55  ;;  %s2749_s21 = sadd.s32 19, %s9998_s7 }
  0xb3   : > { %17471 = vst [vmem:[#allocation128_spill] sm:$0xff] %v11719_v5  ;;  %17472 = vst [vmem:[#allocation129_spill] sm:$0xff] %v11721_v20  ;;  %v11747_v57 = vsub.f32 %v2157_v8, %v2159_v10  ;;  %v3377_v26 = vrot.slane %v11695_v2, 1  ;;  %v11752_v11 = vmul.f32 %v11575_v60, %v11698_v44  ;;  %v11756_v3 = vmul.f32 %v11575_v60, %v11724_v43  ;;  %v4016_v8 = vld [vmem:[%s10057_s12 + $0x108] sm:$0xff]  ;;  %s12180_s30 = sld [smem:[#allocation4 + %s2749_s21]] }
  0xb4   : > { %17473 = vst [vmem:[#allocation130_spill] sm:$0xff] %v11724_v43  ;;  %vm11738_vm0 = vmpackc.low %vm17475_vm1, %vm17474_vm15  ;;  %vm17479_vm12 = vcmp.eq.s32.totalorder %v10991_v50, %v10102_v4  ;;  %vm575_vm1 = vcmp.eq.s32.totalorder %v11103_v62, %v10142_v16  ;;  %vm576_vm10 = vcmp.eq.s32.totalorder %v11106_v34, %v10142_v16  ;;  %4929 = vmatprep.mubr.f32.mxu1 %v4008_v56  ;;  %v2146_v52 = vsub.f32 0.0, %v2145_v23  ;;  %v4020_v23 = vld [vmem:[%s10057_s12 + $0x128] sm:$0xff]  ;;  %v4063_v62 = vld [vmem:[%s10057_s12 + $0x280] sm:$0xff] }
  0xb5   : > { %17478 = vst [vmem:[#allocation131_spill] sm:$0xff] %v11747_v57  ;;  %vm11767_vm15 = vmpackc.low %vm17479_vm12, %vm1079_vm2  ;;  %v11777_v41 = vmul.f32 %v11719_v5, %v11584_v42  ;;  %v11781_v40 = vmul.f32 %v11721_v20, %v11515_v12  ;;  %v11785_v38 = vmul.f32 %v11719_v5, %v11552_v7  ;;  %5203 = vmatprep.mubr.f32.mxu0 %v4012_v21  ;;  %v3383_v19 = vrot.slane %v11752_v11, 2 }
  0xb6   : > { %vm11793_vm2 = vmpackc.low %vm1144_vm14, %vm1143_vm6  ;;  %4930 = vmatmul.mubr.f32.gmra.mrb[6].mxu1 %v4007_v48  ;;  %v11809_v5 = vmul.f32 %v11747_v57, %v11552_v7  ;;  %v2185_v21 = vmul.f32 %v11747_v57, %v11584_v42  ;;  %v11815_v48 = vmul.f32 %v11721_v20, %v11512_v24  ;;  %vm17484_vm14 = vcmp.eq.s32.totalorder %v10991_v50, %v10142_v16  ;;  %v4015_v57 = vld [vmem:[%s10057_s12 + $0x100] sm:$0xff]  ;;  %v4028_v7 = vld [vmem:[%s10057_s12 + $0x168] sm:$0xff] }
  0xb7   : > { %8743 = vmatpush1.bf16.msk.msra.mxu1 %vm11709_vm5, %v17311_v55  ;;  %vm11827_vm6 = vmpackc.low %vm17484_vm14, %vm507_vm7  ;;  %5204 = vmatmul.mubr.f32.gmra.mrb[6].mxu0 %v4011_v36  ;;  %vm1149_vm12 = vcmp.eq.s32.totalorder %v11154_v9, %v10102_v4  ;;  %v11837_v20 = vsub.f32 0.0, %v2146_v52  ;;  %v3379_v58 = vadd.f32 %v3377_v26, %v11691_v30  ;;  %v3389_v50 = vrot.slane %v11695_v2, 2 }
  0xb8   : > { %8871 = vmatpush1.bf16.msk.msra.mxu0 %vm11738_vm0, %v17311_v55  ;;  %8745 = vmatprep.subr.msk.bf16.mxu1 %vm11767_vm15, %v17311_v55  ;;  %vm17488_vm7 = vcmp.eq.s32.totalorder %v11011_v31, %v10142_v16  ;;  %vm17489_vm5 = vcmp.eq.s32.totalorder %v11014_v28, %v10142_v16  ;;  %v2187_v26 = vrot.slane %v2185_v21, 1  ;;  %v3392_v52 = vrot.slane %v11752_v11, 1 }
  0xb9   : > { %17487 = vst [vmem:[#allocation132_spill] sm:$0xff] %v11837_v20  ;;  %vm11855_vm14 = vmpackc.low %vm17489_vm5, %vm17488_vm7  ;;  %8873 = vmatprep.subr.msk.bf16.mxu0 %vm11793_vm2, %v17311_v55  ;;  %vm17492_vm15 = vcmp.eq.s32.totalorder %v11037_v0, %v10102_v4  ;;  %vm17493_vm7 = vcmp.eq.s32.totalorder %v11040_v59, %v10102_v4  ;;  %vm577_vm0 = vcmp.eq.s32.totalorder %v11154_v9, %v10142_v16  ;;  %v3395_v42 = vrot.slane %v11752_v11, 7 }
  0xba   : > { %vm11877_vm5 = vmpackc.low %vm17493_vm7, %vm17492_vm15  ;;  %4935 = vmatprep.mubr.f32.mxu1 %v4016_v8  ;;  %v2169_v56 = vmul.f32 %v11837_v20, %v11512_v24  ;;  %v2184_v21 = vmul.f32 %v11837_v20, %v11515_v12  ;;  %v3385_v10 = vadd.f32 %v3383_v19, %v3379_v58  ;;  %5209 = vmatprep.mubr.f32.mxu0 %v4020_v23  ;;  %v4024_v58 = vld [vmem:[%s10057_s12 + $0x148] sm:$0xff]  ;;  %v3399_v11 = vrot.slane %v11691_v30, 1 }
  0xbb   : > { %vm11900_vm2 = vmpackc.low %vm1146_vm8, %vm1145_vm3  ;;  %4936 = vmatmul.mubr.f32.gmra.mrb[8].mxu1 %v4015_v57  ;;  %v3391_v19 = vadd.f32 %v3389_v50, %v11756_v3  ;;  %v3402_v12 = vrot.slane %v11691_v30, 7  ;;  %v3405_v24 = vrot.slane %v11695_v2, 6  ;;  %vm17498_vm8 = vcmp.eq.s32.totalorder %v11037_v0, %v10142_v16  ;;  %5210 = vmatmul.mubr.f32.gmra.mrb[8].mxu0 %v4019_v22  ;;  %v4023_v30 = vld [vmem:[%s10057_s12 + $0x140] sm:$0xff] }
  0xbc   : > { %8747 = vmatpush1.bf16.msk.msra.mxu1 %vm11827_vm6, %v17311_v55  ;;  %vm17499_vm3 = vcmp.eq.s32.totalorder %v11040_v59, %v10142_v16  ;;  %vm1151_vm15 = vcmp.eq.s32.totalorder %v11380_v27, %v10102_v4  ;;  %vm1152_vm9 = vcmp.eq.s32.totalorder %v11383_v17, %v10102_v4  ;;  %v2171_v2 = vadd.f32 %v11777_v41, %v2169_v56  ;;  %v4027_v41 = vld [vmem:[%s10057_s12 + $0x160] sm:$0xff] }
  0xbd   : > { %vm11926_vm7 = vmpackc.low %vm17499_vm3, %vm17498_vm8  ;;  %v2189_v57 = vadd.f32 %v2187_v26, %v2184_v21  ;;  %v3386_v23 = vsub.f32 0.0, %v3385_v10  ;;  %v3397_v20 = vadd.f32 %v3395_v42, %v11756_v3  ;;  %8875 = vmatpush1.bf16.msk.msra.mxu0 %vm11855_vm14, %v17311_v55  ;;  %8749 = vmatprep.subr.msk.bf16.mxu1 %vm11877_vm5, %v17311_v55  ;;  %vm17502_vm6 = vcmp.eq.s32.totalorder %v11063_v61, %v10142_v16 }
  0xbe   : > { %vm11958_vm8 = vmpackc.low %vm17502_vm6, %vm573_vm4  ;;  %v11968_v22 = vadd.s32 488, %v10083_v47  ;;  %v11971_v36 = vadd.s32 992, %v10083_v47  ;;  %v11973_v35 = vsub.f32 %v3391_v19, %v3392_v52  ;;  %v3404_v26 = vadd.f32 %v3402_v12, %v11756_v3  ;;  %8877 = vmatprep.subr.msk.bf16.mxu0 %vm11900_vm2, %v17311_v55  ;;  %4941 = vmatprep.mubr.f32.mxu1 %v4024_v58 }
  0xbf   : > { %vm17506_vm4 = vcmp.eq.s32.totalorder %v11080_v15, %v10102_v4  ;;  %vm17507_vm5 = vcmp.eq.s32.totalorder %v11083_v13, %v10102_v4  ;;  %vm579_vm14 = vcmp.eq.s32.totalorder %v11380_v27, %v10142_v16  ;;  %v11996_v12 = vadd.s32 1000, %v10083_v47  ;;  %5215 = vmatprep.mubr.f32.mxu0 %v4028_v7  ;;  %4942 = vmatmul.mubr.f32.gmra.mrb[10].mxu1 %v4023_v30  ;;  %v4044_v7 = vld [vmem:[%s10057_s12 + $0x1e8] sm:$0xff] }
  0xc0   : > { %17505 = vst [vmem:[#allocation133_spill] sm:$0xff] %v11973_v35  ;;  %vm11987_vm6 = vmpackc.low %vm17507_vm5, %vm17506_vm4  ;;  %v17510_v3 = vrot.slane %v11781_v40, 2  ;;  %v2191_v56 = vadd.f32 %v11785_v38, %v2189_v57  ;;  %v12001_v21 = vsub.f32 0.0, %v3386_v23  ;;  %vm17512_vm2 = vcmp.eq.s32.totalorder %v11106_v34, %v10102_v4  ;;  %v4032_v40 = vld [vmem:[%s10057_s12 + $0x188] sm:$0xff]  ;;  %8751 = vmatpush1.bf16.msk.msra.mxu1 %vm11926_vm7, %v17311_v55  ;;  %5216 = vmatmul.mubr.f32.gmra.mrb[10].mxu0 %v4027_v41 }
  0xc1   : > { %vm12010_vm4 = vmpackc.low %vm17512_vm2, %vm1147_vm13  ;;  %v12020_v38 = vstv %s11805_s23  ;;  %v12022_v58 = vsub.f32 %v3397_v20, %v3399_v11  ;;  %v12024_v19 = vsub.f32 %v3404_v26, %v3405_v24  ;;  %vm17518_vm13 = vcmp.eq.s32.totalorder %v11083_v13, %v10142_v16  ;;  %v4036_v24 = vld [vmem:[%s10057_s12 + $0x1a8] sm:$0xff]  ;;  %v4031_v20 = vld [vmem:[%s10057_s12 + $0x180] sm:$0xff]  ;;  %8879 = vmatpush1.bf16.msk.msra.mxu0 %vm11958_vm8, %v17311_v55  ;;  %8753 = vmatprep.subr.msk.bf16.mxu1 %vm11987_vm6, %v17311_v55  ;;  %s2743_s23 = sadd.s32 16, %s9998_s7  ;;  %s7100_s7 = sshll.u32 %s18242_s15, 3 }
  0xc2   : > { %v2176_v52 = vadd.f32 %v17510_v3, %v2171_v2  ;;  %17511 = vst [vmem:[#allocation134_spill] sm:$0xff] %v12001_v21  ;;  %17515 = vst [vmem:[#allocation135_spill] sm:$0xff] %v12020_v38  ;;  %v3410_v2 = vmul.f32 %v11973_v35, %v11724_v43  ;;  %vm1153_vm3 = vcmp.eq.s32.totalorder %v11414_v46, %v10102_v4  ;;  %v12048_v11 = vadd.s32 496, %v10083_v47  ;;  %s12232_s24 = sld [smem:[#allocation4 + %s2743_s23]] }
  0xc3   : > { %17516 = vst [vmem:[#allocation136_spill] sm:$0xff] %v12022_v58  ;;  %17517 = vst [vmem:[#allocation137_spill] sm:$0xff] %v12024_v19  ;;  %vm1154_vm5 = vcmp.eq.s32.totalorder %v11417_v1, %v10102_v4  ;;  %v17521_v50 = vrot.slane %v11809_v5, 1  ;;  %v17522_v57 = vrot.slane %v11815_v48, 2  ;;  %v3409_v41 = vmul.f32 %v12001_v21, %v11609_v29  ;;  %v4035_v48 = vld [vmem:[%s10057_s12 + $0x1a0] sm:$0xff]  ;;  %8881 = vmatprep.subr.msk.bf16.mxu0 %vm12010_vm4, %v17311_v55 }
  0xc4   : > { %vm12037_vm2 = vmpackc.low %vm17518_vm13, %vm511_vm11  ;;  %v12086_v42 = vadd.s32 504, %v10083_v47  ;;  %v3412_v26 = vmul.f32 %v12024_v19, %v11672_v45  ;;  %v12092_v10 = vmul.f32 %v12022_v58, %v11698_v44  ;;  %v12096_v3 = vmul.f32 %v12001_v21, %v11672_v45  ;;  %4947 = vmatprep.mubr.f32.mxu1 %v4032_v40  ;;  %5221 = vmatprep.mubr.f32.mxu0 %v4036_v24  ;;  %v4040_v40 = vld [vmem:[%s10057_s12 + $0x1c8] sm:$0xff]  ;;  %v4043_v5 = vld [vmem:[%s10057_s12 + $0x1e0] sm:$0xff] }
  0xc5   : > { %v2181_v30 = vsub.f32 %v2176_v52, %v17521_v50  ;;  %v2196_v23 = vsub.f32 %v2191_v56, %v17522_v57  ;;  %vm12076_vm11 = vmpackc.low %vm576_vm10, %vm575_vm1  ;;  %vm17525_vm10 = vcmp.eq.s32.totalorder %v11129_v18, %v10102_v4  ;;  %vm17526_vm1 = vcmp.eq.s32.totalorder %v11132_v39, %v10102_v4  ;;  %4948 = vmatmul.mubr.f32.gmra.mrb[12].mxu1 %v4031_v20  ;;  %v4052_v20 = vld [vmem:[%s10057_s12 + $0x228] sm:$0xff] }
  0xc6   : > { %vm12112_vm6 = vmpackc.low %vm17526_vm1, %vm17525_vm10  ;;  %v3411_v50 = vadd.f32 %v3410_v2, %v3409_v41  ;;  %v12127_v57 = vstv %s11891_s26  ;;  %vm17530_vm4 = vcmp.eq.s32.totalorder %v11219_v54, %v10102_v4  ;;  %v3414_v2 = vrot.slane %v3412_v26, 2  ;;  %8755 = vmatpush1.bf16.msk.msra.mxu1 %vm12037_vm2, %v17311_v55  ;;  %5222 = vmatmul.mubr.f32.gmra.mrb[12].mxu0 %v4035_v48  ;;  %v4039_v41 = vld [vmem:[%s10057_s12 + $0x1c0] sm:$0xff] }
  0xc7   : > { %v12121_v56 = vmul.f32 %v12020_v38, %v2181_v30  ;;  %v12124_v8 = vmul.f32 %v2196_v23, %v12020_v38  ;;  %17529 = vst [vmem:[#allocation138_spill] sm:$0xff] %v12127_v57  ;;  %vm12135_vm10 = vmpackc.low %vm17530_vm4, %vm1149_vm12  ;;  %v3419_v30 = vrot.slane %v12092_v10, 1  ;;  %v3425_v23 = vmul.f32 %v12022_v58, %v11724_v43  ;;  %8883 = vmatpush1.bf16.msk.msra.mxu0 %vm12076_vm11, %v17311_v55  ;;  %v4051_v10 = vld [vmem:[%s10057_s12 + $0x220] sm:$0xff] }
  0xc8   : > { %v12149_v24 = vmul.f32 %v12024_v19, %v11609_v29  ;;  %vm17533_vm12 = vcmp.eq.s32.totalorder %v11129_v18, %v10142_v16  ;;  %vm17534_vm4 = vcmp.eq.s32.totalorder %v11132_v39, %v10142_v16  ;;  %vm1155_vm1 = vcmp.eq.s32.totalorder %v11444_v53, %v10102_v4  ;;  %8757 = vmatprep.subr.msk.bf16.mxu1 %vm12112_vm6, %v17311_v55 }
  0xc9   : > { %vm12161_vm8 = vmpackc.low %vm17534_vm4, %vm17533_vm12  ;;  %vm2216_vm2 = vcmp.ge.f32.partialorder %v12121_v56, 32.0  ;;  %vm2221_vm7 = vcmp.ge.f32.partialorder %v12124_v8, 32.0  ;;  %2212 = vst [vmem:[#allocation3 + $0xc] sm:$0x1] %v12121_v56  ;;  %v3430_v48 = vmul.f32 %v11973_v35, %v11698_v44  ;;  %vm17537_vm12 = vcmp.eq.s32.totalorder %v11219_v54, %v10142_v16  ;;  %8885 = vmatprep.subr.msk.bf16.mxu0 %vm12135_vm10, %v17311_v55  ;;  %4953 = vmatprep.mubr.f32.mxu1 %v4040_v40  ;;  %v4048_v35 = vld [vmem:[%s10057_s12 + $0x208] sm:$0xff] }
  0xca   : > { %2213 = vst [vmem:[#allocation3 + $0xd] sm:$0x1] %v12124_v8  ;;  %vm12194_vm4 = vmpackc.low %vm17537_vm12, %vm577_vm0  ;;  %v3416_v52 = vadd.f32 %v3414_v2, %v3411_v50  ;;  %v3427_v26 = vrot.slane %v3425_v23, 1  ;;  %vm17540_vm0 = vcmp.eq.s32.totalorder %v11312_v63, %v10102_v4  ;;  %vm17541_vm6 = vcmp.eq.s32.totalorder %v11356_v14, %v10102_v4  ;;  %5227 = vmatprep.mubr.f32.mxu0 %v4044_v7  ;;  %v17546_v2 = vld [vmem:[#allocation108_spill] sm:$0xff]  ;;  %v17547_v23 = vld [vmem:[#allocation109_spill] sm:$0xff] }
  0xcb   : > { %vm12214_vm12 = vmpackc.low %vm17541_vm6, %vm17540_vm0  ;;  %vm583_vm11 = vcmp.eq.s32.totalorder %v11444_v53, %v10142_v16  ;;  %vm2215_vm10 = vcmp.lt.f32.partialorder %v12121_v56, 0.0  ;;  %v2217_v45 = vsel %vm2216_vm2, 31.0, %v12121_v56  ;;  %vm2220_vm0 = vcmp.lt.f32.partialorder %v12124_v8, 0.0  ;;  %4954 = vmatmul.mubr.f32.gmra.mrb[14].mxu1 %v4039_v41  ;;  %5228 = vmatmul.mubr.f32.gmra.mrb[14].mxu0 %v4043_v5  ;;  %v4056_v40 = vld [vmem:[%s10057_s12 + $0x248] sm:$0xff] }
  0xcc   : > { %v2222_v50 = vsel %vm2221_vm7, 31.0, %v12124_v8  ;;  %vm12240_vm6 = vmpackc.low %vm1152_vm9, %vm1151_vm15  ;;  %v3421_v38 = vsub.f32 %v3416_v52, %v3419_v30  ;;  %v3429_v29 = vadd.f32 %v3427_v26, %v12096_v3  ;;  %v3434_v21 = vrot.slane %v12149_v24, 2  ;;  %8759 = vmatpush1.bf16.msk.msra.mxu1 %vm12161_vm8, %v17311_v55  ;;  %v17553_v30 = vld [vmem:[#allocation110_spill] sm:$0xff]  ;;  %v17554_v24 = vld [vmem:[#allocation111_spill] sm:$0xff]  ;;  %8887 = vmatpush1.bf16.msk.msra.mxu0 %vm12194_vm4, %v17311_v55 }
  0xcd   : > { %v17548_v7 = vstv %s11915_s11  ;;  %vm17549_vm9 = vcmp.eq.s32.totalorder %v11312_v63, %v10142_v16  ;;  %vm17550_vm15 = vcmp.eq.s32.totalorder %v11356_v14, %v10142_v16  ;;  %vm1157_vm7 = vcmp.eq.s32.totalorder %v17553_v30, %v10102_v4  ;;  %v4047_v26 = vld [vmem:[%s10057_s12 + $0x200] sm:$0xff]  ;;  %8761 = vmatprep.subr.msk.bf16.mxu1 %vm12214_vm12, %v17311_v55  ;;  %8889 = vmatprep.subr.msk.bf16.mxu0 %vm12240_vm6, %v17311_v55  ;;  %vm12347_vm6 = vmpackc.low %vm1154_vm5, %vm1153_vm3  ;;  %v4060_v3 = vld [vmem:[%s10057_s12 + $0x268] sm:$0xff] }
  0xce   : > { %v1561_v41 = vmul.f32 %v11575_v60, %v17548_v7  ;;  %vm12267_vm2 = vmpackc.low %vm17550_vm15, %vm17549_vm9  ;;  %vm1158_vm13 = vcmp.eq.s32.totalorder %v17554_v24, %v10102_v4  ;;  %v17555_v52 = vstv %s11940_s27  ;;  %v17556_v44 = vstv %s11944_s5  ;;  %4959 = vmatprep.mubr.f32.mxu1 %v4048_v35  ;;  %5233 = vmatprep.mubr.f32.mxu0 %v4052_v20  ;;  %v17566_v35 = vld [vmem:[#allocation112_spill] sm:$0xff]  ;;  %v4055_v20 = vld [vmem:[%s10057_s12 + $0x240] sm:$0xff] }
  0xcf   : > { %v1563_v7 = vmul.f32 %v11575_v60, %v17555_v52  ;;  %v1569_v19 = vmul.f32 %v11575_v60, %v17556_v44  ;;  %v12284_v43 = vstv %s12058_s13  ;;  %v12287_v54 = vstv %s12062_s14  ;;  %4960 = vmatmul.mubr.f32.gmra.mrb[16].mxu1 %v4047_v26  ;;  %5234 = vmatmul.mubr.f32.gmra.mrb[16].mxu0 %v4051_v10  ;;  %v4059_v44 = vld [vmem:[%s10057_s12 + $0x260] sm:$0xff]  ;;  %v4068_v8 = vld [vmem:[%s10057_s12 + $0x2a8] sm:$0xff] }
  0xd0   : > { %vm17557_vm8 = vcmp.eq.s32.totalorder %v11383_v17, %v10142_v16  ;;  %vm521_vm15 = vcmp.eq.s32.totalorder %v17546_v2, %v10142_v16  ;;  %v12312_v58 = vsel %vm2215_vm10, 0.0, %v2217_v45  ;;  %v3423_v5 = vmul.f32 %v12127_v57, %v3421_v38  ;;  %8763 = vmatpush1.bf16.msk.msra.mxu1 %vm12267_vm2, %v17311_v55  ;;  %4965 = vmatprep.mubr.f32.mxu1 %v4056_v40  ;;  %v4064_v40 = vld [vmem:[%s10057_s12 + $0x288] sm:$0xff] }
  0xd1   : > { %vm12301_vm9 = vmpackc.low %vm17557_vm8, %vm579_vm14  ;;  %v3431_v52 = vadd.f32 %v3430_v48, %v3429_v29  ;;  %vm17560_vm14 = vcmp.eq.s32.totalorder %v11386_v33, %v10102_v4  ;;  %vm17561_vm12 = vcmp.eq.s32.totalorder %v11389_v32, %v10102_v4  ;;  %v1565_v29 = vrot.slane %v1563_v7, 1  ;;  %5239 = vmatprep.mubr.f32.mxu0 %v4060_v3  ;;  %v4071_v3 = vld [vmem:[%s10057_s12 + $0x2c0] sm:$0xff] }
  0xd2   : > { %vm12325_vm8 = vmpackc.low %vm17561_vm12, %vm17560_vm14  ;;  %v1571_v38 = vrot.slane %v1569_v19, 2  ;;  %v12335_v56 = vmul.f32 %v11575_v60, %v12284_v43  ;;  %v12339_v48 = vmul.f32 %v11575_v60, %v12287_v54  ;;  %v17567_v19 = vld [vmem:[#allocation113_spill] sm:$0xff]  ;;  %v12358_v7 = vsel %vm2220_vm0, 0.0, %v2222_v50  ;;  %3452 = vst [vmem:[#allocation3 + $0x14] sm:$0x1] %v3423_v5  ;;  %v17573_v50 = vld [vmem:[#allocation115_spill] sm:$0xff]  ;;  %8891 = vmatpush1.bf16.msk.msra.mxu0 %vm12301_vm9, %v17311_v55 }
  0xd3   : > { %v3436_v17 = vsub.f32 %v3431_v52, %v3434_v21  ;;  %vm3455_vm3 = vcmp.lt.f32.partialorder %v3423_v5, 0.0  ;;  %vm3456_vm5 = vcmp.ge.f32.partialorder %v3423_v5, 32.0  ;;  %vm17568_vm14 = vcmp.eq.s32.totalorder %v11386_v33, %v10142_v16  ;;  %v17572_v21 = vld [vmem:[#allocation114_spill] sm:$0xff]  ;;  %8765 = vmatprep.subr.msk.bf16.mxu1 %vm12325_vm8, %v17311_v55  ;;  %8893 = vmatprep.subr.msk.bf16.mxu0 %vm12347_vm6, %v17311_v55 }
  0xd4   : > { %vm17569_vm12 = vcmp.eq.s32.totalorder %v11389_v32, %v10142_v16  ;;  %vm1159_vm0 = vcmp.eq.s32.totalorder %v17572_v21, %v10102_v4  ;;  %v3457_v26 = vsel %vm3456_vm5, 31.0, %v3423_v5  ;;  %v1567_v52 = vadd.f32 %v1565_v29, %v1561_v41  ;;  %4966 = vmatmul.mubr.f32.gmra.mrb[18].mxu1 %v4055_v20  ;;  %5240 = vmatmul.mubr.f32.gmra.mrb[18].mxu0 %v4059_v44  ;;  %v17591_v20 = vld [vmem:[#allocation120_spill] sm:$0xff] }
  0xd5   : > { %vm12369_vm4 = vmpackc.low %vm17569_vm12, %vm17568_vm14  ;;  %v2757_v9 = vrot.slane %v12339_v48, 1  ;;  %v12381_v34 = vstv %s12180_s30  ;;  %vm17574_vm2 = vcmp.eq.s32.totalorder %v11414_v46, %v10142_v16  ;;  %vm17575_vm14 = vcmp.eq.s32.totalorder %v11417_v1, %v10142_v16  ;;  %v17592_v46 = vld [vmem:[#allocation122_spill] sm:$0xff]  ;;  %4971 = vmatprep.mubr.f32.mxu1 %v4064_v40  ;;  %5245 = vmatprep.mubr.f32.mxu0 %v4068_v8 }
  0xd6   : > { %vm12395_vm12 = vmpackc.low %vm17575_vm14, %vm17574_vm2  ;;  %v9661_v27 = vtrunc.f32 %v12312_v58  ;;  %v3437_v10 = vmul.f32 %v3436_v17, %v12127_v57  ;;  %v3458_v29 = vsel %vm3455_vm3, 0.0, %v3457_v26  ;;  %v12409_v1 = vmul.f32 %v11575_v60, %v12381_v34  ;;  %8767 = vmatpush1.bf16.msk.msra.mxu1 %vm12369_vm4, %v17311_v55 }
  0xd7   : > { %vm17578_vm8 = vcmp.eq.s32.totalorder %v11420_v25, %v10102_v4  ;;  %vm17579_vm2 = vcmp.eq.s32.totalorder %v11423_v49, %v10102_v4  ;;  %v9669_v17 = vtrunc.f32 %v3458_v29  ;;  %v1573_v5 = vadd.f32 %v1571_v38, %v1567_v52  ;;  %v17585_v38 = vld [vmem:[#allocation118_spill] sm:$0xff]  ;;  %8895 = vmatpush1.bf16.msk.msra.mxu0 %vm12395_vm12, %v17311_v55 }
  0xd8   : > { %vm12420_vm14 = vmpackc.low %vm17579_vm2, %vm17578_vm8  ;;  %v2759_v45 = vadd.f32 %v2757_v9, %v12335_v56  ;;  %v12430_v26 = vstv %s12232_s24  ;;  %vm17582_vm6 = vcmp.eq.s32.totalorder %v11447_v6, %v10102_v4  ;;  %v17586_v9 = vld [vmem:[#allocation119_spill] sm:$0xff]  ;;  %vm3460_vm3 = vcmp.lt.f32.partialorder %v3437_v10, 0.0  ;;  %3453 = vst [vmem:[#allocation3 + $0x15] sm:$0x1] %v3437_v10  ;;  %4972 = vmatmul.mubr.f32.gmra.mrb[20].mxu1 %v4063_v62 }
  0xd9   : > { %vm12438_vm8 = vmpackc.low %vm17582_vm6, %vm1155_vm1  ;;  %vm3461_vm5 = vcmp.ge.f32.partialorder %v3437_v10, 32.0  ;;  %v1576_v52 = vstv %s12253_s25  ;;  %v2763_v29 = vrot.slane %v12409_v1, 2  ;;  %vm17587_vm1 = vcmp.eq.s32.totalorder %v11420_v25, %v10142_v16  ;;  %8769 = vmatprep.subr.msk.bf16.mxu1 %vm12420_vm14, %v17311_v55 }
  0xda   : > { %vm17588_vm6 = vcmp.eq.s32.totalorder %v11423_v49, %v10142_v16  ;;  %vm1161_vm2 = vcmp.eq.s32.totalorder %v17591_v20, %v10102_v4  ;;  %vm1162_vm10 = vcmp.eq.s32.totalorder %v17592_v46, %v10102_v4  ;;  %v9663_v61 = vtrunc.f32 %v12358_v7  ;;  %v4067_v7 = vld [vmem:[%s10057_s12 + $0x2a0] sm:$0xff]  ;;  %8897 = vmatprep.subr.msk.bf16.mxu0 %vm12438_vm8, %v17311_v55  ;;  %vm12528_vm8 = vmpackc.low %vm1158_vm13, %vm1157_vm7 }
  0xdb   : > { %vm12458_vm9 = vmpackc.low %vm17588_vm6, %vm17587_vm1  ;;  %v3462_v37 = vsel %vm3461_vm5, 31.0, %v3437_v10  ;;  %v17593_v28 = vstv %s12100_s18  ;;  %v12473_v49 = vmul.f32 %v11575_v60, %v12430_v26  ;;  %vm17594_vm4 = vcmp.eq.s32.totalorder %v11447_v6, %v10142_v16  ;;  %5246 = vmatmul.mubr.f32.gmra.mrb[20].mxu0 %v4067_v7  ;;  %v4075_v6 = vld [vmem:[%s10057_s12 + $0x2e0] sm:$0xff] }
  0xdc   : > { %v1575_v31 = vadd.f32 %v17593_v28, %v1573_v5  ;;  %vm12487_vm5 = vmpackc.low %vm17594_vm4, %vm583_vm11  ;;  %vm525_vm1 = vcmp.eq.s32.totalorder %v17585_v38, %v10142_v16  ;;  %vm526_vm12 = vcmp.eq.s32.totalorder %v17586_v9, %v10142_v16  ;;  %v12497_v41 = vadd.s32 1008, %v10083_v47  ;;  %8771 = vmatpush1.bf16.msk.msra.mxu1 %vm12458_vm9, %v17311_v55 }
  0xdd   : > { %v12499_v44 = vcvt.f32.s32 %v9661_v27  ;;  %v3463_v58 = vsel %vm3460_vm3, 0.0, %v3462_v37  ;;  %v2765_v5 = vadd.f32 %v2763_v29, %v2759_v45  ;;  %vm17597_vm11 = vcmp.eq.s32.totalorder %v17546_v2, %v10102_v4  ;;  %8899 = vmatpush1.bf16.msk.msra.mxu0 %vm12487_vm5, %v17311_v55 }
  0xde   : > { %vm17598_vm14 = vcmp.eq.s32.totalorder %v17547_v23, %v10102_v4  ;;  %vm589_vm4 = vcmp.eq.s32.totalorder %v17591_v20, %v10142_v16  ;;  %vm590_vm3 = vcmp.eq.s32.totalorder %v17592_v46, %v10142_v16  ;;  %v12519_v37 = vcvt.f32.s32 %v9669_v17  ;;  %v17603_v17 = vld [vmem:[#allocation124_spill] sm:$0xff]  ;;  %8901 = vmatprep.subr.msk.bf16.mxu0 %vm12528_vm8, %v17311_v55 }
  0xdf   : > { %vm12511_vm6 = vmpackc.low %vm17598_vm14, %vm17597_vm11  ;;  %v9671_v57 = vtrunc.f32 %v3463_v58  ;;  %v1577_v27 = vmul.f32 %v1576_v52, %v1575_v31  ;;  %v2769_v10 = vrot.slane %v12339_v48, 2  ;;  %v4072_v31 = vld [vmem:[%s10057_s12 + $0x2c8] sm:$0xff]  ;;  %v2766_v40 = vsub.f32 0.0, %v2765_v5 }
  0xe0   : > { %v2772_v52 = vrot.slane %v12409_v1, 1  ;;  %v2775_v29 = vrot.slane %v12409_v1, 7  ;;  %v2779_v58 = vrot.slane %v12335_v56, 1  ;;  %vm17604_vm13 = vcmp.eq.s32.totalorder %v17547_v23, %v10142_v16  ;;  %v4076_v1 = vld [vmem:[%s10057_s12 + $0x2e8] sm:$0xff]  ;;  %8773 = vmatprep.subr.msk.bf16.mxu1 %vm12511_vm6, %v17311_v55  ;;  %4977 = vmatprep.mubr.f32.mxu1 %v4072_v31 }
  0xe1   : > { %vm12549_vm7 = vmpackc.low %vm17604_vm13, %vm521_vm15  ;;  %vm1163_vm14 = vcmp.eq.s32.totalorder %v11971_v36, %v10102_v4  ;;  %v9664_v8 = vcvt.f32.s32 %v9663_v61  ;;  %v12559_v5 = vmul.f32 2.0, %v1577_v27  ;;  %v2771_v53 = vadd.f32 %v2769_v10, %v12473_v49  ;;  %5251 = vmatprep.mubr.f32.mxu0 %v4076_v1  ;;  %4978 = vmatmul.mubr.f32.gmra.mrb[22].mxu1 %v4071_v3 }
  0xe2   : > { %v2782_v23 = vrot.slane %v12335_v56, 7  ;;  %vm17607_vm15 = vcmp.eq.s32.totalorder %v17553_v30, %v10142_v16  ;;  %vm17608_vm9 = vcmp.eq.s32.totalorder %v17554_v24, %v10142_v16  ;;  %v2225_v56 = vmul.u32 32, %v12499_v44  ;;  %8775 = vmatpush1.bf16.msk.msra.mxu1 %vm12549_vm7, %v17311_v55  ;;  %5252 = vmatmul.mubr.f32.gmra.mrb[22].mxu0 %v4075_v6 }
  0xe3   : > { %vm12575_vm13 = vmpackc.low %vm17608_vm9, %vm17607_vm15  ;;  %v2777_v28 = vadd.f32 %v2775_v29, %v12473_v49  ;;  %v2785_v7 = vrot.slane %v12339_v48, 6  ;;  %v12587_v27 = vsub.f32 0.0, %v2766_v40  ;;  %vm17611_vm6 = vcmp.eq.s32.totalorder %v17566_v35, %v10102_v4 }
  0xe4   : > { %vm17612_vm15 = vcmp.eq.s32.totalorder %v17567_v19, %v10102_v4  ;;  %vm591_vm5 = vcmp.eq.s32.totalorder %v11971_v36, %v10142_v16  ;;  %v9672_v48 = vcvt.f32.s32 %v9671_v57  ;;  %v3465_v44 = vmul.u32 32, %v12519_v37  ;;  %v3986_v37 = vld [vmem:[%s10057_s12 + $0x18] sm:$0xff]  ;;  %8903 = vmatpush1.bf16.msk.msra.mxu0 %vm12575_vm13, %v17311_v55 }
  0xe5   : > { %vm12598_vm9 = vmpackc.low %vm17612_vm15, %vm17611_vm6  ;;  %v17615_v45 = vstv %s11915_s11  ;;  %v17616_v29 = vstv %s11940_s27  ;;  %vm17617_vm8 = vcmp.eq.s32.totalorder %v17573_v50, %v10102_v4  ;;  %v12628_v57 = vsub.f32 %v2771_v53, %v2772_v52  ;;  %5048 = vmatprep.mubr.f32.mxu1 %v3986_v37 }
  0xe6   : > { %v1579_v40 = vmul.f32 %v12559_v5, %v17615_v45  ;;  %v1581_v24 = vmul.f32 %v12559_v5, %v17616_v29  ;;  %vm12619_vm6 = vmpackc.low %vm17617_vm8, %vm1159_vm0  ;;  %v12630_v31 = vsub.f32 %v2777_v28, %v2779_v58  ;;  %v2784_v45 = vadd.f32 %v2782_v23, %v12473_v49  ;;  %v3990_v49 = vld [vmem:[%s10057_s12 + $0x38] sm:$0xff]  ;;  %8777 = vmatprep.subr.msk.bf16.mxu1 %vm12598_vm9, %v17311_v55  ;;  %v17660_v29 = vld [vmem:[#allocation13_spill] sm:$0xff] }
  0xe7   : > { %17620 = vst [vmem:[#allocation108_spill] sm:$0xff] %v12628_v57  ;;  %vm17621_vm0 = vcmp.eq.s32.totalorder %v17566_v35, %v10142_v16  ;;  %vm17622_vm8 = vcmp.eq.s32.totalorder %v17567_v19, %v10142_v16  ;;  %v2789_v58 = vmul.f32 %v12587_v27, %v12284_v43  ;;  %vm17625_vm7 = vcmp.eq.s32.totalorder %v17572_v21, %v10142_v16 }
  0xe8   : > { %vm12646_vm11 = vmpackc.low %vm17622_vm8, %vm17621_vm0  ;;  %v1580_v23 = vsub.f32 %v11575_v60, %v1579_v40  ;;  %v1583_v52 = vrot.slane %v1581_v24, 7  ;;  %vm17626_vm0 = vcmp.eq.s32.totalorder %v17573_v50, %v10142_v16  ;;  %v12673_v24 = vadd.s32 1016, %v10083_v47  ;;  %8905 = vmatprep.subr.msk.bf16.mxu0 %vm12619_vm6, %v17311_v55  ;;  %5322 = vmatprep.mubr.f32.mxu0 %v3990_v49 }
  0xe9   : > { %vm12668_vm8 = vmpackc.low %vm17626_vm0, %vm17625_vm7  ;;  %vm529_vm13 = vcmp.eq.s32.totalorder %v12048_v11, %v10142_v16  ;;  %v12679_v1 = vsub.f32 %v2784_v45, %v2785_v7  ;;  %v2790_v3 = vmul.f32 %v12628_v57, %v12430_v26  ;;  %v2797_v61 = vmul.f32 %v12630_v31, %v12381_v34  ;;  %8779 = vmatpush1.bf16.msk.msra.mxu1 %vm12646_vm11, %v17311_v55 }
  0xea   : > { %vm17629_vm9 = vcmp.eq.s32.totalorder %v17585_v38, %v10102_v4  ;;  %vm17630_vm7 = vcmp.eq.s32.totalorder %v17586_v9, %v10102_v4  ;;  %v2226_v28 = vadd.s32 %v9664_v8, %v2225_v56  ;;  %v3466_v7 = vadd.s32 %v9672_v48, %v3465_v44  ;;  %1591 = vst [vmem:[#allocation3 + $0x8] sm:$0x1] %v1580_v23  ;;  %vm12705_vm6 = vmpackc.low %vm1162_vm10, %vm1161_vm2 }
  0xeb   : > { %vm12694_vm0 = vmpackc.low %vm17630_vm7, %vm17629_vm9  ;;  %v1585_v10 = vsub.f32 %v11575_v60, %v1583_v52  ;;  %vm1594_vm15 = vcmp.lt.f32.partialorder %v1580_v23, 0.0  ;;  %vm1595_vm9 = vcmp.ge.f32.partialorder %v1580_v23, 32.0  ;;  %v2791_v40 = vadd.f32 %v2790_v3, %v2789_v58  ;;  %8907 = vmatpush1.bf16.msk.msra.mxu0 %vm12668_vm8, %v17311_v55 }
  0xec   : > { %v2792_v8 = vmul.f32 %v12679_v1, %v12287_v54  ;;  %v2799_v56 = vrot.slane %v2797_v61, 1  ;;  %vm12720_vm10 = vmpackc.low %vm526_vm12, %vm525_vm1  ;;  %v1596_v48 = vsel %vm1595_vm9, 31.0, %v1580_v23  ;;  %v2804_v44 = vmul.f32 %v12587_v27, %v12287_v54  ;;  %8781 = vmatprep.subr.msk.bf16.mxu1 %vm12694_vm0, %v17311_v55  ;;  %8909 = vmatprep.subr.msk.bf16.mxu0 %vm12705_vm6, %v17311_v55  ;;  %v17643_v23 = vld [vmem:[#allocation12_spill] sm:$0xff] }
  0xed   : > { %vm1599_vm2 = vcmp.lt.f32.partialorder %v1585_v10, 0.0  ;;  %vm1600_vm7 = vcmp.ge.f32.partialorder %v1585_v10, 32.0  ;;  %1592 = vst [vmem:[#allocation3 + $0x8] sm:$0x2] %v1585_v10  ;;  %vm12738_vm1 = vmpackc.low %vm590_vm3, %vm589_vm4  ;;  %v1597_v37 = vsel %vm1594_vm15, 0.0, %v1596_v48  ;;  %v2805_v49 = vmul.f32 %v12630_v31, %v12430_v26  ;;  %8783 = vmatpush1.bf16.msk.msra.mxu1 %vm12720_vm10, %v17311_v55 }
  0xee   : > { %v1601_v45 = vsel %vm1600_vm7, 31.0, %v1585_v10  ;;  %v2794_v53 = vrot.slane %v2792_v8, 2  ;;  %vm17639_vm12 = vcmp.eq.s32.totalorder %v17603_v17, %v10102_v4  ;;  %vm17640_vm4 = vcmp.eq.s32.totalorder %v11968_v22, %v10102_v4 }
  0xef   : > { %vm12754_vm3 = vmpackc.low %vm17640_vm4, %vm17639_vm12  ;;  %v12759_v58 = vrot.slane %v2226_v28, %v17643_v23  ;;  %v9657_v62 = vtrunc.f32 %v1597_v37  ;;  %v1602_v3 = vsel %vm1599_vm2, 0.0, %v1601_v45  ;;  %v2812_v61 = vmul.f32 %v12679_v1, %v12284_v43  ;;  %8911 = vmatpush1.bf16.msk.msra.mxu0 %vm12738_vm1, %v17311_v55 }
  0xf0   : > { %vm17644_vm11 = vcmp.eq.s32.totalorder %v11996_v12, %v10102_v4  ;;  %v9659_v10 = vtrunc.f32 %v1602_v3  ;;  %v2796_v30 = vadd.f32 %v2794_v53, %v2791_v40  ;;  %v2807_v8 = vrot.slane %v2805_v49, 1  ;;  %8785 = vmatprep.subr.msk.bf16.mxu1 %vm12754_vm3, %v17311_v55 }
  0xf1   : > { %vm12769_vm15 = vmpackc.low %vm17644_vm11, %vm1163_vm14  ;;  %v2810_v28 = vmul.f32 %v12628_v57, %v12381_v34  ;;  %vm17647_vm8 = vcmp.eq.s32.totalorder %v17603_v17, %v10142_v16  ;;  %vm17648_vm0 = vcmp.eq.s32.totalorder %v11968_v22, %v10142_v16  ;;  %vm1166_vm6 = vcmp.eq.s32.totalorder %v12673_v24, %v10102_v4  ;;  %v17697_v57 = vld [vmem:[#allocation33_spill] sm:$0xff] }
  0xf2   : > { %vm12784_vm14 = vmpackc.low %vm17648_vm0, %vm17647_vm8  ;;  %v12791_v40 = vrot.slane %v3466_v7, %v17643_v23  ;;  %v9658_v37 = vcvt.f32.s32 %v9657_v62  ;;  %v12794_v45 = vstv %s12635_s28  ;;  %vm17652_vm9 = vcmp.eq.s32.totalorder %v11996_v12, %v10142_v16  ;;  %8913 = vmatprep.subr.msk.bf16.mxu0 %vm12769_vm15, %v17311_v55  ;;  %v3985_v7 = vld [vmem:[%s10057_s12 + $0x10] sm:$0xff] }
  0xf3   : > { %17651 = vst [vmem:[#allocation112_spill] sm:$0xff] %v12794_v45  ;;  %vm12808_vm10 = vmpackc.low %vm17652_vm9, %vm591_vm5  ;;  %v9660_v60 = vcvt.f32.s32 %v9659_v10  ;;  %v2801_v53 = vsub.f32 %v2796_v30, %v2799_v56  ;;  %v2809_v49 = vadd.f32 %v2807_v8, %v2804_v44  ;;  %v2814_v62 = vrot.slane %v2812_v61, 2  ;;  %8787 = vmatpush1.bf16.msk.msra.mxu1 %vm12784_vm14, %v17311_v55  ;;  %v3997_v8 = vld [vmem:[%s10057_s12 + $0x70] sm:$0xff] }
  0xf4   : > { %vm17655_vm2 = vcmp.eq.s32.totalorder %v12048_v11, %v10102_v4  ;;  %vm17656_vm7 = vcmp.eq.s32.totalorder %v12086_v42, %v10102_v4  ;;  %vm593_vm5 = vcmp.eq.s32.totalorder %v12497_v41, %v10142_v16  ;;  %vm594_vm12 = vcmp.eq.s32.totalorder %v12673_v24, %v10142_v16  ;;  %8915 = vmatpush1.bf16.msk.msra.mxu0 %vm12808_vm10, %v17311_v55 }
  0xf5   : > { %vm8788_vm1 = vmpackc.low %vm17656_vm7, %vm17655_vm2  ;;  %vm2231_vm4 = vcmp.eq.s32.totalorder %v10083_v47, %v12759_v58  ;;  %v1604_v56 = vmul.u32 32, %v9658_v37  ;;  %vm17657_vm3 = vcmp.eq.s32.totalorder %v12497_v41, %v10102_v4  ;;  %vm2232_vm15 = vcmp.eq.s32.totalorder %v17660_v29, %v12759_v58 }
  0xf6   : > { %vm12833_vm11 = vmpackc.low %vm1166_vm6, %vm17657_vm3  ;;  %v1605_v52 = vrot.slane %v9660_v60, 1  ;;  %v2803_v3 = vmul.f32 %v12794_v45, %v2801_v53  ;;  %v2811_v61 = vadd.f32 %v2810_v28, %v2809_v49  ;;  %vm17661_vm8 = vcmp.eq.s32.totalorder %v12086_v42, %v10142_v16  ;;  %8789 = vmatprep.subr.msk.bf16.mxu1 %vm8788_vm1, %v17311_v55  ;;  %v17668_v53 = vld [vmem:[#allocation16_spill] sm:$0xff]  ;;  %v17669_v49 = vld [vmem:[#allocation17_spill] sm:$0xff] }
  0xf7   : > { %vm12849_vm0 = vmpackc.low %vm17661_vm8, %vm529_vm13  ;;  %vm3471_vm6 = vcmp.eq.s32.totalorder %v10083_v47, %v12791_v40  ;;  %vm3472_vm9 = vcmp.eq.s32.totalorder %v17660_v29, %v12791_v40  ;;  %8917 = vmatprep.subr.msk.bf16.mxu0 %vm12833_vm11, %v17311_v55  ;;  %vm2233_vm1 = vcmp.eq.s32.totalorder %v17668_v53, %v12759_v58 }
  0xf8   : > { %vm12864_vm13 = vmpackc.low %vm594_vm12, %vm593_vm5  ;;  %v1606_v10 = vadd.s32 %v1605_v52, %v1604_v56  ;;  %v2816_v30 = vsub.f32 %v2811_v61, %v2814_v62  ;;  %vm2835_vm14 = vcmp.lt.f32.partialorder %v2803_v3, 0.0  ;;  %vm2836_vm2 = vcmp.ge.f32.partialorder %v2803_v3, 32.0  ;;  %2832 = vst [vmem:[#allocation3 + $0x10] sm:$0x1] %v2803_v3  ;;  %8791 = vmatpush1.bf16.msk.msra.mxu1 %vm12849_vm0, %v17311_v55  ;;  %v3989_v62 = vld [vmem:[%s10057_s12 + $0x30] sm:$0xff]  ;;  %v3994_v52 = vld [vmem:[%s10057_s12 + $0x58] sm:$0xff] }
  0xf9   : > { %vm8920_vm10 = vmpackc.low %vm2232_vm15, %vm2231_vm4  ;;  %v2837_v16 = vsel %vm2836_vm2, 31.0, %v2803_v3  ;;  %vm2234_vm5 = vcmp.eq.s32.totalorder %v17669_v49, %v12759_v58  ;;  %8919 = vmatpush1.bf16.msk.msra.mxu0 %vm12864_vm13, %v17311_v55  ;;  %v3998_v3 = vld [vmem:[%s10057_s12 + $0x78] sm:$0xff]  ;;  %vm3473_vm2 = vcmp.eq.s32.totalorder %v17668_v53, %v12791_v40 }
  0xfa   : > { %vm12877_vm7 = vmpackc.low %vm3472_vm9, %vm3471_vm6  ;;  %v12882_v28 = vrot.slane %v1606_v10, %v17643_v23  ;;  %v2817_v48 = vmul.f32 %v2816_v30, %v12794_v45  ;;  %v2838_v37 = vsel %vm2835_vm14, 0.0, %v2837_v16  ;;  %8921 = vmatprep.subr.msk.bf16.mxu1 %vm8920_vm10, %v17311_v55  ;;  %v3993_v10 = vld [vmem:[%s10057_s12 + $0x50] sm:$0xff]  ;;  %v17670_v30 = vld [vmem:[#allocation20_spill] sm:$0xff]  ;;  %vm3474_vm10 = vcmp.eq.s32.totalorder %v17669_v49, %v12791_v40 }
  0xfb   : > { %v9665_v60 = vtrunc.f32 %v2838_v37  ;;  %9177 = vmatprep.subr.msk.bf16.mxu0 %vm12877_vm7, %v17311_v55  ;;  %5049 = vmatmul.mubr.f32.vlgmr.msra.gmra.mrb[0].mxu1 %v3985_v7  ;;  %vm8924_vm6 = vmpackc.low %vm2234_vm5, %vm2233_vm1  ;;  %vm2235_vm9 = vcmp.eq.s32.totalorder %v17670_v30, %v12759_v58  ;;  %v17671_v16 = vld [vmem:[#allocation21_spill] sm:$0xff]  ;;  %v4002_v37 = vld [vmem:[%s10057_s12 + $0x98] sm:$0xff] }
  0xfc   : > { %vm1611_vm12 = vcmp.eq.s32.totalorder %v10083_v47, %v12882_v28  ;;  %vm1612_vm4 = vcmp.eq.s32.totalorder %v17660_v29, %v12882_v28  ;;  %vm2840_vm3 = vcmp.lt.f32.partialorder %v2817_v48, 0.0  ;;  %vm2841_vm11 = vcmp.ge.f32.partialorder %v2817_v48, 32.0  ;;  %2833 = vst [vmem:[#allocation3 + $0x11] sm:$0x1] %v2817_v48  ;;  %5323 = vmatmul.mubr.f32.vlgmr.msra.gmra.mrb[0].mxu0 %v3989_v62  ;;  %5054 = vmatprep.mubr.f32.mxu1 %v3994_v52  ;;  %v4006_v7 = vld [vmem:[%s10057_s12 + $0xb8] sm:$0xff]  ;;  %v4005_v52 = vld [vmem:[%s10057_s12 + $0xb0] sm:$0xff] }
  0xfd   : > { %vm8922_vm15 = vmpackc.low %vm1612_vm4, %vm1611_vm12  ;;  %v9666_v56 = vcvt.f32.s32 %v9665_v60  ;;  %v2842_v44 = vsel %vm2841_vm11, 31.0, %v2817_v48  ;;  %vm1613_vm8 = vcmp.eq.s32.totalorder %v17668_v53, %v12882_v28  ;;  %vm1614_vm0 = vcmp.eq.s32.totalorder %v17669_v49, %v12882_v28  ;;  %5328 = vmatprep.mubr.f32.mxu0 %v3998_v3  ;;  %v17676_v3 = vld [vmem:[#allocation24_spill] sm:$0xff]  ;;  %v4013_v60 = vld [vmem:[%s10057_s12 + $0xf0] sm:$0xff] }
  0xfe   : > { %v2843_v61 = vsel %vm2840_vm3, 0.0, %v2842_v44  ;;  %8923 = vmatpush1.bf16.msk.msra.mxu1 %vm8922_vm15, %v17311_v55  ;;  %vm2236_vm13 = vcmp.eq.s32.totalorder %v17671_v16, %v12759_v58  ;;  %vm8926_vm14 = vmpackc.low %vm1614_vm0, %vm1613_vm8  ;;  %vm1615_vm1 = vcmp.eq.s32.totalorder %v17670_v30, %v12882_v28  ;;  %vm1616_vm5 = vcmp.eq.s32.totalorder %v17671_v16, %v12882_v28  ;;  %v17696_v45 = vld [vmem:[#allocation32_spill] sm:$0xff]  ;;  %v4037_v44 = vld [vmem:[%s10057_s12 + $0x1b0] sm:$0xff] }
  0xff   : > { %v9667_v4 = vtrunc.f32 %v2843_v61  ;;  %v2845_v6 = vmul.u32 32, %v9666_v56  ;;  %8925 = vmatprep.subr.msk.bf16.mxu1 %vm8924_vm6, %v17311_v55  ;;  %5055 = vmatmul.mubr.f32.gmra.mrb[2].mxu1 %v3993_v10  ;;  %vm12934_vm7 = vmpackc.low %vm2236_vm13, %vm2235_vm9  ;;  %v4001_v56 = vld [vmem:[%s10057_s12 + $0x90] sm:$0xff]  ;;  %vm3475_vm12 = vcmp.eq.s32.totalorder %v17670_v30, %v12791_v40  ;;  %vm3476_vm4 = vcmp.eq.s32.totalorder %v17671_v16, %v12791_v40  ;;  %v4010_v10 = vld [vmem:[%s10057_s12 + $0xd8] sm:$0xff] }
 0x100   : > { %5329 = vmatmul.mubr.f32.gmra.mrb[2].mxu0 %v3997_v8  ;;  %vm12948_vm3 = vmpackc.low %vm3474_vm10, %vm3473_vm2  ;;  %5060 = vmatprep.mubr.f32.mxu1 %v4002_v37  ;;  %vm2237_vm11 = vcmp.eq.s32.totalorder %v17676_v3, %v12759_v58  ;;  %v17677_v61 = vld [vmem:[#allocation25_spill] sm:$0xff]  ;;  %vm1617_vm6 = vcmp.eq.s32.totalorder %v17676_v3, %v12882_v28 }
 0x101   : > { %v9668_v48 = vcvt.f32.s32 %v9667_v4  ;;  %5334 = vmatprep.mubr.f32.mxu0 %v4006_v7  ;;  %vm2238_vm15 = vcmp.eq.s32.totalorder %v17677_v61, %v12759_v58  ;;  %vm12969_vm8 = vmpackc.low %vm1616_vm5, %vm1615_vm1  ;;  %vm1618_vm9 = vcmp.eq.s32.totalorder %v17677_v61, %v12882_v28  ;;  %v4009_v37 = vld [vmem:[%s10057_s12 + $0xd0] sm:$0xff]  ;;  %vm3477_vm5 = vcmp.eq.s32.totalorder %v17676_v3, %v12791_v40  ;;  %v4034_v7 = vld [vmem:[%s10057_s12 + $0x198] sm:$0xff] }
 0x102   : > { %8927 = vmatpush1.bf16.msk.msra.mxu1 %vm8926_vm14, %v17311_v55  ;;  %vm12974_vm0 = vmpackc.low %vm3476_vm4, %vm3475_vm12  ;;  %vm3478_vm12 = vcmp.eq.s32.totalorder %v17677_v61, %v12791_v40  ;;  %v4029_v8 = vld [vmem:[%s10057_s12 + $0x170] sm:$0xff] }
 0x103   : > { %v2846_v62 = vadd.s32 %v9668_v48, %v2845_v6  ;;  %8929 = vmatprep.subr.msk.bf16.mxu1 %vm12934_vm7, %v17311_v55  ;;  %5061 = vmatmul.mubr.f32.gmra.mrb[4].mxu1 %v4001_v56  ;;  %v4014_v48 = vld [vmem:[%s10057_s12 + $0xf8] sm:$0xff]  ;;  %vm12998_vm7 = vmpackc.low %vm2238_vm15, %vm2237_vm11  ;;  %v17687_v6 = vld [vmem:[#allocation29_spill] sm:$0xff] }
 0x104   : > { %5335 = vmatmul.mubr.f32.gmra.mrb[4].mxu0 %v4005_v52  ;;  %5066 = vmatprep.mubr.f32.mxu1 %v4010_v10  ;;  %vm13017_vm4 = vmpackc.low %vm1618_vm9, %vm1617_vm6  ;;  %v4018_v56 = vld [vmem:[%s10057_s12 + $0x118] sm:$0xff]  ;;  %v17686_v52 = vld [vmem:[#allocation28_spill] sm:$0xff]  ;;  %vm2240_vm15 = vcmp.eq.s32.totalorder %v17687_v6, %v12759_v58  ;;  %vm1620_vm9 = vcmp.eq.s32.totalorder %v17687_v6, %v12882_v28 }
 0x105   : > { %v12958_v4 = vrot.slane %v2846_v62, %v17643_v23  ;;  %5340 = vmatprep.mubr.f32.mxu0 %v4014_v48  ;;  %vm2239_vm11 = vcmp.eq.s32.totalorder %v17686_v52, %v12759_v58  ;;  %v4022_v48 = vld [vmem:[%s10057_s12 + $0x138] sm:$0xff]  ;;  %vm1619_vm6 = vcmp.eq.s32.totalorder %v17686_v52, %v12882_v28  ;;  %v17706_v62 = vld [vmem:[#allocation36_spill] sm:$0xff] }
 0x106   : > { %8931 = vmatpush1.bf16.msk.msra.mxu1 %vm12969_vm8, %v17311_v55  ;;  %v4046_v10 = vld [vmem:[%s10057_s12 + $0x1f8] sm:$0xff] }
 0x107   : > { %vm2851_vm13 = vcmp.eq.s32.totalorder %v10083_v47, %v12958_v4  ;;  %vm2852_vm14 = vcmp.eq.s32.totalorder %v17660_v29, %v12958_v4  ;;  %vm2853_vm2 = vcmp.eq.s32.totalorder %v17668_v53, %v12958_v4  ;;  %vm2854_vm10 = vcmp.eq.s32.totalorder %v17669_v49, %v12958_v4  ;;  %5067 = vmatmul.mubr.f32.gmra.mrb[6].mxu1 %v4009_v37  ;;  %v4017_v37 = vld [vmem:[%s10057_s12 + $0x110] sm:$0xff] }
 0x108   : > { %vm9178_vm1 = vmpackc.low %vm2852_vm14, %vm2851_vm13  ;;  %vm2856_vm13 = vcmp.eq.s32.totalorder %v17671_v16, %v12958_v4  ;;  %5341 = vmatmul.mubr.f32.gmra.mrb[6].mxu0 %v4013_v60  ;;  %8933 = vmatprep.subr.msk.bf16.mxu1 %vm12998_vm7, %v17311_v55  ;;  %v4021_v60 = vld [vmem:[%s10057_s12 + $0x130] sm:$0xff]  ;;  %vm3480_vm7 = vcmp.eq.s32.totalorder %v17687_v6, %v12791_v40 }
 0x109   : > { %9179 = vmatpush1.bf16.msk.msra.mxu0 %vm9178_vm1, %v17311_v55  ;;  %vm13035_vm8 = vmpackc.low %vm2854_vm10, %vm2853_vm2  ;;  %5072 = vmatprep.mubr.f32.mxu1 %v4018_v56  ;;  %vm3479_vm10 = vcmp.eq.s32.totalorder %v17686_v52, %v12791_v40  ;;  %v4026_v56 = vld [vmem:[%s10057_s12 + $0x158] sm:$0xff]  ;;  %v4025_v16 = vld [vmem:[%s10057_s12 + $0x150] sm:$0xff] }
 0x10a   : > { %9181 = vmatprep.subr.msk.bf16.mxu0 %vm12948_vm3, %v17311_v55  ;;  %vm2855_vm3 = vcmp.eq.s32.totalorder %v17670_v30, %v12958_v4  ;;  %vm13057_vm14 = vmpackc.low %vm3478_vm12, %vm3477_vm5  ;;  %8935 = vmatpush1.bf16.msk.msra.mxu1 %vm13017_vm4, %v17311_v55  ;;  %vm2241_vm5 = vcmp.eq.s32.totalorder %v17696_v45, %v12759_v58  ;;  %vm2242_vm12 = vcmp.eq.s32.totalorder %v17697_v57, %v12759_v58  ;;  %v4050_v30 = vld [vmem:[%s10057_s12 + $0x218] sm:$0xff] }
 0x10b   : > { %vm13072_vm2 = vmpackc.low %vm2240_vm15, %vm2239_vm11  ;;  %5346 = vmatprep.mubr.f32.mxu0 %v4022_v48  ;;  %5073 = vmatmul.mubr.f32.gmra.mrb[8].mxu1 %v4017_v37  ;;  %v4030_v48 = vld [vmem:[%s10057_s12 + $0x178] sm:$0xff]  ;;  %vm1621_vm11 = vcmp.eq.s32.totalorder %v17696_v45, %v12882_v28  ;;  %vm1622_vm15 = vcmp.eq.s32.totalorder %v17697_v57, %v12882_v28  ;;  %v17714_v37 = vld [vmem:[#allocation40_spill] sm:$0xff] }
 0x10c   : > { %vm13089_vm1 = vmpackc.low %vm1620_vm9, %vm1619_vm6  ;;  %5347 = vmatmul.mubr.f32.gmra.mrb[8].mxu0 %v4021_v60  ;;  %8937 = vmatprep.subr.msk.bf16.mxu1 %vm13072_vm2, %v17311_v55  ;;  %v17715_v60 = vld [vmem:[#allocation41_spill] sm:$0xff] }
 0x10d   : > { %9183 = vmatpush1.bf16.msk.msra.mxu0 %vm13035_vm8, %v17311_v55  ;;  %vm13107_vm4 = vmpackc.low %vm2856_vm13, %vm2855_vm3  ;;  %vm2858_vm8 = vcmp.eq.s32.totalorder %v17677_v61, %v12958_v4  ;;  %5078 = vmatprep.mubr.f32.mxu1 %v4026_v56  ;;  %vm3481_vm3 = vcmp.eq.s32.totalorder %v17696_v45, %v12791_v40  ;;  %vm3482_vm13 = vcmp.eq.s32.totalorder %v17697_v57, %v12791_v40  ;;  %v17707_v56 = vld [vmem:[#allocation37_spill] sm:$0xff] }
 0x10e   : > { %9185 = vmatprep.subr.msk.bf16.mxu0 %vm12974_vm0, %v17311_v55  ;;  %vm2857_vm0 = vcmp.eq.s32.totalorder %v17676_v3, %v12958_v4  ;;  %vm13129_vm6 = vmpackc.low %vm3480_vm7, %vm3479_vm10  ;;  %8939 = vmatpush1.bf16.msk.msra.mxu1 %vm13089_vm1, %v17311_v55  ;;  %vm2243_vm10 = vcmp.eq.s32.totalorder %v17706_v62, %v12759_v58  ;;  %vm2244_vm7 = vcmp.eq.s32.totalorder %v17707_v56, %v12759_v58  ;;  %v4033_v61 = vld [vmem:[%s10057_s12 + $0x190] sm:$0xff]  ;;  %v17752_v3 = vld [vmem:[#allocation60_spill] sm:$0xff] }
 0x10f   : > { %vm13144_vm9 = vmpackc.low %vm2242_vm12, %vm2241_vm5  ;;  %5352 = vmatprep.mubr.f32.mxu0 %v4030_v48  ;;  %5079 = vmatmul.mubr.f32.gmra.mrb[10].mxu1 %v4025_v16  ;;  %v4038_v48 = vld [vmem:[%s10057_s12 + $0x1b8] sm:$0xff]  ;;  %vm1623_vm5 = vcmp.eq.s32.totalorder %v17706_v62, %v12882_v28  ;;  %vm1624_vm12 = vcmp.eq.s32.totalorder %v17707_v56, %v12882_v28 }
 0x110   : > { %vm13161_vm2 = vmpackc.low %vm1622_vm15, %vm1621_vm11  ;;  %5353 = vmatmul.mubr.f32.gmra.mrb[10].mxu0 %v4029_v8  ;;  %8941 = vmatprep.subr.msk.bf16.mxu1 %vm13144_vm9, %v17311_v55  ;;  %vm2861_vm15 = vcmp.eq.s32.totalorder %v17696_v45, %v12958_v4  ;;  %v4042_v8 = vld [vmem:[%s10057_s12 + $0x1d8] sm:$0xff]  ;;  %v17767_v45 = vld [vmem:[#allocation73_spill] sm:$0xff] }
 0x111   : > { %9187 = vmatpush1.bf16.msk.msra.mxu0 %vm13107_vm4, %v17311_v55  ;;  %vm13179_vm1 = vmpackc.low %vm2858_vm8, %vm2857_vm0  ;;  %vm2860_vm4 = vcmp.eq.s32.totalorder %v17687_v6, %v12958_v4  ;;  %vm2862_vm0 = vcmp.eq.s32.totalorder %v17697_v57, %v12958_v4  ;;  %5084 = vmatprep.mubr.f32.mxu1 %v4034_v7  ;;  %v4041_v6 = vld [vmem:[%s10057_s12 + $0x1d0] sm:$0xff]  ;;  %v4054_v16 = vld [vmem:[%s10057_s12 + $0x238] sm:$0xff] }
 0x112   : > { %9189 = vmatprep.subr.msk.bf16.mxu0 %vm13057_vm14, %v17311_v55  ;;  %vm2859_vm14 = vcmp.eq.s32.totalorder %v17686_v52, %v12958_v4  ;;  %vm13201_vm11 = vmpackc.low %vm3482_vm13, %vm3481_vm3  ;;  %8943 = vmatpush1.bf16.msk.msra.mxu1 %vm13161_vm2, %v17311_v55  ;;  %vm2245_vm3 = vcmp.eq.s32.totalorder %v17714_v37, %v12759_v58  ;;  %vm2246_vm13 = vcmp.eq.s32.totalorder %v17715_v60, %v12759_v58  ;;  %v4045_v57 = vld [vmem:[%s10057_s12 + $0x1f0] sm:$0xff]  ;;  %v4058_v7 = vld [vmem:[%s10057_s12 + $0x258] sm:$0xff] }
 0x113   : > { %vm8944_vm8 = vmpackc.low %vm2244_vm7, %vm2243_vm10  ;;  %5358 = vmatprep.mubr.f32.mxu0 %v4038_v48  ;;  %5085 = vmatmul.mubr.f32.gmra.mrb[12].mxu1 %v4033_v61  ;;  %vm1625_vm10 = vcmp.eq.s32.totalorder %v17714_v37, %v12882_v28  ;;  %vm1626_vm7 = vcmp.eq.s32.totalorder %v17715_v60, %v12882_v28  ;;  %v17722_v48 = vld [vmem:[#allocation44_spill] sm:$0xff]  ;;  %v17723_v61 = vld [vmem:[#allocation45_spill] sm:$0xff] }
 0x114   : > { %vm13229_vm9 = vmpackc.low %vm1624_vm12, %vm1623_vm5  ;;  %5359 = vmatmul.mubr.f32.gmra.mrb[12].mxu0 %v4037_v44  ;;  %8945 = vmatprep.subr.msk.bf16.mxu1 %vm8944_vm8, %v17311_v55  ;;  %vm3484_vm5 = vcmp.eq.s32.totalorder %v17707_v56, %v12791_v40  ;;  %vm2863_vm12 = vcmp.eq.s32.totalorder %v17706_v62, %v12958_v4  ;;  %vm2248_vm8 = vcmp.eq.s32.totalorder %v17723_v61, %v12759_v58  ;;  %v4066_v44 = vld [vmem:[%s10057_s12 + $0x298] sm:$0xff] }
 0x115   : > { %9191 = vmatpush1.bf16.msk.msra.mxu0 %vm13179_vm1, %v17311_v55  ;;  %vm13247_vm2 = vmpackc.low %vm2860_vm4, %vm2859_vm14  ;;  %vm3483_vm1 = vcmp.eq.s32.totalorder %v17706_v62, %v12791_v40  ;;  %vm2864_vm14 = vcmp.eq.s32.totalorder %v17707_v56, %v12958_v4  ;;  %5090 = vmatprep.mubr.f32.mxu1 %v4042_v8  ;;  %v4049_v8 = vld [vmem:[%s10057_s12 + $0x210] sm:$0xff]  ;;  %v4074_v52 = vld [vmem:[%s10057_s12 + $0x2d8] sm:$0xff] }
 0x116   : > { %9193 = vmatprep.subr.msk.bf16.mxu0 %vm13129_vm6, %v17311_v55  ;;  %vm13262_vm6 = vmpackc.low %vm2862_vm0, %vm2861_vm15  ;;  %8947 = vmatpush1.bf16.msk.msra.mxu1 %vm13229_vm9, %v17311_v55  ;;  %vm2247_vm0 = vcmp.eq.s32.totalorder %v17722_v48, %v12759_v58  ;;  %v4053_v62 = vld [vmem:[%s10057_s12 + $0x230] sm:$0xff]  ;;  %v9752_v56 = vld [vmem:[%s10057_s12 + $0x80] sm:$0xff] }
 0x117   : > { %vm8948_vm4 = vmpackc.low %vm2246_vm13, %vm2245_vm3  ;;  %5364 = vmatprep.mubr.f32.mxu0 %v4046_v10  ;;  %5091 = vmatmul.mubr.f32.gmra.mrb[14].mxu1 %v4041_v6  ;;  %vm1627_vm3 = vcmp.eq.s32.totalorder %v17722_v48, %v12882_v28  ;;  %vm1628_vm13 = vcmp.eq.s32.totalorder %v17723_v61, %v12882_v28  ;;  %v17730_v10 = vld [vmem:[#allocation48_spill] sm:$0xff]  ;;  %v17731_v6 = vld [vmem:[#allocation49_spill] sm:$0xff] }
 0x118   : > { %vm13295_vm15 = vmpackc.low %vm1626_vm7, %vm1625_vm10  ;;  %5365 = vmatmul.mubr.f32.gmra.mrb[14].mxu0 %v4045_v57  ;;  %8949 = vmatprep.subr.msk.bf16.mxu1 %vm8948_vm4, %v17311_v55  ;;  %vm3486_vm10 = vcmp.eq.s32.totalorder %v17715_v60, %v12791_v40  ;;  %vm2865_vm7 = vcmp.eq.s32.totalorder %v17714_v37, %v12958_v4  ;;  %vm2250_vm4 = vcmp.eq.s32.totalorder %v17731_v6, %v12759_v58  ;;  %v4062_v57 = vld [vmem:[%s10057_s12 + $0x278] sm:$0xff] }
 0x119   : > { %9195 = vmatpush1.bf16.msk.msra.mxu0 %vm13247_vm2, %v17311_v55  ;;  %vm13313_vm9 = vmpackc.low %vm3484_vm5, %vm3483_vm1  ;;  %vm3485_vm2 = vcmp.eq.s32.totalorder %v17714_v37, %v12791_v40  ;;  %vm2866_vm1 = vcmp.eq.s32.totalorder %v17715_v60, %v12958_v4  ;;  %5096 = vmatprep.mubr.f32.mxu1 %v4050_v30  ;;  %v4057_v30 = vld [vmem:[%s10057_s12 + $0x250] sm:$0xff]  ;;  %v17771_v60 = vld [vmem:[#allocation76_spill] sm:$0xff] }
 0x11a   : > { %9197 = vmatprep.subr.msk.bf16.mxu0 %vm13201_vm11, %v17311_v55  ;;  %vm13328_vm11 = vmpackc.low %vm2864_vm14, %vm2863_vm12  ;;  %8951 = vmatpush1.bf16.msk.msra.mxu1 %vm13295_vm15, %v17311_v55  ;;  %vm2249_vm14 = vcmp.eq.s32.totalorder %v17730_v10, %v12759_v58  ;;  %vm1629_vm15 = vcmp.eq.s32.totalorder %v17730_v10, %v12882_v28  ;;  %v4061_v37 = vld [vmem:[%s10057_s12 + $0x270] sm:$0xff] }
 0x11b   : > { %vm8952_vm5 = vmpackc.low %vm2248_vm8, %vm2247_vm0  ;;  %5370 = vmatprep.mubr.f32.mxu0 %v4054_v16  ;;  %5097 = vmatmul.mubr.f32.gmra.mrb[16].mxu1 %v4049_v8  ;;  %vm1630_vm0 = vcmp.eq.s32.totalorder %v17731_v6, %v12882_v28  ;;  %v17738_v16 = vld [vmem:[#allocation52_spill] sm:$0xff]  ;;  %v17739_v8 = vld [vmem:[#allocation53_spill] sm:$0xff] }
 0x11c   : > { %vm13361_vm12 = vmpackc.low %vm1628_vm13, %vm1627_vm3  ;;  %5371 = vmatmul.mubr.f32.gmra.mrb[16].mxu0 %v4053_v62  ;;  %8953 = vmatprep.subr.msk.bf16.mxu1 %vm8952_vm5, %v17311_v55  ;;  %vm3488_vm3 = vcmp.eq.s32.totalorder %v17723_v61, %v12791_v40  ;;  %vm2867_vm13 = vcmp.eq.s32.totalorder %v17722_v48, %v12958_v4  ;;  %vm2252_vm5 = vcmp.eq.s32.totalorder %v17739_v8, %v12759_v58  ;;  %v4070_v62 = vld [vmem:[%s10057_s12 + $0x2b8] sm:$0xff] }
 0x11d   : > { %9199 = vmatpush1.bf16.msk.msra.mxu0 %vm13262_vm6, %v17311_v55  ;;  %vm13379_vm6 = vmpackc.low %vm3486_vm10, %vm3485_vm2  ;;  %vm2868_vm2 = vcmp.eq.s32.totalorder %v17723_v61, %v12958_v4  ;;  %5102 = vmatprep.mubr.f32.mxu1 %v4058_v7  ;;  %v4065_v7 = vld [vmem:[%s10057_s12 + $0x290] sm:$0xff]  ;;  %v17785_v61 = vld [vmem:[#allocation84_spill] sm:$0xff] }
 0x11e   : > { %9201 = vmatprep.subr.msk.bf16.mxu0 %vm13313_vm9, %v17311_v55  ;;  %vm13394_vm8 = vmpackc.low %vm2866_vm1, %vm2865_vm7  ;;  %vm3487_vm9 = vcmp.eq.s32.totalorder %v17722_v48, %v12791_v40  ;;  %8955 = vmatpush1.bf16.msk.msra.mxu1 %vm13361_vm12, %v17311_v55  ;;  %vm2251_vm1 = vcmp.eq.s32.totalorder %v17738_v16, %v12759_v58  ;;  %vm1631_vm12 = vcmp.eq.s32.totalorder %v17738_v16, %v12882_v28  ;;  %v4069_v48 = vld [vmem:[%s10057_s12 + $0x2b0] sm:$0xff] }
 0x11f   : > { %vm8956_vm10 = vmpackc.low %vm2250_vm4, %vm2249_vm14  ;;  %5376 = vmatprep.mubr.f32.mxu0 %v4062_v57  ;;  %5103 = vmatmul.mubr.f32.gmra.mrb[18].mxu1 %v4057_v30  ;;  %vm1632_vm14 = vcmp.eq.s32.totalorder %v17739_v8, %v12882_v28  ;;  %v17746_v57 = vld [vmem:[#allocation56_spill] sm:$0xff]  ;;  %v17747_v30 = vld [vmem:[#allocation57_spill] sm:$0xff] }
 0x120   : > { %vm13427_vm7 = vmpackc.low %vm1630_vm0, %vm1629_vm15  ;;  %5377 = vmatmul.mubr.f32.gmra.mrb[18].mxu0 %v4061_v37  ;;  %8957 = vmatprep.subr.msk.bf16.mxu1 %vm8956_vm10, %v17311_v55  ;;  %vm3490_vm15 = vcmp.eq.s32.totalorder %v17731_v6, %v12791_v40  ;;  %vm2869_vm0 = vcmp.eq.s32.totalorder %v17730_v10, %v12958_v4  ;;  %vm2254_vm10 = vcmp.eq.s32.totalorder %v17747_v30, %v12759_v58  ;;  %v4078_v37 = vld [vmem:[%s10057_s12 + $0x2f8] sm:$0xff] }
 0x121   : > { %9203 = vmatpush1.bf16.msk.msra.mxu0 %vm13328_vm11, %v17311_v55  ;;  %vm13445_vm11 = vmpackc.low %vm3488_vm3, %vm3487_vm9  ;;  %vm2870_vm9 = vcmp.eq.s32.totalorder %v17731_v6, %v12958_v4  ;;  %5108 = vmatprep.mubr.f32.mxu1 %v4066_v44  ;;  %v4073_v44 = vld [vmem:[%s10057_s12 + $0x2d0] sm:$0xff]  ;;  %v17801_v6 = vld [vmem:[#allocation92_spill] sm:$0xff] }
 0x122   : > { %9205 = vmatprep.subr.msk.bf16.mxu0 %vm13379_vm6, %v17311_v55  ;;  %vm13460_vm4 = vmpackc.low %vm2868_vm2, %vm2867_vm13  ;;  %vm3489_vm6 = vcmp.eq.s32.totalorder %v17730_v10, %v12791_v40  ;;  %8959 = vmatpush1.bf16.msk.msra.mxu1 %vm13427_vm7, %v17311_v55  ;;  %vm2253_vm2 = vcmp.eq.s32.totalorder %v17746_v57, %v12759_v58  ;;  %vm1633_vm7 = vcmp.eq.s32.totalorder %v17746_v57, %v12882_v28  ;;  %v4077_v10 = vld [vmem:[%s10057_s12 + $0x2f0] sm:$0xff] }
 0x123   : > { %vm8960_vm3 = vmpackc.low %vm2252_vm5, %vm2251_vm1  ;;  %5382 = vmatprep.mubr.f32.mxu0 %v4070_v62  ;;  %5109 = vmatmul.mubr.f32.gmra.mrb[20].mxu1 %v4065_v7  ;;  %vm1634_vm1 = vcmp.eq.s32.totalorder %v17747_v30, %v12882_v28  ;;  %v17753_v62 = vld [vmem:[#allocation61_spill] sm:$0xff]  ;;  %v17758_v7 = vld [vmem:[#allocation64_spill] sm:$0xff] }
 0x124   : > { %vm13493_vm13 = vmpackc.low %vm1632_vm14, %vm1631_vm12  ;;  %5383 = vmatmul.mubr.f32.gmra.mrb[20].mxu0 %v4069_v48  ;;  %8961 = vmatprep.subr.msk.bf16.mxu1 %vm8960_vm3, %v17311_v55  ;;  %vm2256_vm12 = vcmp.eq.s32.totalorder %v17753_v62, %v12759_v58  ;;  %vm3491_vm14 = vcmp.eq.s32.totalorder %v17738_v16, %v12791_v40  ;;  %v17759_v48 = vld [vmem:[#allocation65_spill] sm:$0xff] }
 0x125   : > { %9207 = vmatpush1.bf16.msk.msra.mxu0 %vm13394_vm8, %v17311_v55  ;;  %vm13511_vm8 = vmpackc.low %vm3490_vm15, %vm3489_vm6  ;;  %vm3492_vm6 = vcmp.eq.s32.totalorder %v17739_v8, %v12791_v40  ;;  %5114 = vmatprep.mubr.f32.mxu1 %v4074_v52  ;;  %v17763_v52 = vld [vmem:[#allocation69_spill] sm:$0xff] }
 0x126   : > { %9209 = vmatprep.subr.msk.bf16.mxu0 %vm13445_vm11, %v17311_v55  ;;  %vm13526_vm5 = vmpackc.low %vm2870_vm9, %vm2869_vm0  ;;  %vm2255_vm11 = vcmp.eq.s32.totalorder %v17752_v3, %v12759_v58  ;;  %8963 = vmatpush1.bf16.msk.msra.mxu1 %vm13493_vm13, %v17311_v55  ;;  %vm2871_vm0 = vcmp.eq.s32.totalorder %v17738_v16, %v12958_v4  ;;  %vm2872_vm9 = vcmp.eq.s32.totalorder %v17739_v8, %v12958_v4  ;;  %v9747_v16 = vld [vmem:[%s10057_s12 + $0x8] sm:$0xff] }
 0x127   : > { %vm8964_vm15 = vmpackc.low %vm2254_vm10, %vm2253_vm2  ;;  %5388 = vmatprep.mubr.f32.mxu0 %v4078_v37  ;;  %5115 = vmatmul.mubr.f32.gmra.mrb[22].mxu1 %v4073_v44  ;;  %vm1635_vm13 = vcmp.eq.s32.totalorder %v17752_v3, %v12882_v28  ;;  %vm1636_vm2 = vcmp.eq.s32.totalorder %v17753_v62, %v12882_v28  ;;  %v17762_v8 = vld [vmem:[#allocation68_spill] sm:$0xff]  ;;  %v17768_v37 = vmov 0  ;;  %v17772_v44 = vld [vmem:[#allocation77_spill] sm:$0xff] }
 0x128   : > { %vm8966_vm3 = vmpackc.low %vm1634_vm1, %vm1633_vm7  ;;  %5389 = vmatmul.mubr.f32.gmra.mrb[22].mxu0 %v4077_v10  ;;  %8965 = vmatprep.subr.msk.bf16.mxu1 %vm8964_vm15, %v17311_v55  ;;  %vm2258_vm7 = vcmp.eq.s32.totalorder %v17759_v48, %v12759_v58  ;;  %v17777_v10 = vld [vmem:[#allocation81_spill] sm:$0xff] }
 0x129   : > { %9211 = vmatpush1.bf16.msk.msra.mxu0 %vm13460_vm4, %v17311_v55  ;;  %vm13569_vm4 = vmpackc.low %vm2256_vm12, %vm2255_vm11  ;;  %vm3493_vm11 = vcmp.eq.s32.totalorder %v17746_v57, %v12791_v40  ;;  %vm3494_vm12 = vcmp.eq.s32.totalorder %v17747_v30, %v12791_v40  ;;  %5459 = vmatprep.mubr.f32.mxu1 %v9747_v16 }
 0x12a   : > { %9213 = vmatprep.subr.msk.bf16.mxu0 %vm13511_vm8, %v17311_v55  ;;  %vm13583_vm10 = vmpackc.low %vm3492_vm6, %vm3491_vm14  ;;  %vm2257_vm8 = vcmp.eq.s32.totalorder %v17758_v7, %v12759_v58  ;;  %8967 = vmatpush1.bf16.msk.msra.mxu1 %vm8966_vm3, %v17311_v55  ;;  %vm2873_vm14 = vcmp.eq.s32.totalorder %v17746_v57, %v12958_v4  ;;  %vm2874_vm6 = vcmp.eq.s32.totalorder %v17747_v30, %v12958_v4  ;;  %v17764_v30 = vmov 0  ;;  %v17766_v57 = vld [vmem:[#allocation72_spill] sm:$0xff] }
 0x12b   : > { %vm13592_vm1 = vmpackc.low %vm2872_vm9, %vm2871_vm0  ;;  %8969 = vmatprep.subr.msk.bf16.mxu1 %vm13569_vm4, %v17311_v55  ;;  %vm1637_vm0 = vcmp.eq.s32.totalorder %v17758_v7, %v12882_v28  ;;  %vm1638_vm9 = vcmp.eq.s32.totalorder %v17759_v48, %v12882_v28  ;;  %6007 = vmatprep.mubr.f32.mxu0 %v9747_v16  ;;  %vm2259_vm4 = vcmp.eq.s32.totalorder %v17762_v8, %v12759_v58  ;;  %v17786_v16 = vld [vmem:[#allocation85_spill] sm:$0xff] }
 0x12c   : > { %vm8970_vm15 = vmpackc.low %vm1636_vm2, %vm1635_vm13  ;;  %vm2260_vm13 = vcmp.eq.s32.totalorder %v17763_v52, %v12759_v58 }
 0x12d   : > { %9215 = vmatpush1.bf16.msk.msra.mxu0 %vm13526_vm5, %v17311_v55  ;;  %vm8972_vm5 = vmpackc.low %vm2258_vm7, %vm2257_vm8  ;;  %vm3496_vm8 = vcmp.eq.s32.totalorder %v17753_v62, %v12791_v40  ;;  %vm2875_vm7 = vcmp.eq.s32.totalorder %v17752_v3, %v12958_v4 }
 0x12e   : > { %9217 = vmatprep.subr.msk.bf16.mxu0 %vm13583_vm10, %v17311_v55  ;;  %vm9220_vm3 = vmpackc.low %vm3494_vm12, %vm3493_vm11  ;;  %vm3495_vm10 = vcmp.eq.s32.totalorder %v17752_v3, %v12791_v40  ;;  %8971 = vmatpush1.bf16.msk.msra.mxu1 %vm8970_vm15, %v17311_v55  ;;  %vm2876_vm11 = vcmp.eq.s32.totalorder %v17753_v62, %v12958_v4  ;;  %vm1640_vm15 = vcmp.eq.s32.totalorder %v17763_v52, %v12882_v28  ;;  %v17773_v3 = vmov 0  ;;  %v17776_v62 = vld [vmem:[#allocation80_spill] sm:$0xff] }
 0x12f   : > { %vm13632_vm2 = vmpackc.low %vm2874_vm6, %vm2873_vm14  ;;  %8973 = vmatprep.subr.msk.bf16.mxu1 %vm8972_vm5, %v17311_v55  ;;  %vm1639_vm6 = vcmp.eq.s32.totalorder %v17762_v8, %v12882_v28  ;;  %vm2262_vm5 = vcmp.eq.s32.totalorder %v17767_v45, %v12759_v58 }
 0x130   : > { %v17765_v30 = vsel %vm13632_vm2, 4294967295, %v17764_v30  ;;  %vm8974_vm12 = vmpackc.low %vm1638_vm9, %vm1637_vm0  ;;  %vm3497_vm9 = vcmp.eq.s32.totalorder %v17758_v7, %v12791_v40 }
 0x131   : > { %9219 = vmatpush1.bf16.msk.msra.mxu0 %vm13592_vm1, %v17311_v55  ;;  %vm8976_vm14 = vmpackc.low %vm2260_vm13, %vm2259_vm4  ;;  %vm2261_vm1 = vcmp.eq.s32.totalorder %v17766_v57, %v12759_v58  ;;  %vm17770_vm4 = vnez %v17765_v30  ;;  %vm2877_vm13 = vcmp.eq.s32.totalorder %v17758_v7, %v12958_v4  ;;  %v9760_v30 = vld [vmem:[%s10057_s12 + $0x180] sm:$0xff]  ;;  %v9773_v7 = vld [vmem:[%s10057_s12 + $0x10] sm:$0xff] }
 0x132   : > { %9221 = vmatprep.subr.msk.bf16.mxu0 %vm9220_vm3, %v17311_v55  ;;  %vm9224_vm2 = vmpackc.low %vm3496_vm8, %vm3495_vm10  ;;  %vm3498_vm3 = vcmp.eq.s32.totalorder %v17759_v48, %v12791_v40  ;;  %8975 = vmatpush1.bf16.msk.msra.mxu1 %vm8974_vm12, %v17311_v55  ;;  %vm2878_vm10 = vcmp.eq.s32.totalorder %v17759_v48, %v12958_v4  ;;  %vm1642_vm12 = vcmp.eq.s32.totalorder %v17767_v45, %v12882_v28  ;;  %v9748_v48 = vld [vmem:[%s10057_s12] sm:$0xff] }
 0x133   : > { %vm13658_vm0 = vmpackc.low %vm2876_vm11, %vm2875_vm7  ;;  %8977 = vmatprep.subr.msk.bf16.mxu1 %vm8976_vm14, %v17311_v55  ;;  %vm1641_vm11 = vcmp.eq.s32.totalorder %v17766_v57, %v12882_v28  ;;  %vm2264_vm14 = vcmp.eq.s32.totalorder %v17772_v44, %v12759_v58 }
 0x134   : > { %v17769_v37 = vsel %vm13658_vm0, 4294967295, %v17768_v37  ;;  %vm8978_vm8 = vmpackc.low %vm1640_vm15, %vm1639_vm6  ;;  %vm3500_vm15 = vcmp.eq.s32.totalorder %v17763_v52, %v12791_v40 }
 0x135   : > { %9223 = vmatpush1.bf16.msk.msra.mxu0 %vm17770_vm4, %v17311_v55  ;;  %vm8980_vm7 = vmpackc.low %vm2262_vm5, %vm2261_vm1  ;;  %vm2263_vm4 = vcmp.eq.s32.totalorder %v17771_v60, %v12759_v58  ;;  %vm17775_vm1 = vnez %v17769_v37  ;;  %vm2879_vm5 = vcmp.eq.s32.totalorder %v17762_v8, %v12958_v4  ;;  %v17794_v37 = vld [vmem:[#allocation89_spill] sm:$0xff] }
 0x136   : > { %9225 = vmatprep.subr.msk.bf16.mxu0 %vm9224_vm2, %v17311_v55  ;;  %vm9228_vm0 = vmpackc.low %vm3498_vm3, %vm3497_vm9  ;;  %vm3499_vm2 = vcmp.eq.s32.totalorder %v17762_v8, %v12791_v40  ;;  %8979 = vmatpush1.bf16.msk.msra.mxu1 %vm8978_vm8, %v17311_v55  ;;  %vm2880_vm9 = vcmp.eq.s32.totalorder %v17763_v52, %v12958_v4  ;;  %vm1644_vm8 = vcmp.eq.s32.totalorder %v17772_v44, %v12882_v28  ;;  %v9749_v52 = vld [vmem:[%s10057_s12 + $0x48] sm:$0xff]  ;;  %v17967_v8 = vld [vmem:[#allocation51_spill] sm:$0xff] }
 0x137   : > { %vm13684_vm6 = vmpackc.low %vm2878_vm10, %vm2877_vm13  ;;  %8981 = vmatprep.subr.msk.bf16.mxu1 %vm8980_vm7, %v17311_v55  ;;  %vm1643_vm10 = vcmp.eq.s32.totalorder %v17771_v60, %v12882_v28  ;;  %vm2266_vm7 = vcmp.eq.s32.totalorder %v17777_v10, %v12759_v58 }
 0x138   : > { %v17774_v3 = vsel %vm13684_vm6, 4294967295, %v17773_v3  ;;  %vm8982_vm3 = vmpackc.low %vm1642_vm12, %vm1641_vm11  ;;  %vm3502_vm12 = vcmp.eq.s32.totalorder %v17767_v45, %v12791_v40 }
 0x139   : > { %9227 = vmatpush1.bf16.msk.msra.mxu0 %vm17775_vm1, %v17311_v55  ;;  %vm8984_vm13 = vmpackc.low %vm2264_vm14, %vm2263_vm4  ;;  %vm2265_vm1 = vcmp.eq.s32.totalorder %v17776_v62, %v12759_v58  ;;  %vm17780_vm4 = vnez %v17774_v3  ;;  %vm2881_vm14 = vcmp.eq.s32.totalorder %v17766_v57, %v12958_v4  ;;  %v9751_v3 = vld [vmem:[%s10057_s12 + $0x88] sm:$0xff] }
 0x13a   : > { %9229 = vmatprep.subr.msk.bf16.mxu0 %vm9228_vm0, %v17311_v55  ;;  %vm9232_vm6 = vmpackc.low %vm3500_vm15, %vm3499_vm2  ;;  %vm3501_vm0 = vcmp.eq.s32.totalorder %v17766_v57, %v12791_v40  ;;  %8983 = vmatpush1.bf16.msk.msra.mxu1 %vm8982_vm3, %v17311_v55  ;;  %vm2882_vm2 = vcmp.eq.s32.totalorder %v17767_v45, %v12958_v4  ;;  %vm1646_vm3 = vcmp.eq.s32.totalorder %v17777_v10, %v12882_v28  ;;  %v17793_v45 = vld [vmem:[#allocation88_spill] sm:$0xff]  ;;  %v9754_v57 = vld [vmem:[%s10057_s12 + $0xc0] sm:$0xff] }
 0x13b   : > { %vm13710_vm11 = vmpackc.low %vm2880_vm9, %vm2879_vm5  ;;  %8985 = vmatprep.subr.msk.bf16.mxu1 %vm8984_vm13, %v17311_v55  ;;  %vm1645_vm9 = vcmp.eq.s32.totalorder %v17776_v62, %v12882_v28  ;;  %vm2267_vm13 = vcmp.eq.s32.totalorder %v17785_v61, %v12759_v58 }
 0x13c   : > { %vm8986_vm15 = vmpackc.low %vm1644_vm8, %vm1643_vm10  ;;  %vm3503_vm8 = vcmp.eq.s32.totalorder %v17771_v60, %v12791_v40 }
 0x13d   : > { %9231 = vmatpush1.bf16.msk.msra.mxu0 %vm17780_vm4, %v17311_v55  ;;  %vm13728_vm5 = vmpackc.low %vm2266_vm7, %vm2265_vm1  ;;  %5460 = vmatmul.mubr.f32.vlgmr.msra.gmra.mrb[24].mxu1 %v9748_v48  ;;  %vm3504_vm1 = vcmp.eq.s32.totalorder %v17772_v44, %v12791_v40  ;;  %vm2883_vm7 = vcmp.eq.s32.totalorder %v17771_v60, %v12958_v4  ;;  %v9750_v60 = vld [vmem:[%s10057_s12 + $0x40] sm:$0xff] }
 0x13e   : > { %9233 = vmatprep.subr.msk.bf16.mxu0 %vm9232_vm6, %v17311_v55  ;;  %vm13736_vm4 = vmpackc.low %vm3502_vm12, %vm3501_vm0  ;;  %vm2268_vm6 = vcmp.eq.s32.totalorder %v17786_v16, %v12759_v58  ;;  %8987 = vmatpush1.bf16.msk.msra.mxu1 %vm8986_vm15, %v17311_v55  ;;  %vm2884_vm0 = vcmp.eq.s32.totalorder %v17772_v44, %v12958_v4 }
 0x13f   : > { %vm13745_vm10 = vmpackc.low %vm2882_vm2, %vm2881_vm14  ;;  %5465 = vmatprep.mubr.f32.mxu1 %v9749_v52  ;;  %8989 = vmatprep.subr.msk.bf16.mxu1 %vm13728_vm5, %v17311_v55  ;;  %vm1647_vm14 = vcmp.eq.s32.totalorder %v17785_v61, %v12882_v28  ;;  %vm1648_vm2 = vcmp.eq.s32.totalorder %v17786_v16, %v12882_v28  ;;  %vm2269_vm5 = vcmp.eq.s32.totalorder %v17793_v45, %v12759_v58 }
 0x140   : > { %vm8990_vm12 = vmpackc.low %vm1646_vm3, %vm1645_vm9  ;;  %vm2270_vm9 = vcmp.eq.s32.totalorder %v17794_v37, %v12759_v58 }
 0x141   : > { %9235 = vmatpush1.bf16.msk.msra.mxu0 %vm13710_vm11, %v17311_v55  ;;  %vm13774_vm11 = vmpackc.low %vm2268_vm6, %vm2267_vm13  ;;  %5466 = vmatmul.mubr.f32.gmra.mrb[26].mxu1 %v9750_v60  ;;  %vm3506_vm13 = vcmp.eq.s32.totalorder %v17777_v10, %v12791_v40  ;;  %vm2885_vm6 = vcmp.eq.s32.totalorder %v17776_v62, %v12958_v4 }
 0x142   : > { %9237 = vmatprep.subr.msk.bf16.mxu0 %vm13736_vm4, %v17311_v55  ;;  %vm13782_vm15 = vmpackc.low %vm3504_vm1, %vm3503_vm8  ;;  %vm3505_vm4 = vcmp.eq.s32.totalorder %v17776_v62, %v12791_v40  ;;  %8991 = vmatpush1.bf16.msk.msra.mxu1 %vm8990_vm12, %v17311_v55  ;;  %vm2886_vm8 = vcmp.eq.s32.totalorder %v17777_v10, %v12958_v4  ;;  %v9765_v10 = vld [vmem:[%s10057_s12 + $0x248] sm:$0xff]  ;;  %v17948_v62 = vld [vmem:[#allocation42_spill] sm:$0xff] }
 0x143   : > { %vm13791_vm3 = vmpackc.low %vm2884_vm0, %vm2883_vm7  ;;  %5471 = vmatprep.mubr.f32.mxu1 %v9751_v3  ;;  %8993 = vmatprep.subr.msk.bf16.mxu1 %vm13774_vm11, %v17311_v55  ;;  %vm1649_vm7 = vcmp.eq.s32.totalorder %v17793_v45, %v12882_v28  ;;  %vm1650_vm0 = vcmp.eq.s32.totalorder %v17794_v37, %v12882_v28  ;;  %vm2271_vm11 = vcmp.eq.s32.totalorder %v10988_v51, %v12759_v58 }
 0x144   : > { %vm8994_vm1 = vmpackc.low %vm1648_vm2, %vm1647_vm14  ;;  %vm2272_vm14 = vcmp.eq.s32.totalorder %v17801_v6, %v12759_v58 }
 0x145   : > { %9239 = vmatpush1.bf16.msk.msra.mxu0 %vm13745_vm10, %v17311_v55  ;;  %vm13826_vm10 = vmpackc.low %vm2270_vm9, %vm2269_vm5  ;;  %5472 = vmatmul.mubr.f32.gmra.mrb[28].mxu1 %v9752_v56  ;;  %vm3508_vm5 = vcmp.eq.s32.totalorder %v17786_v16, %v12791_v40  ;;  %vm2887_vm9 = vcmp.eq.s32.totalorder %v17785_v61, %v12958_v4 }
 0x146   : > { %9241 = vmatprep.subr.msk.bf16.mxu0 %vm13782_vm15, %v17311_v55  ;;  %vm13834_vm12 = vmpackc.low %vm3506_vm13, %vm3505_vm4  ;;  %vm3507_vm15 = vcmp.eq.s32.totalorder %v17785_v61, %v12791_v40  ;;  %8995 = vmatpush1.bf16.msk.msra.mxu1 %vm8994_vm1, %v17311_v55  ;;  %vm2888_vm4 = vcmp.eq.s32.totalorder %v17786_v16, %v12958_v4  ;;  %v9753_v16 = vld [vmem:[%s10057_s12 + $0xc8] sm:$0xff] }
 0x147   : > { %vm13843_vm2 = vmpackc.low %vm2886_vm8, %vm2885_vm6  ;;  %8997 = vmatprep.subr.msk.bf16.mxu1 %vm13826_vm10, %v17311_v55  ;;  %vm1651_vm6 = vcmp.eq.s32.totalorder %v10988_v51, %v12882_v28  ;;  %vm1652_vm8 = vcmp.eq.s32.totalorder %v17801_v6, %v12882_v28  ;;  %vm2273_vm10 = vcmp.eq.s32.totalorder %v11037_v0, %v12759_v58  ;;  %5477 = vmatprep.mubr.f32.mxu1 %v9753_v16  ;;  %v9767_v61 = vld [vmem:[%s10057_s12 + $0x288] sm:$0xff] }
 0x148   : > { %6008 = vmatmul.mubr.f32.vlgmr.msra.gmra.mrb[24].mxu0 %v9748_v48  ;;  %vm8998_vm13 = vmpackc.low %vm1650_vm0, %vm1649_vm7  ;;  %vm2274_vm7 = vcmp.eq.s32.totalorder %v11040_v59, %v12759_v58  ;;  %v9758_v48 = vld [vmem:[%s10057_s12 + $0x140] sm:$0xff] }
 0x149   : > { %9243 = vmatpush1.bf16.msk.msra.mxu0 %vm13791_vm3, %v17311_v55  ;;  %vm13874_vm3 = vmpackc.low %vm2272_vm14, %vm2271_vm11  ;;  %6013 = vmatprep.mubr.f32.mxu0 %v9749_v52  ;;  %vm3510_vm11 = vcmp.eq.s32.totalorder %v17794_v37, %v12791_v40  ;;  %vm2889_vm14 = vcmp.eq.s32.totalorder %v17793_v45, %v12958_v4  ;;  %v17842_v52 = vld [vmem:[#allocation105_spill] sm:$0xff] }
 0x14a   : > { %9245 = vmatprep.subr.msk.bf16.mxu0 %vm13834_vm12, %v17311_v55  ;;  %vm13882_vm1 = vmpackc.low %vm3508_vm5, %vm3507_vm15  ;;  %vm3509_vm12 = vcmp.eq.s32.totalorder %v17793_v45, %v12791_v40  ;;  %8999 = vmatpush1.bf16.msk.msra.mxu1 %vm8998_vm13, %v17311_v55  ;;  %vm2890_vm15 = vcmp.eq.s32.totalorder %v17794_v37, %v12958_v4  ;;  %v9761_v45 = vld [vmem:[%s10057_s12 + $0x1c8] sm:$0xff]  ;;  %v17851_v37 = vld [vmem:[#allocation109_spill] sm:$0xff] }
 0x14b   : > { %vm13891_vm0 = vmpackc.low %vm2888_vm4, %vm2887_vm9  ;;  %9001 = vmatprep.subr.msk.bf16.mxu1 %vm13874_vm3, %v17311_v55  ;;  %vm1653_vm9 = vcmp.eq.s32.totalorder %v11037_v0, %v12882_v28  ;;  %vm1654_vm4 = vcmp.eq.s32.totalorder %v11040_v59, %v12882_v28  ;;  %vm2275_vm3 = vcmp.eq.s32.totalorder %v11080_v15, %v12759_v58  ;;  %5478 = vmatmul.mubr.f32.gmra.mrb[30].mxu1 %v9754_v57 }
 0x14c   : > { %6014 = vmatmul.mubr.f32.gmra.mrb[26].mxu0 %v9750_v60  ;;  %vm9002_vm5 = vmpackc.low %vm1652_vm8, %vm1651_vm6  ;;  %vm2276_vm6 = vcmp.eq.s32.totalorder %v11083_v13, %v12759_v58  ;;  %v9755_v60 = vld [vmem:[%s10057_s12 + $0x108] sm:$0xff] }
 0x14d   : > { %9247 = vmatpush1.bf16.msk.msra.mxu0 %vm13843_vm2, %v17311_v55  ;;  %vm13922_vm2 = vmpackc.low %vm2274_vm7, %vm2273_vm10  ;;  %6019 = vmatprep.mubr.f32.mxu0 %v9751_v3  ;;  %vm3512_vm10 = vcmp.eq.s32.totalorder %v17801_v6, %v12791_v40  ;;  %vm2891_vm7 = vcmp.eq.s32.totalorder %v10988_v51, %v12958_v4  ;;  %v9756_v3 = vld [vmem:[%s10057_s12 + $0x100] sm:$0xff] }
 0x14e   : > { %9249 = vmatprep.subr.msk.bf16.mxu0 %vm13882_vm1, %v17311_v55  ;;  %vm13930_vm13 = vmpackc.low %vm3510_vm11, %vm3509_vm12  ;;  %vm3511_vm1 = vcmp.eq.s32.totalorder %v10988_v51, %v12791_v40  ;;  %9003 = vmatpush1.bf16.msk.msra.mxu1 %vm9002_vm5, %v17311_v55  ;;  %vm2892_vm12 = vcmp.eq.s32.totalorder %v17801_v6, %v12958_v4 }
 0x14f   : > { %vm13939_vm8 = vmpackc.low %vm2890_vm15, %vm2889_vm14  ;;  %9005 = vmatprep.subr.msk.bf16.mxu1 %vm13922_vm2, %v17311_v55  ;;  %vm1655_vm14 = vcmp.eq.s32.totalorder %v11080_v15, %v12882_v28  ;;  %vm1656_vm15 = vcmp.eq.s32.totalorder %v11083_v13, %v12882_v28  ;;  %vm2277_vm2 = vcmp.eq.s32.totalorder %v11129_v18, %v12759_v58  ;;  %5483 = vmatprep.mubr.f32.mxu1 %v9755_v60 }
 0x150   : > { %6020 = vmatmul.mubr.f32.gmra.mrb[28].mxu0 %v9752_v56  ;;  %vm9006_vm11 = vmpackc.low %vm1654_vm4, %vm1653_vm9  ;;  %vm2278_vm9 = vcmp.eq.s32.totalorder %v11132_v39, %v12759_v58  ;;  %5484 = vmatmul.mubr.f32.gmra.mrb[32].mxu1 %v9756_v3  ;;  %v9757_v56 = vld [vmem:[%s10057_s12 + $0x148] sm:$0xff] }
 0x151   : > { %9251 = vmatpush1.bf16.msk.msra.mxu0 %vm13891_vm0, %v17311_v55  ;;  %vm13970_vm0 = vmpackc.low %vm2276_vm6, %vm2275_vm3  ;;  %6025 = vmatprep.mubr.f32.mxu0 %v9753_v16  ;;  %vm3514_vm3 = vcmp.eq.s32.totalorder %v11040_v59, %v12791_v40  ;;  %vm2893_vm6 = vcmp.eq.s32.totalorder %v11037_v0, %v12958_v4  ;;  %v9759_v16 = vld [vmem:[%s10057_s12 + $0x188] sm:$0xff] }
 0x152   : > { %9253 = vmatprep.subr.msk.bf16.mxu0 %vm13930_vm13, %v17311_v55  ;;  %vm13978_vm5 = vmpackc.low %vm3512_vm10, %vm3511_vm1  ;;  %vm3513_vm13 = vcmp.eq.s32.totalorder %v11037_v0, %v12791_v40  ;;  %9007 = vmatpush1.bf16.msk.msra.mxu1 %vm9006_vm11, %v17311_v55  ;;  %vm2894_vm1 = vcmp.eq.s32.totalorder %v11040_v59, %v12958_v4  ;;  %v9763_v0 = vld [vmem:[%s10057_s12 + $0x208] sm:$0xff] }
 0x153   : > { %vm13987_vm4 = vmpackc.low %vm2892_vm12, %vm2891_vm7  ;;  %9009 = vmatprep.subr.msk.bf16.mxu1 %vm13970_vm0, %v17311_v55  ;;  %vm1657_vm7 = vcmp.eq.s32.totalorder %v11129_v18, %v12882_v28  ;;  %vm1658_vm12 = vcmp.eq.s32.totalorder %v11132_v39, %v12882_v28  ;;  %vm2279_vm0 = vcmp.eq.s32.totalorder %v11312_v63, %v12759_v58  ;;  %5489 = vmatprep.mubr.f32.mxu1 %v9757_v56 }
 0x154   : > { %6026 = vmatmul.mubr.f32.gmra.mrb[30].mxu0 %v9754_v57  ;;  %vm9010_vm10 = vmpackc.low %vm1656_vm15, %vm1655_vm14  ;;  %vm2280_vm14 = vcmp.eq.s32.totalorder %v11356_v14, %v12759_v58  ;;  %5490 = vmatmul.mubr.f32.gmra.mrb[34].mxu1 %v9758_v48  ;;  %v9770_v57 = vld [vmem:[%s10057_s12 + $0x2c0] sm:$0xff] }
 0x155   : > { %9255 = vmatpush1.bf16.msk.msra.mxu0 %vm13939_vm8, %v17311_v55  ;;  %vm14018_vm8 = vmpackc.low %vm2278_vm9, %vm2277_vm2  ;;  %6031 = vmatprep.mubr.f32.mxu0 %v9755_v60  ;;  %vm3516_vm2 = vcmp.eq.s32.totalorder %v11083_v13, %v12791_v40  ;;  %vm2895_vm9 = vcmp.eq.s32.totalorder %v11080_v15, %v12958_v4  ;;  %v9762_v60 = vld [vmem:[%s10057_s12 + $0x1c0] sm:$0xff] }
 0x156   : > { %9257 = vmatprep.subr.msk.bf16.mxu0 %vm13978_vm5, %v17311_v55  ;;  %vm14026_vm11 = vmpackc.low %vm3514_vm3, %vm3513_vm13  ;;  %vm3515_vm5 = vcmp.eq.s32.totalorder %v11080_v15, %v12791_v40  ;;  %9011 = vmatpush1.bf16.msk.msra.mxu1 %vm9010_vm10, %v17311_v55  ;;  %vm2896_vm13 = vcmp.eq.s32.totalorder %v11083_v13, %v12958_v4  ;;  %v9768_v15 = vld [vmem:[%s10057_s12 + $0x280] sm:$0xff]  ;;  %v9774_v13 = vld [vmem:[%s10057_s12 + $0x58] sm:$0xff] }
 0x157   : > { %vm14035_vm15 = vmpackc.low %vm2894_vm1, %vm2893_vm6  ;;  %9013 = vmatprep.subr.msk.bf16.mxu1 %vm14018_vm8, %v17311_v55  ;;  %vm1659_vm6 = vcmp.eq.s32.totalorder %v11312_v63, %v12882_v28  ;;  %vm1660_vm1 = vcmp.eq.s32.totalorder %v11356_v14, %v12882_v28  ;;  %vm2281_vm8 = vcmp.eq.s32.totalorder %v11386_v33, %v12759_v58  ;;  %5495 = vmatprep.mubr.f32.mxu1 %v9759_v16 }
 0x158   : > { %6032 = vmatmul.mubr.f32.gmra.mrb[32].mxu0 %v9756_v3  ;;  %vm14060_vm3 = vmpackc.low %vm1658_vm12, %vm1657_vm7  ;;  %vm2282_vm7 = vcmp.eq.s32.totalorder %v11389_v32, %v12759_v58  ;;  %5496 = vmatmul.mubr.f32.gmra.mrb[36].mxu1 %v9760_v30  ;;  %v9764_v3 = vld [vmem:[%s10057_s12 + $0x200] sm:$0xff] }
 0x159   : > { %9259 = vmatpush1.bf16.msk.msra.mxu0 %vm13987_vm4, %v17311_v55  ;;  %vm14070_vm4 = vmpackc.low %vm2280_vm14, %vm2279_vm0  ;;  %6037 = vmatprep.mubr.f32.mxu0 %v9757_v56  ;;  %vm3518_vm0 = vcmp.eq.s32.totalorder %v11132_v39, %v12791_v40  ;;  %vm2897_vm14 = vcmp.eq.s32.totalorder %v11129_v18, %v12958_v4  ;;  %v9766_v56 = vld [vmem:[%s10057_s12 + $0x240] sm:$0xff] }
 0x15a   : > { %9261 = vmatprep.subr.msk.bf16.mxu0 %vm14026_vm11, %v17311_v55  ;;  %vm14082_vm10 = vmpackc.low %vm3516_vm2, %vm3515_vm5  ;;  %vm3517_vm11 = vcmp.eq.s32.totalorder %v11129_v18, %v12791_v40  ;;  %9015 = vmatpush1.bf16.msk.msra.mxu1 %vm14060_vm3, %v17311_v55  ;;  %vm2898_vm5 = vcmp.eq.s32.totalorder %v11132_v39, %v12958_v4  ;;  %v17889_v39 = vld [vmem:[#allocation15_spill] sm:$0xff]  ;;  %v17924_v18 = vld [vmem:[#allocation30_spill] sm:$0xff] }
 0x15b   : > { %vm14097_vm12 = vmpackc.low %vm2896_vm13, %vm2895_vm9  ;;  %9017 = vmatprep.subr.msk.bf16.mxu1 %vm14070_vm4, %v17311_v55  ;;  %vm1661_vm9 = vcmp.eq.s32.totalorder %v11386_v33, %v12882_v28  ;;  %vm1662_vm13 = vcmp.eq.s32.totalorder %v11389_v32, %v12882_v28  ;;  %vm2283_vm4 = vcmp.eq.s32.totalorder %v11420_v25, %v12759_v58  ;;  %5501 = vmatprep.mubr.f32.mxu1 %v9761_v45 }
 0x15c   : > { %6038 = vmatmul.mubr.f32.gmra.mrb[34].mxu0 %v9758_v48  ;;  %vm14124_vm2 = vmpackc.low %vm1660_vm1, %vm1659_vm6  ;;  %vm2284_vm6 = vcmp.eq.s32.totalorder %v17842_v52, %v12759_v58  ;;  %5502 = vmatmul.mubr.f32.gmra.mrb[38].mxu1 %v9762_v60  ;;  %v17909_v48 = vld [vmem:[#allocation23_spill] sm:$0xff] }
 0x15d   : > { %9263 = vmatpush1.bf16.msk.msra.mxu0 %vm14035_vm15, %v17311_v55  ;;  %vm14137_vm15 = vmpackc.low %vm2282_vm7, %vm2281_vm8  ;;  %6043 = vmatprep.mubr.f32.mxu0 %v9759_v16  ;;  %vm3520_vm8 = vcmp.eq.s32.totalorder %v11356_v14, %v12791_v40  ;;  %vm2899_vm7 = vcmp.eq.s32.totalorder %v11312_v63, %v12958_v4  ;;  %v17917_v16 = vld [vmem:[#allocation27_spill] sm:$0xff] }
 0x15e   : > { %9265 = vmatprep.subr.msk.bf16.mxu0 %vm14082_vm10, %v17311_v55  ;;  %vm14149_vm3 = vmpackc.low %vm3518_vm0, %vm3517_vm11  ;;  %vm3519_vm10 = vcmp.eq.s32.totalorder %v11312_v63, %v12791_v40  ;;  %9019 = vmatpush1.bf16.msk.msra.mxu1 %vm14124_vm2, %v17311_v55  ;;  %vm2900_vm11 = vcmp.eq.s32.totalorder %v11356_v14, %v12958_v4  ;;  %v17898_v14 = vld [vmem:[#allocation18_spill] sm:$0xff]  ;;  %v17899_v63 = vld [vmem:[#allocation19_spill] sm:$0xff] }
 0x15f   : > { %vm14164_vm1 = vmpackc.low %vm2898_vm5, %vm2897_vm14  ;;  %9021 = vmatprep.subr.msk.bf16.mxu1 %vm14137_vm15, %v17311_v55  ;;  %vm1663_vm14 = vcmp.eq.s32.totalorder %v11420_v25, %v12882_v28  ;;  %vm1664_vm5 = vcmp.eq.s32.totalorder %v17842_v52, %v12882_v28  ;;  %vm2285_vm15 = vcmp.eq.s32.totalorder %v17546_v2, %v12759_v58  ;;  %5507 = vmatprep.mubr.f32.mxu1 %v9763_v0 }
 0x160   : > { %6044 = vmatmul.mubr.f32.gmra.mrb[36].mxu0 %v9760_v30  ;;  %vm14191_vm0 = vmpackc.low %vm1662_vm13, %vm1661_vm9  ;;  %vm2286_vm9 = vcmp.eq.s32.totalorder %v17851_v37, %v12759_v58  ;;  %5508 = vmatmul.mubr.f32.gmra.mrb[40].mxu1 %v9764_v3  ;;  %v18016_v30 = vld [vmem:[#allocation70_spill] sm:$0xff] }
 0x161   : > { %9267 = vmatpush1.bf16.msk.msra.mxu0 %vm14097_vm12, %v17311_v55  ;;  %vm14204_vm12 = vmpackc.low %vm2284_vm6, %vm2283_vm4  ;;  %6049 = vmatprep.mubr.f32.mxu0 %v9761_v45  ;;  %vm3522_vm4 = vcmp.eq.s32.totalorder %v11389_v32, %v12791_v40  ;;  %vm2901_vm6 = vcmp.eq.s32.totalorder %v11386_v33, %v12958_v4  ;;  %v9785_v45 = vld [vmem:[%s10057_s12 + $0x190] sm:$0xff] }
 0x162   : > { %9269 = vmatprep.subr.msk.bf16.mxu0 %vm14149_vm3, %v17311_v55  ;;  %vm14216_vm2 = vmpackc.low %vm3520_vm8, %vm3519_vm10  ;;  %vm3521_vm3 = vcmp.eq.s32.totalorder %v11386_v33, %v12791_v40  ;;  %9023 = vmatpush1.bf16.msk.msra.mxu1 %vm14191_vm0, %v17311_v55  ;;  %vm2902_vm10 = vcmp.eq.s32.totalorder %v11389_v32, %v12958_v4  ;;  %v14634_v33 = vld [vmem:[%s10018_s20] sm:$0x7] }
 0x163   : > { %vm14231_vm13 = vmpackc.low %vm2900_vm11, %vm2899_vm7  ;;  %9025 = vmatprep.subr.msk.bf16.mxu1 %vm14204_vm12, %v17311_v55  ;;  %vm1665_vm7 = vcmp.eq.s32.totalorder %v17546_v2, %v12882_v28  ;;  %vm1666_vm11 = vcmp.eq.s32.totalorder %v17851_v37, %v12882_v28  ;;  %vm2287_vm12 = vcmp.eq.s32.totalorder %v17566_v35, %v12759_v58  ;;  %5513 = vmatprep.mubr.f32.mxu1 %v9765_v10  ;;  %v17949_v32 = vld [vmem:[#allocation43_spill] sm:$0xff] }
 0x164   : > { %6050 = vmatmul.mubr.f32.gmra.mrb[38].mxu0 %v9762_v60  ;;  %vm14258_vm8 = vmpackc.low %vm1664_vm5, %vm1663_vm14  ;;  %vm2288_vm14 = vcmp.eq.s32.totalorder %v17567_v19, %v12759_v58  ;;  %5514 = vmatmul.mubr.f32.gmra.mrb[42].mxu1 %v9766_v56  ;;  %v17897_v60 = vld [vmem:[#allocation10_spill] sm:$0xff] }
 0x165   : > { %9271 = vmatpush1.bf16.msk.msra.mxu0 %vm14164_vm1, %v17311_v55  ;;  %vm14271_vm1 = vmpackc.low %vm2286_vm9, %vm2285_vm15  ;;  %6055 = vmatprep.mubr.f32.mxu0 %v9763_v0  ;;  %vm3524_vm15 = vcmp.eq.s32.totalorder %v17842_v52, %v12791_v40  ;;  %vm2903_vm9 = vcmp.eq.s32.totalorder %v11420_v25, %v12958_v4  ;;  %v18034_v0 = vld [vmem:[#allocation79_spill] sm:$0xff] }
 0x166   : > { %9273 = vmatprep.subr.msk.bf16.mxu0 %vm14216_vm2, %v17311_v55  ;;  %vm14283_vm0 = vmpackc.low %vm3522_vm4, %vm3521_vm3  ;;  %vm3523_vm2 = vcmp.eq.s32.totalorder %v11420_v25, %v12791_v40  ;;  %9027 = vmatpush1.bf16.msk.msra.mxu1 %vm14258_vm8, %v17311_v55  ;;  %vm2904_vm3 = vcmp.eq.s32.totalorder %v17842_v52, %v12958_v4  ;;  %v9769_v52 = vld [vmem:[%s10057_s12 + $0x2c8] sm:$0xff]  ;;  %v17908_v25 = vld [vmem:[#allocation22_spill] sm:$0xff] }
 0x167   : > { %vm14298_vm5 = vmpackc.low %vm2902_vm10, %vm2901_vm6  ;;  %9029 = vmatprep.subr.msk.bf16.mxu1 %vm14271_vm1, %v17311_v55  ;;  %vm1667_vm6 = vcmp.eq.s32.totalorder %v17566_v35, %v12882_v28  ;;  %vm1668_vm10 = vcmp.eq.s32.totalorder %v17567_v19, %v12882_v28  ;;  %vm2289_vm1 = vcmp.eq.s32.totalorder %v17585_v38, %v12759_v58  ;;  %5519 = vmatprep.mubr.f32.mxu1 %v9767_v61 }
 0x168   : > { %6056 = vmatmul.mubr.f32.gmra.mrb[40].mxu0 %v9764_v3  ;;  %vm14325_vm4 = vmpackc.low %vm1666_vm11, %vm1665_vm7  ;;  %vm2290_vm7 = vcmp.eq.s32.totalorder %v17586_v9, %v12759_v58  ;;  %5520 = vmatmul.mubr.f32.gmra.mrb[44].mxu1 %v9768_v15 }
 0x169   : > { %9275 = vmatpush1.bf16.msk.msra.mxu0 %vm14231_vm13, %v17311_v55  ;;  %vm14338_vm13 = vmpackc.low %vm2288_vm14, %vm2287_vm12  ;;  %6061 = vmatprep.mubr.f32.mxu0 %v9765_v10  ;;  %vm3526_vm12 = vcmp.eq.s32.totalorder %v17851_v37, %v12791_v40  ;;  %vm2905_vm14 = vcmp.eq.s32.totalorder %v17546_v2, %v12958_v4 }
 0x16a   : > { %9277 = vmatprep.subr.msk.bf16.mxu0 %vm14283_vm0, %v17311_v55  ;;  %vm14350_vm8 = vmpackc.low %vm3524_vm15, %vm3523_vm2  ;;  %vm3525_vm0 = vcmp.eq.s32.totalorder %v17546_v2, %v12791_v40  ;;  %9031 = vmatpush1.bf16.msk.msra.mxu1 %vm14325_vm4, %v17311_v55  ;;  %vm2906_vm2 = vcmp.eq.s32.totalorder %v17851_v37, %v12958_v4  ;;  %v17896_v37 = vstv %s10021_s22  ;;  %v9775_v2 = vld [vmem:[%s10057_s12 + $0x50] sm:$0xff]  ;;  %s270_s22 = scalar_lea.vmem %s16953_s4, %s7100_s7 }
 0x16b   : > { %vm14365_vm11 = vmpackc.low %vm2904_vm3, %vm2903_vm9  ;;  %9033 = vmatprep.subr.msk.bf16.mxu1 %vm14338_vm13, %v17311_v55  ;;  %vm1669_vm9 = vcmp.eq.s32.totalorder %v17585_v38, %v12882_v28  ;;  %vm1670_vm3 = vcmp.eq.s32.totalorder %v17586_v9, %v12882_v28  ;;  %vm2291_vm13 = vcmp.eq.s32.totalorder %v17603_v17, %v12759_v58  ;;  %5525 = vmatprep.mubr.f32.mxu1 %v9769_v52 }
 0x16c   : > { %6062 = vmatmul.mubr.f32.gmra.mrb[42].mxu0 %v9766_v56  ;;  %vm14392_vm15 = vmpackc.low %vm1668_vm10, %vm1667_vm6  ;;  %vm2292_vm6 = vcmp.eq.s32.totalorder %v11968_v22, %v12759_v58  ;;  %5526 = vmatmul.mubr.f32.gmra.mrb[46].mxu1 %v9770_v57  ;;  %v1014_v44 = vmul.f32 %v17897_v60, %v17896_v37  ;;  %v17986_v60 = vld [vmem:[#allocation58_spill] sm:$0xff]  ;;  %v18030_v37 = vstv %s11944_s5 }
 0x16d   : > { %9279 = vmatpush1.bf16.msk.msra.mxu0 %vm14298_vm5, %v17311_v55  ;;  %vm14405_vm5 = vmpackc.low %vm2290_vm7, %vm2289_vm1  ;;  %6067 = vmatprep.mubr.f32.mxu0 %v9767_v61  ;;  %vm3528_vm1 = vcmp.eq.s32.totalorder %v17567_v19, %v12791_v40  ;;  %vm2907_vm7 = vcmp.eq.s32.totalorder %v17566_v35, %v12958_v4  ;;  %v9781_v61 = vld [vmem:[%s10057_s12 + $0x110] sm:$0xff] }
 0x16e   : > { %9281 = vmatprep.subr.msk.bf16.mxu0 %vm14350_vm8, %v17311_v55  ;;  %vm14417_vm4 = vmpackc.low %vm3526_vm12, %vm3525_vm0  ;;  %vm3527_vm8 = vcmp.eq.s32.totalorder %v17566_v35, %v12791_v40  ;;  %9035 = vmatpush1.bf16.msk.msra.mxu1 %vm14392_vm15, %v17311_v55  ;;  %vm2908_vm0 = vcmp.eq.s32.totalorder %v17567_v19, %v12958_v4  ;;  %v9771_v19 = vld [vmem:[%s10057_s12 + $0x18] sm:$0xff]  ;;  %v1016_v3 = vrot.slane %v1014_v44, 6  ;;  %v17925_v35 = vld [vmem:[#allocation31_spill] sm:$0xff] }
 0x16f   : > { %vm14432_vm10 = vmpackc.low %vm2906_vm2, %vm2905_vm14  ;;  %9037 = vmatprep.subr.msk.bf16.mxu1 %vm14405_vm5, %v17311_v55  ;;  %vm1671_vm14 = vcmp.eq.s32.totalorder %v17603_v17, %v12882_v28  ;;  %vm1672_vm2 = vcmp.eq.s32.totalorder %v11968_v22, %v12882_v28  ;;  %vm2293_vm5 = vcmp.eq.s32.totalorder %v12048_v11, %v12759_v58  ;;  %5596 = vmatprep.mubr.f32.mxu1 %v9771_v19  ;;  %v17940_v44 = vld [vmem:[#allocation38_spill] sm:$0xff] }
 0x170   : > { %6068 = vmatmul.mubr.f32.gmra.mrb[44].mxu0 %v9768_v15  ;;  %vm14459_vm12 = vmpackc.low %vm1670_vm3, %vm1669_vm9  ;;  %vm2294_vm9 = vcmp.eq.s32.totalorder %v12086_v42, %v12759_v58  ;;  %v1018_v6 = vsub.f32 %v14634_v33, %v1016_v3  ;;  %v17916_v15 = vld [vmem:[#allocation26_spill] sm:$0xff] }
 0x171   : > { %9283 = vmatpush1.bf16.msk.msra.mxu0 %vm14365_vm11, %v17311_v55  ;;  %vm14472_vm11 = vmpackc.low %vm2292_vm6, %vm2291_vm13  ;;  %6073 = vmatprep.mubr.f32.mxu0 %v9769_v52  ;;  %vm3530_vm13 = vcmp.eq.s32.totalorder %v17586_v9, %v12791_v40  ;;  %vm2909_vm6 = vcmp.eq.s32.totalorder %v17585_v38, %v12958_v4  ;;  %v9776_v52 = vld [vmem:[%s10057_s12 + $0x98] sm:$0xff] }
 0x172   : > { %9285 = vmatprep.subr.msk.bf16.mxu0 %vm14417_vm4, %v17311_v55  ;;  %vm14484_vm15 = vmpackc.low %vm3528_vm1, %vm3527_vm8  ;;  %vm3529_vm4 = vcmp.eq.s32.totalorder %v17585_v38, %v12791_v40  ;;  %9039 = vmatpush1.bf16.msk.msra.mxu1 %vm14459_vm12, %v17311_v55  ;;  %vm2910_vm8 = vcmp.eq.s32.totalorder %v17586_v9, %v12958_v4  ;;  %v17888_v9 = vld [vmem:[#allocation14_spill] sm:$0xff]  ;;  %1021 = vst [vmem:[#allocation3 + $0x4] sm:$0x4] %v1018_v6  ;;  %v9789_v6 = vld [vmem:[%s10057_s12 + $0x210] sm:$0xff] }
 0x173   : > { %vm14499_vm3 = vmpackc.low %vm2908_vm0, %vm2907_vm7  ;;  %9041 = vmatprep.subr.msk.bf16.mxu1 %vm14472_vm11, %v17311_v55  ;;  %vm1673_vm7 = vcmp.eq.s32.totalorder %v12048_v11, %v12882_v28  ;;  %vm1674_vm0 = vcmp.eq.s32.totalorder %v12086_v42, %v12882_v28  ;;  %vm2295_vm11 = vcmp.eq.s32.totalorder %v17888_v9, %v12759_v58  ;;  %v17932_v38 = vld [vmem:[#allocation34_spill] sm:$0xff] }
 0x174   : > { %6074 = vmatmul.mubr.f32.gmra.mrb[46].mxu0 %v9770_v57  ;;  %vm9042_vm1 = vmpackc.low %vm1672_vm2, %vm1671_vm14  ;;  %vm2296_vm14 = vcmp.eq.s32.totalorder %v17889_v39, %v12759_v58  ;;  %v9788_v3 = vld [vmem:[%s10057_s12 + $0x218] sm:$0xff]  ;;  %v18017_v57 = vld [vmem:[#allocation71_spill] sm:$0xff] }
 0x175   : > { %9287 = vmatpush1.bf16.msk.msra.mxu0 %vm14432_vm10, %v17311_v55  ;;  %vm14535_vm10 = vmpackc.low %vm2294_vm9, %vm2293_vm5  ;;  %6144 = vmatprep.mubr.f32.mxu0 %v9771_v19  ;;  %vm3532_vm5 = vcmp.eq.s32.totalorder %v11968_v22, %v12791_v40  ;;  %vm2911_vm9 = vcmp.eq.s32.totalorder %v17603_v17, %v12958_v4  ;;  %v9777_v19 = vld [vmem:[%s10057_s12 + $0x90] sm:$0xff] }
 0x176   : > { %9289 = vmatprep.subr.msk.bf16.mxu0 %vm14484_vm15, %v17311_v55  ;;  %vm9292_vm12 = vmpackc.low %vm3530_vm13, %vm3529_vm4  ;;  %vm3531_vm15 = vcmp.eq.s32.totalorder %v17603_v17, %v12791_v40  ;;  %9043 = vmatpush1.bf16.msk.msra.mxu1 %vm9042_vm1, %v17311_v55  ;;  %vm2912_vm4 = vcmp.eq.s32.totalorder %v11968_v22, %v12958_v4  ;;  %v17894_v22 = vstv %s10041_s29  ;;  %v17895_v17 = vld [vmem:[#allocation11_spill] sm:$0xff] }
 0x177   : > { %vm14551_vm2 = vmpackc.low %vm2910_vm8, %vm2909_vm6  ;;  %9045 = vmatprep.subr.msk.bf16.mxu1 %vm14535_vm10, %v17311_v55  ;;  %vm1675_vm6 = vcmp.eq.s32.totalorder %v17888_v9, %v12882_v28  ;;  %vm1676_vm8 = vcmp.eq.s32.totalorder %v17889_v39, %v12882_v28  ;;  %v442_v51 = vmul.f32 %v17895_v17, %v17894_v22  ;;  %vm2297_vm10 = vcmp.eq.s32.totalorder %v17898_v14, %v12759_v58  ;;  %v17933_v22 = vld [vmem:[#allocation35_spill] sm:$0xff]  ;;  %v9778_v17 = vld [vmem:[%s10057_s12 + $0xd8] sm:$0xff] }
 0x178   : > { %vm9046_vm13 = vmpackc.low %vm1674_vm0, %vm1673_vm7  ;;  %vm2298_vm7 = vcmp.eq.s32.totalorder %v17899_v63, %v12759_v58 }
 0x179   : > { %9291 = vmatpush1.bf16.msk.msra.mxu0 %vm14499_vm3, %v17311_v55  ;;  %vm14577_vm3 = vmpackc.low %vm2296_vm14, %vm2295_vm11  ;;  %vm3534_vm11 = vcmp.eq.s32.totalorder %v12086_v42, %v12791_v40  ;;  %v444_v59 = vrot.slane %v442_v51, 6  ;;  %vm2913_vm14 = vcmp.eq.s32.totalorder %v12048_v11, %v12958_v4  ;;  %v9786_v51 = vld [vmem:[%s10057_s12 + $0x1d8] sm:$0xff]  ;;  %v6572_v56 = vld [vmem:[#allocation3 + $0x6] sm:$0x1] }
 0x17a   : > { %9293 = vmatprep.subr.msk.bf16.mxu0 %vm9292_vm12, %v17311_v55  ;;  %vm9296_vm1 = vmpackc.low %vm3532_vm5, %vm3531_vm15  ;;  %vm3533_vm12 = vcmp.eq.s32.totalorder %v12048_v11, %v12791_v40  ;;  %9047 = vmatpush1.bf16.msk.msra.mxu1 %vm9046_vm13, %v17311_v55  ;;  %vm2914_vm15 = vcmp.eq.s32.totalorder %v12086_v42, %v12958_v4  ;;  %v18007_v11 = vld [vmem:[#allocation67_spill] sm:$0xff]  ;;  %v9791_v42 = vld [vmem:[%s10057_s12 + $0x250] sm:$0xff] }
 0x17b   : > { %vm14595_vm0 = vmpackc.low %vm2912_vm4, %vm2911_vm9  ;;  %9049 = vmatprep.subr.msk.bf16.mxu1 %vm14577_vm3, %v17311_v55  ;;  %vm1677_vm9 = vcmp.eq.s32.totalorder %v17898_v14, %v12882_v28  ;;  %vm1678_vm4 = vcmp.eq.s32.totalorder %v17899_v63, %v12882_v28  ;;  %v446_v10 = vsub.f32 %v14634_v33, %v444_v59  ;;  %vm2299_vm3 = vcmp.eq.s32.totalorder %v17908_v25, %v12759_v58 }
 0x17c   : > { %vm14620_vm5 = vmpackc.low %vm1676_vm8, %vm1675_vm6  ;;  %vm2300_vm6 = vcmp.eq.s32.totalorder %v17909_v48, %v12759_v58 }
 0x17d   : > { %9295 = vmatpush1.bf16.msk.msra.mxu0 %vm14551_vm2, %v17311_v55  ;;  %vm14625_vm2 = vmpackc.low %vm2298_vm7, %vm2297_vm10  ;;  %5597 = vmatmul.mubr.f32.vlgmr.msra.gmra.mrb[24].mxu1 %v9773_v7  ;;  %vm3536_vm10 = vcmp.eq.s32.totalorder %v17889_v39, %v12791_v40  ;;  %449 = vst [vmem:[#allocation3] sm:$0x4] %v446_v10  ;;  %vm2915_vm7 = vcmp.eq.s32.totalorder %v17888_v9, %v12958_v4  ;;  %v9780_v10 = vld [vmem:[%s10057_s12 + $0x118] sm:$0xff] }
 0x17e   : > { %9297 = vmatprep.subr.msk.bf16.mxu0 %vm9296_vm1, %v17311_v55  ;;  %vm14644_vm13 = vmpackc.low %vm3534_vm11, %vm3533_vm12  ;;  %vm3535_vm1 = vcmp.eq.s32.totalorder %v17888_v9, %v12791_v40  ;;  %9051 = vmatpush1.bf16.msk.msra.mxu1 %vm14620_vm5, %v17311_v55  ;;  %vm2916_vm12 = vcmp.eq.s32.totalorder %v17889_v39, %v12958_v4  ;;  %v17976_v9 = vld [vmem:[#allocation54_spill] sm:$0xff]  ;;  %v17977_v39 = vld [vmem:[#allocation55_spill] sm:$0xff] }
 0x17f   : > { %vm14659_vm8 = vmpackc.low %vm2914_vm15, %vm2913_vm14  ;;  %5602 = vmatprep.mubr.f32.mxu1 %v9774_v13  ;;  %9053 = vmatprep.subr.msk.bf16.mxu1 %vm14625_vm2, %v17311_v55  ;;  %vm1679_vm14 = vcmp.eq.s32.totalorder %v17908_v25, %v12882_v28  ;;  %vm1680_vm15 = vcmp.eq.s32.totalorder %v17909_v48, %v12882_v28  ;;  %vm2301_vm2 = vcmp.eq.s32.totalorder %v17916_v15, %v12759_v58 }
 0x180   : > { %vm9054_vm11 = vmpackc.low %vm1678_vm4, %vm1677_vm9  ;;  %vm2302_vm9 = vcmp.eq.s32.totalorder %v17917_v16, %v12759_v58 }
 0x181   : > { %9299 = vmatpush1.bf16.msk.msra.mxu0 %vm14595_vm0, %v17311_v55  ;;  %vm14696_vm0 = vmpackc.low %vm2300_vm6, %vm2299_vm3  ;;  %5603 = vmatmul.mubr.f32.gmra.mrb[26].mxu1 %v9775_v2  ;;  %vm3538_vm3 = vcmp.eq.s32.totalorder %v17899_v63, %v12791_v40  ;;  %vm2917_vm6 = vcmp.eq.s32.totalorder %v17898_v14, %v12958_v4 }
 0x182   : > { %9301 = vmatprep.subr.msk.bf16.mxu0 %vm14644_vm13, %v17311_v55  ;;  %vm14710_vm5 = vmpackc.low %vm3536_vm10, %vm3535_vm1  ;;  %vm3537_vm13 = vcmp.eq.s32.totalorder %v17898_v14, %v12791_v40  ;;  %9055 = vmatpush1.bf16.msk.msra.mxu1 %vm9054_vm11, %v17311_v55  ;;  %vm2918_vm1 = vcmp.eq.s32.totalorder %v17899_v63, %v12958_v4  ;;  %v17941_v14 = vld [vmem:[#allocation39_spill] sm:$0xff]  ;;  %v9779_v63 = vld [vmem:[%s10057_s12 + $0xd0] sm:$0xff] }
 0x183   : > { %vm14719_vm4 = vmpackc.low %vm2916_vm12, %vm2915_vm7  ;;  %5608 = vmatprep.mubr.f32.mxu1 %v9776_v52  ;;  %9057 = vmatprep.subr.msk.bf16.mxu1 %vm14696_vm0, %v17311_v55  ;;  %vm1681_vm7 = vcmp.eq.s32.totalorder %v17916_v15, %v12882_v28  ;;  %vm1682_vm12 = vcmp.eq.s32.totalorder %v17917_v16, %v12882_v28  ;;  %vm2303_vm0 = vcmp.eq.s32.totalorder %v17924_v18, %v12759_v58 }
 0x184   : > { %vm9058_vm10 = vmpackc.low %vm1680_vm15, %vm1679_vm14  ;;  %vm2304_vm14 = vcmp.eq.s32.totalorder %v17925_v35, %v12759_v58 }
 0x185   : > { %9303 = vmatpush1.bf16.msk.msra.mxu0 %vm14659_vm8, %v17311_v55  ;;  %vm14754_vm8 = vmpackc.low %vm2302_vm9, %vm2301_vm2  ;;  %5609 = vmatmul.mubr.f32.gmra.mrb[28].mxu1 %v9777_v19  ;;  %vm3540_vm2 = vcmp.eq.s32.totalorder %v17909_v48, %v12791_v40  ;;  %vm2919_vm9 = vcmp.eq.s32.totalorder %v17908_v25, %v12958_v4 }
 0x186   : > { %9305 = vmatprep.subr.msk.bf16.mxu0 %vm14710_vm5, %v17311_v55  ;;  %vm14762_vm11 = vmpackc.low %vm3538_vm3, %vm3537_vm13  ;;  %vm3539_vm5 = vcmp.eq.s32.totalorder %v17908_v25, %v12791_v40  ;;  %9059 = vmatpush1.bf16.msk.msra.mxu1 %vm9058_vm10, %v17311_v55  ;;  %vm2920_vm13 = vcmp.eq.s32.totalorder %v17909_v48, %v12958_v4  ;;  %v17956_v25 = vld [vmem:[#allocation46_spill] sm:$0xff]  ;;  %v17957_v48 = vld [vmem:[#allocation47_spill] sm:$0xff] }
 0x187   : > { %vm14771_vm15 = vmpackc.low %vm2918_vm1, %vm2917_vm6  ;;  %9061 = vmatprep.subr.msk.bf16.mxu1 %vm14754_vm8, %v17311_v55  ;;  %vm1683_vm6 = vcmp.eq.s32.totalorder %v17924_v18, %v12882_v28  ;;  %vm1684_vm1 = vcmp.eq.s32.totalorder %v17925_v35, %v12882_v28  ;;  %vm2305_vm8 = vcmp.eq.s32.totalorder %v17932_v38, %v12759_v58  ;;  %5614 = vmatprep.mubr.f32.mxu1 %v9778_v17 }
 0x188   : > { %6145 = vmatmul.mubr.f32.vlgmr.msra.gmra.mrb[24].mxu0 %v9773_v7  ;;  %vm9062_vm3 = vmpackc.low %vm1682_vm12, %vm1681_vm7  ;;  %vm2306_vm7 = vcmp.eq.s32.totalorder %v17933_v22, %v12759_v58 }
 0x189   : > { %9307 = vmatpush1.bf16.msk.msra.mxu0 %vm14719_vm4, %v17311_v55  ;;  %vm14802_vm4 = vmpackc.low %vm2304_vm14, %vm2303_vm0  ;;  %6150 = vmatprep.mubr.f32.mxu0 %v9774_v13  ;;  %vm3542_vm0 = vcmp.eq.s32.totalorder %v17917_v16, %v12791_v40  ;;  %vm2921_vm14 = vcmp.eq.s32.totalorder %v17916_v15, %v12958_v4  ;;  %v18006_v13 = vld [vmem:[#allocation66_spill] sm:$0xff] }
 0x18a   : > { %9309 = vmatprep.subr.msk.bf16.mxu0 %vm14762_vm11, %v17311_v55  ;;  %vm14810_vm10 = vmpackc.low %vm3540_vm2, %vm3539_vm5  ;;  %vm3541_vm11 = vcmp.eq.s32.totalorder %v17916_v15, %v12791_v40  ;;  %9063 = vmatpush1.bf16.msk.msra.mxu1 %vm9062_vm3, %v17311_v55  ;;  %vm2922_vm5 = vcmp.eq.s32.totalorder %v17917_v16, %v12958_v4  ;;  %v9782_v15 = vld [vmem:[%s10057_s12 + $0x158] sm:$0xff] }
 0x18b   : > { %vm14819_vm12 = vmpackc.low %vm2920_vm13, %vm2919_vm9  ;;  %9065 = vmatprep.subr.msk.bf16.mxu1 %vm14802_vm4, %v17311_v55  ;;  %vm1685_vm9 = vcmp.eq.s32.totalorder %v17932_v38, %v12882_v28  ;;  %vm1686_vm13 = vcmp.eq.s32.totalorder %v17933_v22, %v12882_v28  ;;  %vm2307_vm4 = vcmp.eq.s32.totalorder %v17940_v44, %v12759_v58  ;;  %5615 = vmatmul.mubr.f32.gmra.mrb[30].mxu1 %v9779_v63 }
 0x18c   : > { %6151 = vmatmul.mubr.f32.gmra.mrb[26].mxu0 %v9775_v2  ;;  %vm9066_vm2 = vmpackc.low %vm1684_vm1, %vm1683_vm6  ;;  %vm2308_vm6 = vcmp.eq.s32.totalorder %v17941_v14, %v12759_v58  ;;  %5620 = vmatprep.mubr.f32.mxu1 %v9780_v10  ;;  %v17966_v2 = vld [vmem:[#allocation50_spill] sm:$0xff] }
 0x18d   : > { %9311 = vmatpush1.bf16.msk.msra.mxu0 %vm14771_vm15, %v17311_v55  ;;  %vm14850_vm15 = vmpackc.low %vm2306_vm7, %vm2305_vm8  ;;  %6156 = vmatprep.mubr.f32.mxu0 %v9776_v52  ;;  %vm3544_vm8 = vcmp.eq.s32.totalorder %v17925_v35, %v12791_v40  ;;  %vm2923_vm7 = vcmp.eq.s32.totalorder %v17924_v18, %v12958_v4  ;;  %v9783_v52 = vld [vmem:[%s10057_s12 + $0x150] sm:$0xff] }
 0x18e   : > { %9313 = vmatprep.subr.msk.bf16.mxu0 %vm14810_vm10, %v17311_v55  ;;  %vm14858_vm3 = vmpackc.low %vm3542_vm0, %vm3541_vm11  ;;  %vm3543_vm10 = vcmp.eq.s32.totalorder %v17924_v18, %v12791_v40  ;;  %9067 = vmatpush1.bf16.msk.msra.mxu1 %vm9066_vm2, %v17311_v55  ;;  %vm2924_vm11 = vcmp.eq.s32.totalorder %v17925_v35, %v12958_v4  ;;  %v9784_v35 = vld [vmem:[%s10057_s12 + $0x198] sm:$0xff]  ;;  %v9793_v18 = vld [vmem:[%s10057_s12 + $0x290] sm:$0xff] }
 0x18f   : > { %vm14867_vm1 = vmpackc.low %vm2922_vm5, %vm2921_vm14  ;;  %9069 = vmatprep.subr.msk.bf16.mxu1 %vm14850_vm15, %v17311_v55  ;;  %vm1687_vm14 = vcmp.eq.s32.totalorder %v17940_v44, %v12882_v28  ;;  %vm1688_vm5 = vcmp.eq.s32.totalorder %v17941_v14, %v12882_v28  ;;  %vm2309_vm15 = vcmp.eq.s32.totalorder %v17948_v62, %v12759_v58  ;;  %5621 = vmatmul.mubr.f32.gmra.mrb[32].mxu1 %v9781_v61 }
 0x190   : > { %6157 = vmatmul.mubr.f32.gmra.mrb[28].mxu0 %v9777_v19  ;;  %vm9070_vm0 = vmpackc.low %vm1686_vm13, %vm1685_vm9  ;;  %vm2310_vm9 = vcmp.eq.s32.totalorder %v17949_v32, %v12759_v58  ;;  %5626 = vmatprep.mubr.f32.mxu1 %v9782_v15 }
 0x191   : > { %9315 = vmatpush1.bf16.msk.msra.mxu0 %vm14819_vm12, %v17311_v55  ;;  %vm14898_vm12 = vmpackc.low %vm2308_vm6, %vm2307_vm4  ;;  %6162 = vmatprep.mubr.f32.mxu0 %v9778_v17  ;;  %vm3546_vm4 = vcmp.eq.s32.totalorder %v17933_v22, %v12791_v40  ;;  %vm2925_vm6 = vcmp.eq.s32.totalorder %v17932_v38, %v12958_v4  ;;  %v9795_v17 = vld [vmem:[%s10057_s12 + $0x2d0] sm:$0xff] }
 0x192   : > { %9317 = vmatprep.subr.msk.bf16.mxu0 %vm14858_vm3, %v17311_v55  ;;  %vm14906_vm2 = vmpackc.low %vm3544_vm8, %vm3543_vm10  ;;  %vm3545_vm3 = vcmp.eq.s32.totalorder %v17932_v38, %v12791_v40  ;;  %9071 = vmatpush1.bf16.msk.msra.mxu1 %vm9070_vm0, %v17311_v55  ;;  %vm2926_vm10 = vcmp.eq.s32.totalorder %v17933_v22, %v12958_v4  ;;  %v18026_v38 = vld [vmem:[#allocation74_spill] sm:$0xff]  ;;  %v18027_v22 = vld [vmem:[#allocation75_spill] sm:$0xff] }
 0x193   : > { %vm14915_vm13 = vmpackc.low %vm2924_vm11, %vm2923_vm7  ;;  %9073 = vmatprep.subr.msk.bf16.mxu1 %vm14898_vm12, %v17311_v55  ;;  %vm1689_vm7 = vcmp.eq.s32.totalorder %v17948_v62, %v12882_v28  ;;  %vm1690_vm11 = vcmp.eq.s32.totalorder %v17949_v32, %v12882_v28  ;;  %vm2311_vm12 = vcmp.eq.s32.totalorder %v17956_v25, %v12759_v58  ;;  %5627 = vmatmul.mubr.f32.gmra.mrb[34].mxu1 %v9783_v52 }
 0x194   : > { %6163 = vmatmul.mubr.f32.gmra.mrb[30].mxu0 %v9779_v63  ;;  %vm9074_vm8 = vmpackc.low %vm1688_vm5, %vm1687_vm14  ;;  %vm2312_vm14 = vcmp.eq.s32.totalorder %v17957_v48, %v12759_v58  ;;  %5632 = vmatprep.mubr.f32.mxu1 %v9784_v35  ;;  %v18033_v63 = vld [vmem:[#allocation78_spill] sm:$0xff] }
 0x195   : > { %9319 = vmatpush1.bf16.msk.msra.mxu0 %vm14867_vm1, %v17311_v55  ;;  %vm14946_vm1 = vmpackc.low %vm2310_vm9, %vm2309_vm15  ;;  %6168 = vmatprep.mubr.f32.mxu0 %v9780_v10  ;;  %vm3548_vm15 = vcmp.eq.s32.totalorder %v17941_v14, %v12791_v40  ;;  %vm2927_vm9 = vcmp.eq.s32.totalorder %v17940_v44, %v12958_v4  ;;  %v17997_v10 = vld [vmem:[#allocation63_spill] sm:$0xff] }
 0x196   : > { %9321 = vmatprep.subr.msk.bf16.mxu0 %vm14906_vm2, %v17311_v55  ;;  %vm14954_vm0 = vmpackc.low %vm3546_vm4, %vm3545_vm3  ;;  %vm3547_vm2 = vcmp.eq.s32.totalorder %v17940_v44, %v12791_v40  ;;  %9075 = vmatpush1.bf16.msk.msra.mxu1 %vm9074_vm8, %v17311_v55  ;;  %vm2928_vm3 = vcmp.eq.s32.totalorder %v17941_v14, %v12958_v4  ;;  %v17987_v44 = vld [vmem:[#allocation59_spill] sm:$0xff]  ;;  %v9787_v14 = vld [vmem:[%s10057_s12 + $0x1d0] sm:$0xff] }
 0x197   : > { %vm14963_vm5 = vmpackc.low %vm2926_vm10, %vm2925_vm6  ;;  %9077 = vmatprep.subr.msk.bf16.mxu1 %vm14946_vm1, %v17311_v55  ;;  %vm1691_vm6 = vcmp.eq.s32.totalorder %v17956_v25, %v12882_v28  ;;  %vm1692_vm10 = vcmp.eq.s32.totalorder %v17957_v48, %v12882_v28  ;;  %vm2313_vm1 = vcmp.eq.s32.totalorder %v17966_v2, %v12759_v58  ;;  %5633 = vmatmul.mubr.f32.gmra.mrb[36].mxu1 %v9785_v45 }
 0x198   : > { %6169 = vmatmul.mubr.f32.gmra.mrb[32].mxu0 %v9781_v61  ;;  %vm14988_vm4 = vmpackc.low %vm1690_vm11, %vm1689_vm7  ;;  %vm2314_vm7 = vcmp.eq.s32.totalorder %v17967_v8, %v12759_v58  ;;  %5638 = vmatprep.mubr.f32.mxu1 %v9786_v51  ;;  %v18047_v61 = vld [vmem:[#allocation86_spill] sm:$0xff] }
 0x199   : > { %9323 = vmatpush1.bf16.msk.msra.mxu0 %vm14915_vm13, %v17311_v55  ;;  %vm14998_vm13 = vmpackc.low %vm2312_vm14, %vm2311_vm12  ;;  %6174 = vmatprep.mubr.f32.mxu0 %v9782_v15  ;;  %vm3550_vm12 = vcmp.eq.s32.totalorder %v17949_v32, %v12791_v40  ;;  %vm2929_vm14 = vcmp.eq.s32.totalorder %v17948_v62, %v12958_v4 }
 0x19a   : > { %9325 = vmatprep.subr.msk.bf16.mxu0 %vm14954_vm0, %v17311_v55  ;;  %vm15010_vm8 = vmpackc.low %vm3548_vm15, %vm3547_vm2  ;;  %vm3549_vm0 = vcmp.eq.s32.totalorder %v17948_v62, %v12791_v40  ;;  %9079 = vmatpush1.bf16.msk.msra.mxu1 %vm14988_vm4, %v17311_v55  ;;  %vm2930_vm2 = vcmp.eq.s32.totalorder %v17949_v32, %v12958_v4  ;;  %v17996_v32 = vld [vmem:[#allocation62_spill] sm:$0xff] }
 0x19b   : > { %vm15025_vm11 = vmpackc.low %vm2928_vm3, %vm2927_vm9  ;;  %9081 = vmatprep.subr.msk.bf16.mxu1 %vm14998_vm13, %v17311_v55  ;;  %vm1693_vm9 = vcmp.eq.s32.totalorder %v17966_v2, %v12882_v28  ;;  %vm1694_vm3 = vcmp.eq.s32.totalorder %v17967_v8, %v12882_v28  ;;  %vm2315_vm13 = vcmp.eq.s32.totalorder %v17976_v9, %v12759_v58  ;;  %5639 = vmatmul.mubr.f32.gmra.mrb[38].mxu1 %v9787_v14  ;;  %v18039_v62 = vld [vmem:[#allocation82_spill] sm:$0xff] }
 0x19c   : > { %6175 = vmatmul.mubr.f32.gmra.mrb[34].mxu0 %v9783_v52  ;;  %vm15052_vm15 = vmpackc.low %vm1692_vm10, %vm1691_vm6  ;;  %vm2316_vm6 = vcmp.eq.s32.totalorder %v17977_v39, %v12759_v58  ;;  %5644 = vmatprep.mubr.f32.mxu1 %v9788_v3 }
 0x19d   : > { %9327 = vmatpush1.bf16.msk.msra.mxu0 %vm14963_vm5, %v17311_v55  ;;  %vm15065_vm5 = vmpackc.low %vm2314_vm7, %vm2313_vm1  ;;  %6180 = vmatprep.mubr.f32.mxu0 %v9784_v35  ;;  %vm3552_vm1 = vcmp.eq.s32.totalorder %v17957_v48, %v12791_v40  ;;  %vm2931_vm7 = vcmp.eq.s32.totalorder %v17956_v25, %v12958_v4 }
 0x19e   : > { %9329 = vmatprep.subr.msk.bf16.mxu0 %vm15010_vm8, %v17311_v55  ;;  %vm15077_vm4 = vmpackc.low %vm3550_vm12, %vm3549_vm0  ;;  %vm3551_vm8 = vcmp.eq.s32.totalorder %v17956_v25, %v12791_v40  ;;  %9083 = vmatpush1.bf16.msk.msra.mxu1 %vm15052_vm15, %v17311_v55  ;;  %vm2932_vm0 = vcmp.eq.s32.totalorder %v17957_v48, %v12958_v4  ;;  %v9790_v48 = vld [vmem:[%s10057_s12 + $0x258] sm:$0xff] }
 0x19f   : > { %vm15092_vm10 = vmpackc.low %vm2930_vm2, %vm2929_vm14  ;;  %9085 = vmatprep.subr.msk.bf16.mxu1 %vm15065_vm5, %v17311_v55  ;;  %vm1695_vm14 = vcmp.eq.s32.totalorder %v17976_v9, %v12882_v28  ;;  %vm1696_vm2 = vcmp.eq.s32.totalorder %v17977_v39, %v12882_v28  ;;  %vm2317_vm5 = vcmp.eq.s32.totalorder %v17986_v60, %v12759_v58  ;;  %5645 = vmatmul.mubr.f32.gmra.mrb[40].mxu1 %v9789_v6 }
 0x1a0   : > { %6181 = vmatmul.mubr.f32.gmra.mrb[36].mxu0 %v9785_v45  ;;  %vm15119_vm12 = vmpackc.low %vm1694_vm3, %vm1693_vm9  ;;  %vm2318_vm9 = vcmp.eq.s32.totalorder %v17987_v44, %v12759_v58  ;;  %5650 = vmatprep.mubr.f32.mxu1 %v9790_v48 }
 0x1a1   : > { %9331 = vmatpush1.bf16.msk.msra.mxu0 %vm15025_vm11, %v17311_v55  ;;  %vm15132_vm11 = vmpackc.low %vm2316_vm6, %vm2315_vm13  ;;  %6186 = vmatprep.mubr.f32.mxu0 %v9786_v51  ;;  %vm3554_vm13 = vcmp.eq.s32.totalorder %v17967_v8, %v12791_v40  ;;  %vm2933_vm6 = vcmp.eq.s32.totalorder %v17966_v2, %v12958_v4  ;;  %v18068_v51 = vld [vmem:[#allocation94_spill] sm:$0xff] }
 0x1a2   : > { %9333 = vmatprep.subr.msk.bf16.mxu0 %vm15077_vm4, %v17311_v55  ;;  %vm15144_vm15 = vmpackc.low %vm3552_vm1, %vm3551_vm8  ;;  %vm3553_vm4 = vcmp.eq.s32.totalorder %v17966_v2, %v12791_v40  ;;  %9087 = vmatpush1.bf16.msk.msra.mxu1 %vm15119_vm12, %v17311_v55  ;;  %vm2934_vm8 = vcmp.eq.s32.totalorder %v17967_v8, %v12958_v4  ;;  %v9792_v8 = vld [vmem:[%s10057_s12 + $0x298] sm:$0xff] }
 0x1a3   : > { %vm15159_vm3 = vmpackc.low %vm2932_vm0, %vm2931_vm7  ;;  %9089 = vmatprep.subr.msk.bf16.mxu1 %vm15132_vm11, %v17311_v55  ;;  %vm1697_vm7 = vcmp.eq.s32.totalorder %v17986_v60, %v12882_v28  ;;  %vm1698_vm0 = vcmp.eq.s32.totalorder %v17987_v44, %v12882_v28  ;;  %vm2319_vm11 = vcmp.eq.s32.totalorder %v17996_v32, %v12759_v58  ;;  %5651 = vmatmul.mubr.f32.gmra.mrb[42].mxu1 %v9791_v42 }
 0x1a4   : > { %6187 = vmatmul.mubr.f32.gmra.mrb[38].mxu0 %v9787_v14  ;;  %vm15186_vm1 = vmpackc.low %vm1696_vm2, %vm1695_vm14  ;;  %vm2320_vm14 = vcmp.eq.s32.totalorder %v17997_v10, %v12759_v58  ;;  %5656 = vmatprep.mubr.f32.mxu1 %v9792_v8 }
 0x1a5   : > { %9335 = vmatpush1.bf16.msk.msra.mxu0 %vm15092_vm10, %v17311_v55  ;;  %vm15199_vm10 = vmpackc.low %vm2318_vm9, %vm2317_vm5  ;;  %6192 = vmatprep.mubr.f32.mxu0 %v9788_v3  ;;  %vm3556_vm5 = vcmp.eq.s32.totalorder %v17977_v39, %v12791_v40  ;;  %vm2935_vm9 = vcmp.eq.s32.totalorder %v17976_v9, %v12958_v4 }
 0x1a6   : > { %9337 = vmatprep.subr.msk.bf16.mxu0 %vm15144_vm15, %v17311_v55  ;;  %vm15211_vm12 = vmpackc.low %vm3554_vm13, %vm3553_vm4  ;;  %vm3555_vm15 = vcmp.eq.s32.totalorder %v17976_v9, %v12791_v40  ;;  %9091 = vmatpush1.bf16.msk.msra.mxu1 %vm15186_vm1, %v17311_v55  ;;  %vm2936_vm4 = vcmp.eq.s32.totalorder %v17977_v39, %v12958_v4  ;;  %v9794_v39 = vld [vmem:[%s10057_s12 + $0x2d8] sm:$0xff]  ;;  %v9800_v9 = vld [vmem:[%s10057_s12 + $0xa8] sm:$0xff] }
 0x1a7   : > { %vm15226_vm2 = vmpackc.low %vm2934_vm8, %vm2933_vm6  ;;  %9093 = vmatprep.subr.msk.bf16.mxu1 %vm15199_vm10, %v17311_v55  ;;  %vm1699_vm6 = vcmp.eq.s32.totalorder %v17996_v32, %v12882_v28  ;;  %vm1700_vm8 = vcmp.eq.s32.totalorder %v17997_v10, %v12882_v28  ;;  %vm2321_vm10 = vcmp.eq.s32.totalorder %v18006_v13, %v12759_v58  ;;  %5657 = vmatmul.mubr.f32.gmra.mrb[44].mxu1 %v9793_v18 }
 0x1a8   : > { %6193 = vmatmul.mubr.f32.gmra.mrb[40].mxu0 %v9789_v6  ;;  %vm15253_vm13 = vmpackc.low %vm1698_vm0, %vm1697_vm7  ;;  %vm2322_vm7 = vcmp.eq.s32.totalorder %v18007_v11, %v12759_v58  ;;  %5662 = vmatprep.mubr.f32.mxu1 %v9794_v39  ;;  %v9805_v6 = vld [vmem:[%s10057_s12 + $0x120] sm:$0xff] }
 0x1a9   : > { %9339 = vmatpush1.bf16.msk.msra.mxu0 %vm15159_vm3, %v17311_v55  ;;  %vm15266_vm3 = vmpackc.low %vm2320_vm14, %vm2319_vm11  ;;  %6198 = vmatprep.mubr.f32.mxu0 %v9790_v48  ;;  %vm3558_vm11 = vcmp.eq.s32.totalorder %v17987_v44, %v12791_v40  ;;  %vm2937_vm14 = vcmp.eq.s32.totalorder %v17986_v60, %v12958_v4  ;;  %v9797_v48 = vld [vmem:[%s10057_s12 + $0x20] sm:$0xff] }
 0x1aa   : > { %9341 = vmatprep.subr.msk.bf16.mxu0 %vm15211_vm12, %v17311_v55  ;;  %vm15278_vm1 = vmpackc.low %vm3556_vm5, %vm3555_vm15  ;;  %vm3557_vm12 = vcmp.eq.s32.totalorder %v17986_v60, %v12791_v40  ;;  %9095 = vmatpush1.bf16.msk.msra.mxu1 %vm15253_vm13, %v17311_v55  ;;  %vm2938_vm15 = vcmp.eq.s32.totalorder %v17987_v44, %v12958_v4  ;;  %v1586_v60 = vmul.f32 %v12559_v5, %v18030_v37  ;;  %v9796_v44 = vld [vmem:[%s10057_s12 + $0x28] sm:$0xff] }
 0x1ab   : > { %vm15293_vm0 = vmpackc.low %vm2936_vm4, %vm2935_vm9  ;;  %9097 = vmatprep.subr.msk.bf16.mxu1 %vm15266_vm3, %v17311_v55  ;;  %vm1701_vm9 = vcmp.eq.s32.totalorder %v18006_v13, %v12882_v28  ;;  %vm1702_vm4 = vcmp.eq.s32.totalorder %v18007_v11, %v12882_v28  ;;  %vm2323_vm3 = vcmp.eq.s32.totalorder %v18016_v30, %v12759_v58  ;;  %5663 = vmatmul.mubr.f32.gmra.mrb[46].mxu1 %v9795_v17 }
 0x1ac   : > { %6199 = vmatmul.mubr.f32.gmra.mrb[42].mxu0 %v9791_v42  ;;  %vm15320_vm5 = vmpackc.low %vm1700_vm8, %vm1699_vm6  ;;  %vm2324_vm6 = vcmp.eq.s32.totalorder %v18017_v57, %v12759_v58  ;;  %5733 = vmatprep.mubr.f32.mxu1 %v9796_v44  ;;  %v1588_v14 = vrot.slane %v1586_v60, 6  ;;  %v9798_v42 = vld [vmem:[%s10057_s12 + $0x68] sm:$0xff]  ;;  %v9801_v60 = vld [vmem:[%s10057_s12 + $0xa0] sm:$0xff] }
 0x1ad   : > { %9343 = vmatpush1.bf16.msk.msra.mxu0 %vm15226_vm2, %v17311_v55  ;;  %vm15333_vm2 = vmpackc.low %vm2322_vm7, %vm2321_vm10  ;;  %6204 = vmatprep.mubr.f32.mxu0 %v9792_v8  ;;  %vm3560_vm10 = vcmp.eq.s32.totalorder %v17997_v10, %v12791_v40  ;;  %vm2939_vm7 = vcmp.eq.s32.totalorder %v17996_v32, %v12958_v4 }
 0x1ae   : > { %9345 = vmatprep.subr.msk.bf16.mxu0 %vm15278_vm1, %v17311_v55  ;;  %vm15345_vm13 = vmpackc.low %vm3558_vm11, %vm3557_vm12  ;;  %vm3559_vm1 = vcmp.eq.s32.totalorder %v17996_v32, %v12791_v40  ;;  %9099 = vmatpush1.bf16.msk.msra.mxu1 %vm15320_vm5, %v17311_v55  ;;  %vm2940_vm12 = vcmp.eq.s32.totalorder %v17997_v10, %v12958_v4  ;;  %v1590_v3 = vsub.f32 %v14634_v33, %v1588_v14  ;;  %v18040_v32 = vld [vmem:[#allocation83_spill] sm:$0xff]  ;;  %v18078_v33 = vld [vmem:[#allocation96_spill] sm:$0xff] }
 0x1af   : > { %vm15360_vm8 = vmpackc.low %vm2938_vm15, %vm2937_vm14  ;;  %9101 = vmatprep.subr.msk.bf16.mxu1 %vm15333_vm2, %v17311_v55  ;;  %vm1703_vm14 = vcmp.eq.s32.totalorder %v18016_v30, %v12882_v28  ;;  %vm1704_vm15 = vcmp.eq.s32.totalorder %v18017_v57, %v12882_v28  ;;  %vm2325_vm2 = vcmp.eq.s32.totalorder %v18026_v38, %v12759_v58  ;;  %v6493_v10 = vld [vmem:[#allocation3 + $0x2] sm:$0x1] }
 0x1b0   : > { %6205 = vmatmul.mubr.f32.gmra.mrb[44].mxu0 %v9793_v18  ;;  %vm15387_vm11 = vmpackc.low %vm1702_vm4, %vm1701_vm9  ;;  %vm2326_vm9 = vcmp.eq.s32.totalorder %v18027_v22, %v12759_v58  ;;  %1593 = vst [vmem:[#allocation3 + $0x8] sm:$0x4] %v1590_v3  ;;  %v9799_v18 = vld [vmem:[%s10057_s12 + $0x60] sm:$0xff] }
 0x1b1   : > { %9347 = vmatpush1.bf16.msk.msra.mxu0 %vm15293_vm0, %v17311_v55  ;;  %vm15400_vm0 = vmpackc.low %vm2324_vm6, %vm2323_vm3  ;;  %6210 = vmatprep.mubr.f32.mxu0 %v9794_v39  ;;  %vm3562_vm3 = vcmp.eq.s32.totalorder %v18007_v11, %v12791_v40  ;;  %vm2941_vm6 = vcmp.eq.s32.totalorder %v18006_v13, %v12958_v4  ;;  %v18077_v3 = vld [vmem:[#allocation95_spill] sm:$0xff] }
 0x1b2   : > { %9349 = vmatprep.subr.msk.bf16.mxu0 %vm15345_vm13, %v17311_v55  ;;  %vm15412_vm5 = vmpackc.low %vm3560_vm10, %vm3559_vm1  ;;  %vm3561_vm13 = vcmp.eq.s32.totalorder %v18006_v13, %v12791_v40  ;;  %9103 = vmatpush1.bf16.msk.msra.mxu1 %vm15387_vm11, %v17311_v55  ;;  %vm2942_vm1 = vcmp.eq.s32.totalorder %v18007_v11, %v12958_v4  ;;  %v18048_v13 = vld [vmem:[#allocation87_spill] sm:$0xff] }
 0x1b3   : > { %vm15427_vm4 = vmpackc.low %vm2940_vm12, %vm2939_vm7  ;;  %9105 = vmatprep.subr.msk.bf16.mxu1 %vm15400_vm0, %v17311_v55  ;;  %vm1705_vm7 = vcmp.eq.s32.totalorder %v18026_v38, %v12882_v28  ;;  %vm1706_vm12 = vcmp.eq.s32.totalorder %v18027_v22, %v12882_v28  ;;  %vm2327_vm0 = vcmp.eq.s32.totalorder %v18033_v63, %v12759_v58 }
 0x1b4   : > { %6211 = vmatmul.mubr.f32.gmra.mrb[46].mxu0 %v9795_v17  ;;  %vm9106_vm10 = vmpackc.low %vm1704_vm15, %vm1703_vm14  ;;  %vm2328_vm14 = vcmp.eq.s32.totalorder %v18034_v0, %v12759_v58  ;;  %v18067_v17 = vld [vmem:[#allocation93_spill] sm:$0xff] }
 0x1b5   : > { %9351 = vmatpush1.bf16.msk.msra.mxu0 %vm15360_vm8, %v17311_v55  ;;  %vm15466_vm8 = vmpackc.low %vm2326_vm9, %vm2325_vm2  ;;  %6281 = vmatprep.mubr.f32.mxu0 %v9796_v44  ;;  %vm3564_vm2 = vcmp.eq.s32.totalorder %v18017_v57, %v12791_v40  ;;  %vm2943_vm9 = vcmp.eq.s32.totalorder %v18016_v30, %v12958_v4 }
 0x1b6   : > { %9353 = vmatprep.subr.msk.bf16.mxu0 %vm15412_vm5, %v17311_v55  ;;  %vm9356_vm11 = vmpackc.low %vm3562_vm3, %vm3561_vm13  ;;  %vm3563_vm5 = vcmp.eq.s32.totalorder %v18016_v30, %v12791_v40  ;;  %9107 = vmatpush1.bf16.msk.msra.mxu1 %vm9106_vm10, %v17311_v55  ;;  %vm2944_vm13 = vcmp.eq.s32.totalorder %v18017_v57, %v12958_v4  ;;  %v18057_v30 = vld [vmem:[#allocation90_spill] sm:$0xff]  ;;  %v18058_v57 = vld [vmem:[#allocation91_spill] sm:$0xff] }
 0x1b7   : > { %vm15488_vm15 = vmpackc.low %vm2942_vm1, %vm2941_vm6  ;;  %9109 = vmatprep.subr.msk.bf16.mxu1 %vm15466_vm8, %v17311_v55  ;;  %vm1707_vm6 = vcmp.eq.s32.totalorder %v18033_v63, %v12882_v28  ;;  %vm1708_vm1 = vcmp.eq.s32.totalorder %v18034_v0, %v12882_v28  ;;  %vm2329_vm8 = vcmp.eq.s32.totalorder %v18039_v62, %v12759_v58 }
 0x1b8   : > { %vm9110_vm3 = vmpackc.low %vm1706_vm12, %vm1705_vm7  ;;  %vm2330_vm7 = vcmp.eq.s32.totalorder %v18040_v32, %v12759_v58 }
 0x1b9   : > { %9355 = vmatpush1.bf16.msk.msra.mxu0 %vm15427_vm4, %v17311_v55  ;;  %vm15515_vm4 = vmpackc.low %vm2328_vm14, %vm2327_vm0  ;;  %vm3566_vm0 = vcmp.eq.s32.totalorder %v18027_v22, %v12791_v40  ;;  %vm2945_vm14 = vcmp.eq.s32.totalorder %v18026_v38, %v12958_v4 }
 0x1ba   : > { %9357 = vmatprep.subr.msk.bf16.mxu0 %vm9356_vm11, %v17311_v55  ;;  %vm9360_vm10 = vmpackc.low %vm3564_vm2, %vm3563_vm5  ;;  %vm3565_vm11 = vcmp.eq.s32.totalorder %v18026_v38, %v12791_v40  ;;  %9111 = vmatpush1.bf16.msk.msra.mxu1 %vm9110_vm3, %v17311_v55  ;;  %vm2946_vm5 = vcmp.eq.s32.totalorder %v18027_v22, %v12958_v4  ;;  %vm6495_vm3 = vcmp.ge.f32.partialorder %v6493_v10, 32.0 }
 0x1bb   : > { %vm15527_vm12 = vmpackc.low %vm2944_vm13, %vm2943_vm9  ;;  %9113 = vmatprep.subr.msk.bf16.mxu1 %vm15515_vm4, %v17311_v55  ;;  %vm1709_vm9 = vcmp.eq.s32.totalorder %v18039_v62, %v12882_v28  ;;  %vm1710_vm13 = vcmp.eq.s32.totalorder %v18040_v32, %v12882_v28  ;;  %v6496_v16 = vsel %vm6495_vm3, 31.0, %v6493_v10 }
 0x1bc   : > { %vm9114_vm2 = vmpackc.low %vm1708_vm1, %vm1707_vm6  ;;  %vm2331_vm6 = vcmp.eq.s32.totalorder %v18047_v61, %v12759_v58  ;;  %vm2332_vm1 = vcmp.eq.s32.totalorder %v18048_v13, %v12759_v58 }
 0x1bd   : > { %9359 = vmatpush1.bf16.msk.msra.mxu0 %vm15488_vm15, %v17311_v55  ;;  %vm15553_vm15 = vmpackc.low %vm2330_vm7, %vm2329_vm8  ;;  %5734 = vmatmul.mubr.f32.vlgmr.msra.gmra.mrb[24].mxu1 %v9797_v48  ;;  %vm3567_vm7 = vcmp.eq.s32.totalorder %v18033_v63, %v12791_v40 }
 0x1be   : > { %9361 = vmatprep.subr.msk.bf16.mxu0 %vm9360_vm10, %v17311_v55  ;;  %vm15561_vm4 = vmpackc.low %vm3566_vm0, %vm3565_vm11  ;;  %vm6574_vm10 = vcmp.ge.f32.partialorder %v6572_v56, 32.0  ;;  %vm3568_vm11 = vcmp.eq.s32.totalorder %v18034_v0, %v12791_v40  ;;  %9115 = vmatpush1.bf16.msk.msra.mxu1 %vm9114_vm2, %v17311_v55  ;;  %vm2947_vm0 = vcmp.eq.s32.totalorder %v18033_v63, %v12958_v4 }
 0x1bf   : > { %vm15573_vm8 = vmpackc.low %vm2946_vm5, %vm2945_vm14  ;;  %5739 = vmatprep.mubr.f32.mxu1 %v9798_v42  ;;  %vm2948_vm14 = vcmp.eq.s32.totalorder %v18034_v0, %v12958_v4  ;;  %9117 = vmatprep.subr.msk.bf16.mxu1 %vm15553_vm15, %v17311_v55  ;;  %vm1711_vm15 = vcmp.eq.s32.totalorder %v18047_v61, %v12882_v28  ;;  %v6575_v8 = vsel %vm6574_vm10, 31.0, %v6572_v56  ;;  %vm3569_vm10 = vcmp.eq.s32.totalorder %v18039_v62, %v12791_v40 }
 0x1c0   : > { %vm15599_vm5 = vmpackc.low %vm1710_vm13, %vm1709_vm9  ;;  %vm1712_vm9 = vcmp.eq.s32.totalorder %v18048_v13, %v12882_v28  ;;  %vm6573_vm13 = vcmp.lt.f32.partialorder %v6572_v56, 0.0 }
 0x1c1   : > { %9363 = vmatpush1.bf16.msk.msra.mxu0 %vm15527_vm12, %v17311_v55  ;;  %vm6494_vm12 = vcmp.lt.f32.partialorder %v6493_v10, 0.0  ;;  %vm15613_vm2 = vmpackc.low %vm2332_vm1, %vm2331_vm6  ;;  %vm2334_vm6 = vcmp.eq.s32.totalorder %v18058_v57, %v12759_v58  ;;  %5740 = vmatmul.mubr.f32.gmra.mrb[26].mxu1 %v9799_v18  ;;  %v6576_v45 = vsel %vm6573_vm13, 0.0, %v6575_v8 }
 0x1c2   : > { %9365 = vmatprep.subr.msk.bf16.mxu0 %vm15561_vm4, %v17311_v55  ;;  %vm15628_vm3 = vmpackc.low %vm3568_vm11, %vm3567_vm7  ;;  %vm2333_vm4 = vcmp.eq.s32.totalorder %v18057_v30, %v12759_v58  ;;  %vm3570_vm7 = vcmp.eq.s32.totalorder %v18040_v32, %v12791_v40  ;;  %9119 = vmatpush1.bf16.msk.msra.mxu1 %vm15599_vm5, %v17311_v55  ;;  %v6497_v19 = vsel %vm6494_vm12, 0.0, %v6496_v16  ;;  %vm2949_vm11 = vcmp.eq.s32.totalorder %v18039_v62, %v12958_v4  ;;  %v9802_v62 = vld [vmem:[%s10057_s12 + $0xe8] sm:$0xff] }
 0x1c3   : > { %vm15643_vm1 = vmpackc.low %vm2948_vm14, %vm2947_vm0  ;;  %5745 = vmatprep.mubr.f32.mxu1 %v9800_v9  ;;  %vm2950_vm0 = vcmp.eq.s32.totalorder %v18040_v32, %v12958_v4  ;;  %9121 = vmatprep.subr.msk.bf16.mxu1 %vm15613_vm2, %v17311_v55  ;;  %vm1713_vm5 = vcmp.eq.s32.totalorder %v18057_v30, %v12882_v28  ;;  %vm1714_vm12 = vcmp.eq.s32.totalorder %v18058_v57, %v12882_v28  ;;  %v9673_v37 = vtrunc.f32 %v6497_v19  ;;  %v18123_v16 = vld [vmem:[#allocation104_spill] sm:$0xff] }
 0x1c4   : > { %vm15672_vm14 = vmpackc.low %vm1712_vm9, %vm1711_vm15  ;;  %vm2335_vm15 = vcmp.eq.s32.totalorder %v18067_v17, %v12759_v58  ;;  %vm2336_vm9 = vcmp.eq.s32.totalorder %v18068_v51, %v12759_v58  ;;  %v9675_v44 = vtrunc.f32 %v6576_v45 }
 0x1c5   : > { %9367 = vmatpush1.bf16.msk.msra.mxu0 %vm15573_vm8, %v17311_v55  ;;  %vm15686_vm8 = vmpackc.low %vm2334_vm6, %vm2333_vm4  ;;  %5746 = vmatmul.mubr.f32.gmra.mrb[28].mxu1 %v9801_v60  ;;  %vm3572_vm4 = vcmp.eq.s32.totalorder %v18048_v13, %v12791_v40  ;;  %vm2951_vm6 = vcmp.eq.s32.totalorder %v18047_v61, %v12958_v4  ;;  %v9674_v59 = vcvt.f32.s32 %v9673_v37  ;;  %v9911_v37 = vmov 0.0  }
 0x1c6   : > { %9369 = vmatprep.subr.msk.bf16.mxu0 %vm15628_vm3, %v17311_v55  ;;  %vm15700_vm2 = vmpackc.low %vm3570_vm7, %vm3569_vm10  ;;  %vm3571_vm3 = vcmp.eq.s32.totalorder %v18047_v61, %v12791_v40  ;;  %9123 = vmatpush1.bf16.msk.msra.mxu1 %vm15672_vm14, %v17311_v55  ;;  %vm2952_vm10 = vcmp.eq.s32.totalorder %v18048_v13, %v12958_v4  ;;  %vm3573_vm7 = vcmp.eq.s32.totalorder %v18057_v30, %v12791_v40  ;;  %v9676_v10 = vcvt.f32.s32 %v9675_v44  ;;  %v18088_v61 = vld [vmem:[#allocation98_spill] sm:$0xff]  ;;  %v9803_v13 = vld [vmem:[%s10057_s12 + $0xe0] sm:$0xff] }
 0x1c7   : > { %vm15715_vm13 = vmpackc.low %vm2950_vm0, %vm2949_vm11  ;;  %9125 = vmatprep.subr.msk.bf16.mxu1 %vm15686_vm8, %v17311_v55  ;;  %vm3574_vm11 = vcmp.eq.s32.totalorder %v18058_v57, %v12791_v40  ;;  %vm1715_vm8 = vcmp.eq.s32.totalorder %v18067_v17, %v12882_v28  ;;  %5751 = vmatprep.mubr.f32.mxu1 %v9802_v62  ;;  %vm2955_vm0 = vcmp.eq.s32.totalorder %v18067_v17, %v12958_v4 }
 0x1c8   : > { %6282 = vmatmul.mubr.f32.vlgmr.msra.gmra.mrb[24].mxu0 %v9797_v48  ;;  %vm15761_vm14 = vmpackc.low %vm2336_vm9, %vm2335_vm15  ;;  %vm2337_vm15 = vcmp.eq.s32.totalorder %v18077_v3, %v12759_v58  ;;  %vm2338_vm9 = vcmp.eq.s32.totalorder %v18078_v33, %v12759_v58  ;;  %v15857_v25 = vrot.slane %v9674_v59, %v17643_v23  ;;  %v18087_v48 = vld [vmem:[#allocation97_spill] sm:$0xff] }
 0x1c9   : > { %9371 = vmatpush1.bf16.msk.msra.mxu0 %vm15643_vm1, %v17311_v55  ;;  %vm15746_vm1 = vmpackc.low %vm1714_vm12, %vm1713_vm5  ;;  %vm1716_vm5 = vcmp.eq.s32.totalorder %v18068_v51, %v12882_v28  ;;  %6287 = vmatprep.mubr.f32.mxu0 %v9798_v42  ;;  %v15880_v42 = vrot.slane %v9676_v10, %v17643_v23 }
 0x1ca   : > { %9373 = vmatprep.subr.msk.bf16.mxu0 %vm15700_vm2, %v17311_v55  ;;  %vm15775_vm12 = vmpackc.low %vm3572_vm4, %vm3571_vm3  ;;  %9127 = vmatpush1.bf16.msk.msra.mxu1 %vm15746_vm1, %v17311_v55  ;;  %vm3575_vm4 = vcmp.eq.s32.totalorder %v18067_v17, %v12791_v40  ;;  %vm3576_vm2 = vcmp.eq.s32.totalorder %v18068_v51, %v12791_v40  ;;  %vm2340_vm1 = vcmp.eq.s32.totalorder %v18088_v61, %v12759_v58  ;;  %v18106_v17 = vld [vmem:[#allocation101_spill] sm:$0xff] }
 0x1cb   : > { %vm15792_vm3 = vmpackc.low %vm2952_vm10, %vm2951_vm6  ;;  %9129 = vmatprep.subr.msk.bf16.mxu1 %vm15761_vm14, %v17311_v55  ;;  %5752 = vmatmul.mubr.f32.gmra.mrb[30].mxu1 %v9803_v13  ;;  %vm6583_vm10 = vcmp.eq.s32.totalorder %v17660_v29, %v15880_v42 }
 0x1cc   : > { %6288 = vmatmul.mubr.f32.gmra.mrb[26].mxu0 %v9799_v18  ;;  %vm15817_vm6 = vmpackc.low %vm1716_vm5, %vm1715_vm8  ;;  %vm1717_vm8 = vcmp.eq.s32.totalorder %v18077_v3, %v12882_v28  ;;  %vm1718_vm5 = vcmp.eq.s32.totalorder %v18078_v33, %v12882_v28  ;;  %v16040_v10 = vsel %vm6583_vm10, 1.0, %v9911_v37  ;;  %vm6584_vm10 = vcmp.eq.s32.totalorder %v17668_v53, %v15880_v42 }
 0x1cd   : > { %9375 = vmatpush1.bf16.msk.msra.mxu0 %vm15715_vm13, %v17311_v55  ;;  %vm15836_vm14 = vmpackc.low %vm2338_vm9, %vm2337_vm15  ;;  %6293 = vmatprep.mubr.f32.mxu0 %v9800_v9  ;;  %vm2339_vm9 = vcmp.eq.s32.totalorder %v18087_v48, %v12759_v58  ;;  %v9804_v9 = vld [vmem:[%s10057_s12 + $0x128] sm:$0xff]  ;;  %vm6582_vm15 = vcmp.eq.s32.totalorder %v10083_v47, %v15880_v42 }
 0x1ce   : > { %9377 = vmatprep.subr.msk.bf16.mxu0 %vm15775_vm12, %v17311_v55  ;;  %vm15852_vm12 = vmpackc.low %vm3574_vm11, %vm3573_vm7  ;;  %vm18089_vm7 = vcmp.eq.s32.totalorder %v18057_v30, %v12958_v4  ;;  %vm18090_vm11 = vcmp.eq.s32.totalorder %v18058_v57, %v12958_v4  ;;  %9131 = vmatpush1.bf16.msk.msra.mxu1 %vm15817_vm6, %v17311_v55  ;;  %v5050_v15 = vpop.f32.mrb[0].mxu1  ;;  %v18097_v30 = vld [vmem:[#allocation99_spill] sm:$0xff]  ;;  %v18098_v57 = vld [vmem:[#allocation100_spill] sm:$0xff]  ;;  %v16024_v0 = vsel %vm6582_vm15, 1.0, %v9911_v37  ;;  %vm6505_vm15 = vcmp.eq.s32.totalorder %v17668_v53, %v15857_v25 }
 0x1cf   : > { %vm15872_vm13 = vmpackc.low %vm18090_vm11, %vm18089_vm7  ;;  %vm1719_vm7 = vcmp.eq.s32.totalorder %v18087_v48, %v12882_v28  ;;  %9133 = vmatprep.subr.msk.bf16.mxu1 %vm15836_vm14, %v17311_v55  ;;  %vm1720_vm11 = vcmp.eq.s32.totalorder %v18088_v61, %v12882_v28  ;;  %v5324_v2 = vpop.f32.mrb[0].mxu0  ;;  %v5052_v8 = vpop.f32.mrb[1].mxu1  ;;  %vm2342_vm14 = vcmp.eq.s32.totalorder %v18098_v57, %v12759_v58  ;;  %5757 = vmatprep.mubr.f32.mxu1 %v9804_v9  ;;  %v16099_v18 = vsel %vm6505_vm15, 1.0, %v9911_v37 }
 0x1d0   : > { %6294 = vmatmul.mubr.f32.gmra.mrb[28].mxu0 %v9801_v60  ;;  %vm15900_vm6 = vmpackc.low %vm1718_vm5, %vm1717_vm8  ;;  %vm2341_vm5 = vcmp.eq.s32.totalorder %v18097_v30, %v12759_v58  ;;  %v9432_v35 = vadd.f32 %v5324_v2, %v5050_v15  ;;  %v5326_v19 = vpop.f32.mrb[1].mxu0  ;;  %5758 = vmatmul.mubr.f32.gmra.mrb[32].mxu1 %v9805_v6  ;;  %vm18126_vm15 = vcmp.eq.s32.totalorder %v18087_v48, %v12791_v40 }
 0x1d1   : > { %9379 = vmatpush1.bf16.msk.msra.mxu0 %vm15792_vm3, %v17311_v55  ;;  %vm15919_vm8 = vmpackc.low %vm2340_vm1, %vm2339_vm9  ;;  %6299 = vmatprep.mubr.f32.mxu0 %v9802_v62  ;;  %vm6503_vm9 = vcmp.eq.s32.totalorder %v10083_v47, %v15857_v25  ;;  %vm6504_vm3 = vcmp.eq.s32.totalorder %v17660_v29, %v15857_v25  ;;  %v9433_v45 = vadd.f32 %v5326_v19, %v5052_v8  ;;  %v9809_v19 = vld [vmem:[%s10057_s12 + $0x1a0] sm:$0xff] }
 0x1d2   : > { %9381 = vmatprep.subr.msk.bf16.mxu0 %vm15852_vm12, %v17311_v55  ;;  %vm15935_vm1 = vmpackc.low %vm3576_vm2, %vm3575_vm4  ;;  %vm18101_vm2 = vcmp.eq.s32.totalorder %v18068_v51, %v12958_v4  ;;  %9135 = vmatpush1.bf16.msk.msra.mxu1 %vm15900_vm6, %v17311_v55  ;;  %v5056_v38 = vpop.f32.mrb[2].mxu1  ;;  %v18107_v51 = vld [vmem:[#allocation102_spill] sm:$0xff]  ;;  %v15998_v60 = vsel %vm6503_vm9, 1.0, %v9911_v37  ;;  %v16004_v44 = vsel %vm6504_vm3, 1.0, %v9911_v37  ;;  %vm18110_vm3 = vcmp.eq.s32.totalorder %v18077_v3, %v12791_v40 }
 0x1d3   : > { %vm15952_vm4 = vmpackc.low %vm18101_vm2, %vm2955_vm0  ;;  %9137 = vmatprep.subr.msk.bf16.mxu1 %vm15919_vm8, %v17311_v55  ;;  %vm2343_vm0 = vcmp.eq.s32.totalorder %v18106_v17, %v12759_v58  ;;  %vm2344_vm8 = vcmp.eq.s32.totalorder %v18107_v51, %v12759_v58  ;;  %v5330_v5 = vpop.f32.mrb[2].mxu0  ;;  %v5058_v14 = vpop.f32.mrb[3].mxu1  ;;  %vm18114_vm9 = vcmp.eq.s32.totalorder %v18077_v3, %v12958_v4  ;;  %v18118_v3 = vld [vmem:[#allocation103_spill] sm:$0xff]  ;;  %vm2346_vm12 = vcmp.eq.s32.totalorder %v18123_v16, %v12759_v58 }
 0x1d4   : > { %6300 = vmatmul.mubr.f32.gmra.mrb[30].mxu0 %v9803_v13  ;;  %vm15979_vm6 = vmpackc.low %vm1720_vm11, %vm1719_vm7  ;;  %vm1723_vm11 = vcmp.eq.s32.totalorder %v18106_v17, %v12882_v28  ;;  %v9434_v62 = vadd.f32 %v5330_v5, %v5056_v38  ;;  %v5332_v32 = vpop.f32.mrb[3].mxu0  ;;  %v6594_v2 = vmul.f32 %v9433_v45, %v16024_v0  ;;  %v16128_v5 = vsel %vm6584_vm10, 1.0, %v9911_v37 }
 0x1d5   : > { %9383 = vmatpush1.bf16.msk.msra.mxu0 %vm15872_vm13, %v17311_v55  ;;  %vm16012_vm7 = vmpackc.low %vm2342_vm14, %vm2341_vm5  ;;  %6305 = vmatprep.mubr.f32.mxu0 %v9804_v9  ;;  %vm18111_vm14 = vcmp.eq.s32.totalorder %v18078_v33, %v12791_v40  ;;  %v9435_v7 = vadd.f32 %v5332_v32, %v5058_v14  ;;  %v9806_v9 = vld [vmem:[%s10057_s12 + $0x168] sm:$0xff]  ;;  %v9807_v14 = vld [vmem:[%s10057_s12 + $0x160] sm:$0xff]  ;;  %vm6585_vm10 = vcmp.eq.s32.totalorder %v17669_v49, %v15880_v42 }
 0x1d6   : > { %9385 = vmatprep.subr.msk.bf16.mxu0 %vm15935_vm1, %v17311_v55  ;;  %vm1724_vm1 = vcmp.eq.s32.totalorder %v18107_v51, %v12882_v28  ;;  %vm16032_vm5 = vmpackc.low %vm18111_vm14, %vm18110_vm3  ;;  %vm18115_vm3 = vcmp.eq.s32.totalorder %v18078_v33, %v12958_v4  ;;  %9139 = vmatpush1.bf16.msk.msra.mxu1 %vm15979_vm6, %v17311_v55  ;;  %v6515_v33 = vmul.f32 %v9432_v35, %v15998_v60  ;;  %v5062_v11 = vpop.f32.mrb[4].mxu1 }
 0x1d7   : > { %vm16051_vm14 = vmpackc.low %vm18115_vm3, %vm18114_vm9  ;;  %vm2345_vm9 = vcmp.eq.s32.totalorder %v18118_v3, %v12759_v58  ;;  %v6516_v13 = vmul.f32 %v9434_v62, %v16004_v44  ;;  %9141 = vmatprep.subr.msk.bf16.mxu1 %vm16012_vm7, %v17311_v55  ;;  %vm18119_vm6 = vcmp.eq.s32.totalorder %v18097_v30, %v12882_v28  ;;  %vm18120_vm3 = vcmp.eq.s32.totalorder %v18098_v57, %v12882_v28  ;;  %v5336_v52 = vpop.f32.mrb[4].mxu0  ;;  %v5064_v35 = vpop.f32.mrb[5].mxu1 }
 0x1d8   : > { %6306 = vmatmul.mubr.f32.gmra.mrb[32].mxu0 %v9805_v6  ;;  %vm16080_vm2 = vmpackc.low %vm18120_vm3, %vm18119_vm6  ;;  %v6595_v8 = vmul.f32 %v9435_v7, %v16040_v10  ;;  %5763 = vmatprep.mubr.f32.mxu1 %v9806_v9  ;;  %vm18127_vm6 = vcmp.eq.s32.totalorder %v18088_v61, %v12791_v40  ;;  %v9436_v38 = vadd.f32 %v5336_v52, %v5062_v11  ;;  %v5338_v22 = vpop.f32.mrb[5].mxu0  ;;  %v9808_v11 = vld [vmem:[%s10057_s12 + $0x1a8] sm:$0xff] }
 0x1d9   : > { %9387 = vmatpush1.bf16.msk.msra.mxu0 %vm15952_vm4, %v17311_v55  ;;  %vm16107_vm7 = vmpackc.low %vm2344_vm8, %vm2343_vm0  ;;  %v6519_v39 = vadd.f32 %v6516_v13, %v6515_v33  ;;  %vm6506_vm0 = vcmp.eq.s32.totalorder %v17669_v49, %v15857_v25  ;;  %6311 = vmatprep.mubr.f32.mxu0 %v9806_v9  ;;  %vm18130_vm8 = vcmp.eq.s32.totalorder %v18087_v48, %v12958_v4  ;;  %v18138_v25 = vld [vmem:[#allocation106_spill] sm:$0xff]  ;;  %v18143_v9 = vld [vmem:[#allocation107_spill] sm:$0xff] }
 0x1da   : > { %9389 = vmatprep.subr.msk.bf16.mxu0 %vm16032_vm5, %v17311_v55  ;;  %vm1725_vm5 = vcmp.eq.s32.totalorder %v18118_v3, %v12882_v28  ;;  %vm16120_vm3 = vmpackc.low %vm18127_vm6, %vm18126_vm15  ;;  %5764 = vmatmul.mubr.f32.gmra.mrb[34].mxu1 %v9807_v14  ;;  %v6598_v63 = vadd.f32 %v6595_v8, %v6594_v2  ;;  %vm18131_vm15 = vcmp.eq.s32.totalorder %v18088_v61, %v12958_v4  ;;  %v5068_v61 = vpop.f32.mrb[6].mxu1  ;;  %v16181_v7 = vsel %vm6506_vm0, 1.0, %v9911_v37  ;;  %v18157_v13 = vld [vmem:[#allocation111_spill] sm:$0xff] }
 0x1db   : > { %vm16139_vm6 = vmpackc.low %vm18131_vm15, %vm18130_vm8  ;;  %v9437_v62 = vadd.f32 %v5338_v22, %v5064_v35  ;;  %9143 = vmatpush1.bf16.msk.msra.mxu1 %vm16080_vm2, %v17311_v55  ;;  %vm3585_vm13 = vcmp.eq.s32.totalorder %v18118_v3, %v12791_v40  ;;  %vm3586_vm4 = vcmp.eq.s32.totalorder %v18123_v16, %v12791_v40  ;;  %v6517_v48 = vmul.f32 %v9436_v38, %v16099_v18  ;;  %v5342_v56 = vpop.f32.mrb[6].mxu0  ;;  %v5070_v33 = vpop.f32.mrb[7].mxu1  ;;  %v9813_v38 = vld [vmem:[%s10057_s12 + $0x220] sm:$0xff] }
 0x1dc   : > { %6312 = vmatmul.mubr.f32.gmra.mrb[34].mxu0 %v9807_v14  ;;  %9145 = vmatprep.subr.msk.bf16.mxu1 %vm16107_vm7, %v17311_v55  ;;  %vm16165_vm2 = vmpackc.low %vm1724_vm1, %vm1723_vm11  ;;  %vm2965_vm8 = vcmp.eq.s32.totalorder %v18118_v3, %v12958_v4  ;;  %vm2347_vm7 = vcmp.eq.s32.totalorder %v18138_v25, %v12759_v58  ;;  %vm18140_vm0 = vcmp.eq.s32.totalorder %v18098_v57, %v12791_v40  ;;  %v5344_v52 = vpop.f32.mrb[7].mxu0  ;;  %v16212_v35 = vsel %vm6585_vm10, 1.0, %v9911_v37 }
 0x1dd   : > { %9391 = vmatpush1.bf16.msk.msra.mxu0 %vm16051_vm14, %v17311_v55  ;;  %vm1726_vm14 = vcmp.eq.s32.totalorder %v18123_v16, %v12882_v28  ;;  %v6596_v6 = vmul.f32 %v9437_v62, %v16128_v5  ;;  %vm16189_vm11 = vmpackc.low %vm2346_vm12, %vm2345_vm9  ;;  %5769 = vmatprep.mubr.f32.mxu1 %v9808_v11  ;;  %v6520_v15 = vadd.f32 %v6519_v39, %v6517_v48  ;;  %v9810_v62 = vld [vmem:[%s10057_s12 + $0x1e8] sm:$0xff]  ;;  %v18152_v48 = vld [vmem:[#allocation110_spill] sm:$0xff] }
 0x1de   : > { %9393 = vmatprep.subr.msk.bf16.mxu0 %vm16120_vm3, %v17311_v55  ;;  %vm18139_vm3 = vcmp.eq.s32.totalorder %v18097_v30, %v12791_v40  ;;  %v9438_v8 = vadd.f32 %v5342_v56, %v5068_v61  ;;  %6317 = vmatprep.mubr.f32.mxu0 %v9808_v11  ;;  %vm2348_vm12 = vcmp.eq.s32.totalorder %v18143_v9, %v12759_v58 }
 0x1df   : > { %vm16204_vm15 = vmpackc.low %vm18140_vm0, %vm18139_vm3  ;;  %5770 = vmatmul.mubr.f32.gmra.mrb[36].mxu1 %v9809_v19  ;;  %v6599_v39 = vadd.f32 %v6598_v63, %v6596_v6  ;;  %vm18144_vm9 = vcmp.eq.s32.totalorder %v18097_v30, %v12958_v4  ;;  %vm18145_vm3 = vcmp.eq.s32.totalorder %v18098_v57, %v12958_v4  ;;  %v9439_v42 = vadd.f32 %v5344_v52, %v5070_v33  ;;  %v5074_v57 = vpop.f32.mrb[8].mxu1  ;;  %v5348_v14 = vpop.f32.mrb[8].mxu0  ;;  %v9811_v33 = vld [vmem:[%s10057_s12 + $0x1e0] sm:$0xff] }
 0x1e0   : > { %vm16223_vm0 = vmpackc.low %vm18145_vm3, %vm18144_vm9  ;;  %9147 = vmatpush1.bf16.msk.msra.mxu1 %vm16165_vm2, %v17311_v55  ;;  %6318 = vmatmul.mubr.f32.gmra.mrb[36].mxu0 %v9809_v19  ;;  %vm3587_vm10 = vcmp.eq.s32.totalorder %v18138_v25, %v12791_v40  ;;  %v6518_v30 = vmul.f32 %v9438_v8, %v16181_v7  ;;  %vm1728_vm9 = vcmp.eq.s32.totalorder %v18143_v9, %v12882_v28  ;;  %v5076_v63 = vpop.f32.mrb[9].mxu1  ;;  %v5350_v56 = vpop.f32.mrb[9].mxu0 }
 0x1e1   : > { %9395 = vmatpush1.bf16.msk.msra.mxu0 %vm16139_vm6, %v17311_v55  ;;  %9149 = vmatprep.subr.msk.bf16.mxu1 %vm16189_vm11, %v17311_v55  ;;  %vm16247_vm2 = vmpackc.low %vm1726_vm14, %vm1725_vm5  ;;  %vm1727_vm6 = vcmp.eq.s32.totalorder %v18138_v25, %v12882_v28  ;;  %v6597_v22 = vmul.f32 %v9439_v42, %v16212_v35  ;;  %vm2349_vm11 = vcmp.eq.s32.totalorder %v18152_v48, %v12759_v58 }
 0x1e2   : > { %9397 = vmatprep.subr.msk.bf16.mxu0 %vm16204_vm15, %v17311_v55  ;;  %vm16265_vm5 = vmpackc.low %vm2348_vm12, %vm2347_vm7  ;;  %5775 = vmatprep.mubr.f32.mxu1 %v9810_v62  ;;  %v16274_v61 = vadd.f32 %v6520_v15, %v6518_v30  ;;  %vm18153_vm15 = vcmp.eq.s32.totalorder %v18106_v17, %v12791_v40  ;;  %vm18154_vm3 = vcmp.eq.s32.totalorder %v18107_v51, %v12791_v40 }
 0x1e3   : > { %vm16282_vm7 = vmpackc.low %vm18154_vm3, %vm18153_vm15  ;;  %v9440_v6 = vadd.f32 %v5348_v14, %v5074_v57  ;;  %6323 = vmatprep.mubr.f32.mxu0 %v9810_v62  ;;  %5776 = vmatmul.mubr.f32.gmra.mrb[38].mxu1 %v9811_v33  ;;  %vm2350_vm12 = vcmp.eq.s32.totalorder %v18157_v13, %v12759_v58  ;;  %v16289_v11 = vadd.f32 %v6599_v39, %v6597_v22  ;;  %v5354_v8 = vpop.f32.mrb[10].mxu0  ;;  %v9812_v39 = vld [vmem:[%s10057_s12 + $0x228] sm:$0xff] }
 0x1e4   : > { %vm18158_vm14 = vcmp.eq.s32.totalorder %v18106_v17, %v12958_v4  ;;  %vm18159_vm1 = vcmp.eq.s32.totalorder %v18107_v51, %v12958_v4  ;;  %v9441_v2 = vadd.f32 %v5350_v56, %v5076_v63  ;;  %9151 = vmatpush1.bf16.msk.msra.mxu1 %vm16247_vm2, %v17311_v55  ;;  %vm2968_vm3 = vcmp.eq.s32.totalorder %v18143_v9, %v12958_v4  ;;  %v5080_v17 = vpop.f32.mrb[10].mxu1  ;;  %v5356_v57 = vpop.f32.mrb[11].mxu0 }
 0x1e5   : > { %vm16297_vm15 = vmpackc.low %vm18159_vm1, %vm18158_vm14  ;;  %6324 = vmatmul.mubr.f32.gmra.mrb[38].mxu0 %v9811_v33  ;;  %9153 = vmatprep.subr.msk.bf16.mxu1 %vm16265_vm5, %v17311_v55  ;;  %vm1729_vm5 = vcmp.eq.s32.totalorder %v18152_v48, %v12882_v28  ;;  %v5082_v52 = vpop.f32.mrb[11].mxu1  ;;  %v6522_v45 = vrot.slane %v16274_v61, 4  ;;  %v9442_v30 = vadd.f32 %v5354_v8, %v5080_v17  ;;  %v6601_v22 = vrot.slane %v16289_v11, 4  ;;  %v9814_v17 = vld [vmem:[%s10057_s12 + $0x268] sm:$0xff] }
 0x1e6   : > { %9399 = vmatpush1.bf16.msk.msra.mxu0 %vm16223_vm0, %v17311_v55  ;;  %vm16318_vm1 = vmpackc.low %vm1728_vm9, %vm1727_vm6  ;;  %vm1730_vm9 = vcmp.eq.s32.totalorder %v18157_v13, %v12882_v28  ;;  %5781 = vmatprep.mubr.f32.mxu1 %v9812_v39  ;;  %v9443_v63 = vadd.f32 %v5356_v57, %v5082_v52  ;;  %vm3591_vm14 = vcmp.eq.s32.totalorder %v17572_v21, %v12791_v40  ;;  %v5086_v59 = vpop.f32.mrb[12].mxu1 }
 0x1e7   : > { %9401 = vmatprep.subr.msk.bf16.mxu0 %vm16282_vm7, %v17311_v55  ;;  %vm16337_vm6 = vmpackc.low %vm2350_vm12, %vm2349_vm11  ;;  %6329 = vmatprep.mubr.f32.mxu0 %v9812_v39  ;;  %vm2351_vm12 = vcmp.eq.s32.totalorder %v17572_v21, %v12759_v58  ;;  %vm2352_vm7 = vcmp.eq.s32.totalorder %v17573_v50, %v12759_v58  ;;  %vm1731_vm2 = vcmp.eq.s32.totalorder %v17572_v21, %v12882_v28  ;;  %v5360_v56 = vpop.f32.mrb[12].mxu0  ;;  %v5088_v33 = vpop.f32.mrb[13].mxu1  ;;  %v9815_v39 = vld [vmem:[%s10057_s12 + $0x260] sm:$0xff] }
 0x1e8   : > { %vm16355_vm11 = vmpackc.low %vm3586_vm4, %vm3585_vm13  ;;  %5782 = vmatmul.mubr.f32.gmra.mrb[40].mxu1 %v9813_v38  ;;  %vm18168_vm13 = vcmp.eq.s32.totalorder %v18123_v16, %v12958_v4  ;;  %v6528_v3 = vmul.f32 %v9440_v6, %v15998_v60  ;;  %v6529_v16 = vmul.f32 %v9442_v30, %v16004_v44  ;;  %vm2353_vm0 = vcmp.eq.s32.totalorder %v17591_v20, %v12759_v58  ;;  %v5362_v19 = vpop.f32.mrb[13].mxu0 }
 0x1e9   : > { %vm16371_vm4 = vmpackc.low %vm18168_vm13, %vm2965_vm8  ;;  %9155 = vmatpush1.bf16.msk.msra.mxu1 %vm16318_vm1, %v17311_v55  ;;  %6330 = vmatmul.mubr.f32.gmra.mrb[40].mxu0 %v9813_v38  ;;  %vm1732_vm8 = vcmp.eq.s32.totalorder %v17573_v50, %v12882_v28  ;;  %vm2972_vm13 = vcmp.eq.s32.totalorder %v17573_v50, %v12958_v4  ;;  %v6607_v32 = vmul.f32 %v9441_v2, %v16024_v0 }
 0x1ea   : > { %9403 = vmatpush1.bf16.msk.msra.mxu0 %vm16297_vm15, %v17311_v55  ;;  %9157 = vmatprep.subr.msk.bf16.mxu1 %vm16337_vm6, %v17311_v55  ;;  %vm16400_vm1 = vmpackc.low %vm1730_vm9, %vm1729_vm5  ;;  %vm2971_vm15 = vcmp.eq.s32.totalorder %v17572_v21, %v12958_v4  ;;  %v6608_v6 = vmul.f32 %v9443_v63, %v16040_v10  ;;  %vm2354_vm6 = vcmp.eq.s32.totalorder %v17592_v46, %v12759_v58  ;;  %v9816_v63 = vld [vmem:[%s10057_s12 + $0x2a8] sm:$0xff] }
 0x1eb   : > { %9405 = vmatprep.subr.msk.bf16.mxu0 %vm16355_vm11, %v17311_v55  ;;  %vm16421_vm5 = vmpackc.low %vm2352_vm7, %vm2351_vm12  ;;  %5787 = vmatprep.mubr.f32.mxu1 %v9814_v17  ;;  %v6523_v2 = vadd.f32 %v6522_v45, %v16274_v61  ;;  %v6532_v51 = vadd.f32 %v6529_v16, %v6528_v3  ;;  %vm18175_vm9 = vcmp.eq.s32.totalorder %v18143_v9, %v12791_v40  ;;  %v5366_v38 = vpop.f32.mrb[14].mxu0 }
 0x1ec   : > { %vm16435_vm11 = vmpackc.low %vm18175_vm9, %vm3587_vm10  ;;  %v9444_v52 = vadd.f32 %v5360_v56, %v5086_v59  ;;  %6335 = vmatprep.mubr.f32.mxu0 %v9814_v17  ;;  %5788 = vmatmul.mubr.f32.gmra.mrb[42].mxu1 %v9815_v39  ;;  %v6602_v42 = vadd.f32 %v6601_v22, %v16289_v11  ;;  %v6611_v30 = vadd.f32 %v6608_v6, %v6607_v32  ;;  %v5092_v11 = vpop.f32.mrb[14].mxu1  ;;  %v5368_v32 = vpop.f32.mrb[15].mxu0  ;;  %v9817_v6 = vld [vmem:[%s10057_s12 + $0x2a0] sm:$0xff] }
 0x1ed   : > { %vm18178_vm7 = vcmp.eq.s32.totalorder %v18138_v25, %v12958_v4  ;;  %v9445_v45 = vadd.f32 %v5362_v19, %v5088_v33  ;;  %9159 = vmatpush1.bf16.msk.msra.mxu1 %vm16400_vm1, %v17311_v55  ;;  %6336 = vmatmul.mubr.f32.gmra.mrb[42].mxu0 %v9815_v39  ;;  %vm16467_vm10 = vmpackc.low %vm1732_vm8, %vm1731_vm2  ;;  %v5094_v22 = vpop.f32.mrb[15].mxu1  ;;  %vm1734_vm8 = vcmp.eq.s32.totalorder %v17592_v46, %v12882_v28  ;;  %v6524_v3 = vrot.slane %v6523_v2, 2 }
 0x1ee   : > { %vm16447_vm12 = vmpackc.low %vm2968_vm3, %vm18178_vm7  ;;  %9407 = vmatpush1.bf16.msk.msra.mxu0 %vm16371_vm4, %v17311_v55  ;;  %v6530_v25 = vmul.f32 %v9444_v52, %v16099_v18  ;;  %9161 = vmatprep.subr.msk.bf16.mxu1 %vm16421_vm5, %v17311_v55  ;;  %vm3593_vm3 = vcmp.eq.s32.totalorder %v17591_v20, %v12791_v40  ;;  %vm1733_vm4 = vcmp.eq.s32.totalorder %v17591_v20, %v12882_v28  ;;  %v6603_v56 = vrot.slane %v6602_v42, 2 }
 0x1ef   : > { %9409 = vmatprep.subr.msk.bf16.mxu0 %vm16435_vm11, %v17311_v55  ;;  %v6609_v57 = vmul.f32 %v9445_v45, %v16128_v5  ;;  %vm16485_vm2 = vmpackc.low %vm2354_vm6, %vm2353_vm0  ;;  %5793 = vmatprep.mubr.f32.mxu1 %v9816_v63  ;;  %vm2355_vm1 = vcmp.eq.s32.totalorder %v11971_v36, %v12759_v58  ;;  %vm18185_vm5 = vcmp.eq.s32.totalorder %v18152_v48, %v12791_v40  ;;  %v5372_v52 = vpop.f32.mrb[16].mxu0 }
 0x1f0   : > { %v6533_v16 = vadd.f32 %v6532_v51, %v6530_v25  ;;  %vm18186_vm9 = vcmp.eq.s32.totalorder %v18157_v13, %v12791_v40  ;;  %v9446_v62 = vadd.f32 %v5366_v38, %v5092_v11  ;;  %6341 = vmatprep.mubr.f32.mxu0 %v9816_v63  ;;  %5794 = vmatmul.mubr.f32.gmra.mrb[44].mxu1 %v9817_v6  ;;  %v5374_v9 = vpop.f32.mrb[17].mxu0 }
 0x1f1   : > { %vm16500_vm0 = vmpackc.low %vm18186_vm9, %vm18185_vm5  ;;  %vm2356_vm6 = vcmp.eq.s32.totalorder %v11996_v12, %v12759_v58  ;;  %v6612_v33 = vadd.f32 %v6611_v30, %v6609_v57  ;;  %vm18189_vm11 = vcmp.eq.s32.totalorder %v18152_v48, %v12958_v4  ;;  %vm18190_vm7 = vcmp.eq.s32.totalorder %v18157_v13, %v12958_v4  ;;  %9163 = vmatpush1.bf16.msk.msra.mxu1 %vm16467_vm10, %v17311_v55  ;;  %v5098_v13 = vpop.f32.mrb[16].mxu1  ;;  %v9818_v30 = vld [vmem:[%s10057_s12 + $0x2e8] sm:$0xff]  ;;  %v9819_v57 = vld [vmem:[%s10057_s12 + $0x2e0] sm:$0xff] }
 0x1f2   : > { %vm16513_vm5 = vmpackc.low %vm18190_vm7, %vm18189_vm11  ;;  %v9447_v17 = vadd.f32 %v5368_v32, %v5094_v22  ;;  %vm3594_vm9 = vcmp.eq.s32.totalorder %v17592_v46, %v12791_v40  ;;  %6342 = vmatmul.mubr.f32.gmra.mrb[44].mxu0 %v9817_v6  ;;  %v6531_v48 = vmul.f32 %v9446_v62, %v16181_v7  ;;  %9165 = vmatprep.subr.msk.bf16.mxu1 %vm16485_vm2, %v17311_v55  ;;  %v5100_v19 = vpop.f32.mrb[17].mxu1  ;;  %v9820_v62 = vld [vmem:[%s10057_s12 + $0x38] sm:$0xff] }
 0x1f3   : > { %9411 = vmatpush1.bf16.msk.msra.mxu0 %vm16447_vm12, %v17311_v55  ;;  %vm16535_vm10 = vmpackc.low %vm1734_vm8, %vm1733_vm4  ;;  %vm1735_vm12 = vcmp.eq.s32.totalorder %v11971_v36, %v12882_v28  ;;  %vm1736_vm11 = vcmp.eq.s32.totalorder %v11996_v12, %v12882_v28  ;;  %5799 = vmatprep.mubr.f32.mxu1 %v9818_v30  ;;  %vm2357_vm2 = vcmp.eq.s32.totalorder %v12497_v41, %v12759_v58  ;;  %v5104_v21 = vpop.f32.mrb[18].mxu1 }
 0x1f4   : > { %9413 = vmatprep.subr.msk.bf16.mxu0 %vm16500_vm0, %v17311_v55  ;;  %v6610_v8 = vmul.f32 %v9447_v17, %v16212_v35  ;;  %vm16553_vm4 = vmpackc.low %vm2356_vm6, %vm2355_vm1  ;;  %vm2358_vm8 = vcmp.eq.s32.totalorder %v12673_v24, %v12759_v58  ;;  %v6525_v61 = vadd.f32 %v6524_v3, %v6523_v2  ;;  %v6534_v45 = vadd.f32 %v6533_v16, %v6531_v48  ;;  %v5378_v3 = vpop.f32.mrb[18].mxu0  ;;  %v5106_v16 = vpop.f32.mrb[19].mxu1  ;;  %v9821_v58 = vld [vmem:[%s10057_s12 + $0x30] sm:$0xff] }
 0x1f5   : > { %vm18197_vm0 = vcmp.eq.s32.totalorder %v17573_v50, %v12791_v40  ;;  %v9448_v11 = vadd.f32 %v5372_v52, %v5098_v13  ;;  %6347 = vmatprep.mubr.f32.mxu0 %v9818_v30  ;;  %5800 = vmatmul.mubr.f32.gmra.mrb[46].mxu1 %v9819_v57  ;;  %v6604_v38 = vadd.f32 %v6603_v56, %v6602_v42  ;;  %vm16579_vm6 = vmpackc.low %vm2972_vm13, %vm2971_vm15 }
 0x1f6   : > { %vm16568_vm1 = vmpackc.low %vm18197_vm0, %vm3591_vm14  ;;  %v6613_v22 = vadd.f32 %v6612_v33, %v6610_v8  ;;  %v9449_v14 = vadd.f32 %v5374_v9, %v5100_v19  ;;  %9167 = vmatpush1.bf16.msk.msra.mxu1 %vm16535_vm10, %v17311_v55  ;;  %6348 = vmatmul.mubr.f32.gmra.mrb[46].mxu0 %v9819_v57  ;;  %v6535_v42 = vrot.slane %v6534_v45, 4  ;;  %vm2973_vm14 = vcmp.eq.s32.totalorder %v17591_v20, %v12958_v4  ;;  %v5380_v33 = vpop.f32.mrb[19].mxu0  ;;  %v5110_v52 = vpop.f32.mrb[20].mxu1  ;;  %v6491_v9 = vld [vmem:[#allocation3] sm:$0x1] }
 0x1f7   : > { %9415 = vmatpush1.bf16.msk.msra.mxu0 %vm16513_vm5, %v17311_v55  ;;  %vm2974_vm15 = vcmp.eq.s32.totalorder %v17592_v46, %v12958_v4  ;;  %9169 = vmatprep.subr.msk.bf16.mxu1 %vm16553_vm4, %v17311_v55  ;;  %vm3595_vm13 = vcmp.eq.s32.totalorder %v11971_v36, %v12791_v40  ;;  %vm16604_vm7 = vmpackc.low %vm1736_vm11, %vm1735_vm12  ;;  %vm3596_vm5 = vcmp.eq.s32.totalorder %v11996_v12, %v12791_v40  ;;  %v6526_v32 = vrot.slane %v6525_v61, 1  ;;  %v5384_v30 = vpop.f32.mrb[20].mxu0 }
 0x1f8   : > { %v6614_v63 = vrot.slane %v6613_v22, 4  ;;  %9417 = vmatprep.subr.msk.bf16.mxu0 %vm16568_vm1, %v17311_v55  ;;  %vm16619_vm10 = vmpackc.low %vm2358_vm8, %vm2357_vm2  ;;  %vm1737_vm12 = vcmp.eq.s32.totalorder %v12497_v41, %v12882_v28  ;;  %vm1738_vm11 = vcmp.eq.s32.totalorder %v12673_v24, %v12882_v28  ;;  %5870 = vmatprep.mubr.f32.mxu1 %v9820_v62  ;;  %v6536_v6 = vadd.f32 %v6535_v42, %v6534_v45  ;;  %v5112_v45 = vpop.f32.mrb[21].mxu1 }
 0x1f9   : > { %vm16634_vm4 = vmpackc.low %vm3594_vm9, %vm3593_vm3  ;;  %v9450_v56 = vadd.f32 %v5378_v3, %v5104_v21  ;;  %vm2975_vm2 = vcmp.eq.s32.totalorder %v11971_v36, %v12958_v4  ;;  %6418 = vmatprep.mubr.f32.mxu0 %v9820_v62  ;;  %v6605_v15 = vrot.slane %v6604_v38, 1  ;;  %v9451_v48 = vadd.f32 %v5380_v33, %v5106_v16 }
 0x1fa   : > { %v6615_v17 = vadd.f32 %v6614_v63, %v6613_v22  ;;  %9171 = vmatpush1.bf16.msk.msra.mxu1 %vm16604_vm7, %v17311_v55  ;;  %vm2976_vm8 = vcmp.eq.s32.totalorder %v11996_v12, %v12958_v4  ;;  %v6537_v13 = vrot.slane %v6536_v6, 2  ;;  %v6541_v51 = vmul.f32 %v9448_v11, %v15998_v60  ;;  %vm16661_vm9 = vmpackc.low %vm1738_vm11, %vm1737_vm12  ;;  %v5116_v50 = vpop.f32.mrb[22].mxu1  ;;  %v6492_v63 = vld [vmem:[#allocation3 + $0x1] sm:$0x1] }
 0x1fb   : > { %9419 = vmatpush1.bf16.msk.msra.mxu0 %vm16579_vm6, %v17311_v55  ;;  %v6542_v8 = vmul.f32 %v9450_v56, %v16004_v44  ;;  %9173 = vmatprep.subr.msk.bf16.mxu1 %vm16619_vm10, %v17311_v55  ;;  %vm3597_vm3 = vcmp.eq.s32.totalorder %v12497_v41, %v12791_v40  ;;  %v6620_v44 = vmul.f32 %v9449_v14, %v16024_v0  ;;  %vm16675_vm0 = vmpackc.low %vm2974_vm15, %vm2973_vm14  ;;  %v5118_v59 = vpop.f32.mrb[23].mxu1 }
 0x1fc   : > { %v6616_v60 = vrot.slane %v6615_v17, 2  ;;  %9421 = vmatprep.subr.msk.bf16.mxu0 %vm16634_vm4, %v17311_v55  ;;  %v6621_v28 = vmul.f32 %v9451_v48, %v16040_v10  ;;  %vm3598_vm1 = vcmp.eq.s32.totalorder %v12673_v24, %v12791_v40  ;;  %v6527_v0 = vadd.f32 %v6526_v32, %v6525_v61  ;;  %vm16688_vm6 = vmpackc.low %vm3596_vm5, %vm3595_vm13  ;;  %v5386_v10 = vpop.f32.mrb[21].mxu0  ;;  %v6570_v61 = vld [vmem:[#allocation3 + $0x4] sm:$0x1]  ;;  %v6571_v32 = vld [vmem:[#allocation3 + $0x5] sm:$0x1] }
 0x1fd   : > { %v6538_v25 = vadd.f32 %v6537_v13, %v6536_v6  ;;  %v6545_v11 = vadd.f32 %v6542_v8, %v6541_v51  ;;  %v9452_v20 = vadd.f32 %v5384_v30, %v5110_v52  ;;  %v6606_v57 = vadd.f32 %v6605_v15, %v6604_v38  ;;  %vm16708_vm14 = vmpackc.low %vm2976_vm8, %vm2975_vm2  ;;  %v5390_v16 = vpop.f32.mrb[22].mxu0  ;;  %v9822_v48 = vld [vmem:[%s10057_s12 + $0x78] sm:$0xff] }
 0x1fe   : > { %v6617_v22 = vadd.f32 %v6616_v60, %v6615_v17  ;;  %v6624_v2 = vadd.f32 %v6621_v28, %v6620_v44  ;;  %v9453_v14 = vadd.f32 %v5386_v10, %v5112_v45  ;;  %9175 = vmatpush1.bf16.msk.msra.mxu1 %vm16661_vm9, %v17311_v55  ;;  %vm2977_vm15 = vcmp.eq.s32.totalorder %v12497_v41, %v12958_v4  ;;  %vm9428_vm7 = vmpackc.low %vm3598_vm1, %vm3597_vm3  ;;  %v9823_v44 = vld [vmem:[%s10057_s12 + $0x70] sm:$0xff]  ;;  %v9824_v30 = vld [vmem:[%s10057_s12 + $0xb8] sm:$0xff] }
 0x1ff   : > { %v6539_v42 = vrot.slane %v6538_v25, 1  ;;  %9423 = vmatpush1.bf16.msk.msra.mxu0 %vm16675_vm0, %v17311_v55  ;;  %v6543_v21 = vmul.f32 %v9452_v20, %v16099_v18  ;;  %vm2978_vm13 = vcmp.eq.s32.totalorder %v12673_v24, %v12958_v4  ;;  %v6554_v62 = vsub.f32 %v6491_v9, %v6527_v0  ;;  %v9825_v0 = vld [vmem:[%s10057_s12 + $0xb0] sm:$0xff] }
 0x200   : > { %v6618_v3 = vrot.slane %v6617_v22, 1  ;;  %9425 = vmatprep.subr.msk.bf16.mxu0 %vm16688_vm6, %v17311_v55  ;;  %v6622_v18 = vmul.f32 %v9453_v14, %v16128_v5  ;;  %v9454_v12 = vadd.f32 %v5390_v16, %v5116_v50  ;;  %v5392_v5 = vpop.f32.mrb[23].mxu0  ;;  %v6633_v56 = vsub.f32 %v6570_v61, %v6606_v57  ;;  %vm9430_vm5 = vmpackc.low %vm2978_vm13, %vm2977_vm15  ;;  %v9827_v9 = vld [vmem:[%s10057_s12 + $0xf0] sm:$0xff]  ;;  %v9828_v57 = vld [vmem:[%s10057_s12 + $0x138] sm:$0xff] }
 0x201   : > { %v6540_v36 = vadd.f32 %v6539_v42, %v6538_v25  ;;  %v6546_v6 = vadd.f32 %v6545_v11, %v6543_v21  ;;  %5871 = vmatmul.mubr.f32.vlgmr.msra.gmra.mrb[24].mxu1 %v9821_v58  ;;  %v9455_v17 = vadd.f32 %v5392_v5, %v5118_v59  ;;  %v6557_v52 = vmul.f32 %v6554_v62, %v6554_v62  ;;  %v9826_v11 = vld [vmem:[%s10057_s12 + $0xf8] sm:$0xff]  ;;  %v9829_v61 = vld [vmem:[%s10057_s12 + $0x130] sm:$0xff]  ;;  %v9831_v50 = vld [vmem:[#allocation3 + $0x2] sm:$0x1] }
 0x202   : > { %v6619_v33 = vadd.f32 %v6618_v3, %v6617_v22  ;;  %v6625_v15 = vadd.f32 %v6624_v2, %v6622_v18  ;;  %5876 = vmatprep.mubr.f32.mxu1 %v9822_v48  ;;  %v6544_v40 = vmul.f32 %v9454_v12, %v16181_v7  ;;  %v6636_v7 = vmul.f32 %v6633_v56, %v6633_v56  ;;  %v9830_v21 = vld [vmem:[%s10057_s12 + $0x178] sm:$0xff]  ;;  %v9832_v3 = vld [vmem:[#allocation3 + $0x6] sm:$0x1]  ;;  %v9833_v16 = vld [vmem:[%s10057_s12 + $0x170] sm:$0xff] }
 0x203   : > { %v6555_v13 = vsub.f32 %v6492_v63, %v6540_v36  ;;  %9427 = vmatpush1.bf16.msk.msra.mxu0 %vm16708_vm14, %v17311_v55  ;;  %v6623_v8 = vmul.f32 %v9455_v17, %v16212_v35  ;;  %v9834_v62 = vld [vmem:[%s10057_s12 + $0x1b8] sm:$0xff]  ;;  %v9837_v5 = vld [vmem:[%s10057_s12 + $0x1f0] sm:$0xff] }
 0x204   : > { %v6634_v51 = vsub.f32 %v6571_v32, %v6619_v33  ;;  %9429 = vmatprep.subr.msk.bf16.mxu0 %vm9428_vm7, %v17311_v55  ;;  %v6547_v60 = vadd.f32 %v6546_v6, %v6544_v40  ;;  %v9835_v6 = vld [vmem:[%s10057_s12 + $0x1b0] sm:$0xff]  ;;  %v9836_v12 = vld [vmem:[%s10057_s12 + $0x1f8] sm:$0xff] }
 0x205   : > { %v6558_v19 = vmul.f32 %v6555_v13, %v6555_v13  ;;  %5877 = vmatmul.mubr.f32.gmra.mrb[26].mxu1 %v9823_v44  ;;  %v6626_v28 = vadd.f32 %v6625_v15, %v6623_v8  ;;  %v9839_v56 = vld [vmem:[%s10057_s12 + $0x230] sm:$0xff]  ;;  %v9840_v33 = vld [vmem:[%s10057_s12 + $0x278] sm:$0xff] }
 0x206   : > { %v6637_v39 = vmul.f32 %v6634_v51, %v6634_v51  ;;  %5882 = vmatprep.mubr.f32.mxu1 %v9824_v30  ;;  %v6548_v41 = vrot.slane %v6547_v60, 4  ;;  %v9841_v13 = vld [vmem:[%s10057_s12 + $0x270] sm:$0xff]  ;;  %v9842_v8 = vld [vmem:[%s10057_s12 + $0x2b8] sm:$0xff] }
 0x207   : > { %v6559_v45 = vadd.f32 %v6558_v19, %v6557_v52  ;;  %9431 = vmatpush1.bf16.msk.msra.mxu0 %vm9430_vm5, %v17311_v55  ;;  %v6627_v4 = vrot.slane %v6626_v28, 4 }
 0x208   : > { %v6638_v24 = vadd.f32 %v6637_v39, %v6636_v7  ;;  %v6549_v35 = vadd.f32 %v6548_v41, %v6547_v60  ;;  %v9843_v39 = vld [vmem:[%s10057_s12 + $0x2b0] sm:$0xff]  ;;  %v2819_v41 = vmul.f32 %v12679_v1, %v12430_v26  ;;  %v18224_v1 = vld [vmem:[#allocation127_spill] sm:$0xff] }
 0x209   : > { %5883 = vmatmul.mubr.f32.gmra.mrb[28].mxu1 %v9825_v0  ;;  %v6628_v25 = vadd.f32 %v6627_v4, %v6626_v28  ;;  %v18217_v4 = vld [vmem:[#allocation129_spill] sm:$0xff] }
 0x20a   : > { %6419 = vmatmul.mubr.f32.vlgmr.msra.gmra.mrb[24].mxu0 %v9821_v58  ;;  %5888 = vmatprep.mubr.f32.mxu1 %v9826_v11  ;;  %v6550_v46 = vrot.slane %v6549_v35, 2  ;;  %v9838_v58 = vld [vmem:[%s10057_s12 + $0x238] sm:$0xff] }
 0x20b   : > { %6424 = vmatprep.mubr.f32.mxu0 %v9822_v48  ;;  %v6629_v20 = vrot.slane %v6628_v25, 2 }
 0x20c   : > { %v6551_v10 = vadd.f32 %v6550_v46, %v6549_v35  ;;  %v2818_v46 = vmul.f32 %v12587_v27, %v12381_v34 }
 0x20d   : > { %5889 = vmatmul.mubr.f32.gmra.mrb[30].mxu1 %v9827_v9  ;;  %v6630_v55 = vadd.f32 %v6629_v20, %v6628_v25  ;;  %v18219_v25 = vld [vmem:[#allocation137_spill] sm:$0xff]  ;;  %v2821_v20 = vrot.slane %v2819_v41, 2 }
 0x20e   : > { %6425 = vmatmul.mubr.f32.gmra.mrb[26].mxu0 %v9823_v44  ;;  %5894 = vmatprep.mubr.f32.mxu1 %v9828_v57  ;;  %v6552_v22 = vrot.slane %v6551_v10, 1 }
 0x20f   : > { %6430 = vmatprep.mubr.f32.mxu0 %v9824_v30  ;;  %v6631_v2 = vrot.slane %v6630_v55, 1  ;;  %v9844_v30 = vld [vmem:[%s10057_s12 + $0x2f8] sm:$0xff] }
 0x210   : > { %v6553_v14 = vadd.f32 %v6552_v22, %v6551_v10  ;;  %v2824_v10 = vmul.f32 %v12630_v31, %v12284_v43  ;;  %v18228_v43 = vld [vmem:[#allocation108_spill] sm:$0xff] }
 0x211   : > { %5895 = vmatmul.mubr.f32.gmra.mrb[32].mxu1 %v9829_v61  ;;  %v6632_v42 = vadd.f32 %v6631_v2, %v6630_v55  ;;  %v18221_v55 = vld [vmem:[#allocation132_spill] sm:$0xff]  ;;  %v2829_v31 = vmul.f32 %v18228_v43, %v12287_v54 }
 0x212   : > { %6431 = vmatmul.mubr.f32.gmra.mrb[28].mxu0 %v9825_v0  ;;  %5900 = vmatprep.mubr.f32.mxu1 %v9830_v21  ;;  %v6556_v63 = vsub.f32 %v9831_v50, %v6553_v14  ;;  %v18218_v0 = vld [vmem:[#allocation130_spill] sm:$0xff]  ;;  %v18222_v2 = vld [vmem:[#allocation116_spill] sm:$0xff]  ;;  %v18223_v14 = vld [vmem:[#allocation131_spill] sm:$0xff]  ;;  %v2826_v50 = vrot.slane %v2824_v10, 1 }
 0x213   : > { %6436 = vmatprep.mubr.f32.mxu0 %v9826_v11  ;;  %v6635_v38 = vsub.f32 %v9832_v3, %v6632_v42  ;;  %v3439_v11 = vmul.f32 %v18219_v25, %v18218_v0  ;;  %v2204_v26 = vmul.f32 %v18223_v14, %v18222_v2  ;;  %v18226_v3 = vld [vmem:[#allocation125_spill] sm:$0xff] }
 0x214   : > { %v6560_v18 = vmul.f32 %v6556_v63, %v6556_v63 }
 0x215   : > { %5901 = vmatmul.mubr.f32.gmra.mrb[34].mxu1 %v9833_v16  ;;  %v6639_v59 = vmul.f32 %v6635_v38, %v6635_v38  ;;  %v3441_v63 = vrot.slane %v3439_v11, 2  ;;  %v18227_v38 = vld [vmem:[#allocation136_spill] sm:$0xff] }
 0x216   : > { %6437 = vmatmul.mubr.f32.gmra.mrb[30].mxu0 %v9827_v9  ;;  %5906 = vmatprep.mubr.f32.mxu1 %v9834_v62  ;;  %v6561_v36 = vadd.f32 %v6560_v18, %v6559_v45  ;;  %v9845_v45 = vld [vmem:[%s10057_s12 + $0x2f0] sm:$0xff]  ;;  %v3444_v34 = vmul.f32 %v18227_v38, %v18226_v3  ;;  %v2206_v18 = vrot.slane %v2204_v26, 1 }
 0x217   : > { %6442 = vmatprep.mubr.f32.mxu0 %v9828_v57  ;;  %v6640_v32 = vadd.f32 %v6639_v59, %v6638_v24  ;;  %v18216_v24 = vld [vmem:[#allocation123_spill] sm:$0xff]  ;;  %v18220_v9 = vld [vmem:[#allocation121_spill] sm:$0xff] }
 0x218   : > { %9734 = vrsqrt.f32 %v6561_v36  ;;  %vm6564_vm10 = vcmp.eq.f32.partialorder %v6561_v36, inf  ;;  %v6567_v40 = vand.u32 2147483648, %v6561_v36  ;;  %vm6566_vm12 = vcmp.eq.f32.partialorder %v6561_v36, 0.0 }
 0x219   : > { %5907 = vmatmul.mubr.f32.gmra.mrb[36].mxu1 %v9835_v6  ;;  %9736 = vrsqrt.f32 %v6640_v32  ;;  %vm6643_vm11 = vcmp.eq.f32.partialorder %v6640_v32, inf  ;;  %v6646_v19 = vand.u32 2147483648, %v6640_v32  ;;  %vm6645_vm4 = vcmp.eq.f32.partialorder %v6640_v32, 0.0 }
 0x21a   : > { %6443 = vmatmul.mubr.f32.gmra.mrb[32].mxu0 %v9829_v61  ;;  %5912 = vmatprep.mubr.f32.mxu1 %v9836_v12  ;;  %v2199_v35 = vmul.f32 %v18217_v4, %v18216_v24  ;;  %v2198_v57 = vmul.f32 %v18221_v55, %v18220_v9  ;;  %v18225_v61 = vld [vmem:[#allocation134_spill] sm:$0xff] }
 0x21b   : > { %6448 = vmatprep.mubr.f32.mxu0 %v9830_v21  ;;  %v3438_v42 = vmul.f32 %v18225_v61, %v18224_v1  ;;  %v2823_v21 = vadd.f32 %v2821_v20, %v2818_v46 }
 0x21c   : > { %v2201_v22 = vrot.slane %v2199_v35, 2 }
 0x21d   : > { %5913 = vmatmul.mubr.f32.gmra.mrb[38].mxu1 %v9837_v5  ;;  %v3443_v59 = vadd.f32 %v3441_v63, %v3438_v42 }
 0x21e   : > { %6449 = vmatmul.mubr.f32.gmra.mrb[34].mxu0 %v9833_v16  ;;  %5918 = vmatprep.mubr.f32.mxu1 %v9838_v58  ;;  %v2203_v27 = vadd.f32 %v2201_v22, %v2198_v57  ;;  %v2828_v16 = vadd.f32 %v2826_v50, %v2823_v21 }
 0x21f   : > { %6454 = vmatprep.mubr.f32.mxu0 %v9834_v62  ;;  %v3446_v62 = vrot.slane %v3444_v34, 1 }
 0x221   : > { %5919 = vmatmul.mubr.f32.gmra.mrb[40].mxu1 %v9839_v56 }
 0x222   : > { %6455 = vmatmul.mubr.f32.gmra.mrb[36].mxu0 %v9835_v6  ;;  %5924 = vmatprep.mubr.f32.mxu1 %v9840_v33  ;;  %v9735_v15 = vpop.eup %9734  ;;  %v18230_v6 = vld [vmem:[#allocation128_spill] sm:$0xff] }
 0x223   : > { %6460 = vmatprep.mubr.f32.mxu0 %v9836_v12  ;;  %v9737_v17 = vpop.eup %9736  ;;  %v6563_v48 = vmul.f32 %v9735_v15, %v6561_v36  ;;  %v3448_v15 = vadd.f32 %v3446_v62, %v3443_v59 }
 0x224   : > { %v6642_v51 = vmul.f32 %v9737_v17, %v6640_v32 }
 0x225   : > { %5925 = vmatmul.mubr.f32.gmra.mrb[42].mxu1 %v9841_v13  ;;  %v6565_v52 = vsel %vm6564_vm10, %v6561_v36, %v6563_v48  ;;  %v2208_v36 = vadd.f32 %v2206_v18, %v2203_v27  ;;  %v18233_v48 = vld [vmem:[#allocation112_spill] sm:$0xff] }
 0x226   : > { %6461 = vmatmul.mubr.f32.gmra.mrb[38].mxu0 %v9837_v5  ;;  %5930 = vmatprep.mubr.f32.mxu1 %v9842_v8  ;;  %v6568_v60 = vsel %vm6566_vm12, %v6567_v40, %v6565_v52  ;;  %v6644_v44 = vsel %vm6643_vm11, %v6640_v32, %v6642_v51  ;;  %v18229_v32 = vld [vmem:[#allocation117_spill] sm:$0xff]  ;;  %v18231_v5 = vld [vmem:[#allocation126_spill] sm:$0xff]  ;;  %v18234_v51 = vld [vmem:[#allocation135_spill] sm:$0xff] }
 0x227   : > { %6466 = vmatprep.mubr.f32.mxu0 %v9838_v58  ;;  %v6647_v7 = vsel %vm6645_vm4, %v6646_v19, %v6644_v44  ;;  %v2209_v12 = vmul.f32 %v18230_v6, %v18229_v32  ;;  %v18232_v58 = vld [vmem:[#allocation133_spill] sm:$0xff]  ;;  %v18235_v52 = vld [vmem:[#allocation138_spill] sm:$0xff]  ;;  %v16788_v19 = vld [vmem:[#allocation3 + $0xa] sm:$0x1] }
 0x228   : > { %v16757_v28 = vadd.f32 %v6647_v7, %v6568_v60  ;;  %vm6653_vm2 = vcmp.ge.f32.partialorder %v16788_v19, 32.0  ;;  %vm6652_vm3 = vcmp.lt.f32.partialorder %v16788_v19, 0.0 }
 0x229   : > { %5931 = vmatmul.mubr.f32.gmra.mrb[44].mxu1 %v9843_v39  ;;  %v2210_v17 = vsub.f32 %v2208_v36, %v2209_v12  ;;  %v6654_v44 = vsel %vm6653_vm2, 31.0, %v16788_v19 }
 0x22a   : > { %6467 = vmatmul.mubr.f32.gmra.mrb[40].mxu0 %v9839_v56  ;;  %5936 = vmatprep.mubr.f32.mxu1 %v9844_v30  ;;  %v3449_v56 = vmul.f32 %v18232_v58, %v18231_v5 }
 0x22b   : > { %6472 = vmatprep.mubr.f32.mxu0 %v9840_v33  ;;  %v2830_v33 = vsub.f32 %v2828_v16, %v2829_v31 }
 0x22c   : > { %v3450_v40 = vsub.f32 %v3448_v15, %v3449_v56 }
 0x22d   : > { %5937 = vmatmul.mubr.f32.gmra.mrb[46].mxu1 %v9845_v45 }
 0x22e   : > { %6473 = vmatmul.mubr.f32.gmra.mrb[42].mxu0 %v9841_v13  ;;  %v2831_v13 = vmul.f32 %v2830_v33, %v18233_v48  ;;  %v3451_v54 = vmul.f32 %v3450_v40, %v18235_v52 }
 0x22f   : > { %6478 = vmatprep.mubr.f32.mxu0 %v9842_v8  ;;  %v2211_v8 = vmul.f32 %v2210_v17, %v18234_v51 }
 0x230   : > { %2834 = vst [vmem:[#allocation3 + $0x12] sm:$0x1] %v2831_v13  ;;  %3454 = vst [vmem:[#allocation3 + $0x16] sm:$0x1] %v3451_v54 }
 0x231   : > { %2214 = vst [vmem:[#allocation3 + $0xe] sm:$0x1] %v2211_v8 }
 0x232   : > { %6479 = vmatmul.mubr.f32.gmra.mrb[44].mxu0 %v9843_v39  ;;  %v6655_v39 = vsel %vm6652_vm3, 0.0, %v6654_v44 }
 0x233   : > { %6484 = vmatprep.mubr.f32.mxu0 %v9844_v30  ;;  %v9677_v24 = vtrunc.f32 %v6655_v39 }
 0x235   : > { %v9678_v0 = vcvt.f32.s32 %v9677_v24 }
 0x236   : > { %6485 = vmatmul.mubr.f32.gmra.mrb[46].mxu0 %v9845_v45 }
 0x237   : > { %v16798_v30 = vld [vmem:[#allocation3 + $0x12] sm:$0x1]  ;;  %v16800_v41 = vld [vmem:[#allocation3 + $0x16] sm:$0x1]  ;;  %v6660_v10 = vrot.slane %v9678_v0, %v17643_v23 }
 0x238   : > { %v16790_v60 = vld [vmem:[#allocation3 + $0xe] sm:$0x1]  ;;  %vm6811_vm0 = vcmp.ge.f32.partialorder %v16798_v30, 32.0  ;;  %vm6890_vm1 = vcmp.ge.f32.partialorder %v16800_v41, 32.0  ;;  %vm6810_vm6 = vcmp.lt.f32.partialorder %v16798_v30, 0.0  ;;  %vm6889_vm14 = vcmp.lt.f32.partialorder %v16800_v41, 0.0 }
 0x239   : > { %vm6732_vm8 = vcmp.ge.f32.partialorder %v16790_v60, 32.0  ;;  %vm6731_vm9 = vcmp.lt.f32.partialorder %v16790_v60, 0.0  ;;  %v6812_v35 = vsel %vm6811_vm0, 31.0, %v16798_v30  ;;  %v6891_v25 = vsel %vm6890_vm1, 31.0, %v16800_v41 }
 0x23a   : > { %v6733_v7 = vsel %vm6732_vm8, 31.0, %v16790_v60  ;;  %v6813_v46 = vsel %vm6810_vm6, 0.0, %v6812_v35  ;;  %v6892_v20 = vsel %vm6889_vm14, 0.0, %v6891_v25  ;;  %vm6661_vm15 = vcmp.eq.s32.totalorder %v10083_v47, %v6660_v10 }
 0x23b   : > { %v6734_v45 = vsel %vm6731_vm9, 0.0, %v6733_v7  ;;  %v9681_v9 = vtrunc.f32 %v6813_v46  ;;  %v9683_v57 = vtrunc.f32 %v6892_v20  ;;  %vm6662_vm13 = vcmp.eq.s32.totalorder %v17660_v29, %v6660_v10 }
 0x23c   : > { %v9679_v4 = vtrunc.f32 %v6734_v45  ;;  %v16815_v1 = vsel %vm6661_vm15, 1.0, %v9911_v37  ;;  %v16818_v61 = vsel %vm6662_vm13, 1.0, %v9911_v37  ;;  %vm6663_vm10 = vcmp.eq.s32.totalorder %v17668_v53, %v6660_v10 }
 0x23d   : > { %v9682_v2 = vcvt.f32.s32 %v9681_v9  ;;  %v9684_v26 = vcvt.f32.s32 %v9683_v57  ;;  %v16837_v43 = vsel %vm6663_vm10, 1.0, %v9911_v37  ;;  %vm6664_vm11 = vcmp.eq.s32.totalorder %v17669_v49, %v6660_v10 }
 0x23e   : > { %v9680_v11 = vcvt.f32.s32 %v9679_v4  ;;  %v16853_v58 = vsel %vm6664_vm11, 1.0, %v9911_v37 }
 0x23f   : > { %v16828_v50 = vrot.slane %v9682_v2, %v17643_v23  ;;  %v6897_v38 = vrot.slane %v9684_v26, %v17643_v23 }
 0x240   : > { %v6739_v55 = vrot.slane %v9680_v11, %v17643_v23 }
 0x241   : > { %vm6819_vm4 = vcmp.eq.s32.totalorder %v10083_v47, %v16828_v50  ;;  %vm6820_vm2 = vcmp.eq.s32.totalorder %v17660_v29, %v16828_v50  ;;  %vm6898_vm3 = vcmp.eq.s32.totalorder %v10083_v47, %v6897_v38  ;;  %vm6899_vm9 = vcmp.eq.s32.totalorder %v17660_v29, %v6897_v38 }
 0x242   : > { %vm6740_vm7 = vcmp.eq.s32.totalorder %v10083_v47, %v6739_v55  ;;  %vm6741_vm5 = vcmp.eq.s32.totalorder %v17660_v29, %v6739_v55  ;;  %vm6742_vm12 = vcmp.eq.s32.totalorder %v17668_v53, %v6739_v55  ;;  %vm6743_vm8 = vcmp.eq.s32.totalorder %v17669_v49, %v6739_v55 }
 0x243   : > { %v16821_v42 = vsel %vm6740_vm7, 1.0, %v9911_v37  ;;  %v16824_v21 = vsel %vm6741_vm5, 1.0, %v9911_v37  ;;  %v16840_v59 = vsel %vm6742_vm12, 1.0, %v9911_v37  ;;  %v16856_v56 = vsel %vm6819_vm4, 1.0, %v9911_v37 }
 0x244   : > { %v16859_v33 = vsel %vm6820_vm2, 1.0, %v9911_v37  ;;  %v16862_v47 = vsel %vm6743_vm8, 1.0, %v9911_v37  ;;  %v16865_v29 = vsel %vm6898_vm3, 1.0, %v9911_v37  ;;  %v16868_v17 = vsel %vm6899_vm9, 1.0, %v9911_v37 }
 0x245   : > { %vm6821_vm0 = vcmp.eq.s32.totalorder %v17668_v53, %v16828_v50  ;;  %vm6900_vm1 = vcmp.eq.s32.totalorder %v17668_v53, %v6897_v38  ;;  %vm6822_vm6 = vcmp.eq.s32.totalorder %v17669_v49, %v16828_v50  ;;  %vm6901_vm14 = vcmp.eq.s32.totalorder %v17669_v49, %v6897_v38 }
 0x246   : > { %v16880_v24 = vsel %vm6821_vm0, 1.0, %v9911_v37  ;;  %v16883_v53 = vsel %vm6900_vm1, 1.0, %v9911_v37  ;;  %vm6966_vm8 = vcmask 1040384  }
 0x2d4   : > { %v5872_v22 = vpop.f32.mrb[24].mxu1 }
 0x2d5   : > { %v5874_v14 = vpop.f32.mrb[25].mxu1  ;;  %v6673_v3 = vmul.f32 %v16815_v1, %v5872_v22 }
 0x2d6   : > { %v6752_v18 = vmul.f32 %v16821_v42, %v5874_v14  ;;  %v16891_v14 = vsel %vm6822_vm6, 1.0, %v9911_v37 }
 0x2d8   : > { %v5878_v63 = vpop.f32.mrb[26].mxu1 }
 0x2d9   : > { %v6674_v34 = vmul.f32 %v16818_v61, %v5878_v63  ;;  %v5880_v27 = vpop.f32.mrb[27].mxu1  ;;  %v16894_v63 = vsel %vm6901_vm14, 1.0, %v9911_v37 }
 0x2da   : > { %v6753_v16 = vmul.f32 %v16824_v21, %v5880_v27 }
 0x2db   : > { %v6677_v31 = vadd.f32 %v6674_v34, %v6673_v3 }
 0x2dc   : > { %v6756_v23 = vadd.f32 %v6753_v16, %v6752_v18  ;;  %v5884_v62 = vpop.f32.mrb[28].mxu1 }
 0x2dd   : > { %v6420_v36 = vpop.f32.mrb[24].mxu0  ;;  %v6675_v32 = vmul.f32 %v16837_v43, %v5884_v62  ;;  %v5886_v6 = vpop.f32.mrb[29].mxu1 }
 0x2de   : > { %v6422_v12 = vpop.f32.mrb[25].mxu0  ;;  %v6754_v5 = vmul.f32 %v16840_v59, %v5886_v6  ;;  %v6831_v52 = vmul.f32 %v16856_v56, %v6420_v36 }
 0x2df   : > { %v6678_v15 = vadd.f32 %v6677_v31, %v6675_v32  ;;  %v6910_v39 = vmul.f32 %v16865_v29, %v6422_v12 }
 0x2e0   : > { %v6757_v48 = vadd.f32 %v6756_v23, %v6754_v5  ;;  %v5890_v13 = vpop.f32.mrb[30].mxu1 }
 0x2e1   : > { %v6426_v40 = vpop.f32.mrb[26].mxu0  ;;  %v6676_v51 = vmul.f32 %v16853_v58, %v5890_v13  ;;  %v5892_v8 = vpop.f32.mrb[31].mxu1 }
 0x2e2   : > { %v6832_v54 = vmul.f32 %v16859_v33, %v6426_v40  ;;  %v6428_v44 = vpop.f32.mrb[27].mxu0  ;;  %v6755_v7 = vmul.f32 %v16862_v47, %v5892_v8 }
 0x2e3   : > { %v6911_v45 = vmul.f32 %v16868_v17, %v6428_v44  ;;  %v6679_v4 = vadd.f32 %v6678_v15, %v6676_v51 }
 0x2e4   : > { %v6835_v35 = vadd.f32 %v6832_v54, %v6831_v52  ;;  %v6758_v0 = vadd.f32 %v6757_v48, %v6755_v7  ;;  %v5896_v25 = vpop.f32.mrb[32].mxu1 }
 0x2e5   : > { %v6914_v11 = vadd.f32 %v6911_v45, %v6910_v39  ;;  %v6432_v46 = vpop.f32.mrb[28].mxu0  ;;  %v6680_v20 = vrot.slane %v6679_v4, 4  ;;  %v5898_v10 = vpop.f32.mrb[33].mxu1  ;;  %v6686_v38 = vmul.f32 %v16815_v1, %v5896_v25 }
 0x2e6   : > { %v6833_v9 = vmul.f32 %v16880_v24, %v6432_v46  ;;  %v6434_v55 = vpop.f32.mrb[29].mxu0  ;;  %v6759_v57 = vrot.slane %v6758_v0, 4  ;;  %v6765_v36 = vmul.f32 %v16821_v42, %v5898_v10 }
 0x2e7   : > { %v6912_v22 = vmul.f32 %v16883_v53, %v6434_v55  ;;  %v6681_v2 = vadd.f32 %v6680_v20, %v6679_v4 }
 0x2e8   : > { %v6836_v26 = vadd.f32 %v6835_v35, %v6833_v9  ;;  %v6760_v50 = vadd.f32 %v6759_v57, %v6758_v0  ;;  %v5902_v3 = vpop.f32.mrb[34].mxu1 }
 0x2e9   : > { %v6915_v34 = vadd.f32 %v6914_v11, %v6912_v22  ;;  %v6682_v27 = vrot.slane %v6681_v2, 2  ;;  %v6438_v49 = vpop.f32.mrb[30].mxu0  ;;  %v6687_v18 = vmul.f32 %v16818_v61, %v5902_v3  ;;  %v5904_v16 = vpop.f32.mrb[35].mxu1 }
 0x2ea   : > { %v6834_v31 = vmul.f32 %v16891_v14, %v6438_v49  ;;  %v6761_v23 = vrot.slane %v6760_v50, 2  ;;  %v6440_v62 = vpop.f32.mrb[31].mxu0  ;;  %v6766_v32 = vmul.f32 %v16824_v21, %v5904_v16 }
 0x2eb   : > { %v6683_v6 = vadd.f32 %v6682_v27, %v6681_v2  ;;  %v6913_v37 = vmul.f32 %v16894_v63, %v6440_v62  ;;  %v6690_v12 = vadd.f32 %v6687_v18, %v6686_v38  ;;  %v6649_v38 = vld [vmem:[#allocation3 + $0x8] sm:$0x1] }
 0x2ec   : > { %v6837_v5 = vadd.f32 %v6836_v26, %v6834_v31  ;;  %v6762_v15 = vadd.f32 %v6761_v23, %v6760_v50  ;;  %v6769_v48 = vadd.f32 %v6766_v32, %v6765_v36  ;;  %v5908_v13 = vpop.f32.mrb[36].mxu1  ;;  %v6728_v36 = vld [vmem:[#allocation3 + $0xc] sm:$0x1] }
 0x2ed   : > { %v6916_v40 = vadd.f32 %v6915_v34, %v6913_v37  ;;  %v6444_v51 = vpop.f32.mrb[32].mxu0  ;;  %v6688_v8 = vmul.f32 %v16837_v43, %v5908_v13  ;;  %v5910_v52 = vpop.f32.mrb[37].mxu1  ;;  %v6684_v54 = vrot.slane %v6683_v6, 1 }
 0x2ee   : > { %v6838_v44 = vrot.slane %v6837_v5, 4  ;;  %v6446_v7 = vpop.f32.mrb[33].mxu0  ;;  %v6767_v39 = vmul.f32 %v16840_v59, %v5910_v52  ;;  %v6763_v0 = vrot.slane %v6762_v15, 1  ;;  %v6844_v20 = vmul.f32 %v16856_v56, %v6444_v51 }
 0x2ef   : > { %v6917_v45 = vrot.slane %v6916_v40, 4  ;;  %v6691_v4 = vadd.f32 %v6690_v12, %v6688_v8  ;;  %v6685_v57 = vadd.f32 %v6684_v54, %v6683_v6  ;;  %v6923_v34 = vmul.f32 %v16865_v29, %v6446_v7 }
 0x2f0   : > { %v6839_v35 = vadd.f32 %v6838_v44, %v6837_v5  ;;  %v6770_v25 = vadd.f32 %v6769_v48, %v6767_v39  ;;  %v5914_v11 = vpop.f32.mrb[38].mxu1  ;;  %v6764_v18 = vadd.f32 %v6763_v0, %v6762_v15 }
 0x2f1   : > { %v6918_v46 = vadd.f32 %v6917_v45, %v6916_v40  ;;  %v6450_v10 = vpop.f32.mrb[34].mxu0  ;;  %v6689_v9 = vmul.f32 %v16853_v58, %v5914_v11  ;;  %v5916_v55 = vpop.f32.mrb[39].mxu1  ;;  %v6712_v40 = vsub.f32 %v6649_v38, %v6685_v57 }
 0x2f2   : > { %v6840_v22 = vrot.slane %v6839_v35, 2  ;;  %v6845_v2 = vmul.f32 %v16859_v33, %v6450_v10  ;;  %v6452_v26 = vpop.f32.mrb[35].mxu0  ;;  %v6768_v50 = vmul.f32 %v16862_v47, %v5916_v55  ;;  %v6791_v54 = vsub.f32 %v6728_v36, %v6764_v18 }
 0x2f3   : > { %v6919_v3 = vrot.slane %v6918_v46, 2  ;;  %v6924_v27 = vmul.f32 %v16868_v17, %v6452_v26  ;;  %v6692_v49 = vadd.f32 %v6691_v4, %v6689_v9  ;;  %v6715_v26 = vmul.f32 %v6712_v40, %v6712_v40 }
 0x2f4   : > { %v6848_v16 = vadd.f32 %v6845_v2, %v6844_v20  ;;  %v6771_v31 = vadd.f32 %v6770_v25, %v6768_v50  ;;  %v5920_v23 = vpop.f32.mrb[40].mxu1  ;;  %v6841_v62 = vadd.f32 %v6840_v22, %v6839_v35 }
 0x2f5   : > { %v6927_v32 = vadd.f32 %v6924_v27, %v6923_v34  ;;  %v6456_v6 = vpop.f32.mrb[36].mxu0  ;;  %v6693_v37 = vrot.slane %v6692_v49, 4  ;;  %v5922_v12 = vpop.f32.mrb[41].mxu1  ;;  %v6920_v51 = vadd.f32 %v6919_v3, %v6918_v46  ;;  %v6699_v7 = vmul.f32 %v16815_v1, %v5920_v23  ;;  %v6650_v23 = vld [vmem:[#allocation3 + $0x9] sm:$0x1] }
 0x2f6   : > { %v6846_v5 = vmul.f32 %v16880_v24, %v6456_v6  ;;  %v6458_v48 = vpop.f32.mrb[37].mxu0  ;;  %v6772_v13 = vrot.slane %v6771_v31, 4  ;;  %v6842_v45 = vrot.slane %v6841_v62, 1  ;;  %v6778_v9 = vmul.f32 %v16821_v42, %v5922_v12 }
 0x2f7   : > { %v6925_v8 = vmul.f32 %v16883_v53, %v6458_v48  ;;  %v6694_v52 = vadd.f32 %v6693_v37, %v6692_v49  ;;  %v6921_v57 = vrot.slane %v6920_v51, 1 }
 0x2f8   : > { %v6849_v15 = vadd.f32 %v6848_v16, %v6846_v5  ;;  %v6773_v44 = vadd.f32 %v6772_v13, %v6771_v31  ;;  %v5926_v39 = vpop.f32.mrb[42].mxu1  ;;  %v6843_v42 = vadd.f32 %v6842_v45, %v6841_v62  ;;  %v6729_v5 = vld [vmem:[#allocation3 + $0xd] sm:$0x1] }
 0x2f9   : > { %v6928_v4 = vadd.f32 %v6927_v32, %v6925_v8  ;;  %v6695_v35 = vrot.slane %v6694_v52, 2  ;;  %v6462_v0 = vpop.f32.mrb[38].mxu0  ;;  %v6700_v25 = vmul.f32 %v16818_v61, %v5926_v39  ;;  %v5928_v11 = vpop.f32.mrb[43].mxu1  ;;  %v6794_v61 = vmul.f32 %v6791_v54, %v6791_v54 }
 0x2fa   : > { %v6847_v20 = vmul.f32 %v16891_v14, %v6462_v0  ;;  %v6774_v10 = vrot.slane %v6773_v44, 2  ;;  %v6464_v46 = vpop.f32.mrb[39].mxu0  ;;  %v6779_v55 = vmul.f32 %v16824_v21, %v5928_v11  ;;  %v6922_v37 = vadd.f32 %v6921_v57, %v6920_v51 }
 0x2fb   : > { %v6696_v22 = vadd.f32 %v6695_v35, %v6694_v52  ;;  %v6926_v1 = vmul.f32 %v16894_v63, %v6464_v46  ;;  %v6703_v2 = vadd.f32 %v6700_v25, %v6699_v7 }
 0x2fc   : > { %v6850_v50 = vadd.f32 %v6849_v15, %v6847_v20  ;;  %v6775_v3 = vadd.f32 %v6774_v10, %v6773_v44  ;;  %v6782_v34 = vadd.f32 %v6779_v55, %v6778_v9  ;;  %v5932_v27 = vpop.f32.mrb[44].mxu1  ;;  %v6807_v55 = vld [vmem:[#allocation3 + $0x10] sm:$0x1] }
 0x2fd   : > { %v6697_v49 = vrot.slane %v6696_v22, 1  ;;  %v6929_v38 = vadd.f32 %v6928_v4, %v6926_v1  ;;  %v6468_v18 = vpop.f32.mrb[40].mxu0  ;;  %v6701_v16 = vmul.f32 %v16837_v43, %v5932_v27  ;;  %v5934_v31 = vpop.f32.mrb[45].mxu1 }
 0x2fe   : > { %v6851_v21 = vrot.slane %v6850_v50, 4  ;;  %v6776_v36 = vrot.slane %v6775_v3, 1  ;;  %v6470_v32 = vpop.f32.mrb[41].mxu0  ;;  %v6780_v6 = vmul.f32 %v16840_v59, %v5934_v31  ;;  %v6857_v52 = vmul.f32 %v16856_v56, %v6468_v18 }
 0x2ff   : > { %v6698_v12 = vadd.f32 %v6697_v49, %v6696_v22  ;;  %v6930_v48 = vrot.slane %v6929_v38, 4  ;;  %v6704_v13 = vadd.f32 %v6703_v2, %v6701_v16  ;;  %v6936_v62 = vmul.f32 %v16865_v29, %v6470_v32  ;;  %v6808_v49 = vld [vmem:[#allocation3 + $0x11] sm:$0x1] }
 0x300   : > { %v6852_v40 = vadd.f32 %v6851_v21, %v6850_v50  ;;  %v6777_v8 = vadd.f32 %v6776_v36, %v6775_v3  ;;  %v6783_v54 = vadd.f32 %v6782_v34, %v6780_v6  ;;  %v5938_v15 = vpop.f32.mrb[46].mxu1  ;;  %v6886_v50 = vld [vmem:[#allocation3 + $0x14] sm:$0x1]  ;;  %v6870_v16 = vsub.f32 %v6807_v55, %v6843_v42 }
 0x301   : > { %v6713_v43 = vsub.f32 %v6650_v23, %v6698_v12  ;;  %v6931_v44 = vadd.f32 %v6930_v48, %v6929_v38  ;;  %v6474_v7 = vpop.f32.mrb[42].mxu0  ;;  %v6702_v39 = vmul.f32 %v16853_v58, %v5938_v15  ;;  %v5940_v45 = vpop.f32.mrb[47].mxu1  ;;  %v6887_v23 = vld [vmem:[#allocation3 + $0x15] sm:$0x1]  ;;  %v6949_v36 = vsub.f32 %v6886_v50, %v6922_v37 }
 0x302   : > { %v6853_v59 = vrot.slane %v6852_v40, 2  ;;  %v6792_v51 = vsub.f32 %v6729_v5, %v6777_v8  ;;  %v6858_v4 = vmul.f32 %v16859_v33, %v6474_v7  ;;  %v6476_v35 = vpop.f32.mrb[43].mxu0  ;;  %v6781_v0 = vmul.f32 %v16862_v47, %v5940_v45 }
 0x303   : > { %v6716_v25 = vmul.f32 %v6713_v43, %v6713_v43  ;;  %v6932_v11 = vrot.slane %v6931_v44, 2  ;;  %v6937_v56 = vmul.f32 %v16868_v17, %v6476_v35  ;;  %v6705_v20 = vadd.f32 %v6704_v13, %v6702_v39 }
 0x304   : > { %v6854_v10 = vadd.f32 %v6853_v59, %v6852_v40  ;;  %v6795_v46 = vmul.f32 %v6792_v51, %v6792_v51  ;;  %v6861_v9 = vadd.f32 %v6858_v4, %v6857_v52  ;;  %v6784_v29 = vadd.f32 %v6783_v54, %v6781_v0 }
 0x305   : > { %v6717_v57 = vadd.f32 %v6716_v25, %v6715_v26  ;;  %v6933_v58 = vadd.f32 %v6932_v11, %v6931_v44  ;;  %v6940_v22 = vadd.f32 %v6937_v56, %v6936_v62  ;;  %v6480_v1 = vpop.f32.mrb[44].mxu0  ;;  %v6706_v2 = vrot.slane %v6705_v20, 4 }
 0x306   : > { %v6855_v33 = vrot.slane %v6854_v10, 1  ;;  %v6796_v3 = vadd.f32 %v6795_v46, %v6794_v61  ;;  %v6859_v47 = vmul.f32 %v16880_v24, %v6480_v1  ;;  %v6482_v34 = vpop.f32.mrb[45].mxu0  ;;  %v6785_v27 = vrot.slane %v6784_v29, 4 }
 0x307   : > { %v6934_v17 = vrot.slane %v6933_v58, 1  ;;  %v6938_v38 = vmul.f32 %v16883_v53, %v6482_v34  ;;  %v6707_v18 = vadd.f32 %v6706_v2, %v6705_v20  ;;  %v6873_v52 = vmul.f32 %v6870_v16, %v6870_v16 }
 0x308   : > { %v6856_v31 = vadd.f32 %v6855_v33, %v6854_v10  ;;  %v6862_v26 = vadd.f32 %v6861_v9, %v6859_v47  ;;  %v6786_v21 = vadd.f32 %v6785_v27, %v6784_v29  ;;  %v6952_v43 = vmul.f32 %v6949_v36, %v6949_v36 }
 0x309   : > { %v6935_v32 = vadd.f32 %v6934_v17, %v6933_v58  ;;  %v6941_v6 = vadd.f32 %v6940_v22, %v6938_v38  ;;  %v6708_v12 = vrot.slane %v6707_v18, 2  ;;  %v6486_v5 = vpop.f32.mrb[46].mxu0 }
 0x30a   : > { %v6871_v61 = vsub.f32 %v6808_v49, %v6856_v31  ;;  %v6860_v24 = vmul.f32 %v16891_v14, %v6486_v5  ;;  %v6787_v48 = vrot.slane %v6786_v21, 2  ;;  %v6488_v13 = vpop.f32.mrb[47].mxu0 }
 0x30b   : > { %v6950_v40 = vsub.f32 %v6887_v23, %v6935_v32  ;;  %v6709_v8 = vadd.f32 %v6708_v12, %v6707_v18  ;;  %v6939_v53 = vmul.f32 %v16894_v63, %v6488_v13  ;;  %v18236_v32 = vlaneseq }
 0x30c   : > { %v6874_v42 = vmul.f32 %v6871_v61, %v6871_v61  ;;  %v6863_v54 = vadd.f32 %v6862_v26, %v6860_v24  ;;  %v6788_v15 = vadd.f32 %v6787_v48, %v6786_v21 }
 0x30d   : > { %v6953_v44 = vmul.f32 %v6950_v40, %v6950_v40  ;;  %v6710_v37 = vrot.slane %v6709_v8, 1  ;;  %v6942_v62 = vadd.f32 %v6941_v6, %v6939_v53  ;;  %v403_v6 = vand.u32 127, %v18236_v32 }
 0x30e   : > { %v6875_v7 = vadd.f32 %v6874_v42, %v6873_v52  ;;  %v6864_v39 = vrot.slane %v6863_v54, 4  ;;  %v6789_v45 = vrot.slane %v6788_v15, 1 }
 0x30f   : > { %v6954_v59 = vadd.f32 %v6953_v44, %v6952_v43  ;;  %v6711_v51 = vadd.f32 %v6710_v37, %v6709_v8  ;;  %v6943_v14 = vrot.slane %v6942_v62, 4  ;;  %vm406_vm2 = vcmp.lt.s32.totalorder %v403_v6, 8 }
 0x310   : > { %v6865_v4 = vadd.f32 %v6864_v39, %v6863_v54  ;;  %v6790_v35 = vadd.f32 %v6789_v45, %v6788_v15 }
 0x311   : > { %v6714_v0 = vsub.f32 %v16788_v19, %v6711_v51  ;;  %v6944_v25 = vadd.f32 %v6943_v14, %v6942_v62 }
 0x312   : > { %v6866_v63 = vrot.slane %v6865_v4, 2  ;;  %v6793_v11 = vsub.f32 %v16790_v60, %v6790_v35 }
 0x313   : > { %v6718_v56 = vmul.f32 %v6714_v0, %v6714_v0  ;;  %v6945_v20 = vrot.slane %v6944_v25, 2 }
 0x314   : > { %v6867_v10 = vadd.f32 %v6866_v63, %v6865_v4  ;;  %v6797_v46 = vmul.f32 %v6793_v11, %v6793_v11 }
 0x315   : > { %v6719_v9 = vadd.f32 %v6718_v56, %v6717_v57  ;;  %v6946_v29 = vadd.f32 %v6945_v20, %v6944_v25 }
 0x316   : > { %v6868_v55 = vrot.slane %v6867_v10, 1  ;;  %v6798_v58 = vadd.f32 %v6797_v46, %v6796_v3 }
 0x317   : > { %v6947_v22 = vrot.slane %v6946_v29, 1  ;;  %9738 = vrsqrt.f32 %v6719_v9  ;;  %vm6722_vm15 = vcmp.eq.f32.partialorder %v6719_v9, inf  ;;  %v6725_v3 = vand.u32 2147483648, %v6719_v9 }
 0x318   : > { %v6869_v1 = vadd.f32 %v6868_v55, %v6867_v10  ;;  %9740 = vrsqrt.f32 %v6798_v58  ;;  %vm6724_vm13 = vcmp.eq.f32.partialorder %v6719_v9, 0.0  ;;  %vm6801_vm7 = vcmp.eq.f32.partialorder %v6798_v58, inf }
 0x319   : > { %v6948_v2 = vadd.f32 %v6947_v22, %v6946_v29  ;;  %v6804_v18 = vand.u32 2147483648, %v6798_v58  ;;  %vm6803_vm5 = vcmp.eq.f32.partialorder %v6798_v58, 0.0 }
 0x31a   : > { %v6872_v50 = vsub.f32 %v16798_v30, %v6869_v1 }
 0x31b   : > { %v6951_v19 = vsub.f32 %v16800_v41, %v6948_v2 }
 0x31c   : > { %v6876_v33 = vmul.f32 %v6872_v50, %v6872_v50 }
 0x31d   : > { %v6955_v47 = vmul.f32 %v6951_v19, %v6951_v19 }
 0x31e   : > { %v6877_v60 = vadd.f32 %v6876_v33, %v6875_v7 }
 0x31f   : > { %v6956_v34 = vadd.f32 %v6955_v47, %v6954_v59 }
 0x320   : > { %9742 = vrsqrt.f32 %v6877_v60  ;;  %vm6880_vm10 = vcmp.eq.f32.partialorder %v6877_v60, inf  ;;  %v6883_v12 = vand.u32 2147483648, %v6877_v60  ;;  %vm6882_vm12 = vcmp.eq.f32.partialorder %v6877_v60, 0.0 }
 0x321   : > { %v9739_v27 = vpop.eup %9738  ;;  %9744 = vrsqrt.f32 %v6956_v34  ;;  %vm6959_vm11 = vcmp.eq.f32.partialorder %v6956_v34, inf  ;;  %v6962_v13 = vand.u32 2147483648, %v6956_v34  ;;  %vm6961_vm4 = vcmp.eq.f32.partialorder %v6956_v34, 0.0 }
 0x322   : > { %v9741_v57 = vpop.eup %9740  ;;  %v6721_v49 = vmul.f32 %v9739_v27, %v6719_v9 }
 0x323   : > { %v6800_v17 = vmul.f32 %v9741_v57, %v6798_v58 }
 0x324   : > { %v6723_v38 = vsel %vm6722_vm15, %v6719_v9, %v6721_v49 }
 0x325   : > { %v6726_v16 = vsel %vm6724_vm13, %v6725_v3, %v6723_v38  ;;  %v6802_v30 = vsel %vm6801_vm7, %v6798_v58, %v6800_v17 }
 0x326   : > { %v6727_v41 = vadd.f32 %v6726_v16, %v16757_v28  ;;  %v6805_v31 = vsel %vm6803_vm5, %v6804_v18, %v6802_v30 }
 0x328   : > { %v6806_v23 = vadd.f32 %v6805_v31, %v6727_v41 }
 0x32a   : > { %v9743_v26 = vpop.eup %9742 }
 0x32b   : > { %v9745_v21 = vpop.eup %9744  ;;  %v6879_v36 = vmul.f32 %v9743_v26, %v6877_v60 }
 0x32c   : > { %v6958_v5 = vmul.f32 %v9745_v21, %v6956_v34 }
 0x32d   : > { %v6881_v61 = vsel %vm6880_vm10, %v6877_v60, %v6879_v36 }
 0x32e   : > { %v6884_v24 = vsel %vm6882_vm12, %v6883_v12, %v6881_v61  ;;  %v6960_v48 = vsel %vm6959_vm11, %v6956_v34, %v6958_v5 }
 0x32f   : > { %v6885_v40 = vadd.f32 %v6884_v24, %v6806_v23  ;;  %v6963_v28 = vsel %vm6961_vm4, %v6962_v13, %v6960_v48 }
 0x331   : > { %v6964_v8 = vadd.f32 %v6963_v28, %v6885_v40 }
 0x333   : > { %v6965_v53 = vsel %vm406_vm2, %v6964_v8, 0.0 }
 0x334   : > { %v6967_v52 = vsel %vm6966_vm8, %v6965_v53, 0.0 }
 0x335   : > { %6968 = vadd.xlane.f32.xlu0 %v6967_v52 }
 0x3c2   : > { %v6969_v42 = vpop.xlane.xlu0 %6968 }
 0x3c3   : > { %v6970_v54 = vrot.slane %v6969_v42, 4 }
 0x3c5   : > { %v6971_v15 = vadd.f32 %v6970_v54, %v6969_v42 }
 0x3c7   : > { %v6972_v43 = vrot.slane %v6971_v15, 2 }
 0x3c9   : > { %v6973_v44 = vadd.f32 %v6972_v43, %v6971_v15 }
 0x3cb   : > { %v6974_v37 = vrot.slane %v6973_v44, 1 }
 0x3cd   : > { %v6975_v62 = vadd.f32 %v6974_v37, %v6973_v44 }
 0x3cf   : > { %9685 = vpush %v6975_v62 }
 0x400   : > { %s9686_s29 = spop %9685 }
 0x401   : > { %v6977_v7 = vstv %s9686_s29 }
 0x402   : > { %6979 = vst [vmem:[%s270_s22] sm:$0xff] %v6977_v7 }
 0x403 PF: > { %s16_s17 = sadd.s32 1, %s9906_s17   ;;  %s18237_s15 = smov %s9902_s16 }
 0x404   : > { %p13_p4 = scmp.ge.s32.totalorder %s16_s17, 4   ;;  %s18238_s16 = smov %s18240_s19 }
 0x406   :  { %15 = sbr.rel (!%p13_p4) target bundleno = 3 (0x3), region = 78 }
 0x40d   :  { %7005 = vsyncpa [#allocation5], 1 }
 0x40e   :  { %7007 = vsyncpa [#allocation5 + $0x1], 1 }
 0x40f   :  { %7008 = vsyncpa [#allocation7], 1 }

</bundles_post_ra>
